<compile_context>
chip_gen: v7x
topology: tpu7x:2x2x1
jax: 0.10.0
libtpu: 0.0.40
codegen_flags: <defaults>
</compile_context>

<pallas_src>
import functools

import jax
import jax.numpy as jnp
from jax.experimental import pallas as pl
from jax.experimental.pallas import tpu as pltpu

V_TH = 1.0  # IFNode default threshold; hard reset to v_reset = 0.
_VMEM_LIMIT = 32 * 1024 * 1024  # explicit scoped-VMEM limit (safe on v5e/v6e/v7x)


def _round_up(x, m):
    return (x + m - 1) // m * m


def _pick_tm(M, bytes_per_row, tm_target=1024, vmem_budget=24 * 1024 * 1024):
    """Row-tile size for the 1x1 kernels: big (fewer grid steps), VMEM-bounded,
    sublane-aligned, and with >=2 blocks on the parallel axis when possible."""
    tm = max(8, _round_up(min(tm_target, M), 8))
    while tm > 8 and tm * bytes_per_row > vmem_budget:
        tm = max(8, _round_up(tm // 2, 8))
    # Prefer >=2 row blocks so v7x's second TensorCore gets work.
    if pl.cdiv(M, tm) < 2 and M >= 16:
        tm = max(8, _round_up(pl.cdiv(M, 2), 8))
    return tm


def _pick_b_tile(B, HW, row_budget):
    """Batch-tile for the 3x3 kernel: fits the row budget, sublane-aligned, and
    prefers >=2 grid blocks (megacore).  Falls back to 1 instead of the whole
    batch when nothing fits (prevents VMEM blow-up on large spatial sizes)."""
    cands = [c for c in range(1, B + 1)
             if B % c == 0 and c * HW <= row_budget and (c * HW) % 8 == 0]
    if not cands:
        # TODO(synk): H-row tiling (with a dilation-row halo) for very large H*W.
        return 1
    multi = [c for c in cands if B // c >= 2]
    return max(multi) if multi else max(cands)


# ---------------------------------------------------------------------------
# Kernel 1: 1x1 conv (matmul) + folded BN + multi-step IF neuron, fully fused.
# grid = (row_tiles,); the T timesteps are looped inside the kernel so the
# membrane potential v stays in VMEM scratch and weights load once per tile.
# ---------------------------------------------------------------------------
def _conv1x1_bn_if_kernel(x_ref, w_ref, scale_ref, bias_ref, o_ref, v_ref):
    T = x_ref.shape[0]
    scale = scale_ref[...]
    bias = bias_ref[...]
    v_ref[...] = jnp.zeros_like(v_ref)
    for t in range(T):  # T is small and static; unrolled for the LLO scheduler.
        pre = jnp.dot(x_ref[t], w_ref[...],
                      preferred_element_type=jnp.float32) * scale + bias
        v = v_ref[...] + pre
        spiked = v >= V_TH
        v_ref[...] = jnp.where(spiked, 0.0, v)          # hard reset to 0
        o_ref[t] = jnp.where(spiked, 1.0, 0.0).astype(o_ref.dtype)


# Same, plus the fused residual 'ADD' (connect_f == 'ADD'); identity is bf16,
# the add happens in f32 and the module output stays f32.
def _conv1x1_bn_if_add_kernel(x_ref, id_ref, w_ref, scale_ref, bias_ref,
                              o_ref, v_ref):
    T = x_ref.shape[0]
    scale = scale_ref[...]
    bias = bias_ref[...]
    v_ref[...] = jnp.zeros_like(v_ref)
    for t in range(T):
        pre = jnp.dot(x_ref[t], w_ref[...],
                      preferred_element_type=jnp.float32) * scale + bias
        v = v_ref[...] + pre
        spiked = v >= V_TH
        v_ref[...] = jnp.where(spiked, 0.0, v)
        idv = id_ref[t].astype(jnp.float32)
        o_ref[t] = jnp.where(spiked, idv + 1.0, idv).astype(o_ref.dtype)


def conv1x1_bn_if(x, w, scale, bias, identity=None, *, tm_target=1024):
    """Fused 1x1-conv + folded-BN + multi-step IF (+ optional residual ADD).

    x:        (T, M, Cin)  bf16
    w:        (Cin, Cout)  bf16
    scale/bias: (Cout,)    f32 (folded eval-mode BatchNorm)
    identity: (T, M, Cout) bf16 or None.  If given, output = spike + identity (f32);
              otherwise output = spikes (bf16).
    """
    T, M, Cin = x.shape
    Cout = w.shape[1]
    has_id = identity is not None
    out_dtype = jnp.float32 if has_id else jnp.bfloat16
    out_bytes = 4 if has_id else 2

    # Per-row VMEM bytes (double-buffered in/out blocks over full T + v scratch).
    bytes_per_row = 2 * T * (Cin * 2 + Cout * out_bytes
                             + (Cout * 2 if has_id else 0)) + Cout * 4
    tm = _pick_tm(M, bytes_per_row, tm_target)
    Mp = _round_up(M, tm)
    if Mp != M:  # ragged M: pad rows (padded rows burn compute, sliced off below)
        x = jnp.pad(x, ((0, 0), (0, Mp - M), (0, 0)))
        if has_id:
            identity = jnp.pad(identity, ((0, 0), (0, Mp - M), (0, 0)))

    row_spec = lambda c: pl.BlockSpec((T, tm, c), lambda i: (0, i, 0))
    const2 = lambda shape: pl.BlockSpec(shape, lambda i: (0, 0))

    if has_id:
        kernel = _conv1x1_bn_if_add_kernel
        in_specs = [row_spec(Cin), row_spec(Cout), const2((Cin, Cout)),
                    const2((1, Cout)), const2((1, Cout))]
        args = (x, identity, w, scale.reshape(1, Cout), bias.reshape(1, Cout))
    else:
        kernel = _conv1x1_bn_if_kernel
        in_specs = [row_spec(Cin), const2((Cin, Cout)),
                    const2((1, Cout)), const2((1, Cout))]
        args = (x, w, scale.reshape(1, Cout), bias.reshape(1, Cout))

    out = pl.pallas_call(
        kernel,
        out_shape=jax.ShapeDtypeStruct((T, Mp, Cout), out_dtype),
        grid_spec=pltpu.PrefetchScalarGridSpec(
            num_scalar_prefetch=0,
            grid=(Mp // tm,),
            in_specs=in_specs,
            out_specs=pl.BlockSpec((T, tm, Cout), lambda i: (0, i, 0)),
            scratch_shapes=[pltpu.VMEM((tm, Cout), jnp.float32)],  # membrane v
        ),
        compiler_params=pltpu.CompilerParams(
            dimension_semantics=("parallel",),
            vmem_limit_bytes=_VMEM_LIMIT),
    )(*args)
    if Mp != M:
        out = out[:, :M]
    return out


# ---------------------------------------------------------------------------
# Kernel 2: 3x3 conv (stride=1, pad=dilation) + folded BN + multi-step IF.
# Halo built in a VMEM scratch (no wrapper pad); partial im2col along kw only
# -> 3 accumulated matmuls with K = 3*Cin; acc bounded in a VMEM scratch.
# ---------------------------------------------------------------------------
def _conv3x3_bn_if_kernel(x_ref, w_ref, scale_ref, bias_ref, o_ref,
                          xpad_ref, acc_ref, v_ref, *, d, L):
    T, b_tile, H, W, Cin = x_ref.shape
    M = b_tile * H * W
    K = 3 * Cin

    scale = scale_ref[...]
    bias = bias_ref[...]

    # Zero the halo'd scratch once per tile; only the interior is rewritten each
    # timestep, so the borders stay zero (replaces the HBM jnp.pad round trip).
    xpad_ref[...] = jnp.zeros_like(xpad_ref)
    v_ref[...] = jnp.zeros_like(v_ref)

    for t in range(T):
        # Interior at rows [d, d+H), cols [L, L+W): L is sublane-aligned so the
        # store is unmasked; the kw-shifted reads below absorb the L-d offset.
        xpad_ref[:, d:d + H, L:L + W, :] = x_ref[t]

        # Partial im2col along kw only: (b_tile, H+2d, W, 3*Cin).
        xcol = jnp.concatenate(
            [xpad_ref[:, :, L - d + kw * d:L - d + kw * d + W, :] for kw in range(3)],
            axis=-1)

        # 3 matmuls with K = 3*Cin (fills the 256-wide MXU) instead of 9 with K = Cin;
        # accumulate into a VMEM scratch to bound the live range.
        acc_ref[...] = jnp.dot(xcol[:, 0:H].reshape(M, K), w_ref[0],
                               preferred_element_type=jnp.float32)
        acc_ref[...] += jnp.dot(xcol[:, d:d + H].reshape(M, K), w_ref[1],
                                preferred_element_type=jnp.float32)
        acc_ref[...] += jnp.dot(xcol[:, 2 * d:2 * d + H].reshape(M, K), w_ref[2],
                                preferred_element_type=jnp.float32)

        # Folded BN + IF neuron (hard reset to 0).
        v = v_ref[...] + acc_ref[...] * scale + bias
        spiked = v >= V_TH
        v_ref[...] = jnp.where(spiked, 0.0, v)
        o_ref[t] = jnp.where(spiked, 1.0, 0.0).astype(o_ref.dtype)


def conv3x3_bn_if(x, w, scale, bias, *, dilation=1, row_budget=512):
    """x: (T, B, H, W, Cin) bf16 spikes -> (T, B*H*W, Cout) bf16 spikes.

    w: (3, 3*Cin, Cout) bf16, rows ordered (kw, Cin) per kh (partial im2col layout).
    """
    T, B, H, W, Cin = x.shape
    Cout = w.shape[-1]
    d = int(dilation)
    assert d >= 1

    b_tile = _pick_b_tile(B, H * W, row_budget)
    bm = b_tile * H * W
    assert bm % 8 == 0, "TODO(synk): pad rows when b_tile*H*W is not sublane-aligned"
    M = B * H * W

    # Scratch layout: interior starts at sublane-aligned column L (>= d).
    L = _round_up(max(d, 8), 8)
    Ws = L + W + d
    Hp = H + 2 * d

    kernel = functools.partial(_conv3x3_bn_if_kernel, d=d, L=L)
    return pl.pallas_call(
        kernel,
        out_shape=jax.ShapeDtypeStruct((T, M, Cout), jnp.bfloat16),
        grid_spec=pltpu.PrefetchScalarGridSpec(
            num_scalar_prefetch=0,
            grid=(B // b_tile,),
            in_specs=[
                pl.BlockSpec((T, b_tile, H, W, Cin), lambda i: (0, i, 0, 0, 0)),
                pl.BlockSpec((3, 3 * Cin, Cout), lambda i: (0, 0, 0)),
                pl.BlockSpec((1, Cout), lambda i: (0, 0)),
                pl.BlockSpec((1, Cout), lambda i: (0, 0)),
            ],
            out_specs=pl.BlockSpec((T, bm, Cout), lambda i: (0, i, 0)),
            scratch_shapes=[
                pltpu.VMEM((b_tile, Hp, Ws, Cin), x.dtype),  # halo'd input tile
                pltpu.VMEM((bm, Cout), jnp.float32),         # conv accumulator
                pltpu.VMEM((bm, Cout), jnp.float32),         # membrane potential v
            ],
        ),
        compiler_params=pltpu.CompilerParams(
            dimension_semantics=("parallel",),
            vmem_limit_bytes=_VMEM_LIMIT),
    )(x, w, scale.reshape(1, Cout), bias.reshape(1, Cout))


# ---------------------------------------------------------------------------
# Parameters: conv weights in matmul layout (bf16) + folded eval-mode BN (f32).
# ---------------------------------------------------------------------------
def init_params(key, inplanes, planes, base_width=64, groups=1, eps=1e-5):
    expansion = 4
    width = int(planes * (base_width / 64.0)) * groups
    ks = jax.random.split(key, 15)

    def fold_bn(kg, kb, km, kv, c):
        gamma = 1.0 + 0.1 * jax.random.normal(kg, (c,), jnp.float32)
        beta = 0.1 * jax.random.normal(kb, (c,), jnp.float32)
        rmean = 0.1 * jax.random.normal(km, (c,), jnp.float32)
        rvar = 1.0 + 0.1 * jnp.abs(jax.random.normal(kv, (c,), jnp.float32))
        scale = gamma / jnp.sqrt(rvar + eps)
        bias = beta - rmean * scale
        return scale, bias

    # PyTorch conv layouts (Cout, Cin, kh, kw) -> matmul layouts.
    w1_t = jax.random.normal(ks[0], (width, inplanes, 1, 1), jnp.float32) / jnp.sqrt(1.0 * inplanes)
    w2_t = jax.random.normal(ks[1], (width, width, 3, 3), jnp.float32) / jnp.sqrt(9.0 * width)
    w3_t = jax.random.normal(ks[2], (planes * expansion, width, 1, 1), jnp.float32) / jnp.sqrt(1.0 * width)

    w1 = jnp.transpose(w1_t[:, :, 0, 0], (1, 0)).astype(jnp.bfloat16)        # (Cin, width)
    w2 = (jnp.transpose(w2_t, (2, 3, 1, 0))                                  # (kh, kw, Cin, Cout)
          .reshape(3, 3 * width, width).astype(jnp.bfloat16))                # (kh, kw*Cin, Cout)
    w3 = jnp.transpose(w3_t[:, :, 0, 0], (1, 0)).astype(jnp.bfloat16)        # (width, 4*planes)

    s1, b1 = fold_bn(ks[3], ks[4], ks[5], ks[6], width)
    s2, b2 = fold_bn(ks[7], ks[8], ks[9], ks[10], width)
    s3, b3 = fold_bn(ks[11], ks[12], ks[13], ks[14], planes * expansion)
    return dict(w1=w1, s1=s1, b1=b1, w2=w2, s2=s2, b2=b2, w3=w3, s3=s3, b3=b3)


# ---------------------------------------------------------------------------
# Full Bottleneck forward (PyTorch-compatible NCHW-with-time layout).
# ---------------------------------------------------------------------------
@functools.partial(jax.jit, static_argnames=("dilation",))
def bottleneck_forward(x, params, dilation=1):
    # x: (T, B, Cin, H, W) f32.
    T, B, Cin, H, W = x.shape
    width = params["w1"].shape[1]
    cout = params["w3"].shape[1]
    assert Cin == cout, "connect_f='ADD' with downsample=None requires Cin == 4*planes"
    M = B * H * W

    # bf16 BEFORE the NCHW -> channels-last transpose (halves transpose bytes);
    # the single bf16 array is both the conv1 operand and the conv3 identity.
    x_bf = jnp.transpose(x.astype(jnp.bfloat16), (0, 1, 3, 4, 2)).reshape(T, M, Cin)

    # conv1 (1x1) + bn1 + sn1     (fused; bf16 spikes out)
    s1 = conv1x1_bn_if(x_bf, params["w1"], params["s1"], params["b1"])
    # conv2 (3x3) + bn2 + sn2     (fused; in-kernel halo + partial im2col, K=3*Cin)
    s2 = conv3x3_bn_if(s1.reshape(T, B, H, W, width), params["w2"],
                       params["s2"], params["b2"], dilation=dilation)
    # conv3 (1x1) + bn3 + sn3 + residual 'ADD'   (fused; f32 out for module parity)
    out = conv1x1_bn_if(s2, params["w3"], params["s3"], params["b3"],
                        identity=x_bf)

    out = out.reshape(T, B, H, W, cout)
    return jnp.transpose(out, (0, 1, 4, 2, 3))      # back to (T, B, C, H, W)


if __name__ == "__main__":
    key = jax.random.PRNGKey(0)
    # Lane-dense demo config: width = planes*(base_width/64) = 128, so every
    # channel axis is 128 (full MXU/vreg lanes, unmasked stores).  inplanes ==
    # planes*4 so connect_f='ADD' needs no downsample.
    T, B, H, W = 4, 2, 8, 8
    planes, base_width = 32, 256
    inplanes = planes * 4  # 128

    kx, kp = jax.random.split(key)
    x = jax.random.normal(kx, (T, B, inplanes, H, W), jnp.float32)
    params = init_params(kp, inplanes, planes, base_width=base_width)

    out = jax.block_until_ready(bottleneck_forward(x, params))

    assert out.shape == (T, B, planes * 4, H, W), out.shape
    assert out.dtype == jnp.float32
    assert bool(jnp.all(jnp.isfinite(out)))
    # Residual self-check: out - identity must be exactly the {0,1} spike train
    # (identity flows through as bf16, added in f32, so this is bit-exact).
    ident = x.astype(jnp.bfloat16).astype(jnp.float32)
    resid = out - ident
    assert bool(jnp.all((resid == 0.0) | (resid == 1.0)))
    print("KERNEL_OK")
</pallas_src>

<mosaic_0001>
module attributes {stable_mosaic.version = 11 : i64} {
  func.func @_conv1x1_bn_if_kernel(%arg0: i32, %arg1: memref<4x64x128xbf16, #tpu.memory_space<vmem>>, %arg2: memref<128x128xbf16, #tpu.memory_space<vmem>>, %arg3: memref<1x128xf32, #tpu.memory_space<vmem>>, %arg4: memref<1x128xf32, #tpu.memory_space<vmem>>, %arg5: memref<4x64x128xbf16, #tpu.memory_space<vmem>>, %arg6: memref<64x128xf32, #tpu.memory_space<vmem>>) attributes {dimension_semantics = [#tpu.dimension_semantics<parallel>], iteration_bounds = array<i64: 2>, scalar_prefetch = 0 : i64, scratch_operands = 1 : i64, tpu.core_type = #tpu.core_type<tc>, window_params = [{transform_indices = @transform_0, window_bounds = array<i64: 4, 64, 128>}, {pipeline_mode = #tpu.pipeline_mode<synchronous>, transform_indices = @transform_1, window_bounds = array<i64: 128, 128>}, {pipeline_mode = #tpu.pipeline_mode<synchronous>, transform_indices = @transform_2, window_bounds = array<i64: 1, 128>}, {pipeline_mode = #tpu.pipeline_mode<synchronous>, transform_indices = @transform_3, window_bounds = array<i64: 1, 128>}, {transform_indices = @transform_4, window_bounds = array<i64: 4, 64, 128>}]} {
    %c0 = arith.constant 0 : index
    %c0_0 = arith.constant 0 : index
    %0 = vector.load %arg3[%c0, %c0_0] : memref<1x128xf32, #tpu.memory_space<vmem>>, vector<1x128xf32>
    %c0_1 = arith.constant 0 : index
    %c0_2 = arith.constant 0 : index
    %1 = vector.load %arg4[%c0_1, %c0_2] : memref<1x128xf32, #tpu.memory_space<vmem>>, vector<1x128xf32>
    %cst = arith.constant 0.000000e+00 : f32
    %2 = vector.broadcast %cst : f32 to vector<64x128xf32>
    %c0_3 = arith.constant 0 : index
    %c0_4 = arith.constant 0 : index
    %3 = vector.load %arg6[%c0_3, %c0_4] : memref<64x128xf32, #tpu.memory_space<vmem>>, vector<64x128xf32>
    tpu.vector_store %arg6[%c0_3, %c0_4], %2 {strides = array<i32>} : memref<64x128xf32, #tpu.memory_space<vmem>>, vector<64x128xf32>,
    %c0_5 = arith.constant 0 : index
    %c0_6 = arith.constant 0 : index
    %c0_7 = arith.constant 0 : index
    %4 = vector.load %arg1[%c0_5, %c0_6, %c0_7] : memref<4x64x128xbf16, #tpu.memory_space<vmem>>, vector<1x64x128xbf16>
    %5 = vector.shape_cast %4 : vector<1x64x128xbf16> to vector<64x128xbf16>
    %c0_8 = arith.constant 0 : index
    %c0_9 = arith.constant 0 : index
    %6 = vector.load %arg2[%c0_8, %c0_9] : memref<128x128xbf16, #tpu.memory_space<vmem>>, vector<128x128xbf16>
    %cst_10 = arith.constant dense<0.000000e+00> : vector<64x128xf32>
    %7 = tpu.matmul %5, %6, %cst_10 {dimension_numbers = #tpu.dot_dimension_numbers<[1], [0], [0], [1], [0, 0, 1, 1], [], []>} : vector<64x128xbf16>, vector<128x128xbf16>, vector<64x128xf32> -> vector<64x128xf32>
    %8 = vector.broadcast %0 : vector<1x128xf32> to vector<64x128xf32>
    %9 = arith.mulf %7, %8 : vector<64x128xf32>
    %10 = vector.broadcast %1 : vector<1x128xf32> to vector<64x128xf32>
    %11 = arith.addf %9, %10 : vector<64x128xf32>
    %c0_11 = arith.constant 0 : index
    %c0_12 = arith.constant 0 : index
    %12 = vector.load %arg6[%c0_11, %c0_12] : memref<64x128xf32, #tpu.memory_space<vmem>>, vector<64x128xf32>
    %13 = arith.addf %12, %11 : vector<64x128xf32>
    %cst_13 = arith.constant 1.000000e+00 : f32
    %14 = vector.broadcast %cst_13 : f32 to vector<64x128xf32>
    %15 = arith.cmpf oge, %13, %14 : vector<64x128xf32>
    %cst_14 = arith.constant 0.000000e+00 : f32
    %16 = vector.broadcast %cst_14 : f32 to vector<64x128xf32>
    %17 = arith.select %15, %16, %13 : vector<64x128xi1>, vector<64x128xf32>
    %c0_15 = arith.constant 0 : index
    %c0_16 = arith.constant 0 : index
    %18 = vector.load %arg6[%c0_15, %c0_16] : memref<64x128xf32, #tpu.memory_space<vmem>>, vector<64x128xf32>
    tpu.vector_store %arg6[%c0_15, %c0_16], %17 {strides = array<i32>} : memref<64x128xf32, #tpu.memory_space<vmem>>, vector<64x128xf32>,
    %cst_17 = arith.constant 1.000000e+00 : f32
    %cst_18 = arith.constant 0.000000e+00 : f32
    %19 = vector.broadcast %cst_17 : f32 to vector<64x128xf32>
    %20 = vector.broadcast %cst_18 : f32 to vector<64x128xf32>
    %21 = arith.select %15, %19, %20 : vector<64x128xi1>, vector<64x128xf32>
    %22 = arith.truncf %21 : vector<64x128xf32> to vector<64x128xbf16>
    %c0_19 = arith.constant 0 : index
    %c0_20 = arith.constant 0 : index
    %c0_21 = arith.constant 0 : index
    %23 = vector.load %arg5[%c0_19, %c0_20, %c0_21] : memref<4x64x128xbf16, #tpu.memory_space<vmem>>, vector<1x64x128xbf16>
    %24 = vector.shape_cast %23 : vector<1x64x128xbf16> to vector<64x128xbf16>
    %25 = vector.shape_cast %22 : vector<64x128xbf16> to vector<1x64x128xbf16>
    tpu.vector_store %arg5[%c0_19, %c0_20, %c0_21], %25 {strides = array<i32>} : memref<4x64x128xbf16, #tpu.memory_space<vmem>>, vector<1x64x128xbf16>,
    %c1 = arith.constant 1 : index
    %c0_22 = arith.constant 0 : index
    %c0_23 = arith.constant 0 : index
    %26 = vector.load %arg1[%c1, %c0_22, %c0_23] : memref<4x64x128xbf16, #tpu.memory_space<vmem>>, vector<1x64x128xbf16>
    %27 = vector.shape_cast %26 : vector<1x64x128xbf16> to vector<64x128xbf16>
    %c0_24 = arith.constant 0 : index
    %c0_25 = arith.constant 0 : index
    %28 = vector.load %arg2[%c0_24, %c0_25] : memref<128x128xbf16, #tpu.memory_space<vmem>>, vector<128x128xbf16>
    %cst_26 = arith.constant dense<0.000000e+00> : vector<64x128xf32>
    %29 = tpu.matmul %27, %28, %cst_26 {dimension_numbers = #tpu.dot_dimension_numbers<[1], [0], [0], [1], [0, 0, 1, 1], [], []>} : vector<64x128xbf16>, vector<128x128xbf16>, vector<64x128xf32> -> vector<64x128xf32>
    %30 = vector.broadcast %0 : vector<1x128xf32> to vector<64x128xf32>
    %31 = arith.mulf %29, %30 : vector<64x128xf32>
    %32 = vector.broadcast %1 : vector<1x128xf32> to vector<64x128xf32>
    %33 = arith.addf %31, %32 : vector<64x128xf32>
    %c0_27 = arith.constant 0 : index
    %c0_28 = arith.constant 0 : index
    %34 = vector.load %arg6[%c0_27, %c0_28] : memref<64x128xf32, #tpu.memory_space<vmem>>, vector<64x128xf32>
    %35 = arith.addf %34, %33 : vector<64x128xf32>
    %cst_29 = arith.constant 1.000000e+00 : f32
    %36 = vector.broadcast %cst_29 : f32 to vector<64x128xf32>
    %37 = arith.cmpf oge, %35, %36 : vector<64x128xf32>
    %cst_30 = arith.constant 0.000000e+00 : f32
    %38 = vector.broadcast %cst_30 : f32 to vector<64x128xf32>
    %39 = arith.select %37, %38, %35 : vector<64x128xi1>, vector<64x128xf32>
    %c0_31 = arith.constant 0 : index
    %c0_32 = arith.constant 0 : index
    %40 = vector.load %arg6[%c0_31, %c0_32] : memref<64x128xf32, #tpu.memory_space<vmem>>, vector<64x128xf32>
    tpu.vector_store %arg6[%c0_31, %c0_32], %39 {strides = array<i32>} : memref<64x128xf32, #tpu.memory_space<vmem>>, vector<64x128xf32>,
    %cst_33 = arith.constant 1.000000e+00 : f32
    %cst_34 = arith.constant 0.000000e+00 : f32
    %41 = vector.broadcast %cst_33 : f32 to vector<64x128xf32>
    %42 = vector.broadcast %cst_34 : f32 to vector<64x128xf32>
    %43 = arith.select %37, %41, %42 : vector<64x128xi1>, vector<64x128xf32>
    %44 = arith.truncf %43 : vector<64x128xf32> to vector<64x128xbf16>
    %c1_35 = arith.constant 1 : index
    %c0_36 = arith.constant 0 : index
    %c0_37 = arith.constant 0 : index
    %45 = vector.load %arg5[%c1_35, %c0_36, %c0_37] : memref<4x64x128xbf16, #tpu.memory_space<vmem>>, vector<1x64x128xbf16>
    %46 = vector.shape_cast %45 : vector<1x64x128xbf16> to vector<64x128xbf16>
    %47 = vector.shape_cast %44 : vector<64x128xbf16> to vector<1x64x128xbf16>
    tpu.vector_store %arg5[%c1_35, %c0_36, %c0_37], %47 {strides = array<i32>} : memref<4x64x128xbf16, #tpu.memory_space<vmem>>, vector<1x64x128xbf16>,
    %c2 = arith.constant 2 : index
    %c0_38 = arith.constant 0 : index
    %c0_39 = arith.constant 0 : index
    %48 = vector.load %arg1[%c2, %c0_38, %c0_39] : memref<4x64x128xbf16, #tpu.memory_space<vmem>>, vector<1x64x128xbf16>
    %49 = vector.shape_cast %48 : vector<1x64x128xbf16> to vector<64x128xbf16>
    %c0_40 = arith.constant 0 : index
    %c0_41 = arith.constant 0 : index
    %50 = vector.load %arg2[%c0_40, %c0_41] : memref<128x128xbf16, #tpu.memory_space<vmem>>, vector<128x128xbf16>
    %cst_42 = arith.constant dense<0.000000e+00> : vector<64x128xf32>
    %51 = tpu.matmul %49, %50, %cst_42 {dimension_numbers = #tpu.dot_dimension_numbers<[1], [0], [0], [1], [0, 0, 1, 1], [], []>} : vector<64x128xbf16>, vector<128x128xbf16>, vector<64x128xf32> -> vector<64x128xf32>
    %52 = vector.broadcast %0 : vector<1x128xf32> to vector<64x128xf32>
    %53 = arith.mulf %51, %52 : vector<64x128xf32>
    %54 = vector.broadcast %1 : vector<1x128xf32> to vector<64x128xf32>
    %55 = arith.addf %53, %54 : vector<64x128xf32>
    %c0_43 = arith.constant 0 : index
    %c0_44 = arith.constant 0 : index
    %56 = vector.load %arg6[%c0_43, %c0_44] : memref<64x128xf32, #tpu.memory_space<vmem>>, vector<64x128xf32>
    %57 = arith.addf %56, %55 : vector<64x128xf32>
    %cst_45 = arith.constant 1.000000e+00 : f32
    %58 = vector.broadcast %cst_45 : f32 to vector<64x128xf32>
    %59 = arith.cmpf oge, %57, %58 : vector<64x128xf32>
    %cst_46 = arith.constant 0.000000e+00 : f32
    %60 = vector.broadcast %cst_46 : f32 to vector<64x128xf32>
    %61 = arith.select %59, %60, %57 : vector<64x128xi1>, vector<64x128xf32>
    %c0_47 = arith.constant 0 : index
    %c0_48 = arith.constant 0 : index
    %62 = vector.load %arg6[%c0_47, %c0_48] : memref<64x128xf32, #tpu.memory_space<vmem>>, vector<64x128xf32>
    tpu.vector_store %arg6[%c0_47, %c0_48], %61 {strides = array<i32>} : memref<64x128xf32, #tpu.memory_space<vmem>>, vector<64x128xf32>,
    %cst_49 = arith.constant 1.000000e+00 : f32
    %cst_50 = arith.constant 0.000000e+00 : f32
    %63 = vector.broadcast %cst_49 : f32 to vector<64x128xf32>
    %64 = vector.broadcast %cst_50 : f32 to vector<64x128xf32>
    %65 = arith.select %59, %63, %64 : vector<64x128xi1>, vector<64x128xf32>
    %66 = arith.truncf %65 : vector<64x128xf32> to vector<64x128xbf16>
    %c2_51 = arith.constant 2 : index
    %c0_52 = arith.constant 0 : index
    %c0_53 = arith.constant 0 : index
    %67 = vector.load %arg5[%c2_51, %c0_52, %c0_53] : memref<4x64x128xbf16, #tpu.memory_space<vmem>>, vector<1x64x128xbf16>
    %68 = vector.shape_cast %67 : vector<1x64x128xbf16> to vector<64x128xbf16>
    %69 = vector.shape_cast %66 : vector<64x128xbf16> to vector<1x64x128xbf16>
    tpu.vector_store %arg5[%c2_51, %c0_52, %c0_53], %69 {strides = array<i32>} : memref<4x64x128xbf16, #tpu.memory_space<vmem>>, vector<1x64x128xbf16>,
    %c3 = arith.constant 3 : index
    %c0_54 = arith.constant 0 : index
    %c0_55 = arith.constant 0 : index
    %70 = vector.load %arg1[%c3, %c0_54, %c0_55] : memref<4x64x128xbf16, #tpu.memory_space<vmem>>, vector<1x64x128xbf16>
    %71 = vector.shape_cast %70 : vector<1x64x128xbf16> to vector<64x128xbf16>
    %c0_56 = arith.constant 0 : index
    %c0_57 = arith.constant 0 : index
    %72 = vector.load %arg2[%c0_56, %c0_57] : memref<128x128xbf16, #tpu.memory_space<vmem>>, vector<128x128xbf16>
    %cst_58 = arith.constant dense<0.000000e+00> : vector<64x128xf32>
    %73 = tpu.matmul %71, %72, %cst_58 {dimension_numbers = #tpu.dot_dimension_numbers<[1], [0], [0], [1], [0, 0, 1, 1], [], []>} : vector<64x128xbf16>, vector<128x128xbf16>, vector<64x128xf32> -> vector<64x128xf32>
    %74 = vector.broadcast %0 : vector<1x128xf32> to vector<64x128xf32>
    %75 = arith.mulf %73, %74 : vector<64x128xf32>
    %76 = vector.broadcast %1 : vector<1x128xf32> to vector<64x128xf32>
    %77 = arith.addf %75, %76 : vector<64x128xf32>
    %c0_59 = arith.constant 0 : index
    %c0_60 = arith.constant 0 : index
    %78 = vector.load %arg6[%c0_59, %c0_60] : memref<64x128xf32, #tpu.memory_space<vmem>>, vector<64x128xf32>
    %79 = arith.addf %78, %77 : vector<64x128xf32>
    %cst_61 = arith.constant 1.000000e+00 : f32
    %80 = vector.broadcast %cst_61 : f32 to vector<64x128xf32>
    %81 = arith.cmpf oge, %79, %80 : vector<64x128xf32>
    %cst_62 = arith.constant 0.000000e+00 : f32
    %82 = vector.broadcast %cst_62 : f32 to vector<64x128xf32>
    %83 = arith.select %81, %82, %79 : vector<64x128xi1>, vector<64x128xf32>
    %c0_63 = arith.constant 0 : index
    %c0_64 = arith.constant 0 : index
    %84 = vector.load %arg6[%c0_63, %c0_64] : memref<64x128xf32, #tpu.memory_space<vmem>>, vector<64x128xf32>
    tpu.vector_store %arg6[%c0_63, %c0_64], %83 {strides = array<i32>} : memref<64x128xf32, #tpu.memory_space<vmem>>, vector<64x128xf32>,
    %cst_65 = arith.constant 1.000000e+00 : f32
    %cst_66 = arith.constant 0.000000e+00 : f32
    %85 = vector.broadcast %cst_65 : f32 to vector<64x128xf32>
    %86 = vector.broadcast %cst_66 : f32 to vector<64x128xf32>
    %87 = arith.select %81, %85, %86 : vector<64x128xi1>, vector<64x128xf32>
    %88 = arith.truncf %87 : vector<64x128xf32> to vector<64x128xbf16>
    %c3_67 = arith.constant 3 : index
    %c0_68 = arith.constant 0 : index
    %c0_69 = arith.constant 0 : index
    %89 = vector.load %arg5[%c3_67, %c0_68, %c0_69] : memref<4x64x128xbf16, #tpu.memory_space<vmem>>, vector<1x64x128xbf16>
    %90 = vector.shape_cast %89 : vector<1x64x128xbf16> to vector<64x128xbf16>
    %91 = vector.shape_cast %88 : vector<64x128xbf16> to vector<1x64x128xbf16>
    tpu.vector_store %arg5[%c3_67, %c0_68, %c0_69], %91 {strides = array<i32>} : memref<4x64x128xbf16, #tpu.memory_space<vmem>>, vector<1x64x128xbf16>,
    return
  }
  func.func @transform_0(%arg0: i32) -> (i32, i32, i32) {
    %c0_i32 = arith.constant 0 : i32
    %c0_i32_0 = arith.constant 0 : i32
    %c0_i32_1 = arith.constant 0 : i32
    return %c0_i32, %arg0, %c0_i32_0 : i32, i32, i32
  }
  func.func @transform_1(%arg0: i32) -> (i32, i32) {
    %c0_i32 = arith.constant 0 : i32
    %c0_i32_0 = arith.constant 0 : i32
    %c0_i32_1 = arith.constant 0 : i32
    return %c0_i32, %c0_i32_0 : i32, i32
  }
  func.func @transform_2(%arg0: i32) -> (i32, i32) {
    %c0_i32 = arith.constant 0 : i32
    %c0_i32_0 = arith.constant 0 : i32
    %c0_i32_1 = arith.constant 0 : i32
    return %c0_i32, %c0_i32_0 : i32, i32
  }
  func.func @transform_3(%arg0: i32) -> (i32, i32) {
    %c0_i32 = arith.constant 0 : i32
    %c0_i32_0 = arith.constant 0 : i32
    %c0_i32_1 = arith.constant 0 : i32
    return %c0_i32, %c0_i32_0 : i32, i32
  }
  func.func @transform_4(%arg0: i32) -> (i32, i32, i32) {
    %c0_i32 = arith.constant 0 : i32
    %c0_i32_0 = arith.constant 0 : i32
    %c0_i32_1 = arith.constant 0 : i32
    return %c0_i32, %arg0, %c0_i32_0 : i32, i32, i32
  }
}

module attributes {stable_mosaic.version = 11 : i64} {
  func.func @_conv1x1_bn_if_add_kernel(%arg0: i32, %arg1: memref<4x64x128xbf16, #tpu.memory_space<vmem>>, %arg2: memref<4x64x128xbf16, #tpu.memory_space<vmem>>, %arg3: memref<128x128xbf16, #tpu.memory_space<vmem>>, %arg4: memref<1x128xf32, #tpu.memory_space<vmem>>, %arg5: memref<1x128xf32, #tpu.memory_space<vmem>>, %arg6: memref<4x64x128xf32, #tpu.memory_space<vmem>>, %arg7: memref<64x128xf32, #tpu.memory_space<vmem>>) attributes {dimension_semantics = [#tpu.dimension_semantics<parallel>], iteration_bounds = array<i64: 2>, scalar_prefetch = 0 : i64, scratch_operands = 1 : i64, tpu.core_type = #tpu.core_type<tc>, window_params = [{transform_indices = @transform_0, window_bounds = array<i64: 4, 64, 128>}, {transform_indices = @transform_1, window_bounds = array<i64: 4, 64, 128>}, {pipeline_mode = #tpu.pipeline_mode<synchronous>, transform_indices = @transform_2, window_bounds = array<i64: 128, 128>}, {pipeline_mode = #tpu.pipeline_mode<synchronous>, transform_indices = @transform_3, window_bounds = array<i64: 1, 128>}, {pipeline_mode = #tpu.pipeline_mode<synchronous>, transform_indices = @transform_4, window_bounds = array<i64: 1, 128>}, {transform_indices = @transform_5, window_bounds = array<i64: 4, 64, 128>}]} {
    %c0 = arith.constant 0 : index
    %c0_0 = arith.constant 0 : index
    %0 = vector.load %arg4[%c0, %c0_0] : memref<1x128xf32, #tpu.memory_space<vmem>>, vector<1x128xf32>
    %c0_1 = arith.constant 0 : index
    %c0_2 = arith.constant 0 : index
    %1 = vector.load %arg5[%c0_1, %c0_2] : memref<1x128xf32, #tpu.memory_space<vmem>>, vector<1x128xf32>
    %cst = arith.constant 0.000000e+00 : f32
    %2 = vector.broadcast %cst : f32 to vector<64x128xf32>
    %c0_3 = arith.constant 0 : index
    %c0_4 = arith.constant 0 : index
    %3 = vector.load %arg7[%c0_3, %c0_4] : memref<64x128xf32, #tpu.memory_space<vmem>>, vector<64x128xf32>
    tpu.vector_store %arg7[%c0_3, %c0_4], %2 {strides = array<i32>} : memref<64x128xf32, #tpu.memory_space<vmem>>, vector<64x128xf32>,
    %c0_5 = arith.constant 0 : index
    %c0_6 = arith.constant 0 : index
    %c0_7 = arith.constant 0 : index
    %4 = vector.load %arg1[%c0_5, %c0_6, %c0_7] : memref<4x64x128xbf16, #tpu.memory_space<vmem>>, vector<1x64x128xbf16>
    %5 = vector.shape_cast %4 : vector<1x64x128xbf16> to vector<64x128xbf16>
    %c0_8 = arith.constant 0 : index
    %c0_9 = arith.constant 0 : index
    %6 = vector.load %arg3[%c0_8, %c0_9] : memref<128x128xbf16, #tpu.memory_space<vmem>>, vector<128x128xbf16>
    %cst_10 = arith.constant dense<0.000000e+00> : vector<64x128xf32>
    %7 = tpu.matmul %5, %6, %cst_10 {dimension_numbers = #tpu.dot_dimension_numbers<[1], [0], [0], [1], [0, 0, 1, 1], [], []>} : vector<64x128xbf16>, vector<128x128xbf16>, vector<64x128xf32> -> vector<64x128xf32>
    %8 = vector.broadcast %0 : vector<1x128xf32> to vector<64x128xf32>
    %9 = arith.mulf %7, %8 : vector<64x128xf32>
    %10 = vector.broadcast %1 : vector<1x128xf32> to vector<64x128xf32>
    %11 = arith.addf %9, %10 : vector<64x128xf32>
    %c0_11 = arith.constant 0 : index
    %c0_12 = arith.constant 0 : index
    %12 = vector.load %arg7[%c0_11, %c0_12] : memref<64x128xf32, #tpu.memory_space<vmem>>, vector<64x128xf32>
    %13 = arith.addf %12, %11 : vector<64x128xf32>
    %cst_13 = arith.constant 1.000000e+00 : f32
    %14 = vector.broadcast %cst_13 : f32 to vector<64x128xf32>
    %15 = arith.cmpf oge, %13, %14 : vector<64x128xf32>
    %cst_14 = arith.constant 0.000000e+00 : f32
    %16 = vector.broadcast %cst_14 : f32 to vector<64x128xf32>
    %17 = arith.select %15, %16, %13 : vector<64x128xi1>, vector<64x128xf32>
    %c0_15 = arith.constant 0 : index
    %c0_16 = arith.constant 0 : index
    %18 = vector.load %arg7[%c0_15, %c0_16] : memref<64x128xf32, #tpu.memory_space<vmem>>, vector<64x128xf32>
    tpu.vector_store %arg7[%c0_15, %c0_16], %17 {strides = array<i32>} : memref<64x128xf32, #tpu.memory_space<vmem>>, vector<64x128xf32>,
    %c0_17 = arith.constant 0 : index
    %c0_18 = arith.constant 0 : index
    %c0_19 = arith.constant 0 : index
    %19 = vector.load %arg2[%c0_17, %c0_18, %c0_19] : memref<4x64x128xbf16, #tpu.memory_space<vmem>>, vector<1x64x128xbf16>
    %20 = vector.shape_cast %19 : vector<1x64x128xbf16> to vector<64x128xbf16>
    %21 = arith.extf %20 : vector<64x128xbf16> to vector<64x128xf32>
    %cst_20 = arith.constant 1.000000e+00 : f32
    %22 = vector.broadcast %cst_20 : f32 to vector<64x128xf32>
    %23 = arith.addf %21, %22 : vector<64x128xf32>
    %24 = arith.select %15, %23, %21 : vector<64x128xi1>, vector<64x128xf32>
    %c0_21 = arith.constant 0 : index
    %c0_22 = arith.constant 0 : index
    %c0_23 = arith.constant 0 : index
    %25 = vector.load %arg6[%c0_21, %c0_22, %c0_23] : memref<4x64x128xf32, #tpu.memory_space<vmem>>, vector<1x64x128xf32>
    %26 = vector.shape_cast %25 : vector<1x64x128xf32> to vector<64x128xf32>
    %27 = vector.shape_cast %24 : vector<64x128xf32> to vector<1x64x128xf32>
    tpu.vector_store %arg6[%c0_21, %c0_22, %c0_23], %27 {strides = array<i32>} : memref<4x64x128xf32, #tpu.memory_space<vmem>>, vector<1x64x128xf32>,
    %c1 = arith.constant 1 : index
    %c0_24 = arith.constant 0 : index
    %c0_25 = arith.constant 0 : index
    %28 = vector.load %arg1[%c1, %c0_24, %c0_25] : memref<4x64x128xbf16, #tpu.memory_space<vmem>>, vector<1x64x128xbf16>
    %29 = vector.shape_cast %28 : vector<1x64x128xbf16> to vector<64x128xbf16>
    %c0_26 = arith.constant 0 : index
    %c0_27 = arith.constant 0 : index
    %30 = vector.load %arg3[%c0_26, %c0_27] : memref<128x128xbf16, #tpu.memory_space<vmem>>, vector<128x128xbf16>
    %cst_28 = arith.constant dense<0.000000e+00> : vector<64x128xf32>
    %31 = tpu.matmul %29, %30, %cst_28 {dimension_numbers = #tpu.dot_dimension_numbers<[1], [0], [0], [1], [0, 0, 1, 1], [], []>} : vector<64x128xbf16>, vector<128x128xbf16>, vector<64x128xf32> -> vector<64x128xf32>
    %32 = vector.broadcast %0 : vector<1x128xf32> to vector<64x128xf32>
    %33 = arith.mulf %31, %32 : vector<64x128xf32>
    %34 = vector.broadcast %1 : vector<1x128xf32> to vector<64x128xf32>
    %35 = arith.addf %33, %34 : vector<64x128xf32>
    %c0_29 = arith.constant 0 : index
    %c0_30 = arith.constant 0 : index
    %36 = vector.load %arg7[%c0_29, %c0_30] : memref<64x128xf32, #tpu.memory_space<vmem>>, vector<64x128xf32>
    %37 = arith.addf %36, %35 : vector<64x128xf32>
    %cst_31 = arith.constant 1.000000e+00 : f32
    %38 = vector.broadcast %cst_31 : f32 to vector<64x128xf32>
    %39 = arith.cmpf oge, %37, %38 : vector<64x128xf32>
    %cst_32 = arith.constant 0.000000e+00 : f32
    %40 = vector.broadcast %cst_32 : f32 to vector<64x128xf32>
    %41 = arith.select %39, %40, %37 : vector<64x128xi1>, vector<64x128xf32>
    %c0_33 = arith.constant 0 : index
    %c0_34 = arith.constant 0 : index
    %42 = vector.load %arg7[%c0_33, %c0_34] : memref<64x128xf32, #tpu.memory_space<vmem>>, vector<64x128xf32>
    tpu.vector_store %arg7[%c0_33, %c0_34], %41 {strides = array<i32>} : memref<64x128xf32, #tpu.memory_space<vmem>>, vector<64x128xf32>,
    %c1_35 = arith.constant 1 : index
    %c0_36 = arith.constant 0 : index
    %c0_37 = arith.constant 0 : index
    %43 = vector.load %arg2[%c1_35, %c0_36, %c0_37] : memref<4x64x128xbf16, #tpu.memory_space<vmem>>, vector<1x64x128xbf16>
    %44 = vector.shape_cast %43 : vector<1x64x128xbf16> to vector<64x128xbf16>
    %45 = arith.extf %44 : vector<64x128xbf16> to vector<64x128xf32>
    %cst_38 = arith.constant 1.000000e+00 : f32
    %46 = vector.broadcast %cst_38 : f32 to vector<64x128xf32>
    %47 = arith.addf %45, %46 : vector<64x128xf32>
    %48 = arith.select %39, %47, %45 : vector<64x128xi1>, vector<64x128xf32>
    %c1_39 = arith.constant 1 : index
    %c0_40 = arith.constant 0 : index
    %c0_41 = arith.constant 0 : index
    %49 = vector.load %arg6[%c1_39, %c0_40, %c0_41] : memref<4x64x128xf32, #tpu.memory_space<vmem>>, vector<1x64x128xf32>
    %50 = vector.shape_cast %49 : vector<1x64x128xf32> to vector<64x128xf32>
    %51 = vector.shape_cast %48 : vector<64x128xf32> to vector<1x64x128xf32>
    tpu.vector_store %arg6[%c1_39, %c0_40, %c0_41], %51 {strides = array<i32>} : memref<4x64x128xf32, #tpu.memory_space<vmem>>, vector<1x64x128xf32>,
    %c2 = arith.constant 2 : index
    %c0_42 = arith.constant 0 : index
    %c0_43 = arith.constant 0 : index
    %52 = vector.load %arg1[%c2, %c0_42, %c0_43] : memref<4x64x128xbf16, #tpu.memory_space<vmem>>, vector<1x64x128xbf16>
    %53 = vector.shape_cast %52 : vector<1x64x128xbf16> to vector<64x128xbf16>
    %c0_44 = arith.constant 0 : index
    %c0_45 = arith.constant 0 : index
    %54 = vector.load %arg3[%c0_44, %c0_45] : memref<128x128xbf16, #tpu.memory_space<vmem>>, vector<128x128xbf16>
    %cst_46 = arith.constant dense<0.000000e+00> : vector<64x128xf32>
    %55 = tpu.matmul %53, %54, %cst_46 {dimension_numbers = #tpu.dot_dimension_numbers<[1], [0], [0], [1], [0, 0, 1, 1], [], []>} : vector<64x128xbf16>, vector<128x128xbf16>, vector<64x128xf32> -> vector<64x128xf32>
    %56 = vector.broadcast %0 : vector<1x128xf32> to vector<64x128xf32>
    %57 = arith.mulf %55, %56 : vector<64x128xf32>
    %58 = vector.broadcast %1 : vector<1x128xf32> to vector<64x128xf32>
    %59 = arith.addf %57, %58 : vector<64x128xf32>
    %c0_47 = arith.constant 0 : index
    %c0_48 = arith.constant 0 : index
    %60 = vector.load %arg7[%c0_47, %c0_48] : memref<64x128xf32, #tpu.memory_space<vmem>>, vector<64x128xf32>
    %61 = arith.addf %60, %59 : vector<64x128xf32>
    %cst_49 = arith.constant 1.000000e+00 : f32
    %62 = vector.broadcast %cst_49 : f32 to vector<64x128xf32>
    %63 = arith.cmpf oge, %61, %62 : vector<64x128xf32>
    %cst_50 = arith.constant 0.000000e+00 : f32
    %64 = vector.broadcast %cst_50 : f32 to vector<64x128xf32>
    %65 = arith.select %63, %64, %61 : vector<64x128xi1>, vector<64x128xf32>
    %c0_51 = arith.constant 0 : index
    %c0_52 = arith.constant 0 : index
    %66 = vector.load %arg7[%c0_51, %c0_52] : memref<64x128xf32, #tpu.memory_space<vmem>>, vector<64x128xf32>
    tpu.vector_store %arg7[%c0_51, %c0_52], %65 {strides = array<i32>} : memref<64x128xf32, #tpu.memory_space<vmem>>, vector<64x128xf32>,
    %c2_53 = arith.constant 2 : index
    %c0_54 = arith.constant 0 : index
    %c0_55 = arith.constant 0 : index
    %67 = vector.load %arg2[%c2_53, %c0_54, %c0_55] : memref<4x64x128xbf16, #tpu.memory_space<vmem>>, vector<1x64x128xbf16>
    %68 = vector.shape_cast %67 : vector<1x64x128xbf16> to vector<64x128xbf16>
    %69 = arith.extf %68 : vector<64x128xbf16> to vector<64x128xf32>
    %cst_56 = arith.constant 1.000000e+00 : f32
    %70 = vector.broadcast %cst_56 : f32 to vector<64x128xf32>
    %71 = arith.addf %69, %70 : vector<64x128xf32>
    %72 = arith.select %63, %71, %69 : vector<64x128xi1>, vector<64x128xf32>
    %c2_57 = arith.constant 2 : index
    %c0_58 = arith.constant 0 : index
    %c0_59 = arith.constant 0 : index
    %73 = vector.load %arg6[%c2_57, %c0_58, %c0_59] : memref<4x64x128xf32, #tpu.memory_space<vmem>>, vector<1x64x128xf32>
    %74 = vector.shape_cast %73 : vector<1x64x128xf32> to vector<64x128xf32>
    %75 = vector.shape_cast %72 : vector<64x128xf32> to vector<1x64x128xf32>
    tpu.vector_store %arg6[%c2_57, %c0_58, %c0_59], %75 {strides = array<i32>} : memref<4x64x128xf32, #tpu.memory_space<vmem>>, vector<1x64x128xf32>,
    %c3 = arith.constant 3 : index
    %c0_60 = arith.constant 0 : index
    %c0_61 = arith.constant 0 : index
    %76 = vector.load %arg1[%c3, %c0_60, %c0_61] : memref<4x64x128xbf16, #tpu.memory_space<vmem>>, vector<1x64x128xbf16>
    %77 = vector.shape_cast %76 : vector<1x64x128xbf16> to vector<64x128xbf16>
    %c0_62 = arith.constant 0 : index
    %c0_63 = arith.constant 0 : index
    %78 = vector.load %arg3[%c0_62, %c0_63] : memref<128x128xbf16, #tpu.memory_space<vmem>>, vector<128x128xbf16>
    %cst_64 = arith.constant dense<0.000000e+00> : vector<64x128xf32>
    %79 = tpu.matmul %77, %78, %cst_64 {dimension_numbers = #tpu.dot_dimension_numbers<[1], [0], [0], [1], [0, 0, 1, 1], [], []>} : vector<64x128xbf16>, vector<128x128xbf16>, vector<64x128xf32> -> vector<64x128xf32>
    %80 = vector.broadcast %0 : vector<1x128xf32> to vector<64x128xf32>
    %81 = arith.mulf %79, %80 : vector<64x128xf32>
    %82 = vector.broadcast %1 : vector<1x128xf32> to vector<64x128xf32>
    %83 = arith.addf %81, %82 : vector<64x128xf32>
    %c0_65 = arith.constant 0 : index
    %c0_66 = arith.constant 0 : index
    %84 = vector.load %arg7[%c0_65, %c0_66] : memref<64x128xf32, #tpu.memory_space<vmem>>, vector<64x128xf32>
    %85 = arith.addf %84, %83 : vector<64x128xf32>
    %cst_67 = arith.constant 1.000000e+00 : f32
    %86 = vector.broadcast %cst_67 : f32 to vector<64x128xf32>
    %87 = arith.cmpf oge, %85, %86 : vector<64x128xf32>
    %cst_68 = arith.constant 0.000000e+00 : f32
    %88 = vector.broadcast %cst_68 : f32 to vector<64x128xf32>
    %89 = arith.select %87, %88, %85 : vector<64x128xi1>, vector<64x128xf32>
    %c0_69 = arith.constant 0 : index
    %c0_70 = arith.constant 0 : index
    %90 = vector.load %arg7[%c0_69, %c0_70] : memref<64x128xf32, #tpu.memory_space<vmem>>, vector<64x128xf32>
    tpu.vector_store %arg7[%c0_69, %c0_70], %89 {strides = array<i32>} : memref<64x128xf32, #tpu.memory_space<vmem>>, vector<64x128xf32>,
    %c3_71 = arith.constant 3 : index
    %c0_72 = arith.constant 0 : index
    %c0_73 = arith.constant 0 : index
    %91 = vector.load %arg2[%c3_71, %c0_72, %c0_73] : memref<4x64x128xbf16, #tpu.memory_space<vmem>>, vector<1x64x128xbf16>
    %92 = vector.shape_cast %91 : vector<1x64x128xbf16> to vector<64x128xbf16>
    %93 = arith.extf %92 : vector<64x128xbf16> to vector<64x128xf32>
    %cst_74 = arith.constant 1.000000e+00 : f32
    %94 = vector.broadcast %cst_74 : f32 to vector<64x128xf32>
    %95 = arith.addf %93, %94 : vector<64x128xf32>
    %96 = arith.select %87, %95, %93 : vector<64x128xi1>, vector<64x128xf32>
    %c3_75 = arith.constant 3 : index
    %c0_76 = arith.constant 0 : index
    %c0_77 = arith.constant 0 : index
    %97 = vector.load %arg6[%c3_75, %c0_76, %c0_77] : memref<4x64x128xf32, #tpu.memory_space<vmem>>, vector<1x64x128xf32>
    %98 = vector.shape_cast %97 : vector<1x64x128xf32> to vector<64x128xf32>
    %99 = vector.shape_cast %96 : vector<64x128xf32> to vector<1x64x128xf32>
    tpu.vector_store %arg6[%c3_75, %c0_76, %c0_77], %99 {strides = array<i32>} : memref<4x64x128xf32, #tpu.memory_space<vmem>>, vector<1x64x128xf32>,
    return
  }
  func.func @transform_0(%arg0: i32) -> (i32, i32, i32) {
    %c0_i32 = arith.constant 0 : i32
    %c0_i32_0 = arith.constant 0 : i32
    %c0_i32_1 = arith.constant 0 : i32
    return %c0_i32, %arg0, %c0_i32_0 : i32, i32, i32
  }
  func.func @transform_1(%arg0: i32) -> (i32, i32, i32) {
    %c0_i32 = arith.constant 0 : i32
    %c0_i32_0 = arith.constant 0 : i32
    %c0_i32_1 = arith.constant 0 : i32
    return %c0_i32, %arg0, %c0_i32_0 : i32, i32, i32
  }
  func.func @transform_2(%arg0: i32) -> (i32, i32) {
    %c0_i32 = arith.constant 0 : i32
    %c0_i32_0 = arith.constant 0 : i32
    %c0_i32_1 = arith.constant 0 : i32
    return %c0_i32, %c0_i32_0 : i32, i32
  }
  func.func @transform_3(%arg0: i32) -> (i32, i32) {
    %c0_i32 = arith.constant 0 : i32
    %c0_i32_0 = arith.constant 0 : i32
    %c0_i32_1 = arith.constant 0 : i32
    return %c0_i32, %c0_i32_0 : i32, i32
  }
  func.func @transform_4(%arg0: i32) -> (i32, i32) {
    %c0_i32 = arith.constant 0 : i32
    %c0_i32_0 = arith.constant 0 : i32
    %c0_i32_1 = arith.constant 0 : i32
    return %c0_i32, %c0_i32_0 : i32, i32
  }
  func.func @transform_5(%arg0: i32) -> (i32, i32, i32) {
    %c0_i32 = arith.constant 0 : i32
    %c0_i32_0 = arith.constant 0 : i32
    %c0_i32_1 = arith.constant 0 : i32
    return %c0_i32, %arg0, %c0_i32_0 : i32, i32, i32
  }
}

module attributes {stable_mosaic.version = 11 : i64} {
  func.func @_conv3x3_bn_if_kernel(%arg0: i32, %arg1: memref<4x1x8x8x128xbf16, #tpu.memory_space<vmem>>, %arg2: memref<3x384x128xbf16, #tpu.memory_space<vmem>>, %arg3: memref<1x128xf32, #tpu.memory_space<vmem>>, %arg4: memref<1x128xf32, #tpu.memory_space<vmem>>, %arg5: memref<4x64x128xbf16, #tpu.memory_space<vmem>>, %arg6: memref<1x10x17x128xbf16, #tpu.memory_space<vmem>>, %arg7: memref<64x128xf32, #tpu.memory_space<vmem>>, %arg8: memref<64x128xf32, #tpu.memory_space<vmem>>) attributes {dimension_semantics = [#tpu.dimension_semantics<parallel>], iteration_bounds = array<i64: 2>, scalar_prefetch = 0 : i64, scratch_operands = 3 : i64, tpu.core_type = #tpu.core_type<tc>, window_params = [{transform_indices = @transform_0, window_bounds = array<i64: 4, 1, 8, 8, 128>}, {pipeline_mode = #tpu.pipeline_mode<synchronous>, transform_indices = @transform_1, window_bounds = array<i64: 3, 384, 128>}, {pipeline_mode = #tpu.pipeline_mode<synchronous>, transform_indices = @transform_2, window_bounds = array<i64: 1, 128>}, {pipeline_mode = #tpu.pipeline_mode<synchronous>, transform_indices = @transform_3, window_bounds = array<i64: 1, 128>}, {transform_indices = @transform_4, window_bounds = array<i64: 4, 64, 128>}]} {
    %c0 = arith.constant 0 : index
    %c0_0 = arith.constant 0 : index
    %0 = vector.load %arg3[%c0, %c0_0] : memref<1x128xf32, #tpu.memory_space<vmem>>, vector<1x128xf32>
    %c0_1 = arith.constant 0 : index
    %c0_2 = arith.constant 0 : index
    %1 = vector.load %arg4[%c0_1, %c0_2] : memref<1x128xf32, #tpu.memory_space<vmem>>, vector<1x128xf32>
    %cst = arith.constant 0.000000e+00 : bf16
    %2 = vector.broadcast %cst : bf16 to vector<1x10x17x128xbf16>
    %c0_3 = arith.constant 0 : index
    %c0_4 = arith.constant 0 : index
    %c0_5 = arith.constant 0 : index
    %c0_6 = arith.constant 0 : index
    %3 = vector.load %arg6[%c0_3, %c0_4, %c0_5, %c0_6] : memref<1x10x17x128xbf16, #tpu.memory_space<vmem>>, vector<1x10x17x128xbf16>
    tpu.vector_store %arg6[%c0_3, %c0_4, %c0_5, %c0_6], %2 {strides = array<i32>} : memref<1x10x17x128xbf16, #tpu.memory_space<vmem>>, vector<1x10x17x128xbf16>,
    %cst_7 = arith.constant 0.000000e+00 : f32
    %4 = vector.broadcast %cst_7 : f32 to vector<64x128xf32>
    %c0_8 = arith.constant 0 : index
    %c0_9 = arith.constant 0 : index
    %5 = vector.load %arg8[%c0_8, %c0_9] : memref<64x128xf32, #tpu.memory_space<vmem>>, vector<64x128xf32>
    tpu.vector_store %arg8[%c0_8, %c0_9], %4 {strides = array<i32>} : memref<64x128xf32, #tpu.memory_space<vmem>>, vector<64x128xf32>,
    %c0_10 = arith.constant 0 : index
    %c0_11 = arith.constant 0 : index
    %c0_12 = arith.constant 0 : index
    %c0_13 = arith.constant 0 : index
    %c0_14 = arith.constant 0 : index
    %6 = vector.load %arg1[%c0_10, %c0_11, %c0_12, %c0_13, %c0_14] : memref<4x1x8x8x128xbf16, #tpu.memory_space<vmem>>, vector<1x1x8x8x128xbf16>
    %7 = vector.shape_cast %6 : vector<1x1x8x8x128xbf16> to vector<1x8x8x128xbf16>
    %c0_15 = arith.constant 0 : index
    %c1 = arith.constant 1 : index
    %c8 = arith.constant 8 : index
    %c0_16 = arith.constant 0 : index
    %8 = vector.load %arg6[%c0_15, %c1, %c8, %c0_16] : memref<1x10x17x128xbf16, #tpu.memory_space<vmem>>, vector<1x8x8x128xbf16>
    tpu.vector_store %arg6[%c0_15, %c1, %c8, %c0_16], %7 {strides = array<i32>} : memref<1x10x17x128xbf16, #tpu.memory_space<vmem>>, vector<1x8x8x128xbf16>,
    %c0_17 = arith.constant 0 : index
    %c0_18 = arith.constant 0 : index
    %c7 = arith.constant 7 : index
    %c0_19 = arith.constant 0 : index
    %9 = vector.load %arg6[%c0_17, %c0_18, %c7, %c0_19] : memref<1x10x17x128xbf16, #tpu.memory_space<vmem>>, vector<1x10x8x128xbf16>
    %c0_20 = arith.constant 0 : index
    %c0_21 = arith.constant 0 : index
    %c8_22 = arith.constant 8 : index
    %c0_23 = arith.constant 0 : index
    %10 = vector.load %arg6[%c0_20, %c0_21, %c8_22, %c0_23] : memref<1x10x17x128xbf16, #tpu.memory_space<vmem>>, vector<1x10x8x128xbf16>
    %c0_24 = arith.constant 0 : index
    %c0_25 = arith.constant 0 : index
    %c9 = arith.constant 9 : index
    %c0_26 = arith.constant 0 : index
    %11 = vector.load %arg6[%c0_24, %c0_25, %c9, %c0_26] : memref<1x10x17x128xbf16, #tpu.memory_space<vmem>>, vector<1x10x8x128xbf16>
    %12 = tpu.concatenate %9, %10, %11 in 3 : vector<1x10x8x128xbf16>, vector<1x10x8x128xbf16>, vector<1x10x8x128xbf16> -> vector<1x10x8x384xbf16>
    %13 = vector.extract_strided_slice %12 {offsets = [0, 0, 0, 0], sizes = [1, 8, 8, 384], strides = [1, 1, 1, 1]} : vector<1x10x8x384xbf16> to vector<1x8x8x384xbf16>
    %14 = vector.shape_cast %13 : vector<1x8x8x384xbf16> to vector<64x384xbf16>
    %c0_27 = arith.constant 0 : index
    %c0_28 = arith.constant 0 : index
    %c0_29 = arith.constant 0 : index
    %15 = vector.load %arg2[%c0_27, %c0_28, %c0_29] : memref<3x384x128xbf16, #tpu.memory_space<vmem>>, vector<1x384x128xbf16>
    %16 = vector.shape_cast %15 : vector<1x384x128xbf16> to vector<384x128xbf16>
    %cst_30 = arith.constant dense<0.000000e+00> : vector<64x128xf32>
    %17 = tpu.matmul %14, %16, %cst_30 {dimension_numbers = #tpu.dot_dimension_numbers<[1], [0], [0], [1], [0, 0, 1, 1], [], []>} : vector<64x384xbf16>, vector<384x128xbf16>, vector<64x128xf32> -> vector<64x128xf32>
    %c0_31 = arith.constant 0 : index
    %c0_32 = arith.constant 0 : index
    %18 = vector.load %arg7[%c0_31, %c0_32] : memref<64x128xf32, #tpu.memory_space<vmem>>, vector<64x128xf32>
    tpu.vector_store %arg7[%c0_31, %c0_32], %17 {strides = array<i32>} : memref<64x128xf32, #tpu.memory_space<vmem>>, vector<64x128xf32>,
    %c0_33 = arith.constant 0 : index
    %c0_34 = arith.constant 0 : index
    %19 = vector.load %arg7[%c0_33, %c0_34] : memref<64x128xf32, #tpu.memory_space<vmem>>, vector<64x128xf32>
    %20 = vector.extract_strided_slice %12 {offsets = [0, 1, 0, 0], sizes = [1, 8, 8, 384], strides = [1, 1, 1, 1]} : vector<1x10x8x384xbf16> to vector<1x8x8x384xbf16>
    %21 = vector.shape_cast %20 : vector<1x8x8x384xbf16> to vector<64x384xbf16>
    %c1_35 = arith.constant 1 : index
    %c0_36 = arith.constant 0 : index
    %c0_37 = arith.constant 0 : index
    %22 = vector.load %arg2[%c1_35, %c0_36, %c0_37] : memref<3x384x128xbf16, #tpu.memory_space<vmem>>, vector<1x384x128xbf16>
    %23 = vector.shape_cast %22 : vector<1x384x128xbf16> to vector<384x128xbf16>
    %cst_38 = arith.constant dense<0.000000e+00> : vector<64x128xf32>
    %24 = tpu.matmul %21, %23, %cst_38 {dimension_numbers = #tpu.dot_dimension_numbers<[1], [0], [0], [1], [0, 0, 1, 1], [], []>} : vector<64x384xbf16>, vector<384x128xbf16>, vector<64x128xf32> -> vector<64x128xf32>
    %25 = arith.addf %19, %24 : vector<64x128xf32>
    %c0_39 = arith.constant 0 : index
    %c0_40 = arith.constant 0 : index
    %26 = vector.load %arg7[%c0_39, %c0_40] : memref<64x128xf32, #tpu.memory_space<vmem>>, vector<64x128xf32>
    tpu.vector_store %arg7[%c0_39, %c0_40], %25 {strides = array<i32>} : memref<64x128xf32, #tpu.memory_space<vmem>>, vector<64x128xf32>,
    %c0_41 = arith.constant 0 : index
    %c0_42 = arith.constant 0 : index
    %27 = vector.load %arg7[%c0_41, %c0_42] : memref<64x128xf32, #tpu.memory_space<vmem>>, vector<64x128xf32>
    %28 = vector.extract_strided_slice %12 {offsets = [0, 2, 0, 0], sizes = [1, 8, 8, 384], strides = [1, 1, 1, 1]} : vector<1x10x8x384xbf16> to vector<1x8x8x384xbf16>
    %29 = vector.shape_cast %28 : vector<1x8x8x384xbf16> to vector<64x384xbf16>
    %c2 = arith.constant 2 : index
    %c0_43 = arith.constant 0 : index
    %c0_44 = arith.constant 0 : index
    %30 = vector.load %arg2[%c2, %c0_43, %c0_44] : memref<3x384x128xbf16, #tpu.memory_space<vmem>>, vector<1x384x128xbf16>
    %31 = vector.shape_cast %30 : vector<1x384x128xbf16> to vector<384x128xbf16>
    %cst_45 = arith.constant dense<0.000000e+00> : vector<64x128xf32>
    %32 = tpu.matmul %29, %31, %cst_45 {dimension_numbers = #tpu.dot_dimension_numbers<[1], [0], [0], [1], [0, 0, 1, 1], [], []>} : vector<64x384xbf16>, vector<384x128xbf16>, vector<64x128xf32> -> vector<64x128xf32>
    %33 = arith.addf %27, %32 : vector<64x128xf32>
    %c0_46 = arith.constant 0 : index
    %c0_47 = arith.constant 0 : index
    %34 = vector.load %arg7[%c0_46, %c0_47] : memref<64x128xf32, #tpu.memory_space<vmem>>, vector<64x128xf32>
    tpu.vector_store %arg7[%c0_46, %c0_47], %33 {strides = array<i32>} : memref<64x128xf32, #tpu.memory_space<vmem>>, vector<64x128xf32>,
    %c0_48 = arith.constant 0 : index
    %c0_49 = arith.constant 0 : index
    %35 = vector.load %arg8[%c0_48, %c0_49] : memref<64x128xf32, #tpu.memory_space<vmem>>, vector<64x128xf32>
    %c0_50 = arith.constant 0 : index
    %c0_51 = arith.constant 0 : index
    %36 = vector.load %arg7[%c0_50, %c0_51] : memref<64x128xf32, #tpu.memory_space<vmem>>, vector<64x128xf32>
    %37 = vector.broadcast %0 : vector<1x128xf32> to vector<64x128xf32>
    %38 = arith.mulf %36, %37 : vector<64x128xf32>
    %39 = arith.addf %35, %38 : vector<64x128xf32>
    %40 = vector.broadcast %1 : vector<1x128xf32> to vector<64x128xf32>
    %41 = arith.addf %39, %40 : vector<64x128xf32>
    %cst_52 = arith.constant 1.000000e+00 : f32
    %42 = vector.broadcast %cst_52 : f32 to vector<64x128xf32>
    %43 = arith.cmpf oge, %41, %42 : vector<64x128xf32>
    %cst_53 = arith.constant 0.000000e+00 : f32
    %44 = vector.broadcast %cst_53 : f32 to vector<64x128xf32>
    %45 = arith.select %43, %44, %41 : vector<64x128xi1>, vector<64x128xf32>
    %c0_54 = arith.constant 0 : index
    %c0_55 = arith.constant 0 : index
    %46 = vector.load %arg8[%c0_54, %c0_55] : memref<64x128xf32, #tpu.memory_space<vmem>>, vector<64x128xf32>
    tpu.vector_store %arg8[%c0_54, %c0_55], %45 {strides = array<i32>} : memref<64x128xf32, #tpu.memory_space<vmem>>, vector<64x128xf32>,
    %cst_56 = arith.constant 1.000000e+00 : f32
    %cst_57 = arith.constant 0.000000e+00 : f32
    %47 = vector.broadcast %cst_56 : f32 to vector<64x128xf32>
    %48 = vector.broadcast %cst_57 : f32 to vector<64x128xf32>
    %49 = arith.select %43, %47, %48 : vector<64x128xi1>, vector<64x128xf32>
    %50 = arith.truncf %49 : vector<64x128xf32> to vector<64x128xbf16>
    %c0_58 = arith.constant 0 : index
    %c0_59 = arith.constant 0 : index
    %c0_60 = arith.constant 0 : index
    %51 = vector.load %arg5[%c0_58, %c0_59, %c0_60] : memref<4x64x128xbf16, #tpu.memory_space<vmem>>, vector<1x64x128xbf16>
    %52 = vector.shape_cast %51 : vector<1x64x128xbf16> to vector<64x128xbf16>
    %53 = vector.shape_cast %50 : vector<64x128xbf16> to vector<1x64x128xbf16>
    tpu.vector_store %arg5[%c0_58, %c0_59, %c0_60], %53 {strides = array<i32>} : memref<4x64x128xbf16, #tpu.memory_space<vmem>>, vector<1x64x128xbf16>,
    %c1_61 = arith.constant 1 : index
    %c0_62 = arith.constant 0 : index
    %c0_63 = arith.constant 0 : index
    %c0_64 = arith.constant 0 : index
    %c0_65 = arith.constant 0 : index
    %54 = vector.load %arg1[%c1_61, %c0_62, %c0_63, %c0_64, %c0_65] : memref<4x1x8x8x128xbf16, #tpu.memory_space<vmem>>, vector<1x1x8x8x128xbf16>
    %55 = vector.shape_cast %54 : vector<1x1x8x8x128xbf16> to vector<1x8x8x128xbf16>
    %c0_66 = arith.constant 0 : index
    %c1_67 = arith.constant 1 : index
    %c8_68 = arith.constant 8 : index
    %c0_69 = arith.constant 0 : index
    %56 = vector.load %arg6[%c0_66, %c1_67, %c8_68, %c0_69] : memref<1x10x17x128xbf16, #tpu.memory_space<vmem>>, vector<1x8x8x128xbf16>
    tpu.vector_store %arg6[%c0_66, %c1_67, %c8_68, %c0_69], %55 {strides = array<i32>} : memref<1x10x17x128xbf16, #tpu.memory_space<vmem>>, vector<1x8x8x128xbf16>,
    %c0_70 = arith.constant 0 : index
    %c0_71 = arith.constant 0 : index
    %c7_72 = arith.constant 7 : index
    %c0_73 = arith.constant 0 : index
    %57 = vector.load %arg6[%c0_70, %c0_71, %c7_72, %c0_73] : memref<1x10x17x128xbf16, #tpu.memory_space<vmem>>, vector<1x10x8x128xbf16>
    %c0_74 = arith.constant 0 : index
    %c0_75 = arith.constant 0 : index
    %c8_76 = arith.constant 8 : index
    %c0_77 = arith.constant 0 : index
    %58 = vector.load %arg6[%c0_74, %c0_75, %c8_76, %c0_77] : memref<1x10x17x128xbf16, #tpu.memory_space<vmem>>, vector<1x10x8x128xbf16>
    %c0_78 = arith.constant 0 : index
    %c0_79 = arith.constant 0 : index
    %c9_80 = arith.constant 9 : index
    %c0_81 = arith.constant 0 : index
    %59 = vector.load %arg6[%c0_78, %c0_79, %c9_80, %c0_81] : memref<1x10x17x128xbf16, #tpu.memory_space<vmem>>, vector<1x10x8x128xbf16>
    %60 = tpu.concatenate %57, %58, %59 in 3 : vector<1x10x8x128xbf16>, vector<1x10x8x128xbf16>, vector<1x10x8x128xbf16> -> vector<1x10x8x384xbf16>
    %61 = vector.extract_strided_slice %60 {offsets = [0, 0, 0, 0], sizes = [1, 8, 8, 384], strides = [1, 1, 1, 1]} : vector<1x10x8x384xbf16> to vector<1x8x8x384xbf16>
    %62 = vector.shape_cast %61 : vector<1x8x8x384xbf16> to vector<64x384xbf16>
    %c0_82 = arith.constant 0 : index
    %c0_83 = arith.constant 0 : index
    %c0_84 = arith.constant 0 : index
    %63 = vector.load %arg2[%c0_82, %c0_83, %c0_84] : memref<3x384x128xbf16, #tpu.memory_space<vmem>>, vector<1x384x128xbf16>
    %64 = vector.shape_cast %63 : vector<1x384x128xbf16> to vector<384x128xbf16>
    %cst_85 = arith.constant dense<0.000000e+00> : vector<64x128xf32>
    %65 = tpu.matmul %62, %64, %cst_85 {dimension_numbers = #tpu.dot_dimension_numbers<[1], [0], [0], [1], [0, 0, 1, 1], [], []>} : vector<64x384xbf16>, vector<384x128xbf16>, vector<64x128xf32> -> vector<64x128xf32>
    %c0_86 = arith.constant 0 : index
    %c0_87 = arith.constant 0 : index
    %66 = vector.load %arg7[%c0_86, %c0_87] : memref<64x128xf32, #tpu.memory_space<vmem>>, vector<64x128xf32>
    tpu.vector_store %arg7[%c0_86, %c0_87], %65 {strides = array<i32>} : memref<64x128xf32, #tpu.memory_space<vmem>>, vector<64x128xf32>,
    %c0_88 = arith.constant 0 : index
    %c0_89 = arith.constant 0 : index
    %67 = vector.load %arg7[%c0_88, %c0_89] : memref<64x128xf32, #tpu.memory_space<vmem>>, vector<64x128xf32>
    %68 = vector.extract_strided_slice %60 {offsets = [0, 1, 0, 0], sizes = [1, 8, 8, 384], strides = [1, 1, 1, 1]} : vector<1x10x8x384xbf16> to vector<1x8x8x384xbf16>
    %69 = vector.shape_cast %68 : vector<1x8x8x384xbf16> to vector<64x384xbf16>
    %c1_90 = arith.constant 1 : index
    %c0_91 = arith.constant 0 : index
    %c0_92 = arith.constant 0 : index
    %70 = vector.load %arg2[%c1_90, %c0_91, %c0_92] : memref<3x384x128xbf16, #tpu.memory_space<vmem>>, vector<1x384x128xbf16>
    %71 = vector.shape_cast %70 : vector<1x384x128xbf16> to vector<384x128xbf16>
    %cst_93 = arith.constant dense<0.000000e+00> : vector<64x128xf32>
    %72 = tpu.matmul %69, %71, %cst_93 {dimension_numbers = #tpu.dot_dimension_numbers<[1], [0], [0], [1], [0, 0, 1, 1], [], []>} : vector<64x384xbf16>, vector<384x128xbf16>, vector<64x128xf32> -> vector<64x128xf32>
    %73 = arith.addf %67, %72 : vector<64x128xf32>
    %c0_94 = arith.constant 0 : index
    %c0_95 = arith.constant 0 : index
    %74 = vector.load %arg7[%c0_94, %c0_95] : memref<64x128xf32, #tpu.memory_space<vmem>>, vector<64x128xf32>
    tpu.vector_store %arg7[%c0_94, %c0_95], %73 {strides = array<i32>} : memref<64x128xf32, #tpu.memory_space<vmem>>, vector<64x128xf32>,
    %c0_96 = arith.constant 0 : index
    %c0_97 = arith.constant 0 : index
    %75 = vector.load %arg7[%c0_96, %c0_97] : memref<64x128xf32, #tpu.memory_space<vmem>>, vector<64x128xf32>
    %76 = vector.extract_strided_slice %60 {offsets = [0, 2, 0, 0], sizes = [1, 8, 8, 384], strides = [1, 1, 1, 1]} : vector<1x10x8x384xbf16> to vector<1x8x8x384xbf16>
    %77 = vector.shape_cast %76 : vector<1x8x8x384xbf16> to vector<64x384xbf16>
    %c2_98 = arith.constant 2 : index
    %c0_99 = arith.constant 0 : index
    %c0_100 = arith.constant 0 : index
    %78 = vector.load %arg2[%c2_98, %c0_99, %c0_100] : memref<3x384x128xbf16, #tpu.memory_space<vmem>>, vector<1x384x128xbf16>
    %79 = vector.shape_cast %78 : vector<1x384x128xbf16> to vector<384x128xbf16>
    %cst_101 = arith.constant dense<0.000000e+00> : vector<64x128xf32>
    %80 = tpu.matmul %77, %79, %cst_101 {dimension_numbers = #tpu.dot_dimension_numbers<[1], [0], [0], [1], [0, 0, 1, 1], [], []>} : vector<64x384xbf16>, vector<384x128xbf16>, vector<64x128xf32> -> vector<64x128xf32>
    %81 = arith.addf %75, %80 : vector<64x128xf32>
    %c0_102 = arith.constant 0 : index
    %c0_103 = arith.constant 0 : index
    %82 = vector.load %arg7[%c0_102, %c0_103] : memref<64x128xf32, #tpu.memory_space<vmem>>, vector<64x128xf32>
    tpu.vector_store %arg7[%c0_102, %c0_103], %81 {strides = array<i32>} : memref<64x128xf32, #tpu.memory_space<vmem>>, vector<64x128xf32>,
    %c0_104 = arith.constant 0 : index
    %c0_105 = arith.constant 0 : index
    %83 = vector.load %arg8[%c0_104, %c0_105] : memref<64x128xf32, #tpu.memory_space<vmem>>, vector<64x128xf32>
    %c0_106 = arith.constant 0 : index
    %c0_107 = arith.constant 0 : index
    %84 = vector.load %arg7[%c0_106, %c0_107] : memref<64x128xf32, #tpu.memory_space<vmem>>, vector<64x128xf32>
    %85 = vector.broadcast %0 : vector<1x128xf32> to vector<64x128xf32>
    %86 = arith.mulf %84, %85 : vector<64x128xf32>
    %87 = arith.addf %83, %86 : vector<64x128xf32>
    %88 = vector.broadcast %1 : vector<1x128xf32> to vector<64x128xf32>
    %89 = arith.addf %87, %88 : vector<64x128xf32>
    %cst_108 = arith.constant 1.000000e+00 : f32
    %90 = vector.broadcast %cst_108 : f32 to vector<64x128xf32>
    %91 = arith.cmpf oge, %89, %90 : vector<64x128xf32>
    %cst_109 = arith.constant 0.000000e+00 : f32
    %92 = vector.broadcast %cst_109 : f32 to vector<64x128xf32>
    %93 = arith.select %91, %92, %89 : vector<64x128xi1>, vector<64x128xf32>
    %c0_110 = arith.constant 0 : index
    %c0_111 = arith.constant 0 : index
    %94 = vector.load %arg8[%c0_110, %c0_111] : memref<64x128xf32, #tpu.memory_space<vmem>>, vector<64x128xf32>
    tpu.vector_store %arg8[%c0_110, %c0_111], %93 {strides = array<i32>} : memref<64x128xf32, #tpu.memory_space<vmem>>, vector<64x128xf32>,
    %cst_112 = arith.constant 1.000000e+00 : f32
    %cst_113 = arith.constant 0.000000e+00 : f32
    %95 = vector.broadcast %cst_112 : f32 to vector<64x128xf32>
    %96 = vector.broadcast %cst_113 : f32 to vector<64x128xf32>
    %97 = arith.select %91, %95, %96 : vector<64x128xi1>, vector<64x128xf32>
    %98 = arith.truncf %97 : vector<64x128xf32> to vector<64x128xbf16>
    %c1_114 = arith.constant 1 : index
    %c0_115 = arith.constant 0 : index
    %c0_116 = arith.constant 0 : index
    %99 = vector.load %arg5[%c1_114, %c0_115, %c0_116] : memref<4x64x128xbf16, #tpu.memory_space<vmem>>, vector<1x64x128xbf16>
    %100 = vector.shape_cast %99 : vector<1x64x128xbf16> to vector<64x128xbf16>
    %101 = vector.shape_cast %98 : vector<64x128xbf16> to vector<1x64x128xbf16>
    tpu.vector_store %arg5[%c1_114, %c0_115, %c0_116], %101 {strides = array<i32>} : memref<4x64x128xbf16, #tpu.memory_space<vmem>>, vector<1x64x128xbf16>,
    %c2_117 = arith.constant 2 : index
    %c0_118 = arith.constant 0 : index
    %c0_119 = arith.constant 0 : index
    %c0_120 = arith.constant 0 : index
    %c0_121 = arith.constant 0 : index
    %102 = vector.load %arg1[%c2_117, %c0_118, %c0_119, %c0_120, %c0_121] : memref<4x1x8x8x128xbf16, #tpu.memory_space<vmem>>, vector<1x1x8x8x128xbf16>
    %103 = vector.shape_cast %102 : vector<1x1x8x8x128xbf16> to vector<1x8x8x128xbf16>
    %c0_122 = arith.constant 0 : index
    %c1_123 = arith.constant 1 : index
    %c8_124 = arith.constant 8 : index
    %c0_125 = arith.constant 0 : index
    %104 = vector.load %arg6[%c0_122, %c1_123, %c8_124, %c0_125] : memref<1x10x17x128xbf16, #tpu.memory_space<vmem>>, vector<1x8x8x128xbf16>
    tpu.vector_store %arg6[%c0_122, %c1_123, %c8_124, %c0_125], %103 {strides = array<i32>} : memref<1x10x17x128xbf16, #tpu.memory_space<vmem>>, vector<1x8x8x128xbf16>,
    %c0_126 = arith.constant 0 : index
    %c0_127 = arith.constant 0 : index
    %c7_128 = arith.constant 7 : index
    %c0_129 = arith.constant 0 : index
    %105 = vector.load %arg6[%c0_126, %c0_127, %c7_128, %c0_129] : memref<1x10x17x128xbf16, #tpu.memory_space<vmem>>, vector<1x10x8x128xbf16>
    %c0_130 = arith.constant 0 : index
    %c0_131 = arith.constant 0 : index
    %c8_132 = arith.constant 8 : index
    %c0_133 = arith.constant 0 : index
    %106 = vector.load %arg6[%c0_130, %c0_131, %c8_132, %c0_133] : memref<1x10x17x128xbf16, #tpu.memory_space<vmem>>, vector<1x10x8x128xbf16>
    %c0_134 = arith.constant 0 : index
    %c0_135 = arith.constant 0 : index
    %c9_136 = arith.constant 9 : index
    %c0_137 = arith.constant 0 : index
    %107 = vector.load %arg6[%c0_134, %c0_135, %c9_136, %c0_137] : memref<1x10x17x128xbf16, #tpu.memory_space<vmem>>, vector<1x10x8x128xbf16>
    %108 = tpu.concatenate %105, %106, %107 in 3 : vector<1x10x8x128xbf16>, vector<1x10x8x128xbf16>, vector<1x10x8x128xbf16> -> vector<1x10x8x384xbf16>
    %109 = vector.extract_strided_slice %108 {offsets = [0, 0, 0, 0], sizes = [1, 8, 8, 384], strides = [1, 1, 1, 1]} : vector<1x10x8x384xbf16> to vector<1x8x8x384xbf16>
    %110 = vector.shape_cast %109 : vector<1x8x8x384xbf16> to vector<64x384xbf16>
    %c0_138 = arith.constant 0 : index
    %c0_139 = arith.constant 0 : index
    %c0_140 = arith.constant 0 : index
    %111 = vector.load %arg2[%c0_138, %c0_139, %c0_140] : memref<3x384x128xbf16, #tpu.memory_space<vmem>>, vector<1x384x128xbf16>
    %112 = vector.shape_cast %111 : vector<1x384x128xbf16> to vector<384x128xbf16>
    %cst_141 = arith.constant dense<0.000000e+00> : vector<64x128xf32>
    %113 = tpu.matmul %110, %112, %cst_141 {dimension_numbers = #tpu.dot_dimension_numbers<[1], [0], [0], [1], [0, 0, 1, 1], [], []>} : vector<64x384xbf16>, vector<384x128xbf16>, vector<64x128xf32> -> vector<64x128xf32>
    %c0_142 = arith.constant 0 : index
    %c0_143 = arith.constant 0 : index
    %114 = vector.load %arg7[%c0_142, %c0_143] : memref<64x128xf32, #tpu.memory_space<vmem>>, vector<64x128xf32>
    tpu.vector_store %arg7[%c0_142, %c0_143], %113 {strides = array<i32>} : memref<64x128xf32, #tpu.memory_space<vmem>>, vector<64x128xf32>,
    %c0_144 = arith.constant 0 : index
    %c0_145 = arith.constant 0 : index
    %115 = vector.load %arg7[%c0_144, %c0_145] : memref<64x128xf32, #tpu.memory_space<vmem>>, vector<64x128xf32>
    %116 = vector.extract_strided_slice %108 {offsets = [0, 1, 0, 0], sizes = [1, 8, 8, 384], strides = [1, 1, 1, 1]} : vector<1x10x8x384xbf16> to vector<1x8x8x384xbf16>
    %117 = vector.shape_cast %116 : vector<1x8x8x384xbf16> to vector<64x384xbf16>
    %c1_146 = arith.constant 1 : index
    %c0_147 = arith.constant 0 : index
    %c0_148 = arith.constant 0 : index
    %118 = vector.load %arg2[%c1_146, %c0_147, %c0_148] : memref<3x384x128xbf16, #tpu.memory_space<vmem>>, vector<1x384x128xbf16>
    %119 = vector.shape_cast %118 : vector<1x384x128xbf16> to vector<384x128xbf16>
    %cst_149 = arith.constant dense<0.000000e+00> : vector<64x128xf32>
    %120 = tpu.matmul %117, %119, %cst_149 {dimension_numbers = #tpu.dot_dimension_numbers<[1], [0], [0], [1], [0, 0, 1, 1], [], []>} : vector<64x384xbf16>, vector<384x128xbf16>, vector<64x128xf32> -> vector<64x128xf32>
    %121 = arith.addf %115, %120 : vector<64x128xf32>
    %c0_150 = arith.constant 0 : index
    %c0_151 = arith.constant 0 : index
    %122 = vector.load %arg7[%c0_150, %c0_151] : memref<64x128xf32, #tpu.memory_space<vmem>>, vector<64x128xf32>
    tpu.vector_store %arg7[%c0_150, %c0_151], %121 {strides = array<i32>} : memref<64x128xf32, #tpu.memory_space<vmem>>, vector<64x128xf32>,
    %c0_152 = arith.constant 0 : index
    %c0_153 = arith.constant 0 : index
    %123 = vector.load %arg7[%c0_152, %c0_153] : memref<64x128xf32, #tpu.memory_space<vmem>>, vector<64x128xf32>
    %124 = vector.extract_strided_slice %108 {offsets = [0, 2, 0, 0], sizes = [1, 8, 8, 384], strides = [1, 1, 1, 1]} : vector<1x10x8x384xbf16> to vector<1x8x8x384xbf16>
    %125 = vector.shape_cast %124 : vector<1x8x8x384xbf16> to vector<64x384xbf16>
    %c2_154 = arith.constant 2 : index
    %c0_155 = arith.constant 0 : index
    %c0_156 = arith.constant 0 : index
    %126 = vector.load %arg2[%c2_154, %c0_155, %c0_156] : memref<3x384x128xbf16, #tpu.memory_space<vmem>>, vector<1x384x128xbf16>
    %127 = vector.shape_cast %126 : vector<1x384x128xbf16> to vector<384x128xbf16>
    %cst_157 = arith.constant dense<0.000000e+00> : vector<64x128xf32>
    %128 = tpu.matmul %125, %127, %cst_157 {dimension_numbers = #tpu.dot_dimension_numbers<[1], [0], [0], [1], [0, 0, 1, 1], [], []>} : vector<64x384xbf16>, vector<384x128xbf16>, vector<64x128xf32> -> vector<64x128xf32>
    %129 = arith.addf %123, %128 : vector<64x128xf32>
    %c0_158 = arith.constant 0 : index
    %c0_159 = arith.constant 0 : index
    %130 = vector.load %arg7[%c0_158, %c0_159] : memref<64x128xf32, #tpu.memory_space<vmem>>, vector<64x128xf32>
    tpu.vector_store %arg7[%c0_158, %c0_159], %129 {strides = array<i32>} : memref<64x128xf32, #tpu.memory_space<vmem>>, vector<64x128xf32>,
    %c0_160 = arith.constant 0 : index
    %c0_161 = arith.constant 0 : index
    %131 = vector.load %arg8[%c0_160, %c0_161] : memref<64x128xf32, #tpu.memory_space<vmem>>, vector<64x128xf32>
    %c0_162 = arith.constant 0 : index
    %c0_163 = arith.constant 0 : index
    %132 = vector.load %arg7[%c0_162, %c0_163] : memref<64x128xf32, #tpu.memory_space<vmem>>, vector<64x128xf32>
    %133 = vector.broadcast %0 : vector<1x128xf32> to vector<64x128xf32>
    %134 = arith.mulf %132, %133 : vector<64x128xf32>
    %135 = arith.addf %131, %134 : vector<64x128xf32>
    %136 = vector.broadcast %1 : vector<1x128xf32> to vector<64x128xf32>
    %137 = arith.addf %135, %136 : vector<64x128xf32>
    %cst_164 = arith.constant 1.000000e+00 : f32
    %138 = vector.broadcast %cst_164 : f32 to vector<64x128xf32>
    %139 = arith.cmpf oge, %137, %138 : vector<64x128xf32>
    %cst_165 = arith.constant 0.000000e+00 : f32
    %140 = vector.broadcast %cst_165 : f32 to vector<64x128xf32>
    %141 = arith.select %139, %140, %137 : vector<64x128xi1>, vector<64x128xf32>
    %c0_166 = arith.constant 0 : index
    %c0_167 = arith.constant 0 : index
    %142 = vector.load %arg8[%c0_166, %c0_167] : memref<64x128xf32, #tpu.memory_space<vmem>>, vector<64x128xf32>
    tpu.vector_store %arg8[%c0_166, %c0_167], %141 {strides = array<i32>} : memref<64x128xf32, #tpu.memory_space<vmem>>, vector<64x128xf32>,
    %cst_168 = arith.constant 1.000000e+00 : f32
    %cst_169 = arith.constant 0.000000e+00 : f32
    %143 = vector.broadcast %cst_168 : f32 to vector<64x128xf32>
    %144 = vector.broadcast %cst_169 : f32 to vector<64x128xf32>
    %145 = arith.select %139, %143, %144 : vector<64x128xi1>, vector<64x128xf32>
    %146 = arith.truncf %145 : vector<64x128xf32> to vector<64x128xbf16>
    %c2_170 = arith.constant 2 : index
    %c0_171 = arith.constant 0 : index
    %c0_172 = arith.constant 0 : index
    %147 = vector.load %arg5[%c2_170, %c0_171, %c0_172] : memref<4x64x128xbf16, #tpu.memory_space<vmem>>, vector<1x64x128xbf16>
    %148 = vector.shape_cast %147 : vector<1x64x128xbf16> to vector<64x128xbf16>
    %149 = vector.shape_cast %146 : vector<64x128xbf16> to vector<1x64x128xbf16>
    tpu.vector_store %arg5[%c2_170, %c0_171, %c0_172], %149 {strides = array<i32>} : memref<4x64x128xbf16, #tpu.memory_space<vmem>>, vector<1x64x128xbf16>,
    %c3 = arith.constant 3 : index
    %c0_173 = arith.constant 0 : index
    %c0_174 = arith.constant 0 : index
    %c0_175 = arith.constant 0 : index
    %c0_176 = arith.constant 0 : index
    %150 = vector.load %arg1[%c3, %c0_173, %c0_174, %c0_175, %c0_176] : memref<4x1x8x8x128xbf16, #tpu.memory_space<vmem>>, vector<1x1x8x8x128xbf16>
    %151 = vector.shape_cast %150 : vector<1x1x8x8x128xbf16> to vector<1x8x8x128xbf16>
    %c0_177 = arith.constant 0 : index
    %c1_178 = arith.constant 1 : index
    %c8_179 = arith.constant 8 : index
    %c0_180 = arith.constant 0 : index
    %152 = vector.load %arg6[%c0_177, %c1_178, %c8_179, %c0_180] : memref<1x10x17x128xbf16, #tpu.memory_space<vmem>>, vector<1x8x8x128xbf16>
    tpu.vector_store %arg6[%c0_177, %c1_178, %c8_179, %c0_180], %151 {strides = array<i32>} : memref<1x10x17x128xbf16, #tpu.memory_space<vmem>>, vector<1x8x8x128xbf16>,
    %c0_181 = arith.constant 0 : index
    %c0_182 = arith.constant 0 : index
    %c7_183 = arith.constant 7 : index
    %c0_184 = arith.constant 0 : index
    %153 = vector.load %arg6[%c0_181, %c0_182, %c7_183, %c0_184] : memref<1x10x17x128xbf16, #tpu.memory_space<vmem>>, vector<1x10x8x128xbf16>
    %c0_185 = arith.constant 0 : index
    %c0_186 = arith.constant 0 : index
    %c8_187 = arith.constant 8 : index
    %c0_188 = arith.constant 0 : index
    %154 = vector.load %arg6[%c0_185, %c0_186, %c8_187, %c0_188] : memref<1x10x17x128xbf16, #tpu.memory_space<vmem>>, vector<1x10x8x128xbf16>
    %c0_189 = arith.constant 0 : index
    %c0_190 = arith.constant 0 : index
    %c9_191 = arith.constant 9 : index
    %c0_192 = arith.constant 0 : index
    %155 = vector.load %arg6[%c0_189, %c0_190, %c9_191, %c0_192] : memref<1x10x17x128xbf16, #tpu.memory_space<vmem>>, vector<1x10x8x128xbf16>
    %156 = tpu.concatenate %153, %154, %155 in 3 : vector<1x10x8x128xbf16>, vector<1x10x8x128xbf16>, vector<1x10x8x128xbf16> -> vector<1x10x8x384xbf16>
    %157 = vector.extract_strided_slice %156 {offsets = [0, 0, 0, 0], sizes = [1, 8, 8, 384], strides = [1, 1, 1, 1]} : vector<1x10x8x384xbf16> to vector<1x8x8x384xbf16>
    %158 = vector.shape_cast %157 : vector<1x8x8x384xbf16> to vector<64x384xbf16>
    %c0_193 = arith.constant 0 : index
    %c0_194 = arith.constant 0 : index
    %c0_195 = arith.constant 0 : index
    %159 = vector.load %arg2[%c0_193, %c0_194, %c0_195] : memref<3x384x128xbf16, #tpu.memory_space<vmem>>, vector<1x384x128xbf16>
    %160 = vector.shape_cast %159 : vector<1x384x128xbf16> to vector<384x128xbf16>
    %cst_196 = arith.constant dense<0.000000e+00> : vector<64x128xf32>
    %161 = tpu.matmul %158, %160, %cst_196 {dimension_numbers = #tpu.dot_dimension_numbers<[1], [0], [0], [1], [0, 0, 1, 1], [], []>} : vector<64x384xbf16>, vector<384x128xbf16>, vector<64x128xf32> -> vector<64x128xf32>
    %c0_197 = arith.constant 0 : index
    %c0_198 = arith.constant 0 : index
    %162 = vector.load %arg7[%c0_197, %c0_198] : memref<64x128xf32, #tpu.memory_space<vmem>>, vector<64x128xf32>
    tpu.vector_store %arg7[%c0_197, %c0_198], %161 {strides = array<i32>} : memref<64x128xf32, #tpu.memory_space<vmem>>, vector<64x128xf32>,
    %c0_199 = arith.constant 0 : index
    %c0_200 = arith.constant 0 : index
    %163 = vector.load %arg7[%c0_199, %c0_200] : memref<64x128xf32, #tpu.memory_space<vmem>>, vector<64x128xf32>
    %164 = vector.extract_strided_slice %156 {offsets = [0, 1, 0, 0], sizes = [1, 8, 8, 384], strides = [1, 1, 1, 1]} : vector<1x10x8x384xbf16> to vector<1x8x8x384xbf16>
    %165 = vector.shape_cast %164 : vector<1x8x8x384xbf16> to vector<64x384xbf16>
    %c1_201 = arith.constant 1 : index
    %c0_202 = arith.constant 0 : index
    %c0_203 = arith.constant 0 : index
    %166 = vector.load %arg2[%c1_201, %c0_202, %c0_203] : memref<3x384x128xbf16, #tpu.memory_space<vmem>>, vector<1x384x128xbf16>
    %167 = vector.shape_cast %166 : vector<1x384x128xbf16> to vector<384x128xbf16>
    %cst_204 = arith.constant dense<0.000000e+00> : vector<64x128xf32>
    %168 = tpu.matmul %165, %167, %cst_204 {dimension_numbers = #tpu.dot_dimension_numbers<[1], [0], [0], [1], [0, 0, 1, 1], [], []>} : vector<64x384xbf16>, vector<384x128xbf16>, vector<64x128xf32> -> vector<64x128xf32>
    %169 = arith.addf %163, %168 : vector<64x128xf32>
    %c0_205 = arith.constant 0 : index
    %c0_206 = arith.constant 0 : index
    %170 = vector.load %arg7[%c0_205, %c0_206] : memref<64x128xf32, #tpu.memory_space<vmem>>, vector<64x128xf32>
    tpu.vector_store %arg7[%c0_205, %c0_206], %169 {strides = array<i32>} : memref<64x128xf32, #tpu.memory_space<vmem>>, vector<64x128xf32>,
    %c0_207 = arith.constant 0 : index
    %c0_208 = arith.constant 0 : index
    %171 = vector.load %arg7[%c0_207, %c0_208] : memref<64x128xf32, #tpu.memory_space<vmem>>, vector<64x128xf32>
    %172 = vector.extract_strided_slice %156 {offsets = [0, 2, 0, 0], sizes = [1, 8, 8, 384], strides = [1, 1, 1, 1]} : vector<1x10x8x384xbf16> to vector<1x8x8x384xbf16>
    %173 = vector.shape_cast %172 : vector<1x8x8x384xbf16> to vector<64x384xbf16>
    %c2_209 = arith.constant 2 : index
    %c0_210 = arith.constant 0 : index
    %c0_211 = arith.constant 0 : index
    %174 = vector.load %arg2[%c2_209, %c0_210, %c0_211] : memref<3x384x128xbf16, #tpu.memory_space<vmem>>, vector<1x384x128xbf16>
    %175 = vector.shape_cast %174 : vector<1x384x128xbf16> to vector<384x128xbf16>
    %cst_212 = arith.constant dense<0.000000e+00> : vector<64x128xf32>
    %176 = tpu.matmul %173, %175, %cst_212 {dimension_numbers = #tpu.dot_dimension_numbers<[1], [0], [0], [1], [0, 0, 1, 1], [], []>} : vector<64x384xbf16>, vector<384x128xbf16>, vector<64x128xf32> -> vector<64x128xf32>
    %177 = arith.addf %171, %176 : vector<64x128xf32>
    %c0_213 = arith.constant 0 : index
    %c0_214 = arith.constant 0 : index
    %178 = vector.load %arg7[%c0_213, %c0_214] : memref<64x128xf32, #tpu.memory_space<vmem>>, vector<64x128xf32>
    tpu.vector_store %arg7[%c0_213, %c0_214], %177 {strides = array<i32>} : memref<64x128xf32, #tpu.memory_space<vmem>>, vector<64x128xf32>,
    %c0_215 = arith.constant 0 : index
    %c0_216 = arith.constant 0 : index
    %179 = vector.load %arg8[%c0_215, %c0_216] : memref<64x128xf32, #tpu.memory_space<vmem>>, vector<64x128xf32>
    %c0_217 = arith.constant 0 : index
    %c0_218 = arith.constant 0 : index
    %180 = vector.load %arg7[%c0_217, %c0_218] : memref<64x128xf32, #tpu.memory_space<vmem>>, vector<64x128xf32>
    %181 = vector.broadcast %0 : vector<1x128xf32> to vector<64x128xf32>
    %182 = arith.mulf %180, %181 : vector<64x128xf32>
    %183 = arith.addf %179, %182 : vector<64x128xf32>
    %184 = vector.broadcast %1 : vector<1x128xf32> to vector<64x128xf32>
    %185 = arith.addf %183, %184 : vector<64x128xf32>
    %cst_219 = arith.constant 1.000000e+00 : f32
    %186 = vector.broadcast %cst_219 : f32 to vector<64x128xf32>
    %187 = arith.cmpf oge, %185, %186 : vector<64x128xf32>
    %cst_220 = arith.constant 0.000000e+00 : f32
    %188 = vector.broadcast %cst_220 : f32 to vector<64x128xf32>
    %189 = arith.select %187, %188, %185 : vector<64x128xi1>, vector<64x128xf32>
    %c0_221 = arith.constant 0 : index
    %c0_222 = arith.constant 0 : index
    %190 = vector.load %arg8[%c0_221, %c0_222] : memref<64x128xf32, #tpu.memory_space<vmem>>, vector<64x128xf32>
    tpu.vector_store %arg8[%c0_221, %c0_222], %189 {strides = array<i32>} : memref<64x128xf32, #tpu.memory_space<vmem>>, vector<64x128xf32>,
    %cst_223 = arith.constant 1.000000e+00 : f32
    %cst_224 = arith.constant 0.000000e+00 : f32
    %191 = vector.broadcast %cst_223 : f32 to vector<64x128xf32>
    %192 = vector.broadcast %cst_224 : f32 to vector<64x128xf32>
    %193 = arith.select %187, %191, %192 : vector<64x128xi1>, vector<64x128xf32>
    %194 = arith.truncf %193 : vector<64x128xf32> to vector<64x128xbf16>
    %c3_225 = arith.constant 3 : index
    %c0_226 = arith.constant 0 : index
    %c0_227 = arith.constant 0 : index
    %195 = vector.load %arg5[%c3_225, %c0_226, %c0_227] : memref<4x64x128xbf16, #tpu.memory_space<vmem>>, vector<1x64x128xbf16>
    %196 = vector.shape_cast %195 : vector<1x64x128xbf16> to vector<64x128xbf16>
    %197 = vector.shape_cast %194 : vector<64x128xbf16> to vector<1x64x128xbf16>
    tpu.vector_store %arg5[%c3_225, %c0_226, %c0_227], %197 {strides = array<i32>} : memref<4x64x128xbf16, #tpu.memory_space<vmem>>, vector<1x64x128xbf16>,
    return
  }
  func.func @transform_0(%arg0: i32) -> (i32, i32, i32, i32, i32) {
    %c0_i32 = arith.constant 0 : i32
    %c0_i32_0 = arith.constant 0 : i32
    %c0_i32_1 = arith.constant 0 : i32
    %c0_i32_2 = arith.constant 0 : i32
    %c0_i32_3 = arith.constant 0 : i32
    return %c0_i32, %arg0, %c0_i32_0, %c0_i32_1, %c0_i32_2 : i32, i32, i32, i32, i32
  }
  func.func @transform_1(%arg0: i32) -> (i32, i32, i32) {
    %c0_i32 = arith.constant 0 : i32
    %c0_i32_0 = arith.constant 0 : i32
    %c0_i32_1 = arith.constant 0 : i32
    %c0_i32_2 = arith.constant 0 : i32
    return %c0_i32, %c0_i32_0, %c0_i32_1 : i32, i32, i32
  }
  func.func @transform_2(%arg0: i32) -> (i32, i32) {
    %c0_i32 = arith.constant 0 : i32
    %c0_i32_0 = arith.constant 0 : i32
    %c0_i32_1 = arith.constant 0 : i32
    return %c0_i32, %c0_i32_0 : i32, i32
  }
  func.func @transform_3(%arg0: i32) -> (i32, i32) {
    %c0_i32 = arith.constant 0 : i32
    %c0_i32_0 = arith.constant 0 : i32
    %c0_i32_1 = arith.constant 0 : i32
    return %c0_i32, %c0_i32_0 : i32, i32
  }
  func.func @transform_4(%arg0: i32) -> (i32, i32, i32) {
    %c0_i32 = arith.constant 0 : i32
    %c0_i32_0 = arith.constant 0 : i32
    %c0_i32_1 = arith.constant 0 : i32
    return %c0_i32, %arg0, %c0_i32_0 : i32, i32, i32
  }
}

</mosaic_0001>

<bundles_post_ra>
// kernel: bottleneck_forward.3
= control target key start
LH: loop header
LB: loop body
LE: loop exit
PB: predicated region body
PF: predicated region fallthrough
CT: control target
= control target key end

     0   :  { %s2187_s15 = smov 0   ;;  %s2189_s16 = smov 0   ;;  %s2589_s0 = inlined_call_operand.vmem [shape: bf16[4,128,128], index: 0, kind: input, shape index: {}]   ;;  %s2590_s1 = inlined_call_operand.vmem [shape: bf16[128,128], index: 1, kind: input, shape index: {}]   ;;  %s2591_s2 = inlined_call_operand.vmem [shape: f32[1,128], index: 2, kind: input, shape index: {}]   ;;  %s2592_s3 = inlined_call_operand.vmem [shape: f32[1,128], index: 3, kind: input, shape index: {}]   ;;  %s2593_s4 = inlined_call_operand.vmem [shape: bf16[4,128,128], index: 4, kind: output, shape index: {}]  }
   0x1   :  { %s2191_s17 = smov 0  }
   0x2 LB: > { %s1678_s18 = sadd.s32 4294967295, %s2159_s17   ;;  %s2204_s19 = sadd.s32 1, %s2159_s17   ;;  %s2159_s17 = sphi %s2191_s17, %s2597_s17   ;;  %s2155_s16 = sphi %s2189_s16, %s2596_s16   ;;  %s2151_s15 = sphi %s2187_s15, %s2595_s15  }
   0x3   : > { %s18_s20 = ssub.s32 %s2159_s17, %s2204_s19  ;;  %s21_s21 = sadd.s32 1, %s2155_s16 }
   0x4   : > { %p19_p0 = scmp.eq.s32.totalorder %s18_s20, 0  ;;  %p28_p1 = scmp.ne.s32.totalorder %s2155_s16, %s2151_s15 }
   0x5   : > { %p29_p2 = scmp.eq.s32.totalorder %s2159_s17, 0  ;;  %p121_p3 = scmp.eq.s32.totalorder %s1678_s18, 1 }
   0x6   : > { %s2215_s22 = scalar_select %p19_p0, %s2155_s16, %s21_s21  }
   0x7   : > { %p30_p4 = por %p29_p2, %p28_p1  ;;  %p2217_p5 = por %p121_p3, %p28_p1 }
   0x8   : > { %p1681_p6 = scmp.ge.s32.totalorder %s2159_s17, 2 }
   0xa   : > { %152 = sbr.rel (%p1681_p6) target bundleno = 29 (0x1d), region = 28 }
  0x11   : > { %155 = sbr.rel (!%p30_p4) target bundleno = 29 (0x1d), region = 32  ;;  %s157_s24 = sand.u32 (%p30_p4), 1, %s2155_s16  }
  0x12   : > { %s1823_s25 = sshll.u32 (%p30_p4), %s2159_s17, 5  ;;  %s1682_s26 = sshll.u32 (%p30_p4), %s157_s24, 7 }
  0x13   : > { %s2227_s29 = scalar_lea.vmem (%p30_p4), %s2589_s0, %s1823_s25  ;;  %s159_s30 = scalar_lea.vmem (%p30_p4), [#allocation3], %s1682_s26 }
  0x14   : > { %v178_v0 = vld [vmem:[%s2227_s29] sm:$0xff] (%p30_p4)   ;;  %v182_v1 = vld [vmem:[%s2227_s29 + $0x8] sm:$0xff] (%p30_p4)   ;;  %v186_v2 = vld [vmem:[%s2227_s29 + $0x10] sm:$0xff] (%p30_p4)  }
  0x15   : > { %179 = vst [vmem:[%s159_s30] sm:$0xff] (%p30_p4), %v178_v0   ;;  %183 = vst [vmem:[%s159_s30 + $0x8] sm:$0xff] (%p30_p4), %v182_v1   ;;  %v190_v3 = vld [vmem:[%s2227_s29 + $0x18] sm:$0xff] (%p30_p4)   ;;  %v194_v4 = vld [vmem:[%s2227_s29 + $0x40] sm:$0xff] (%p30_p4)  }
  0x16   : > { %187 = vst [vmem:[%s159_s30 + $0x10] sm:$0xff] (%p30_p4), %v186_v2   ;;  %v198_v5 = vld [vmem:[%s2227_s29 + $0x48] sm:$0xff] (%p30_p4)   ;;  %191 = vst [vmem:[%s159_s30 + $0x18] sm:$0xff] (%p30_p4), %v190_v3   ;;  %v202_v6 = vld [vmem:[%s2227_s29 + $0x50] sm:$0xff] (%p30_p4)  }
  0x17   : > { %195 = vst [vmem:[%s159_s30 + $0x20] sm:$0xff] (%p30_p4), %v194_v4   ;;  %199 = vst [vmem:[%s159_s30 + $0x28] sm:$0xff] (%p30_p4), %v198_v5   ;;  %v206_v7 = vld [vmem:[%s2227_s29 + $0x58] sm:$0xff] (%p30_p4)   ;;  %v210_v8 = vld [vmem:[%s2227_s29 + $0x80] sm:$0xff] (%p30_p4)  }
  0x18   : > { %203 = vst [vmem:[%s159_s30 + $0x30] sm:$0xff] %v202_v6   ;;  %207 = vst [vmem:[%s159_s30 + $0x38] sm:$0xff] %v206_v7   ;;  %v214_v9 = vld [vmem:[%s2227_s29 + $0x88] sm:$0xff]   ;;  %v218_v10 = vld [vmem:[%s2227_s29 + $0x90] sm:$0xff]  }
  0x19   : > { %211 = vst [vmem:[%s159_s30 + $0x40] sm:$0xff] %v210_v8   ;;  %v222_v11 = vld [vmem:[%s2227_s29 + $0x98] sm:$0xff]   ;;  %215 = vst [vmem:[%s159_s30 + $0x48] sm:$0xff] %v214_v9   ;;  %v226_v12 = vld [vmem:[%s2227_s29 + $0xc0] sm:$0xff]  }
  0x1a   : > { %219 = vst [vmem:[%s159_s30 + $0x50] sm:$0xff] %v218_v10   ;;  %223 = vst [vmem:[%s159_s30 + $0x58] sm:$0xff] %v222_v11   ;;  %v230_v13 = vld [vmem:[%s2227_s29 + $0xc8] sm:$0xff]   ;;  %v234_v14 = vld [vmem:[%s2227_s29 + $0xd0] sm:$0xff]  }
  0x1b   : > { %227 = vst [vmem:[%s159_s30 + $0x60] sm:$0xff] %v226_v12   ;;  %231 = vst [vmem:[%s159_s30 + $0x68] sm:$0xff] %v230_v13   ;;  %v238_v15 = vld [vmem:[%s2227_s29 + $0xd8] sm:$0xff]  }
  0x1c   : > { %235 = vst [vmem:[%s159_s30 + $0x70] sm:$0xff] %v234_v14   ;;  %239 = vst [vmem:[%s159_s30 + $0x78] sm:$0xff] %v238_v15  }
  0x1d PF: > { %p1685_p7 = scmp.ge.s32.totalorder %s2159_s17, 1  ;;  %p327_p8 = scmp.lt.s32.totalorder %s2159_s17, 3 }
  0x1f   : > { %p328_p9 = pnand %p1685_p7, %p327_p8 }
  0x20   : > { %v2089_v16 = vld [vmem:[%s2590_s1] sm:$0xff] (!%p328_p9)   ;;  %v2091_v18 = vld [vmem:[%s2590_s1 + $0x8] sm:$0xff] (!%p328_p9)   ;;  %v2093_v20 = vld [vmem:[%s2590_s1 + $0x10] sm:$0xff] (!%p328_p9)   ;;  %s334_s24 = sand.u32 (!%p328_p9), 1, %s2151_s15  }
  0x21   : > { %331 = sbr.rel (%p328_p9) target bundleno = 348 (0x15c), region = 73  ;;  %v2090_v17 = vld [vmem:[%s2590_s1] sm:$0xff] (!%p328_p9)   ;;  %1968 = vmatprep.subr.bf16.mxu0 (!%p328_p9), %v2089_v16  ;;  %v2092_v19 = vld [vmem:[%s2590_s1 + $0x8] sm:$0xff] (!%p328_p9)   ;;  %v2094_v21 = vld [vmem:[%s2590_s1 + $0x10] sm:$0xff] (!%p328_p9)   ;;  %s2272_s29 = sshll.u32 (!%p328_p9), %s334_s24, 7 }
  0x22   : > { %1969 = vmatpush3.bf16.msra.mxu0 (!%p328_p9), %v2089_v16  ;;  %1992 = vmatprep.subr.bf16.mxu1 (!%p328_p9), %v2090_v17  ;;  %v2095_v22 = vld [vmem:[%s2590_s1 + $0x18] sm:$0xff] (!%p328_p9)   ;;  %v2097_v24 = vld [vmem:[%s2590_s1 + $0x20] sm:$0xff] (!%p328_p9)   ;;  %v2099_v26 = vld [vmem:[%s2590_s1 + $0x28] sm:$0xff] (!%p328_p9)   ;;  %s2284_s9 = scalar_lea.vmem (!%p328_p9), [#allocation3], %s2272_s29 }
  0x23   : > { %1993 = vmatpush3.bf16.msra.mxu1 (!%p328_p9), %v2090_v17  ;;  %1970 = vmatprep.subr.bf16.mxu0 (!%p328_p9), %v2091_v18  ;;  %v2096_v23 = vld [vmem:[%s2590_s1 + $0x18] sm:$0xff] (!%p328_p9)   ;;  %v2098_v25 = vld [vmem:[%s2590_s1 + $0x20] sm:$0xff] (!%p328_p9)   ;;  %v2100_v28 = vld [vmem:[%s2590_s1 + $0x28] sm:$0xff] (!%p328_p9)  }
  0x24   : > { %1994 = vmatprep.subr.bf16.mxu1 (!%p328_p9), %v2092_v19  ;;  %v2105_v27 = vld [vmem:[%s2284_s9] sm:$0xff] (!%p328_p9)   ;;  %v2101_v30 = vld [vmem:[%s2590_s1 + $0x30] sm:$0xff] (!%p328_p9)   ;;  %v2103_v32 = vld [vmem:[%s2590_s1 + $0x38] sm:$0xff] (!%p328_p9)  }
  0x25   : > { %1984 = vmatprep.mubr.bf16.mxu0 (!%p328_p9), %v2105_v27  ;;  %v2108_v29 = vld [vmem:[%s2284_s9 + $0x20] sm:$0xff] (!%p328_p9)   ;;  %v2102_v31 = vld [vmem:[%s2590_s1 + $0x30] sm:$0xff] (!%p328_p9)   ;;  %v2104_v33 = vld [vmem:[%s2590_s1 + $0x38] sm:$0xff] (!%p328_p9)  }
  0x26   : > { %1971 = vmatpush3.bf16.msra.mxu0 (!%p328_p9), %v2091_v18  ;;  %2008 = vmatprep.mubr.bf16.mxu1 (!%p328_p9), %v2108_v29  ;;  %v2106_v34 = vld [vmem:[%s2284_s9 + $0x8] sm:$0xff] (!%p328_p9)   ;;  %v2107_v35 = vld [vmem:[%s2590_s1] sm:$0xff] (!%p328_p9)   ;;  %v2119_v40 = vld [vmem:[%s2284_s9 + $0x10] sm:$0xff] (!%p328_p9)  }
  0x27   : > { %1995 = vmatpush3.bf16.msra.mxu1 (!%p328_p9), %v2092_v19  ;;  %1972 = vmatprep.subr.bf16.mxu0 (!%p328_p9), %v2093_v20  ;;  %v2109_v36 = vld [vmem:[%s2590_s1] sm:$0xff] (!%p328_p9)   ;;  %v2110_v37 = vld [vmem:[%s2284_s9 + $0x28] sm:$0xff] (!%p328_p9)   ;;  %v2121_v41 = vld [vmem:[%s2284_s9 + $0x30] sm:$0xff] (!%p328_p9)  }
  0x28   : > { %1996 = vmatprep.subr.bf16.mxu1 %v2094_v21  ;;  %v2111_v38 = vld [vmem:[%s2590_s1 + $0x8] sm:$0xff]   ;;  %v2113_v42 = vld [vmem:[%s2590_s1 + $0x10] sm:$0xff]   ;;  %v2115_v44 = vld [vmem:[%s2590_s1 + $0x18] sm:$0xff]  }
  0x29   : > { %v2112_v39 = vld [vmem:[%s2590_s1 + $0x8] sm:$0xff]   ;;  %v2114_v43 = vld [vmem:[%s2590_s1 + $0x10] sm:$0xff]   ;;  %v2120_v45 = vld [vmem:[%s2284_s9 + $0x18] sm:$0xff]  }
  0x2a   : > { %1973 = vmatpush3.bf16.msra.mxu0 %v2093_v20  ;;  %v2123_v46 = vld [vmem:[%s2284_s9 + $0x38] sm:$0xff]   ;;  %v2129_v48 = vld [vmem:[%s2284_s9 + $0x40] sm:$0xff]   ;;  %v2122_v52 = vld [vmem:[%s2590_s1 + $0x28] sm:$0xff]  }
  0x2b   : > { %1997 = vmatpush3.bf16.msra.mxu1 %v2094_v21  ;;  %1974 = vmatprep.subr.bf16.mxu0 %v2095_v22  ;;  %v2116_v47 = vld [vmem:[%s2590_s1 + $0x18] sm:$0xff]   ;;  %v2131_v49 = vld [vmem:[%s2284_s9 + $0x60] sm:$0xff]   ;;  %v2124_v53 = vld [vmem:[%s2590_s1 + $0x28] sm:$0xff]  }
  0x2c   : > { %1998 = vmatprep.subr.bf16.mxu1 %v2096_v23  ;;  %v2117_v50 = vld [vmem:[%s2590_s1 + $0x20] sm:$0xff]   ;;  %v2125_v54 = vld [vmem:[%s2590_s1 + $0x30] sm:$0xff]   ;;  %v2127_v56 = vld [vmem:[%s2590_s1 + $0x38] sm:$0xff]  }
  0x2d   : > { %v2118_v51 = vld [vmem:[%s2590_s1 + $0x20] sm:$0xff]   ;;  %v2126_v55 = vld [vmem:[%s2590_s1 + $0x30] sm:$0xff]   ;;  %v2128_v57 = vld [vmem:[%s2590_s1 + $0x38] sm:$0xff]  }
  0x2e   : > { %1975 = vmatpush3.bf16.msra.mxu0 %v2095_v22  ;;  %v2130_v58 = vld [vmem:[%s2284_s9 + $0x48] sm:$0xff]   ;;  %v2133_v60 = vld [vmem:[%s2284_s9 + $0x50] sm:$0xff]   ;;  %v2134_v62 = vld [vmem:[%s2284_s9 + $0x58] sm:$0xff]  }
  0x2f   : > { %1999 = vmatpush3.bf16.msra.mxu1 %v2096_v23  ;;  %1976 = vmatprep.subr.bf16.mxu0 %v2097_v24  ;;  %v2132_v59 = vld [vmem:[%s2284_s9 + $0x68] sm:$0xff]   ;;  %v2135_v61 = vld [vmem:[%s2284_s9 + $0x70] sm:$0xff]   ;;  %v2136_v63 = vld [vmem:[%s2284_s9 + $0x78] sm:$0xff]   ;;  %s2402_s9 = scalar_lea.vmem [#allocation4], %s2272_s29  ;;  %s1856_s29 = sshll.u32 (%p2217_p5), %s1678_s18, 5 }
  0x30   : > { %2000 = vmatprep.subr.bf16.mxu1 %v2098_v25  ;;  %v2368_v0 = vld [vmem:[%s2591_s2] ss:$0 sm:$0xff]  ;;  %s1458_s23 = scalar_lea.vmem (%p2217_p5), %s2593_s4, %s1856_s29 }
  0x31   : > { %v2373_v1 = vld [vmem:[%s2592_s3] ss:$0 sm:$0xff] }
  0x32   : > { %1977 = vmatpush3.bf16.msra.mxu0 %v2097_v24  ;;  %v2161_v24 = vmov 0.0  }
  0x33   : > { %2001 = vmatpush3.bf16.msra.mxu1 %v2098_v25  ;;  %1978 = vmatprep.subr.bf16.mxu0 %v2099_v26 }
  0x34   : > { %2002 = vmatprep.subr.bf16.mxu1 %v2100_v28 }
  0x36   : > { %1979 = vmatpush3.bf16.msra.mxu0 %v2099_v26 }
  0x37   : > { %2003 = vmatpush3.bf16.msra.mxu1 %v2100_v28  ;;  %1980 = vmatprep.subr.bf16.mxu0 %v2101_v30 }
  0x38   : > { %2004 = vmatprep.subr.bf16.mxu1 %v2102_v31 }
  0x3a   : > { %1981 = vmatpush3.bf16.msra.mxu0 %v2101_v30 }
  0x3b   : > { %2005 = vmatpush3.bf16.msra.mxu1 %v2102_v31  ;;  %1982 = vmatprep.subr.bf16.mxu0 %v2103_v32 }
  0x3c   : > { %2006 = vmatprep.subr.bf16.mxu1 %v2104_v33 }
  0x3e   : > { %1983 = vmatpush3.bf16.msra.mxu0 %v2103_v32 }
  0x3f   : > { %2007 = vmatpush3.bf16.msra.mxu1 %v2104_v33  ;;  %2016 = vmatprep.subr.bf16.mxu0 %v2107_v35 }
  0x40   : > { %2040 = vmatprep.subr.bf16.mxu1 %v2109_v36 }
  0x41   : > { %1985 = vmatmul.mubr.bf16.vlgmr.msra.gmra.mrb[0].mxu0 %v2106_v34 }
  0x42   : > { %2017 = vmatpush3.bf16.msra.mxu0 %v2107_v35  ;;  %2009 = vmatmul.mubr.bf16.vlgmr.msra.gmra.mrb[0].mxu1 %v2110_v37 }
  0x43   : > { %2041 = vmatpush3.bf16.msra.mxu1 %v2109_v36  ;;  %2018 = vmatprep.subr.bf16.mxu0 %v2111_v38 }
  0x44   : > { %2042 = vmatprep.subr.bf16.mxu1 %v2112_v39  ;;  %1988 = vmatprep.mubr.bf16.mxu0 %v2119_v40 }
  0x45   : > { %2012 = vmatprep.mubr.bf16.mxu1 %v2121_v41 }
  0x46   : > { %2019 = vmatpush3.bf16.msra.mxu0 %v2111_v38 }
  0x47   : > { %2043 = vmatpush3.bf16.msra.mxu1 %v2112_v39  ;;  %2020 = vmatprep.subr.bf16.mxu0 %v2113_v42 }
  0x48   : > { %2044 = vmatprep.subr.bf16.mxu1 %v2114_v43 }
  0x49   : > { %1989 = vmatmul.mubr.bf16.gmra.mrb[4].mxu0 %v2120_v45 }
  0x4a   : > { %2021 = vmatpush3.bf16.msra.mxu0 %v2113_v42  ;;  %2013 = vmatmul.mubr.bf16.gmra.mrb[4].mxu1 %v2123_v46 }
  0x4b   : > { %2045 = vmatpush3.bf16.msra.mxu1 %v2114_v43  ;;  %2022 = vmatprep.subr.bf16.mxu0 %v2115_v44 }
  0x4c   : > { %2046 = vmatprep.subr.bf16.mxu1 %v2116_v47  ;;  %2032 = vmatprep.mubr.bf16.mxu0 %v2129_v48 }
  0x4d   : > { %2056 = vmatprep.mubr.bf16.mxu1 %v2131_v49 }
  0x4e   : > { %2023 = vmatpush3.bf16.msra.mxu0 %v2115_v44 }
  0x4f   : > { %2047 = vmatpush3.bf16.msra.mxu1 %v2116_v47  ;;  %2024 = vmatprep.subr.bf16.mxu0 %v2117_v50 }
  0x50   : > { %2048 = vmatprep.subr.bf16.mxu1 %v2118_v51 }
  0x52   : > { %2025 = vmatpush3.bf16.msra.mxu0 %v2117_v50 }
  0x53   : > { %2049 = vmatpush3.bf16.msra.mxu1 %v2118_v51  ;;  %2026 = vmatprep.subr.bf16.mxu0 %v2122_v52 }
  0x54   : > { %2050 = vmatprep.subr.bf16.mxu1 %v2124_v53 }
  0x56   : > { %2027 = vmatpush3.bf16.msra.mxu0 %v2122_v52 }
  0x57   : > { %2051 = vmatpush3.bf16.msra.mxu1 %v2124_v53  ;;  %2028 = vmatprep.subr.bf16.mxu0 %v2125_v54 }
  0x58   : > { %2052 = vmatprep.subr.bf16.mxu1 %v2126_v55 }
  0x5a   : > { %2029 = vmatpush3.bf16.msra.mxu0 %v2125_v54 }
  0x5b   : > { %2053 = vmatpush3.bf16.msra.mxu1 %v2126_v55  ;;  %2030 = vmatprep.subr.bf16.mxu0 %v2127_v56 }
  0x5c   : > { %2054 = vmatprep.subr.bf16.mxu1 %v2128_v57 }
  0x5e   : > { %2031 = vmatpush3.bf16.msra.mxu0 %v2127_v56 }
  0x5f   : > { %2055 = vmatpush3.bf16.msra.mxu1 %v2128_v57 }
  0x61   : > { %2033 = vmatmul.mubr.bf16.vlgmr.msra.gmra.mrb[8].mxu0 %v2130_v58 }
  0x62   : > { %2057 = vmatmul.mubr.bf16.vlgmr.msra.gmra.mrb[8].mxu1 %v2132_v59  ;;  %2036 = vmatprep.mubr.bf16.mxu0 %v2133_v60 }
  0x63   : > { %2060 = vmatprep.mubr.bf16.mxu1 %v2135_v61 }
  0x69   : > { %2037 = vmatmul.mubr.bf16.gmra.mrb[12].mxu0 %v2134_v62 }
  0x6a   : > { %2061 = vmatmul.mubr.bf16.gmra.mrb[12].mxu1 %v2136_v63 }
 0x114   : > { %v1986_v2 = vpop.f32.mrb[0].mxu0 }
 0x115   : > { %v540_v3 = vmul.f32 %v1986_v2, %v2368_v0  ;;  %v501_v4 = vpop.f32.mrb[1].mxu0  ;;  %v2010_v5 = vpop.f32.mrb[0].mxu1 }
 0x116   : > { %v538_v6 = vmul.f32 %v2368_v0, %v501_v4  ;;  %v1987_v7 = vpop.f32.mrb[2].mxu0  ;;  %v812_v8 = vmul.f32 %v2010_v5, %v2368_v0  ;;  %v779_v9 = vpop.f32.mrb[1].mxu1 }
 0x117   : > { %v554_v10 = vadd.f32 %v2373_v1, %v540_v3  ;;  %v541_v11 = vmul.f32 %v1987_v7, %v2368_v0  ;;  %v504_v12 = vpop.f32.mrb[3].mxu0  ;;  %v810_v13 = vmul.f32 %v2368_v0, %v779_v9  ;;  %v2011_v14 = vpop.f32.mrb[2].mxu1 }
 0x118   : > { %v552_v15 = vadd.f32 %v2373_v1, %v538_v6  ;;  %v820_v16 = vadd.f32 %v2373_v1, %v812_v8  ;;  %v539_v17 = vmul.f32 %v2368_v0, %v504_v12  ;;  %v813_v18 = vmul.f32 %v2011_v14, %v2368_v0  ;;  %v782_v19 = vpop.f32.mrb[3].mxu1 }
 0x119   : > { %vm578_vm0 = vcmp.ge.f32.partialorder %v554_v10, 1.0  ;;  %v555_v20 = vadd.f32 %v2373_v1, %v541_v11  ;;  %v818_v21 = vadd.f32 %v2373_v1, %v810_v13  ;;  %v811_v22 = vmul.f32 %v2368_v0, %v782_v19 }
 0x11a   : > { %v586_v23 = vsel %vm578_vm0, 0.0, %v554_v10  ;;  %v602_v25 = vsel %vm578_vm0, 1.0, %v2161_v24  ;;  %vm576_vm1 = vcmp.ge.f32.partialorder %v552_v15, 1.0  ;;  %v553_v26 = vadd.f32 %v2373_v1, %v539_v17 }
 0x11b   : > { %v584_v27 = vsel %vm576_vm1, 0.0, %v552_v15  ;;  %v600_v28 = vsel %vm576_vm1, 1.0, %v2161_v24  ;;  %vm579_vm2 = vcmp.ge.f32.partialorder %v555_v20, 1.0  ;;  %v2391_v29 = vadd.f32 %v820_v16, %v586_v23 }
 0x11c   : > { %v587_v30 = vsel %vm579_vm2, 0.0, %v555_v20  ;;  %v603_v31 = vsel %vm579_vm2, 1.0, %v2161_v24  ;;  %vm577_vm3 = vcmp.ge.f32.partialorder %v553_v26, 1.0  ;;  %v2394_v32 = vadd.f32 %v818_v21, %v584_v27  ;;  %v1990_v33 = vpop.f32.mrb[4].mxu0 }
 0x11d   : > { %v1861_v34 = vpack.c.bf16 %v603_v31, %v602_v25  ;;  %v585_v35 = vsel %vm577_vm3, 0.0, %v553_v26  ;;  %v601_v36 = vsel %vm577_vm3, 1.0, %v2161_v24  ;;  %v821_v37 = vadd.f32 %v2373_v1, %v813_v18  ;;  %v517_v38 = vpop.f32.mrb[5].mxu0  ;;  %v2014_v39 = vpop.f32.mrb[4].mxu1 }
 0x11e   : > { %v1858_v40 = vpack.c.bf16 %v601_v36, %v600_v28  ;;  %v819_v41 = vadd.f32 %v2373_v1, %v811_v22  ;;  %v544_v42 = vmul.f32 %v1990_v33, %v2368_v0  ;;  %v542_v43 = vmul.f32 %v2368_v0, %v517_v38  ;;  %v1991_v44 = vpop.f32.mrb[6].mxu0  ;;  %v795_v45 = vpop.f32.mrb[5].mxu1 }
 0x11f   : > { %1905 = vst [vmem:[%s2402_s9 + $0x8] sm:$0xff] %v1861_v34   ;;  %v2405_v46 = vadd.f32 %v821_v37, %v587_v30  ;;  %v545_v47 = vmul.f32 %v1991_v44, %v2368_v0  ;;  %v816_v48 = vmul.f32 %v2014_v39, %v2368_v0  ;;  %v520_v49 = vpop.f32.mrb[7].mxu0  ;;  %v814_v50 = vmul.f32 %v2368_v0, %v795_v45  ;;  %v2015_v51 = vpop.f32.mrb[6].mxu1 }
 0x120   : > { %1859 = vst [vmem:[%s2402_s9] sm:$0xff] %v1858_v40   ;;  %v2411_v52 = vadd.f32 %v819_v41, %v585_v35  ;;  %v558_v53 = vadd.f32 %v2373_v1, %v544_v42  ;;  %v556_v54 = vadd.f32 %v2373_v1, %v542_v43  ;;  %v543_v55 = vmul.f32 %v2368_v0, %v520_v49  ;;  %v798_v56 = vpop.f32.mrb[7].mxu1 }
 0x121   : > { %v559_v57 = vadd.f32 %v2373_v1, %v545_v47  ;;  %v824_v58 = vadd.f32 %v2373_v1, %v816_v48  ;;  %v822_v59 = vadd.f32 %v2373_v1, %v814_v50  ;;  %v817_v60 = vmul.f32 %v2015_v51, %v2368_v0 }
 0x122   : > { %vm582_vm4 = vcmp.ge.f32.partialorder %v558_v53, 1.0  ;;  %vm580_vm5 = vcmp.ge.f32.partialorder %v556_v54, 1.0  ;;  %v557_v61 = vadd.f32 %v2373_v1, %v543_v55  ;;  %v815_v62 = vmul.f32 %v2368_v0, %v798_v56 }
 0x123   : > { %v590_v63 = vsel %vm582_vm4, 0.0, %v558_v53  ;;  %v606_v2 = vsel %vm582_vm4, 1.0, %v2161_v24  ;;  %v588_v3 = vsel %vm580_vm5, 0.0, %v556_v54  ;;  %v604_v4 = vsel %vm580_vm5, 1.0, %v2161_v24 }
 0x124   : > { %vm583_vm6 = vcmp.ge.f32.partialorder %v559_v57, 1.0  ;;  %v2424_v5 = vadd.f32 %v824_v58, %v590_v63  ;;  %vm581_vm7 = vcmp.ge.f32.partialorder %v557_v61, 1.0  ;;  %v2426_v6 = vadd.f32 %v822_v59, %v588_v3 }
 0x125   : > { %v591_v7 = vsel %vm583_vm6, 0.0, %v559_v57  ;;  %v607_v8 = vsel %vm583_vm6, 1.0, %v2161_v24  ;;  %v589_v9 = vsel %vm581_vm7, 0.0, %v557_v61  ;;  %v605_v10 = vsel %vm581_vm7, 1.0, %v2161_v24 }
 0x126   : > { %v1867_v11 = vpack.c.bf16 %v607_v8, %v606_v2  ;;  %v1864_v12 = vpack.c.bf16 %v605_v10, %v604_v4  ;;  %v825_v13 = vadd.f32 %v2373_v1, %v817_v60  ;;  %v823_v14 = vadd.f32 %v2373_v1, %v815_v62 }
 0x127   : > { %vm844_vm8 = vcmp.ge.f32.partialorder %v2391_v29, 1.0  ;;  %vm842_vm9 = vcmp.ge.f32.partialorder %v2394_v32, 1.0  ;;  %vm845_vm10 = vcmp.ge.f32.partialorder %v2405_v46, 1.0  ;;  %vm843_vm11 = vcmp.ge.f32.partialorder %v2411_v52, 1.0 }
 0x128   : > { %1907 = vst [vmem:[%s2402_s9 + $0x18] sm:$0xff] %v1867_v11   ;;  %1906 = vst [vmem:[%s2402_s9 + $0x10] sm:$0xff] %v1864_v12   ;;  %v2438_v15 = vadd.f32 %v825_v13, %v591_v7  ;;  %v2440_v16 = vadd.f32 %v823_v14, %v589_v9  ;;  %v868_v17 = vsel %vm844_vm8, 1.0, %v2161_v24  ;;  %v869_v18 = vsel %vm845_vm10, 1.0, %v2161_v24 }
 0x129   : > { %v866_v19 = vsel %vm842_vm9, 1.0, %v2161_v24  ;;  %v1873_v20 = vpack.c.bf16 %v869_v18, %v868_v17  ;;  %v867_v21 = vsel %vm843_vm11, 1.0, %v2161_v24  ;;  %vm848_vm12 = vcmp.ge.f32.partialorder %v2424_v5, 1.0 }
 0x12a   : > { %v1870_v22 = vpack.c.bf16 %v867_v21, %v866_v19  ;;  %v872_v23 = vsel %vm848_vm12, 1.0, %v2161_v24  ;;  %vm846_vm13 = vcmp.ge.f32.partialorder %v2426_v6, 1.0  ;;  %vm849_vm14 = vcmp.ge.f32.partialorder %v2438_v15, 1.0 }
 0x12b   : > { %1909 = vst [vmem:[%s2402_s9 + $0x28] sm:$0xff] %v1873_v20   ;;  %v870_v25 = vsel %vm846_vm13, 1.0, %v2161_v24  ;;  %vm847_vm15 = vcmp.ge.f32.partialorder %v2440_v16, 1.0  ;;  %v873_v26 = vsel %vm849_vm14, 1.0, %v2161_v24  ;;  %v852_v36 = vsel %vm844_vm8, 0.0, %v2391_v29 }
 0x12c   : > { %1908 = vst [vmem:[%s2402_s9 + $0x20] sm:$0xff] %v1870_v22   ;;  %v871_v27 = vsel %vm847_vm15, 1.0, %v2161_v24  ;;  %v1879_v28 = vpack.c.bf16 %v873_v26, %v872_v23  ;;  %v850_v37 = vsel %vm842_vm9, 0.0, %v2394_v32  ;;  %v853_v43 = vsel %vm845_vm10, 0.0, %v2405_v46 }
 0x12d   : > { %v1876_v30 = vpack.c.bf16 %v871_v27, %v870_v25  ;;  %v851_v48 = vsel %vm843_vm11, 0.0, %v2411_v52  ;;  %v856_v52 = vsel %vm848_vm12, 0.0, %v2424_v5 }
 0x12e   : > { %1911 = vst [vmem:[%s2402_s9 + $0x38] sm:$0xff] %v1879_v28  }
 0x12f   : > { %1910 = vst [vmem:[%s2402_s9 + $0x30] sm:$0xff] %v1876_v30  }
 0x134   : > { %v2034_v31 = vpop.f32.mrb[8].mxu0 }
 0x135   : > { %v1079_v33 = vmul.f32 %v2034_v31, %v2368_v0  ;;  %v1046_v34 = vpop.f32.mrb[9].mxu0  ;;  %v2058_v35 = vpop.f32.mrb[8].mxu1 }
 0x136   : > { %v1077_v38 = vmul.f32 %v2368_v0, %v1046_v34  ;;  %v1346_v39 = vmul.f32 %v2058_v35, %v2368_v0  ;;  %v2035_v40 = vpop.f32.mrb[10].mxu0  ;;  %v1313_v41 = vpop.f32.mrb[9].mxu1 }
 0x137   : > { %v1087_v42 = vadd.f32 %v2373_v1, %v1079_v33  ;;  %v1080_v44 = vmul.f32 %v2035_v40, %v2368_v0  ;;  %v1344_v29 = vmul.f32 %v2368_v0, %v1313_v41  ;;  %v1049_v45 = vpop.f32.mrb[11].mxu0  ;;  %v2059_v47 = vpop.f32.mrb[10].mxu1  ;;  %v854_v40 = vsel %vm846_vm13, 0.0, %v2426_v6 }
 0x138   : > { %v1085_v32 = vadd.f32 %v2373_v1, %v1077_v38  ;;  %v1078_v49 = vmul.f32 %v2368_v0, %v1049_v45  ;;  %v1347_v50 = vmul.f32 %v2059_v47, %v2368_v0  ;;  %v1316_v51 = vpop.f32.mrb[11].mxu1  ;;  %v1354_v46 = vadd.f32 %v2373_v1, %v1346_v39 }
 0x139   : > { %v1103_v53 = vadd.f32 %v1087_v42, %v852_v36  ;;  %v1088_v54 = vadd.f32 %v2373_v1, %v1080_v44  ;;  %v1345_v55 = vmul.f32 %v2368_v0, %v1316_v51  ;;  %v1352_v57 = vadd.f32 %v2373_v1, %v1344_v29 }
 0x13a   : > { %v1101_v56 = vadd.f32 %v1085_v32, %v850_v37  ;;  %v1086_v58 = vadd.f32 %v2373_v1, %v1078_v49  ;;  %v1355_v60 = vadd.f32 %v2373_v1, %v1347_v50  ;;  %v857_v32 = vsel %vm849_vm14, 0.0, %v2438_v15 }
 0x13b   : > { %vm1111_vm0 = vcmp.ge.f32.partialorder %v1103_v53, 1.0  ;;  %v1104_v59 = vadd.f32 %v1088_v54, %v853_v43  ;;  %v1353_v61 = vadd.f32 %v2373_v1, %v1345_v55 }
 0x13c   : > { %v1119_v62 = vsel %vm1111_vm0, 0.0, %v1103_v53  ;;  %v1135_v63 = vsel %vm1111_vm0, 1.0, %v2161_v24  ;;  %vm1109_vm1 = vcmp.ge.f32.partialorder %v1101_v56, 1.0  ;;  %v1102_v2 = vadd.f32 %v1086_v58, %v851_v48  ;;  %v2038_v3 = vpop.f32.mrb[12].mxu0 }
 0x13d   : > { %v1370_v4 = vadd.f32 %v1354_v46, %v1119_v62  ;;  %v1117_v7 = vsel %vm1109_vm1, 0.0, %v1101_v56  ;;  %v1133_v8 = vsel %vm1109_vm1, 1.0, %v2161_v24  ;;  %vm1112_vm2 = vcmp.ge.f32.partialorder %v1104_v59, 1.0  ;;  %v1062_v9 = vpop.f32.mrb[13].mxu0  ;;  %v2062_v10 = vpop.f32.mrb[12].mxu1 }
 0x13e   : > { %v1368_v5 = vadd.f32 %v1352_v57, %v1117_v7  ;;  %v1120_v11 = vsel %vm1112_vm2, 0.0, %v1104_v59  ;;  %v1136_v12 = vsel %vm1112_vm2, 1.0, %v2161_v24  ;;  %vm1110_vm3 = vcmp.ge.f32.partialorder %v1102_v2, 1.0  ;;  %v2039_v13 = vpop.f32.mrb[14].mxu0  ;;  %v1329_v14 = vpop.f32.mrb[13].mxu1 }
 0x13f   : > { %vm1378_vm4 = vcmp.ge.f32.partialorder %v1370_v4, 1.0  ;;  %v1885_v17 = vpack.c.bf16 %v1136_v12, %v1135_v63  ;;  %v1371_v18 = vadd.f32 %v1355_v60, %v1120_v11  ;;  %v1118_v19 = vsel %vm1110_vm3, 0.0, %v1102_v2  ;;  %v1065_v20 = vpop.f32.mrb[15].mxu0  ;;  %v2063_v21 = vpop.f32.mrb[14].mxu1  ;;  %v1482_v11 = vld [vmem:[%s2402_s9 + $0x10] sm:$0xff] (%p2217_p5)   ;;  %v1486_v12 = vld [vmem:[%s2402_s9 + $0x18] sm:$0xff] (%p2217_p5)  }
 0x140   : > { %v1402_v22 = vsel %vm1378_vm4, 1.0, %v2161_v24  ;;  %vm1376_vm5 = vcmp.ge.f32.partialorder %v1368_v5, 1.0  ;;  %v1134_v23 = vsel %vm1110_vm3, 1.0, %v2161_v24  ;;  %v1369_v25 = vadd.f32 %v1353_v61, %v1118_v19  ;;  %v1332_v26 = vpop.f32.mrb[15].mxu1  ;;  %v1474_v5 = vld [vmem:[%s2402_s9] sm:$0xff] (%p2217_p5)   ;;  %1483 = vst [vmem:[%s1458_s23 + $0x10] sm:$0xff] (%p2217_p5), %v1482_v11  }
 0x141   : > { %v1400_v27 = vsel %vm1376_vm5, 1.0, %v2161_v24  ;;  %1913 = vst [vmem:[%s2402_s9 + $0x48] sm:$0xff] %v1885_v17   ;;  %vm1379_vm6 = vcmp.ge.f32.partialorder %v1371_v18, 1.0  ;;  %v1882_v28 = vpack.c.bf16 %v1134_v23, %v1133_v8  ;;  %v1083_v30 = vmul.f32 %v2038_v3, %v2368_v0  ;;  %1475 = vst [vmem:[%s1458_s23] sm:$0xff] (%p2217_p5), %v1474_v5   ;;  %v1498_v17 = vld [vmem:[%s2402_s9 + $0x30] sm:$0xff] (%p2217_p5)   ;;  %v1502_v18 = vld [vmem:[%s2402_s9 + $0x38] sm:$0xff] (%p2217_p5)  }
 0x142   : > { %v1403_v31 = vsel %vm1379_vm6, 1.0, %v2161_v24  ;;  %vm1377_vm7 = vcmp.ge.f32.partialorder %v1369_v25, 1.0  ;;  %v1081_v33 = vmul.f32 %v2368_v0, %v1062_v9  ;;  %v1350_v34 = vmul.f32 %v2062_v10, %v2368_v0  ;;  %1487 = vst [vmem:[%s1458_s23 + $0x18] sm:$0xff] (%p2217_p5), %v1486_v12   ;;  %1499 = vst [vmem:[%s1458_s23 + $0x50] sm:$0xff] (%p2217_p5), %v1498_v17  }
 0x143   : > { %v1897_v35 = vpack.c.bf16 %v1403_v31, %v1402_v22  ;;  %1912 = vst [vmem:[%s2402_s9 + $0x40] sm:$0xff] %v1882_v28   ;;  %v1401_v36 = vsel %vm1377_vm7, 1.0, %v2161_v24  ;;  %v1091_v37 = vadd.f32 %v2373_v1, %v1083_v30  ;;  %v1084_v38 = vmul.f32 %v2039_v13, %v2368_v0  ;;  %v1490_v13 = vld [vmem:[%s2402_s9 + $0x20] sm:$0xff] (%p2217_p5)   ;;  %1503 = vst [vmem:[%s1458_s23 + $0x58] sm:$0xff] (%p2217_p5), %v1502_v18  }
 0x144   : > { %v1894_v39 = vpack.c.bf16 %v1401_v36, %v1400_v27  ;;  %v1089_v41 = vadd.f32 %v2373_v1, %v1081_v33  ;;  %v1348_v42 = vmul.f32 %v2368_v0, %v1329_v14  ;;  %v1358_v44 = vadd.f32 %v2373_v1, %v1350_v34  ;;  %v1494_v14 = vld [vmem:[%s2402_s9 + $0x28] sm:$0xff] (%p2217_p5)   ;;  %1491 = vst [vmem:[%s1458_s23 + $0x40] sm:$0xff] (%p2217_p5), %v1490_v13  }
 0x145   : > { %1917 = vst [vmem:[%s2402_s9 + $0x68] sm:$0xff] %v1897_v35   ;;  %v1107_v43 = vadd.f32 %v1091_v37, %v856_v52  ;;  %v1092_v29 = vadd.f32 %v2373_v1, %v1084_v38  ;;  %v1082_v45 = vmul.f32 %v2368_v0, %v1065_v20  ;;  %v1351_v48 = vmul.f32 %v2063_v21, %v2368_v0 }
 0x146   : > { %1916 = vst [vmem:[%s2402_s9 + $0x60] sm:$0xff] %v1894_v39   ;;  %v1105_v47 = vadd.f32 %v1089_v41, %v854_v40  ;;  %v1356_v6 = vadd.f32 %v2373_v1, %v1348_v42  ;;  %v855_v53 = vsel %vm847_vm15, 0.0, %v2440_v16  ;;  %v1349_v46 = vmul.f32 %v2368_v0, %v1332_v26  ;;  %1495 = vst [vmem:[%s1458_s23 + $0x48] sm:$0xff] (%p2217_p5), %v1494_v14  }
 0x147   : > { %vm1115_vm8 = vcmp.ge.f32.partialorder %v1107_v43, 1.0  ;;  %v1108_v49 = vadd.f32 %v1092_v29, %v857_v32  ;;  %v1090_v50 = vadd.f32 %v2373_v1, %v1082_v45  ;;  %v1359_v57 = vadd.f32 %v2373_v1, %v1351_v48 }
 0x148   : > { %v1123_v51 = vsel %vm1115_vm8, 0.0, %v1107_v43  ;;  %vm1113_vm9 = vcmp.ge.f32.partialorder %v1105_v47, 1.0  ;;  %v1139_v58 = vsel %vm1115_vm8, 1.0, %v2161_v24  ;;  %v1357_v0 = vadd.f32 %v2373_v1, %v1349_v46  ;;  %v1510_v20 = vld [vmem:[%s2402_s9 + $0x48] sm:$0xff] (%p2217_p5)  }
 0x149   : > { %v1374_v54 = vadd.f32 %v1358_v44, %v1123_v51  ;;  %v1121_v55 = vsel %vm1113_vm9, 0.0, %v1105_v47  ;;  %v1106_v15 = vadd.f32 %v1090_v50, %v855_v53  ;;  %vm1116_vm10 = vcmp.ge.f32.partialorder %v1108_v49, 1.0  ;;  %1511 = vst [vmem:[%s1458_s23 + $0x88] sm:$0xff] (%p2217_p5), %v1510_v20  }
 0x14a   : > { %v1372_v56 = vadd.f32 %v1356_v6, %v1121_v55  ;;  %v1124_v52 = vsel %vm1116_vm10, 0.0, %v1108_v49  ;;  %v1140_v59 = vsel %vm1116_vm10, 1.0, %v2161_v24  ;;  %v1137_v61 = vsel %vm1113_vm9, 1.0, %v2161_v24  ;;  %v1506_v19 = vld [vmem:[%s2402_s9 + $0x40] sm:$0xff] (%p2217_p5)  }
 0x14b   : > { %vm1114_vm11 = vcmp.ge.f32.partialorder %v1106_v15, 1.0  ;;  %vm1382_vm12 = vcmp.ge.f32.partialorder %v1374_v54, 1.0  ;;  %v1891_v16 = vpack.c.bf16 %v1140_v59, %v1139_v58  ;;  %v1375_v60 = vadd.f32 %v1359_v57, %v1124_v52  ;;  %1507 = vst [vmem:[%s1458_s23 + $0x80] sm:$0xff] (%p2217_p5), %v1506_v19  }
 0x14c   : > { %v1122_v62 = vsel %vm1114_vm11, 0.0, %v1106_v15  ;;  %v1138_v63 = vsel %vm1114_vm11, 1.0, %v2161_v24  ;;  %vm1380_vm13 = vcmp.ge.f32.partialorder %v1372_v56, 1.0  ;;  %v1406_v4 = vsel %vm1382_vm12, 1.0, %v2161_v24  ;;  %v1526_v25 = vld [vmem:[%s2402_s9 + $0x68] sm:$0xff] (%p2217_p5)  }
 0x14d   : > { %1915 = vst [vmem:[%s2402_s9 + $0x58] sm:$0xff] %v1891_v16   ;;  %vm1383_vm14 = vcmp.ge.f32.partialorder %v1375_v60, 1.0  ;;  %v1888_v2 = vpack.c.bf16 %v1138_v63, %v1137_v61  ;;  %v1373_v3 = vadd.f32 %v1357_v0, %v1122_v62  ;;  %v1404_v1 = vsel %vm1380_vm13, 1.0, %v2161_v24  ;;  %1455 = sbr.rel (!%p2217_p5) target bundleno = 348 (0x15c), region = 81  ;;  %v1522_v23 = vld [vmem:[%s2402_s9 + $0x60] sm:$0xff] (%p2217_p5)   ;;  %1527 = vst [vmem:[%s1458_s23 + $0xc8] sm:$0xff] (%p2217_p5), %v1526_v25  }
 0x14e   : > { %v1407_v7 = vsel %vm1383_vm14, 1.0, %v2161_v24  ;;  %1523 = vst [vmem:[%s1458_s23 + $0xc0] sm:$0xff] (%p2217_p5), %v1522_v23  }
 0x14f   : > { %v1903_v8 = vpack.c.bf16 %v1407_v7, %v1406_v4  ;;  %1914 = vst [vmem:[%s2402_s9 + $0x50] sm:$0xff] %v1888_v2   ;;  %vm1381_vm15 = vcmp.ge.f32.partialorder %v1373_v3, 1.0 }
 0x150   : > { %v1405_v9 = vsel %vm1381_vm15, 1.0, %v2161_v24  ;;  %v1478_v24 = vld [vmem:[%s2402_s9 + $0x8] sm:$0xff] (%p2217_p5)  }
 0x151   : > { %1919 = vst [vmem:[%s2402_s9 + $0x78] sm:$0xff] %v1903_v8   ;;  %v1900_v10 = vpack.c.bf16 %v1405_v9, %v1404_v1  ;;  %1479 = vst [vmem:[%s1458_s23 + $0x8] sm:$0xff] (%p2217_p5), %v1478_v24  }
 0x153   : > { %1918 = vst [vmem:[%s2402_s9 + $0x70] sm:$0xff] %v1900_v10  }
 0x154   : > { %v1518_v22 = vld [vmem:[%s2402_s9 + $0x58] sm:$0xff]  }
 0x155   : > { %1519 = vst [vmem:[%s1458_s23 + $0x98] sm:$0xff] %v1518_v22  }
 0x156   : > { %v1514_v21 = vld [vmem:[%s2402_s9 + $0x50] sm:$0xff]  }
 0x157   : > { %1515 = vst [vmem:[%s1458_s23 + $0x90] sm:$0xff] %v1514_v21  }
 0x158   : > { %v1534_v27 = vld [vmem:[%s2402_s9 + $0x78] sm:$0xff]  }
 0x159   : > { %1535 = vst [vmem:[%s1458_s23 + $0xd8] sm:$0xff] %v1534_v27  }
 0x15a   : > { %v1530_v26 = vld [vmem:[%s2402_s9 + $0x70] sm:$0xff]  }
 0x15b   : > { %1531 = vst [vmem:[%s1458_s23 + $0xd0] sm:$0xff] %v1530_v26  }
 0x15c PF: > { %p11_p10 = scmp.ge.s32.totalorder %s2204_s19, 4   ;;  %s2595_s15 = smov %s2155_s16 }
 0x15d   : > { %s2596_s16 = smov %s2215_s22  ;;  %s2597_s17 = smov %s2204_s19 }
 0x15e   :  { %13 = sbr.rel (!%p11_p10) target bundleno = 2 (0x2), region = 159 }

// kernel: bottleneck_forward.5
= control target key start
LH: loop header
LB: loop body
LE: loop exit
PB: predicated region body
PF: predicated region fallthrough
CT: control target
= control target key end

     0   :  { %10 = vsyncpa [#allocation6], 0  ;;  %s3014_s0 = inlined_call_operand.vmem [shape: bf16[4,128,128], index: 0, kind: input, shape index: {}]   ;;  %s3015_s1 = inlined_call_operand.vmem [shape: bf16[4,128,128], index: 1, kind: input, shape index: {}]   ;;  %s3016_s2 = inlined_call_operand.vmem [shape: bf16[128,128], index: 2, kind: input, shape index: {}]   ;;  %s3017_s3 = inlined_call_operand.vmem [shape: f32[1,128], index: 3, kind: input, shape index: {}]   ;;  %s3018_s4 = inlined_call_operand.vmem [shape: f32[1,128], index: 4, kind: input, shape index: {}]   ;;  %s3019_s5 = inlined_call_operand.hbm [shape: f32[4,128,128], index: 5, kind: output, shape index: {}]  }
   0x1   :  { %12 = vsyncpa [#allocation6 + $0x1], 0  ;;  %s2304_s18 = smov 0   ;;  %s2306_s19 = smov 0  }
   0x2   :  { %s2308_s20 = smov 0   ;;  %s2310_s21 = smov 0  }
   0x3 LB: > { %s1766_s22 = sadd.s32 4294967295, %s2266_s21   ;;  %s1767_s23 = sadd.s32 4294967294, %s2266_s21   ;;  %s2266_s21 = sphi %s2310_s21, %s3030_s21   ;;  %s2262_s20 = sphi %s2308_s20, %s3029_s20   ;;  %s2258_s19 = sphi %s2306_s19, %s3028_s19   ;;  %s2254_s18 = sphi %s2304_s18, %s3027_s18  }
   0x4   : > { %s2327_s24 = sadd.s32 1, %s2266_s21   ;;  %s25_s25 = sadd.s32 1, %s2262_s20 }
   0x5   : > { %s22_s26 = ssub.s32 %s2266_s21, %s2327_s24  ;;  %p32_p0 = scmp.ne.s32.totalorder %s2262_s20, %s2258_s19 }
   0x6   : > { %p23_p1 = scmp.eq.s32.totalorder %s22_s26, 0  ;;  %p33_p2 = scmp.eq.s32.totalorder %s2266_s21, 0 }
   0x7   : > { %p151_p3 = scmp.eq.s32.totalorder %s1766_s22, 1  ;;  %p156_p4 = scmp.ne.s32.totalorder %s2258_s19, %s2254_s18 }
   0x8   : > { %s2340_s27 = scalar_select %p23_p1, %s2262_s20, %s25_s25  }
   0x9   : > { %p2342_p5 = por %p33_p2, %p32_p0  ;;  %p2346_p6 = por %p151_p3, %p32_p0 }
   0xa   : > { %p157_p7 = scmp.eq.s32.totalorder %s1767_s23, 1  ;;  %p1769_p9 = scmp.ge.s32.totalorder %s2266_s21, 2 }
   0xc   : > { %p2350_p8 = por %p157_p7, %p156_p4  ;;  %182 = sbr.rel (%p1769_p9) target bundleno = 43 (0x2b), region = 28 }
  0x13   : > { %185 = sbr.rel (!%p2342_p5) target bundleno = 31 (0x1f), region = 32  ;;  %s187_s6 = sand.u32 (%p2342_p5), 1, %s2262_s20  }
  0x14   : > { %s1907_s7 = sshll.u32 (%p2342_p5), %s2266_s21, 5  ;;  %s1770_s8 = sshll.u32 (%p2342_p5), %s187_s6, 7 }
  0x15   : > { %s2364_s11 = scalar_lea.vmem (%p2342_p5), %s3014_s0, %s1907_s7  ;;  %s189_s12 = scalar_lea.vmem (%p2342_p5), [#allocation3], %s1770_s8 }
  0x16   : > { %v208_v0 = vld [vmem:[%s2364_s11] sm:$0xff] (%p2342_p5)   ;;  %v212_v1 = vld [vmem:[%s2364_s11 + $0x8] sm:$0xff] (%p2342_p5)   ;;  %v216_v2 = vld [vmem:[%s2364_s11 + $0x10] sm:$0xff] (%p2342_p5)  }
  0x17   : > { %209 = vst [vmem:[%s189_s12] sm:$0xff] (%p2342_p5), %v208_v0   ;;  %213 = vst [vmem:[%s189_s12 + $0x8] sm:$0xff] (%p2342_p5), %v212_v1   ;;  %v220_v3 = vld [vmem:[%s2364_s11 + $0x18] sm:$0xff] (%p2342_p5)   ;;  %v224_v4 = vld [vmem:[%s2364_s11 + $0x40] sm:$0xff] (%p2342_p5)  }
  0x18   : > { %217 = vst [vmem:[%s189_s12 + $0x10] sm:$0xff] (%p2342_p5), %v216_v2   ;;  %v228_v5 = vld [vmem:[%s2364_s11 + $0x48] sm:$0xff] (%p2342_p5)   ;;  %221 = vst [vmem:[%s189_s12 + $0x18] sm:$0xff] (%p2342_p5), %v220_v3   ;;  %v232_v6 = vld [vmem:[%s2364_s11 + $0x50] sm:$0xff] (%p2342_p5)  }
  0x19   : > { %225 = vst [vmem:[%s189_s12 + $0x20] sm:$0xff] (%p2342_p5), %v224_v4   ;;  %229 = vst [vmem:[%s189_s12 + $0x28] sm:$0xff] (%p2342_p5), %v228_v5   ;;  %v236_v7 = vld [vmem:[%s2364_s11 + $0x58] sm:$0xff] (%p2342_p5)   ;;  %v240_v8 = vld [vmem:[%s2364_s11 + $0x80] sm:$0xff] (%p2342_p5)  }
  0x1a   : > { %233 = vst [vmem:[%s189_s12 + $0x30] sm:$0xff] %v232_v6   ;;  %237 = vst [vmem:[%s189_s12 + $0x38] sm:$0xff] %v236_v7   ;;  %v244_v9 = vld [vmem:[%s2364_s11 + $0x88] sm:$0xff]   ;;  %v248_v10 = vld [vmem:[%s2364_s11 + $0x90] sm:$0xff]  }
  0x1b   : > { %241 = vst [vmem:[%s189_s12 + $0x40] sm:$0xff] %v240_v8   ;;  %v252_v11 = vld [vmem:[%s2364_s11 + $0x98] sm:$0xff]   ;;  %245 = vst [vmem:[%s189_s12 + $0x48] sm:$0xff] %v244_v9   ;;  %v256_v12 = vld [vmem:[%s2364_s11 + $0xc0] sm:$0xff]  }
  0x1c   : > { %249 = vst [vmem:[%s189_s12 + $0x50] sm:$0xff] %v248_v10   ;;  %253 = vst [vmem:[%s189_s12 + $0x58] sm:$0xff] %v252_v11   ;;  %v260_v13 = vld [vmem:[%s2364_s11 + $0xc8] sm:$0xff]   ;;  %v264_v14 = vld [vmem:[%s2364_s11 + $0xd0] sm:$0xff]  }
  0x1d   : > { %257 = vst [vmem:[%s189_s12 + $0x60] sm:$0xff] %v256_v12   ;;  %261 = vst [vmem:[%s189_s12 + $0x68] sm:$0xff] %v260_v13   ;;  %v268_v15 = vld [vmem:[%s2364_s11 + $0xd8] sm:$0xff]  }
  0x1e   : > { %265 = vst [vmem:[%s189_s12 + $0x70] sm:$0xff] %v264_v14   ;;  %269 = vst [vmem:[%s189_s12 + $0x78] sm:$0xff] %v268_v15  }
  0x1f PF: > { %358 = sbr.rel (!%p2342_p5) target bundleno = 43 (0x2b), region = 73  ;;  %s360_s13 = sand.u32 (%p2342_p5), 1, %s2262_s20  }
  0x20   : > { %s1908_s14 = sshll.u32 (%p2342_p5), %s2266_s21, 5  ;;  %s1773_s15 = sshll.u32 (%p2342_p5), %s360_s13, 7 }
  0x21   : > { %s2389_s23 = scalar_lea.vmem (%p2342_p5), %s3015_s1, %s1908_s14  ;;  %s362_s25 = scalar_lea.vmem (%p2342_p5), [#allocation4], %s1773_s15 }
  0x22   : > { %v381_v16 = vld [vmem:[%s2389_s23] sm:$0xff] (%p2342_p5)   ;;  %v385_v17 = vld [vmem:[%s2389_s23 + $0x8] sm:$0xff] (%p2342_p5)   ;;  %v389_v18 = vld [vmem:[%s2389_s23 + $0x10] sm:$0xff] (%p2342_p5)  }
  0x23   : > { %382 = vst [vmem:[%s362_s25] sm:$0xff] (%p2342_p5), %v381_v16   ;;  %386 = vst [vmem:[%s362_s25 + $0x8] sm:$0xff] (%p2342_p5), %v385_v17   ;;  %v393_v19 = vld [vmem:[%s2389_s23 + $0x18] sm:$0xff] (%p2342_p5)   ;;  %v397_v20 = vld [vmem:[%s2389_s23 + $0x40] sm:$0xff] (%p2342_p5)  }
  0x24   : > { %390 = vst [vmem:[%s362_s25 + $0x10] sm:$0xff] (%p2342_p5), %v389_v18   ;;  %v401_v21 = vld [vmem:[%s2389_s23 + $0x48] sm:$0xff] (%p2342_p5)   ;;  %394 = vst [vmem:[%s362_s25 + $0x18] sm:$0xff] (%p2342_p5), %v393_v19   ;;  %v405_v22 = vld [vmem:[%s2389_s23 + $0x50] sm:$0xff] (%p2342_p5)  }
  0x25   : > { %398 = vst [vmem:[%s362_s25 + $0x20] sm:$0xff] (%p2342_p5), %v397_v20   ;;  %402 = vst [vmem:[%s362_s25 + $0x28] sm:$0xff] (%p2342_p5), %v401_v21   ;;  %v409_v23 = vld [vmem:[%s2389_s23 + $0x58] sm:$0xff] (%p2342_p5)   ;;  %v413_v24 = vld [vmem:[%s2389_s23 + $0x80] sm:$0xff] (%p2342_p5)  }
  0x26   : > { %406 = vst [vmem:[%s362_s25 + $0x30] sm:$0xff] %v405_v22   ;;  %410 = vst [vmem:[%s362_s25 + $0x38] sm:$0xff] %v409_v23   ;;  %v417_v25 = vld [vmem:[%s2389_s23 + $0x88] sm:$0xff]   ;;  %v421_v26 = vld [vmem:[%s2389_s23 + $0x90] sm:$0xff]  }
  0x27   : > { %414 = vst [vmem:[%s362_s25 + $0x40] sm:$0xff] %v413_v24   ;;  %v425_v27 = vld [vmem:[%s2389_s23 + $0x98] sm:$0xff]   ;;  %418 = vst [vmem:[%s362_s25 + $0x48] sm:$0xff] %v417_v25   ;;  %v429_v28 = vld [vmem:[%s2389_s23 + $0xc0] sm:$0xff]  }
  0x28   : > { %422 = vst [vmem:[%s362_s25 + $0x50] sm:$0xff] %v421_v26   ;;  %426 = vst [vmem:[%s362_s25 + $0x58] sm:$0xff] %v425_v27   ;;  %v433_v29 = vld [vmem:[%s2389_s23 + $0xc8] sm:$0xff]   ;;  %v437_v30 = vld [vmem:[%s2389_s23 + $0xd0] sm:$0xff]  }
  0x29   : > { %430 = vst [vmem:[%s362_s25 + $0x60] sm:$0xff] %v429_v28   ;;  %434 = vst [vmem:[%s362_s25 + $0x68] sm:$0xff] %v433_v29   ;;  %v441_v31 = vld [vmem:[%s2389_s23 + $0xd8] sm:$0xff]  }
  0x2a   : > { %438 = vst [vmem:[%s362_s25 + $0x70] sm:$0xff] %v437_v30   ;;  %442 = vst [vmem:[%s362_s25 + $0x78] sm:$0xff] %v441_v31  }
  0x2b PF: > { %p1776_p10 = scmp.ge.s32.totalorder %s2266_s21, 1  ;;  %p530_p11 = scmp.lt.s32.totalorder %s2266_s21, 3 }
  0x2d   : > { %p531_p12 = pnand %p1776_p10, %p530_p11 }
  0x2e   : > { %v2184_v32 = vld [vmem:[%s3016_s2] sm:$0xff] (!%p531_p12)   ;;  %v2186_v34 = vld [vmem:[%s3016_s2 + $0x8] sm:$0xff] (!%p531_p12)   ;;  %v2188_v36 = vld [vmem:[%s3016_s2 + $0x10] sm:$0xff] (!%p531_p12)   ;;  %s2425_s14 = sand.u32 (!%p531_p12), 1, %s2258_s19  }
  0x2f   : > { %534 = sbr.rel (%p531_p12) target bundleno = 360 (0x168), region = 114  ;;  %v2185_v33 = vld [vmem:[%s3016_s2] sm:$0xff] (!%p531_p12)   ;;  %2037 = vmatprep.subr.bf16.mxu0 (!%p531_p12), %v2184_v32  ;;  %v2187_v35 = vld [vmem:[%s3016_s2 + $0x8] sm:$0xff] (!%p531_p12)   ;;  %v2189_v37 = vld [vmem:[%s3016_s2 + $0x10] sm:$0xff] (!%p531_p12)   ;;  %s1777_s28 = sshll.u32 (!%p531_p12), %s2425_s14, 7 }
  0x30   : > { %2038 = vmatpush3.bf16.msra.mxu0 (!%p531_p12), %v2184_v32  ;;  %2061 = vmatprep.subr.bf16.mxu1 (!%p531_p12), %v2185_v33  ;;  %v2190_v38 = vld [vmem:[%s3016_s2 + $0x18] sm:$0xff] (!%p531_p12)   ;;  %v2192_v40 = vld [vmem:[%s3016_s2 + $0x20] sm:$0xff] (!%p531_p12)   ;;  %v2194_v42 = vld [vmem:[%s3016_s2 + $0x28] sm:$0xff] (!%p531_p12)   ;;  %s2448_s12 = scalar_lea.vmem (!%p531_p12), [#allocation3], %s1777_s28  ;;  %s2531_s17 = scalar_lea.vmem (!%p531_p12), [#allocation4], %s1777_s28 }
  0x31   : > { %2062 = vmatpush3.bf16.msra.mxu1 (!%p531_p12), %v2185_v33  ;;  %2039 = vmatprep.subr.bf16.mxu0 (!%p531_p12), %v2186_v34  ;;  %v2191_v39 = vld [vmem:[%s3016_s2 + $0x18] sm:$0xff] (!%p531_p12)   ;;  %v2193_v41 = vld [vmem:[%s3016_s2 + $0x20] sm:$0xff] (!%p531_p12)   ;;  %v2195_v44 = vld [vmem:[%s3016_s2 + $0x28] sm:$0xff] (!%p531_p12)   ;;  %s1779_s26 = sshll.u32 (!%p531_p12), %s2425_s14, 8  ;;  %s1639_s7 = scalar_lea.sflag (!%p531_p12), [#allocation6], %s2425_s14 }
  0x32   : > { %2063 = vmatprep.subr.bf16.mxu1 (!%p531_p12), %v2187_v35  ;;  %v2200_v43 = vld [vmem:[%s2448_s12] sm:$0xff] (!%p531_p12)   ;;  %v2196_v46 = vld [vmem:[%s3016_s2 + $0x30] sm:$0xff] (!%p531_p12)   ;;  %v2198_v48 = vld [vmem:[%s3016_s2 + $0x38] sm:$0xff] (!%p531_p12)   ;;  %s2642_s6 = scalar_lea.vmem (!%p531_p12), [#allocation5], %s1779_s26 }
  0x33   : > { %2053 = vmatprep.mubr.bf16.mxu0 (!%p531_p12), %v2200_v43  ;;  %v2203_v45 = vld [vmem:[%s2448_s12 + $0x20] sm:$0xff] (!%p531_p12)   ;;  %v2197_v47 = vld [vmem:[%s3016_s2 + $0x30] sm:$0xff] (!%p531_p12)   ;;  %v2199_v49 = vld [vmem:[%s3016_s2 + $0x38] sm:$0xff] (!%p531_p12)  }
  0x34   : > { %2040 = vmatpush3.bf16.msra.mxu0 (!%p531_p12), %v2186_v34  ;;  %2077 = vmatprep.mubr.bf16.mxu1 (!%p531_p12), %v2203_v45  ;;  %v2201_v50 = vld [vmem:[%s2448_s12 + $0x8] sm:$0xff] (!%p531_p12)   ;;  %v2202_v51 = vld [vmem:[%s3016_s2] sm:$0xff] (!%p531_p12)   ;;  %v2214_v56 = vld [vmem:[%s2448_s12 + $0x10] sm:$0xff] (!%p531_p12)  }
  0x35   : > { %2064 = vmatpush3.bf16.msra.mxu1 (!%p531_p12), %v2187_v35  ;;  %2041 = vmatprep.subr.bf16.mxu0 (!%p531_p12), %v2188_v36  ;;  %v2204_v52 = vld [vmem:[%s3016_s2] sm:$0xff] (!%p531_p12)   ;;  %v2205_v53 = vld [vmem:[%s2448_s12 + $0x28] sm:$0xff] (!%p531_p12)   ;;  %v2216_v57 = vld [vmem:[%s2448_s12 + $0x30] sm:$0xff] (!%p531_p12)  }
  0x36   : > { %2065 = vmatprep.subr.bf16.mxu1 %v2189_v37  ;;  %v2206_v54 = vld [vmem:[%s3016_s2 + $0x8] sm:$0xff]   ;;  %v2208_v58 = vld [vmem:[%s3016_s2 + $0x10] sm:$0xff]   ;;  %v2210_v60 = vld [vmem:[%s3016_s2 + $0x18] sm:$0xff]  }
  0x37   : > { %v2207_v55 = vld [vmem:[%s3016_s2 + $0x8] sm:$0xff]   ;;  %v2209_v59 = vld [vmem:[%s3016_s2 + $0x10] sm:$0xff]   ;;  %v2215_v61 = vld [vmem:[%s2448_s12 + $0x18] sm:$0xff]  }
  0x38   : > { %2042 = vmatpush3.bf16.msra.mxu0 %v2188_v36  ;;  %v2218_v62 = vld [vmem:[%s2448_s12 + $0x38] sm:$0xff]   ;;  %v2224_v0 = vld [vmem:[%s2448_s12 + $0x40] sm:$0xff]   ;;  %v2217_v4 = vld [vmem:[%s3016_s2 + $0x28] sm:$0xff]  }
  0x39   : > { %2066 = vmatpush3.bf16.msra.mxu1 %v2189_v37  ;;  %2043 = vmatprep.subr.bf16.mxu0 %v2190_v38  ;;  %v2211_v63 = vld [vmem:[%s3016_s2 + $0x18] sm:$0xff]   ;;  %v2226_v1 = vld [vmem:[%s2448_s12 + $0x60] sm:$0xff]   ;;  %v2219_v5 = vld [vmem:[%s3016_s2 + $0x28] sm:$0xff]  }
  0x3a   : > { %2067 = vmatprep.subr.bf16.mxu1 %v2191_v39  ;;  %v2212_v2 = vld [vmem:[%s3016_s2 + $0x20] sm:$0xff]   ;;  %v2220_v6 = vld [vmem:[%s3016_s2 + $0x30] sm:$0xff]   ;;  %v2222_v8 = vld [vmem:[%s3016_s2 + $0x38] sm:$0xff]  }
  0x3b   : > { %v2213_v3 = vld [vmem:[%s3016_s2 + $0x20] sm:$0xff]   ;;  %v2221_v7 = vld [vmem:[%s3016_s2 + $0x30] sm:$0xff]   ;;  %v2223_v9 = vld [vmem:[%s3016_s2 + $0x38] sm:$0xff]  }
  0x3c   : > { %2044 = vmatpush3.bf16.msra.mxu0 %v2190_v38  ;;  %v2225_v10 = vld [vmem:[%s2448_s12 + $0x48] sm:$0xff]   ;;  %v2228_v12 = vld [vmem:[%s2448_s12 + $0x50] sm:$0xff]   ;;  %v2229_v14 = vld [vmem:[%s2448_s12 + $0x58] sm:$0xff]  }
  0x3d   : > { %2068 = vmatpush3.bf16.msra.mxu1 %v2191_v39  ;;  %2045 = vmatprep.subr.bf16.mxu0 %v2192_v40  ;;  %v2227_v11 = vld [vmem:[%s2448_s12 + $0x68] sm:$0xff]   ;;  %v2230_v13 = vld [vmem:[%s2448_s12 + $0x70] sm:$0xff]   ;;  %v2231_v15 = vld [vmem:[%s2448_s12 + $0x78] sm:$0xff]  }
  0x3e   : > { %2069 = vmatprep.subr.bf16.mxu1 %v2193_v41  ;;  %v2534_v16 = vld [vmem:[%s2531_s17 + $0x8] sm:$0xff]   ;;  %v2537_v17 = vld [vmem:[%s2531_s17] sm:$0xff]   ;;  %v2546_v20 = vld [vmem:[%s2531_s17 + $0x18] sm:$0xff]  }
  0x3f   : > { %v2540_v18 = vld [vmem:[%s2531_s17 + $0x28] sm:$0xff]   ;;  %v2543_v19 = vld [vmem:[%s2531_s17 + $0x20] sm:$0xff]   ;;  %v2549_v21 = vld [vmem:[%s2531_s17 + $0x10] sm:$0xff]   ;;  %v1916_v22 = vunpack.c.l.bf16 %v2534_v16  ;;  %v1912_v23 = vunpack.c.l.bf16 %v2537_v17  ;;  %v1917_v24 = vunpack.c.h.bf16 %v2534_v16  ;;  %v1913_v25 = vunpack.c.h.bf16 %v2537_v17 }
  0x40   : > { %2046 = vmatpush3.bf16.msra.mxu0 %v2192_v40  ;;  %v1932_v26 = vunpack.c.l.bf16 %v2540_v18  ;;  %v1928_v27 = vunpack.c.l.bf16 %v2543_v19  ;;  %v1924_v28 = vunpack.c.l.bf16 %v2546_v20  ;;  %v1920_v29 = vunpack.c.l.bf16 %v2549_v21  ;;  %v2562_v32 = vld [vmem:[%s2531_s17 + $0x38] sm:$0xff]   ;;  %v2569_v35 = vld [vmem:[%s3017_s3] ss:$0 sm:$0xff]  ;;  %v2576_v39 = vld [vmem:[%s2531_s17 + $0x30] sm:$0xff]  }
  0x41   : > { %2070 = vmatpush3.bf16.msra.mxu1 %v2193_v41  ;;  %2047 = vmatprep.subr.bf16.mxu0 %v2194_v42  ;;  %v1925_v30 = vunpack.c.h.bf16 %v2546_v20  ;;  %v1933_v31 = vunpack.c.h.bf16 %v2540_v18  ;;  %v1921_v33 = vunpack.c.h.bf16 %v2549_v21  ;;  %v1929_v34 = vunpack.c.h.bf16 %v2543_v19  ;;  %v2581_v40 = vld [vmem:[%s3018_s4] ss:$0 sm:$0xff]  ;;  %v2740_v18 = vld [vmem:[%s2531_s17 + $0x48] sm:$0xff]  }
  0x42   : > { %2071 = vmatprep.subr.bf16.mxu1 %v2195_v44  ;;  %v836_v36 = vadd.f32 1.0, %v1916_v22  ;;  %v834_v37 = vadd.f32 1.0, %v1912_v23  ;;  %v837_v38 = vadd.f32 1.0, %v1917_v24  ;;  %v835_v41 = vadd.f32 1.0, %v1913_v25 }
  0x43   : > { %v2591_v43 = vadd.f32 1.0, %v1928_v27 }
  0x44   : > { %2048 = vmatpush3.bf16.msra.mxu0 %v2194_v42  ;;  %v2587_v42 = vadd.f32 1.0, %v1932_v26 }
  0x45   : > { %2072 = vmatpush3.bf16.msra.mxu1 %v2195_v44  ;;  %2049 = vmatprep.subr.bf16.mxu0 %v2196_v46  ;;  %v1940_v44 = vunpack.c.l.bf16 %v2562_v32 }
  0x46   : > { %2073 = vmatprep.subr.bf16.mxu1 %v2197_v47 }
  0x48   : > { %2050 = vmatpush3.bf16.msra.mxu0 %v2196_v46  ;;  %v2596_v46 = vadd.f32 1.0, %v1924_v28 }
  0x49   : > { %2074 = vmatpush3.bf16.msra.mxu1 %v2197_v47  ;;  %2051 = vmatprep.subr.bf16.mxu0 %v2198_v48  ;;  %v2600_v47 = vadd.f32 1.0, %v1920_v29 }
  0x4a   : > { %2075 = vmatprep.subr.bf16.mxu1 %v2199_v49 }
  0x4c   : > { %2052 = vmatpush3.bf16.msra.mxu0 %v2198_v48  ;;  %v2604_v48 = vadd.f32 1.0, %v1925_v30 }
  0x4d   : > { %2076 = vmatpush3.bf16.msra.mxu1 %v2199_v49  ;;  %2085 = vmatprep.subr.bf16.mxu0 %v2202_v51  ;;  %v2608_v49 = vadd.f32 1.0, %v1933_v31 }
  0x4e   : > { %2109 = vmatprep.subr.bf16.mxu1 %v2204_v52 }
  0x4f   : > { %2054 = vmatmul.mubr.bf16.vlgmr.msra.gmra.mrb[0].mxu0 %v2201_v50 }
  0x50   : > { %2086 = vmatpush3.bf16.msra.mxu0 %v2202_v51  ;;  %2078 = vmatmul.mubr.bf16.vlgmr.msra.gmra.mrb[0].mxu1 %v2205_v53  ;;  %v2614_v53 = vadd.f32 1.0, %v1921_v33 }
  0x51   : > { %2110 = vmatpush3.bf16.msra.mxu1 %v2204_v52  ;;  %2087 = vmatprep.subr.bf16.mxu0 %v2206_v54 }
  0x52   : > { %2111 = vmatprep.subr.bf16.mxu1 %v2207_v55  ;;  %2057 = vmatprep.mubr.bf16.mxu0 %v2214_v56 }
  0x53   : > { %2081 = vmatprep.mubr.bf16.mxu1 %v2216_v57 }
  0x54   : > { %2088 = vmatpush3.bf16.msra.mxu0 %v2206_v54  ;;  %v2618_v54 = vadd.f32 1.0, %v1929_v34 }
  0x55   : > { %2112 = vmatpush3.bf16.msra.mxu1 %v2207_v55  ;;  %2089 = vmatprep.subr.bf16.mxu0 %v2208_v58  ;;  %v1936_v55 = vunpack.c.l.bf16 %v2576_v39 }
  0x56   : > { %2113 = vmatprep.subr.bf16.mxu1 %v2209_v59 }
  0x57   : > { %2058 = vmatmul.mubr.bf16.gmra.mrb[4].mxu0 %v2215_v61  ;;  %v1937_v61 = vunpack.c.h.bf16 %v2576_v39 }
  0x58   : > { %2090 = vmatpush3.bf16.msra.mxu0 %v2208_v58  ;;  %2082 = vmatmul.mubr.bf16.gmra.mrb[4].mxu1 %v2218_v62 }
  0x59   : > { %2114 = vmatpush3.bf16.msra.mxu1 %v2209_v59  ;;  %2091 = vmatprep.subr.bf16.mxu0 %v2210_v60 }
  0x5a   : > { %2115 = vmatprep.subr.bf16.mxu1 %v2211_v63  ;;  %2101 = vmatprep.mubr.bf16.mxu0 %v2224_v0 }
  0x5b   : > { %2125 = vmatprep.mubr.bf16.mxu1 %v2226_v1 }
  0x5c   : > { %2092 = vmatpush3.bf16.msra.mxu0 %v2210_v60  ;;  %v1941_v60 = vunpack.c.h.bf16 %v2562_v32 }
  0x5d   : > { %2116 = vmatpush3.bf16.msra.mxu1 %v2211_v63  ;;  %2093 = vmatprep.subr.bf16.mxu0 %v2212_v2 }
  0x5e   : > { %2117 = vmatprep.subr.bf16.mxu1 %v2213_v3 }
  0x60   : > { %2094 = vmatpush3.bf16.msra.mxu0 %v2212_v2 }
  0x61   : > { %2118 = vmatpush3.bf16.msra.mxu1 %v2213_v3  ;;  %2095 = vmatprep.subr.bf16.mxu0 %v2217_v4  ;;  %v2630_v3 = vadd.f32 1.0, %v1940_v44 }
  0x62   : > { %2119 = vmatprep.subr.bf16.mxu1 %v2219_v5 }
  0x64   : > { %2096 = vmatpush3.bf16.msra.mxu0 %v2217_v4 }
  0x65   : > { %2120 = vmatpush3.bf16.msra.mxu1 %v2219_v5  ;;  %2097 = vmatprep.subr.bf16.mxu0 %v2220_v6 }
  0x66   : > { %2121 = vmatprep.subr.bf16.mxu1 %v2221_v7 }
  0x68   : > { %2098 = vmatpush3.bf16.msra.mxu0 %v2220_v6 }
  0x69   : > { %2122 = vmatpush3.bf16.msra.mxu1 %v2221_v7  ;;  %2099 = vmatprep.subr.bf16.mxu0 %v2222_v8 }
  0x6a   : > { %2123 = vmatprep.subr.bf16.mxu1 %v2223_v9 }
  0x6c   : > { %2100 = vmatpush3.bf16.msra.mxu0 %v2222_v8 }
  0x6d   : > { %2124 = vmatpush3.bf16.msra.mxu1 %v2223_v9 }
  0x6f   : > { %2102 = vmatmul.mubr.bf16.vlgmr.msra.gmra.mrb[8].mxu0 %v2225_v10 }
  0x70   : > { %2126 = vmatmul.mubr.bf16.vlgmr.msra.gmra.mrb[8].mxu1 %v2227_v11  ;;  %2105 = vmatprep.mubr.bf16.mxu0 %v2228_v12 }
  0x71   : > { %2129 = vmatprep.mubr.bf16.mxu1 %v2230_v13 }
  0x77   : > { %2106 = vmatmul.mubr.bf16.gmra.mrb[12].mxu0 %v2229_v14 }
  0x78   : > { %2130 = vmatmul.mubr.bf16.gmra.mrb[12].mxu1 %v2231_v15 }
 0x122   : > { %v2055_v45 = vpop.f32.mrb[0].mxu0 }
 0x123   : > { %v758_v50 = vmul.f32 %v2055_v45, %v2569_v35  ;;  %v719_v51 = vpop.f32.mrb[1].mxu0  ;;  %v2079_v52 = vpop.f32.mrb[0].mxu1 }
 0x124   : > { %v756_v56 = vmul.f32 %v2569_v35, %v719_v51  ;;  %v2056_v57 = vpop.f32.mrb[2].mxu0  ;;  %v1022_v58 = vmul.f32 %v2079_v52, %v2569_v35  ;;  %v989_v59 = vpop.f32.mrb[1].mxu1 }
 0x125   : > { %v772_v62 = vadd.f32 %v2581_v40, %v758_v50  ;;  %v759_v63 = vmul.f32 %v2056_v57, %v2569_v35  ;;  %v722_v0 = vpop.f32.mrb[3].mxu0  ;;  %v1020_v1 = vmul.f32 %v2569_v35, %v989_v59  ;;  %v2080_v2 = vpop.f32.mrb[2].mxu1 }
 0x126   : > { %v770_v4 = vadd.f32 %v2581_v40, %v756_v56  ;;  %v1030_v5 = vadd.f32 %v2581_v40, %v1022_v58  ;;  %v757_v6 = vmul.f32 %v2569_v35, %v722_v0  ;;  %v1023_v7 = vmul.f32 %v2080_v2, %v2569_v35  ;;  %v992_v8 = vpop.f32.mrb[3].mxu1 }
 0x127   : > { %vm796_vm0 = vcmp.ge.f32.partialorder %v772_v62, 1.0  ;;  %v773_v9 = vadd.f32 %v2581_v40, %v759_v63  ;;  %v1028_v10 = vadd.f32 %v2581_v40, %v1020_v1  ;;  %v1021_v11 = vmul.f32 %v2569_v35, %v992_v8 }
 0x128   : > { %v804_v12 = vsel %vm796_vm0, 0.0, %v772_v62  ;;  %v844_v13 = vsel %vm796_vm0, %v836_v36, %v1916_v22  ;;  %vm794_vm1 = vcmp.ge.f32.partialorder %v770_v4, 1.0  ;;  %v771_v14 = vadd.f32 %v2581_v40, %v757_v6 }
 0x129   : > { %852 = vst [vmem:[%s2642_s6 + $0x10] sm:$0xff] %v844_v13  ;;  %v802_v15 = vsel %vm794_vm1, 0.0, %v770_v4  ;;  %v842_v45 = vsel %vm794_vm1, %v834_v37, %v1912_v23  ;;  %vm797_vm2 = vcmp.ge.f32.partialorder %v773_v9, 1.0  ;;  %v2647_v50 = vadd.f32 %v1030_v5, %v804_v12 }
 0x12a   : > { %850 = vst [vmem:[%s2642_s6] sm:$0xff] %v842_v45  ;;  %v805_v22 = vsel %vm797_vm2, 0.0, %v773_v9  ;;  %v845_v36 = vsel %vm797_vm2, %v837_v38, %v1917_v24  ;;  %vm795_vm3 = vcmp.ge.f32.partialorder %v771_v14, 1.0  ;;  %v2652_v51 = vadd.f32 %v1028_v10, %v802_v15  ;;  %v2059_v52 = vpop.f32.mrb[4].mxu0 }
 0x12b   : > { %853 = vst [vmem:[%s2642_s6 + $0x18] sm:$0xff] %v845_v36  ;;  %v803_v56 = vsel %vm795_vm3, 0.0, %v771_v14  ;;  %v843_v57 = vsel %vm795_vm3, %v835_v41, %v1913_v25  ;;  %v1031_v23 = vadd.f32 %v2581_v40, %v1023_v7  ;;  %v1029_v37 = vadd.f32 %v2581_v40, %v1021_v11  ;;  %v735_v58 = vpop.f32.mrb[5].mxu0  ;;  %v2083_v59 = vpop.f32.mrb[4].mxu1 }
 0x12c   : > { %851 = vst [vmem:[%s2642_s6 + $0x8] sm:$0xff] %v843_v57  ;;  %v762_v62 = vmul.f32 %v2059_v52, %v2569_v35  ;;  %v760_v16 = vmul.f32 %v2569_v35, %v735_v58  ;;  %v2060_v24 = vpop.f32.mrb[6].mxu0  ;;  %v1026_v38 = vmul.f32 %v2083_v59, %v2569_v35  ;;  %v1005_v63 = vpop.f32.mrb[5].mxu1  ;;  %v1097_v0 = vadd.f32 1.0, %v1936_v55  ;;  %v2782_v58 = vld [vmem:[%s2531_s17 + $0x78] sm:$0xff]   ;;  %v2786_v59 = vld [vmem:[%s2531_s17 + $0x70] sm:$0xff]  }
 0x12d   : > { %v2665_v17 = vadd.f32 %v1031_v23, %v805_v22  ;;  %v2667_v25 = vadd.f32 %v1029_v37, %v803_v56  ;;  %v763_v41 = vmul.f32 %v2060_v24, %v2569_v35  ;;  %v738_v1 = vpop.f32.mrb[7].mxu0  ;;  %v1024_v2 = vmul.f32 %v2569_v35, %v1005_v63  ;;  %v2084_v4 = vpop.f32.mrb[6].mxu1 }
 0x12e   : > { %v776_v5 = vadd.f32 %v2581_v40, %v762_v62  ;;  %v774_v6 = vadd.f32 %v2581_v40, %v760_v16  ;;  %v1034_v7 = vadd.f32 %v2581_v40, %v1026_v38  ;;  %v761_v8 = vmul.f32 %v2569_v35, %v738_v1  ;;  %v1008_v9 = vpop.f32.mrb[7].mxu1 }
 0x12f   : > { %v777_v10 = vadd.f32 %v2581_v40, %v763_v41  ;;  %v1032_v11 = vadd.f32 %v2581_v40, %v1024_v2  ;;  %v1027_v12 = vmul.f32 %v2084_v4, %v2569_v35  ;;  %vm1054_vm4 = vcmp.ge.f32.partialorder %v2647_v50, 1.0 }
 0x130   : > { %vm800_vm5 = vcmp.ge.f32.partialorder %v776_v5, 1.0  ;;  %vm798_vm6 = vcmp.ge.f32.partialorder %v774_v6, 1.0  ;;  %v775_v13 = vadd.f32 %v2581_v40, %v761_v8  ;;  %v1025_v14 = vmul.f32 %v2569_v35, %v1008_v9 }
 0x131   : > { %v808_v15 = vsel %vm800_vm5, 0.0, %v776_v5  ;;  %v848_v45 = vsel %vm800_vm5, %v2596_v46, %v1924_v28  ;;  %v806_v22 = vsel %vm798_vm6, 0.0, %v774_v6  ;;  %v846_v36 = vsel %vm798_vm6, %v2600_v47, %v1920_v29 }
 0x132   : > { %856 = vst [vmem:[%s2642_s6 + $0x30] sm:$0xff] %v848_v45  ;;  %854 = vst [vmem:[%s2642_s6 + $0x20] sm:$0xff] %v846_v36  ;;  %vm801_vm7 = vcmp.ge.f32.partialorder %v777_v10, 1.0  ;;  %v2689_v52 = vadd.f32 %v1034_v7, %v808_v15  ;;  %vm799_vm8 = vcmp.ge.f32.partialorder %v775_v13, 1.0  ;;  %v2691_v56 = vadd.f32 %v1032_v11, %v806_v22 }
 0x133   : > { %v809_v57 = vsel %vm801_vm7, 0.0, %v777_v10  ;;  %v849_v23 = vsel %vm801_vm7, %v2604_v48, %v1925_v30  ;;  %v807_v28 = vsel %vm799_vm8, 0.0, %v775_v13  ;;  %v847_v29 = vsel %vm799_vm8, %v2614_v53, %v1921_v33  ;;  %v2743_v48 = vld [vmem:[%s2531_s17 + $0x68] sm:$0xff]   ;;  %v2766_v53 = vld [vmem:[%s2531_s17 + $0x58] sm:$0xff]  }
 0x134   : > { %857 = vst [vmem:[%s2642_s6 + $0x38] sm:$0xff] %v849_v23  ;;  %855 = vst [vmem:[%s2642_s6 + $0x28] sm:$0xff] %v847_v29  ;;  %v1035_v46 = vadd.f32 %v2581_v40, %v1027_v12  ;;  %v1033_v47 = vadd.f32 %v2581_v40, %v1025_v14  ;;  %v1103_v20 = vsel %vm1054_vm4, %v2587_v42, %v1932_v26  ;;  %vm1052_vm9 = vcmp.ge.f32.partialorder %v2652_v51, 1.0 }
 0x135   : > { %1824 = vst [vmem:[%s2642_s6 + $0x50] sm:$0xff] %v1103_v20  ;;  %v1101_v21 = vsel %vm1052_vm9, %v2591_v43, %v1928_v27  ;;  %vm1055_vm10 = vcmp.ge.f32.partialorder %v2665_v17, 1.0  ;;  %vm1053_vm11 = vcmp.ge.f32.partialorder %v2667_v25, 1.0  ;;  %v1100_v26 = vadd.f32 1.0, %v1941_v60 }
 0x136   : > { %v2719_v30 = vadd.f32 %v1035_v46, %v809_v57  ;;  %v2721_v33 = vadd.f32 %v1033_v47, %v807_v28  ;;  %1822 = vst [vmem:[%s2642_s6 + $0x40] sm:$0xff] %v1101_v21  ;;  %v1104_v27 = vsel %vm1055_vm10, %v2608_v49, %v1933_v31  ;;  %v1098_v42 = vadd.f32 1.0, %v1937_v61  ;;  %v2759_v49 = vld [vmem:[%s2531_s17 + $0x60] sm:$0xff]  }
 0x137   : > { %1825 = vst [vmem:[%s2642_s6 + $0x58] sm:$0xff] %v1104_v27  ;;  %v1102_v43 = vsel %vm1053_vm11, %v2618_v54, %v1929_v34  ;;  %vm1058_vm12 = vcmp.ge.f32.partialorder %v2689_v52, 1.0  ;;  %vm1056_vm13 = vcmp.ge.f32.partialorder %v2691_v56, 1.0  ;;  %v2756_v34 = vld [vmem:[%s2531_s17 + $0x40] sm:$0xff]   ;;  %v2773_v54 = vld [vmem:[%s2531_s17 + $0x50] sm:$0xff]   ;;  %v1964_v37 = vunpack.c.l.bf16 %v2743_v48 }
 0x138   : > { %1823 = vst [vmem:[%s2642_s6 + $0x48] sm:$0xff] %v1102_v43  ;;  %v1107_v19 = vsel %vm1058_vm12, %v2630_v3, %v1940_v44  ;;  %v1105_v31 = vsel %vm1056_vm13, %v1097_v0, %v1936_v55  ;;  %vm1059_vm14 = vcmp.ge.f32.partialorder %v2719_v30, 1.0  ;;  %vm1057_vm15 = vcmp.ge.f32.partialorder %v2721_v33, 1.0 }
 0x139   : > { %1828 = vst [vmem:[%s2642_s6 + $0x70] sm:$0xff] %v1107_v19  ;;  %1826 = vst [vmem:[%s2642_s6 + $0x60] sm:$0xff] %v1105_v31  ;;  %v1108_v44 = vsel %vm1059_vm14, %v1100_v26, %v1941_v60  ;;  %v1106_v55 = vsel %vm1057_vm15, %v1098_v42, %v1937_v61  ;;  %v1948_v3 = vunpack.c.l.bf16 %v2740_v18  ;;  %v1944_v32 = vunpack.c.l.bf16 %v2756_v34 }
 0x13a   : > { %1829 = vst [vmem:[%s2642_s6 + $0x78] sm:$0xff] %v1108_v44  ;;  %1827 = vst [vmem:[%s2642_s6 + $0x68] sm:$0xff] %v1106_v55  ;;  %v1960_v60 = vunpack.c.l.bf16 %v2759_v49  ;;  %v1949_v62 = vunpack.c.h.bf16 %v2740_v18  ;;  %v1965_v39 = vunpack.c.h.bf16 %v2743_v48  ;;  %v1945_v61 = vunpack.c.h.bf16 %v2756_v34 }
 0x13b   : > { %v1961_v16 = vunpack.c.h.bf16 %v2759_v49  ;;  %v1956_v24 = vunpack.c.l.bf16 %v2766_v53  ;;  %v1952_v38 = vunpack.c.l.bf16 %v2773_v54  ;;  %v1972_v63 = vunpack.c.l.bf16 %v2782_v58 }
 0x13c   : > { %v1968_v0 = vunpack.c.l.bf16 %v2786_v59  ;;  %v1957_v41 = vunpack.c.h.bf16 %v2766_v53  ;;  %v3021_v1 = vunpack.c.h.bf16 %v2773_v54  ;;  %v1355_v2 = vadd.f32 1.0, %v1948_v3 }
 0x13d   : > { %v2805_v4 = vadd.f32 1.0, %v1964_v37  ;;  %v3020_v5 = vunpack.c.h.bf16 %v2782_v58  ;;  %v1353_v6 = vadd.f32 1.0, %v1944_v32  ;;  %v2812_v7 = vadd.f32 1.0, %v1960_v60 }
 0x13e   : > { %v1356_v8 = vadd.f32 1.0, %v1949_v62  ;;  %v2818_v9 = vadd.f32 1.0, %v1965_v39  ;;  %v2822_v10 = vadd.f32 1.0, %v1945_v61  ;;  %v2826_v11 = vadd.f32 1.0, %v1961_v16 }
 0x13f   : > { %v2830_v12 = vadd.f32 1.0, %v1956_v24  ;;  %v2834_v13 = vadd.f32 1.0, %v1952_v38  ;;  %v2838_v15 = vadd.f32 1.0, %v1972_v63  ;;  %v2842_v45 = vadd.f32 1.0, %v1968_v0 }
 0x140   : > { %v2846_v22 = vadd.f32 1.0, %v1957_v41  ;;  %v2850_v36 = vadd.f32 1.0, %v3021_v1  ;;  %v1062_v57 = vsel %vm1054_vm4, 0.0, %v2647_v50  ;;  %v2858_v46 = vadd.f32 1.0, %v3020_v5 }
 0x141   : > { %v1969_v47 = vunpack.c.h.bf16 %v2786_v59  ;;  %v1060_v20 = vsel %vm1052_vm9, 0.0, %v2652_v51  ;;  %v1063_v50 = vsel %vm1055_vm10, 0.0, %v2665_v17  ;;  %v1061_v51 = vsel %vm1053_vm11, 0.0, %v2667_v25 }
 0x142   : > { %v2103_v14 = vpop.f32.mrb[8].mxu0  ;;  %v3025_v53 = vunpack.c.h.bf16 %v2773_v54 }
 0x143   : > { %v1282_v23 = vmul.f32 %v2103_v14, %v2569_v35  ;;  %v1249_v28 = vpop.f32.mrb[9].mxu0  ;;  %v2127_v29 = vpop.f32.mrb[8].mxu1 }
 0x144   : > { %v1280_v21 = vmul.f32 %v2569_v35, %v1249_v28  ;;  %v1542_v26 = vmul.f32 %v2127_v29, %v2569_v35  ;;  %v2104_v27 = vpop.f32.mrb[10].mxu0  ;;  %v1509_v42 = vpop.f32.mrb[9].mxu1 }
 0x145   : > { %v1290_v43 = vadd.f32 %v2581_v40, %v1282_v23  ;;  %v1283_v19 = vmul.f32 %v2104_v27, %v2569_v35  ;;  %v1540_v31 = vmul.f32 %v2569_v35, %v1509_v42  ;;  %v1252_v44 = vpop.f32.mrb[11].mxu0  ;;  %v2128_v55 = vpop.f32.mrb[10].mxu1  ;;  %v1066_v23 = vsel %vm1058_vm12, 0.0, %v2689_v52 }
 0x146   : > { %v1288_v14 = vadd.f32 %v2581_v40, %v1280_v21  ;;  %v1281_v28 = vmul.f32 %v2569_v35, %v1252_v44  ;;  %v1543_v17 = vmul.f32 %v2128_v55, %v2569_v35  ;;  %v1512_v29 = vpop.f32.mrb[11].mxu1  ;;  %v1550_v42 = vadd.f32 %v2581_v40, %v1542_v26 }
 0x147   : > { %v1306_v27 = vadd.f32 %v1290_v43, %v1062_v57  ;;  %v1291_v5 = vadd.f32 %v2581_v40, %v1283_v19  ;;  %v1541_v25 = vmul.f32 %v2569_v35, %v1512_v29  ;;  %v1548_v21 = vadd.f32 %v2581_v40, %v1540_v31 }
 0x148   : > { %v1304_v1 = vadd.f32 %v1288_v14, %v1060_v20  ;;  %v1289_v44 = vadd.f32 %v2581_v40, %v1281_v28  ;;  %v1064_v55 = vsel %vm1056_vm13, 0.0, %v2691_v56  ;;  %v1551_v57 = vadd.f32 %v2581_v40, %v1543_v17 }
 0x149   : > { %vm1314_vm0 = vcmp.ge.f32.partialorder %v1306_v27, 1.0  ;;  %v1307_v52 = vadd.f32 %v1291_v5, %v1063_v50  ;;  %v1549_v26 = vadd.f32 %v2581_v40, %v1541_v25 }
 0x14a   : > { %v1322_v43 = vsel %vm1314_vm0, 0.0, %v1306_v27  ;;  %v1363_v19 = vsel %vm1314_vm0, %v1355_v2, %v1948_v3  ;;  %vm1312_vm1 = vcmp.ge.f32.partialorder %v1304_v1, 1.0  ;;  %v1305_v20 = vadd.f32 %v1289_v44, %v1061_v51  ;;  %v2107_v31 = vpop.f32.mrb[12].mxu0 }
 0x14b   : > { %1860 = vst [vmem:[%s2642_s6 + $0x90] sm:$0xff] %v1363_v19  ;;  %v1566_v14 = vadd.f32 %v1550_v42, %v1322_v43  ;;  %v1320_v28 = vsel %vm1312_vm1, 0.0, %v1304_v1  ;;  %v1361_v56 = vsel %vm1312_vm1, %v1353_v6, %v1944_v32  ;;  %vm1315_vm2 = vcmp.ge.f32.partialorder %v1307_v52, 1.0  ;;  %v1265_v5 = vpop.f32.mrb[13].mxu0  ;;  %v2131_v50 = vpop.f32.mrb[12].mxu1 }
 0x14c   : > { %1858 = vst [vmem:[%s2642_s6 + $0x80] sm:$0xff] %v1361_v56  ;;  %v1564_v17 = vadd.f32 %v1548_v21, %v1320_v28  ;;  %v1323_v29 = vsel %vm1315_vm2, 0.0, %v1307_v52  ;;  %v1364_v3 = vsel %vm1315_vm2, %v1356_v8, %v1949_v62  ;;  %vm1313_vm3 = vcmp.ge.f32.partialorder %v1305_v20, 1.0  ;;  %v2108_v2 = vpop.f32.mrb[14].mxu0  ;;  %v1525_v51 = vpop.f32.mrb[13].mxu1 }
 0x14d   : > { %vm1574_vm4 = vcmp.ge.f32.partialorder %v1566_v14, 1.0  ;;  %1861 = vst [vmem:[%s2642_s6 + $0x98] sm:$0xff] %v1364_v3  ;;  %v1567_v1 = vadd.f32 %v1551_v57, %v1323_v29  ;;  %v1321_v27 = vsel %vm1313_vm3, 0.0, %v1305_v20  ;;  %v1362_v32 = vsel %vm1313_vm3, %v2822_v10, %v1945_v61  ;;  %v1268_v6 = vpop.f32.mrb[15].mxu0  ;;  %v2132_v42 = vpop.f32.mrb[14].mxu1 }
 0x14e   : > { %v1623_v18 = vsel %vm1574_vm4, %v2805_v4, %v1964_v37  ;;  %vm1572_vm5 = vcmp.ge.f32.partialorder %v1564_v17, 1.0  ;;  %1859 = vst [vmem:[%s2642_s6 + $0x88] sm:$0xff] %v1362_v32  ;;  %v1565_v62 = vadd.f32 %v1549_v26, %v1321_v27  ;;  %v1286_v8 = vmul.f32 %v2107_v31, %v2569_v35  ;;  %v1528_v25 = vpop.f32.mrb[15].mxu1 }
 0x14f   : > { %1896 = vst [vmem:[%s2642_s6 + $0xd0] sm:$0xff] %v1623_v18  ;;  %v1621_v34 = vsel %vm1572_vm5, %v2812_v7, %v1960_v60  ;;  %vm1575_vm6 = vcmp.ge.f32.partialorder %v1567_v1, 1.0  ;;  %v1284_v61 = vmul.f32 %v2569_v35, %v1265_v5  ;;  %v1546_v10 = vmul.f32 %v2131_v50, %v2569_v35 }
 0x150   : > { %1894 = vst [vmem:[%s2642_s6 + $0xc0] sm:$0xff] %v1621_v34  ;;  %v1624_v37 = vsel %vm1575_vm6, %v2818_v9, %v1965_v39  ;;  %vm1573_vm7 = vcmp.ge.f32.partialorder %v1565_v62, 1.0  ;;  %v1294_v4 = vadd.f32 %v2581_v40, %v1286_v8  ;;  %v1287_v21 = vmul.f32 %v2108_v2, %v2569_v35 }
 0x151   : > { %1897 = vst [vmem:[%s2642_s6 + $0xd8] sm:$0xff] %v1624_v37  ;;  %v1622_v60 = vsel %vm1573_vm7, %v2826_v11, %v1961_v16  ;;  %v1292_v7 = vadd.f32 %v2581_v40, %v1284_v61  ;;  %v1067_v44 = vsel %vm1059_vm14, 0.0, %v2719_v30  ;;  %v1544_v48 = vmul.f32 %v2569_v35, %v1525_v51 }
 0x152   : > { %1895 = vst [vmem:[%s2642_s6 + $0xc8] sm:$0xff] %v1622_v60  ;;  %v1310_v39 = vadd.f32 %v1294_v4, %v1066_v23  ;;  %v1554_v9 = vadd.f32 %v2581_v40, %v1546_v10  ;;  %v1295_v52 = vadd.f32 %v2581_v40, %v1287_v21  ;;  %v1285_v57 = vmul.f32 %v2569_v35, %v1268_v6 }
 0x153   : > { %v1308_v49 = vadd.f32 %v1292_v7, %v1064_v55  ;;  %v1552_v16 = vadd.f32 %v2581_v40, %v1544_v48  ;;  %v1547_v11 = vmul.f32 %v2132_v42, %v2569_v35  ;;  %v1545_v26 = vmul.f32 %v2569_v35, %v1528_v25 }
 0x154   : > { %vm1318_vm8 = vcmp.ge.f32.partialorder %v1310_v39, 1.0  ;;  %v1311_v30 = vadd.f32 %v1295_v52, %v1067_v44  ;;  %v1293_v43 = vadd.f32 %v2581_v40, %v1285_v57  ;;  %v1618_v23 = vadd.f32 1.0, %v1969_v47 }
 0x155   : > { %v1326_v19 = vsel %vm1318_vm8, 0.0, %v1310_v39  ;;  %v1367_v20 = vsel %vm1318_vm8, %v2830_v12, %v1956_v24  ;;  %vm1316_vm9 = vcmp.ge.f32.partialorder %v1308_v49, 1.0  ;;  %v1065_v55 = vsel %vm1057_vm15, 0.0, %v2721_v33 }
 0x156   : > { %1864 = vst [vmem:[%s2642_s6 + $0xb0] sm:$0xff] %v1367_v20  ;;  %v1570_v35 = vadd.f32 %v1554_v9, %v1326_v19  ;;  %v1324_v31 = vsel %vm1316_vm9, 0.0, %v1308_v49  ;;  %v1365_v14 = vsel %vm1316_vm9, %v2834_v13, %v1952_v38  ;;  %v1309_v28 = vadd.f32 %v1293_v43, %v1065_v55 }
 0x157   : > { %1862 = vst [vmem:[%s2642_s6 + $0xa0] sm:$0xff] %v1365_v14  ;;  %v1568_v56 = vadd.f32 %v1552_v16, %v1324_v31  ;;  %vm1319_vm10 = vcmp.ge.f32.partialorder %v1311_v30, 1.0  ;;  %v1555_v24 = vadd.f32 %v2581_v40, %v1547_v11  ;;  %v1553_v12 = vadd.f32 %v2581_v40, %v1545_v26 }
 0x158   : > { %vm1578_vm11 = vcmp.ge.f32.partialorder %v1570_v35, 1.0  ;;  %v1327_v33 = vsel %vm1319_vm10, 0.0, %v1311_v30  ;;  %v1368_v5 = vsel %vm1319_vm10, %v2846_v22, %v1957_v41  ;;  %vm1317_vm12 = vcmp.ge.f32.partialorder %v1309_v28, 1.0 }
 0x159   : > { %v1627_v38 = vsel %vm1578_vm11, %v2838_v15, %v1972_v63  ;;  %vm1576_vm13 = vcmp.ge.f32.partialorder %v1568_v56, 1.0  ;;  %1865 = vst [vmem:[%s2642_s6 + $0xb8] sm:$0xff] %v1368_v5  ;;  %v1571_v13 = vadd.f32 %v1555_v24, %v1327_v33  ;;  %v1325_v50 = vsel %vm1317_vm12, 0.0, %v1309_v28 }
 0x15a   : > { %1900 = vst [vmem:[%s2642_s6 + $0xf0] sm:$0xff] %v1627_v38  ;;  %v1625_v40 = vsel %vm1576_vm13, %v2842_v45, %v1968_v0  ;;  %v1366_v41 = vsel %vm1317_vm12, %v2850_v36, %v3025_v53  ;;  %v1569_v22 = vadd.f32 %v1553_v12, %v1325_v50  ;;  %v3026_v63 = vunpack.c.h.bf16 %v2782_v58 }
 0x15b   : > { %1898 = vst [vmem:[%s2642_s6 + $0xe0] sm:$0xff] %v1625_v40  ;;  %vm1579_vm14 = vcmp.ge.f32.partialorder %v1571_v13, 1.0  ;;  %1863 = vst [vmem:[%s2642_s6 + $0xa8] sm:$0xff] %v1366_v41 }
 0x15c   : > { %v1628_v15 = vsel %vm1579_vm14, %v2858_v46, %v3026_v63  ;;  %vm1577_vm15 = vcmp.ge.f32.partialorder %v1569_v22, 1.0 }
 0x15d   : > { %1901 = vst [vmem:[%s2642_s6 + $0xf8] sm:$0xff] %v1628_v15  ;;  %v1626_v17 = vsel %vm1577_vm15, %v1618_v23, %v1969_v47 }
 0x15e   : > { %1899 = vst [vmem:[%s2642_s6 + $0xe8] sm:$0xff] %v1626_v17 }
 0x15f   : > { %s1909_s8 = sshll.u32 %s1766_s22, 10  ;;  %s1668_s9 = sshll.u32 %s2642_s6, 4  ;;  %s1669_s9 = int_to_ptr.vmem [resolvable:$true] %s1668_s9 }
 0x160   : > { %s1651_s13 = scalar_lea.hbm %s3019_s5, %s1909_s8  ;;  %s2268_s15 = smov 1024  }
 0x161   : > { %2133 = sst [smem:[#allocation8]] (%p2346_p6), %s2268_s15  ;;  %s2269_s14 = smov 2048  }
 0x162   : > { %2134 = sst [smem:[#allocation8 + $0x1]] (%p2346_p6), %s2269_s14  ;;  %s2270_s16 = smov 8  }
 0x163   : > { %2135 = sst [smem:[#allocation8 + $0x2]] (%p2346_p6), %s2270_s16  ;;  %s2271_s17 = smov 128  }
 0x164   : > { %2136 = sst [smem:[#allocation8 + $0x3]] (%p2346_p6), %s2271_s17  ;;  %s2272_s22 = smov [#allocation7]  }
 0x165   : > { %2137 = sst [smem:[#allocation8 + $0x4]] (%p2346_p6), %s2271_s17  ;;  %s2273_s28 = smov 0  }
 0x166   : > { %2138 = sst [smem:[#allocation8 + $0x5]] (%p2346_p6), %s2270_s16 }
 0x167   : > { %2139 = dma.general (%p2346_p6), %s1669_s9, 4096, %s1651_s13, %s1639_s7, %s2272_s22, [#allocation8], %s2273_s28, 0  }
 0x168 PF: > { %s1696_s12 = sand.u32 1, %s2254_s18   ;;  %p2142_p13 = pnand %p1769_p9, %p2350_p8 }
 0x169   : > { %s1697_s23 = scalar_lea.sflag [#allocation6], %s1696_s12 }
 0x16a   : > { %2249 = dma.done.wait (!%p2142_p13), %s1697_s23, 4096  }
 0x16b   : > { %2251 = vsyncadd (!%p2142_p13), %s1697_s23, 4294963200  ;;  %p15_p0 = scmp.ge.s32.totalorder %s2327_s24, 4   ;;  %s3027_s18 = smov %s2258_s19 }
 0x16c   : > { %s3028_s19 = smov %s2262_s20  ;;  %s3029_s20 = smov %s2340_s27 }
 0x16d   : > { %s3030_s21 = smov %s2327_s24  ;;  %17 = sbr.rel (!%p15_p0) target bundleno = 3 (0x3), region = 184 }
 0x174   :  { %1702 = vsyncpa [#allocation6], 1 }
 0x175   :  { %1704 = vsyncpa [#allocation6 + $0x1], 1 }

// kernel: bottleneck_forward.4
= control target key start
LH: loop header
LB: loop body
LE: loop exit
PB: predicated region body
PF: predicated region fallthrough
CT: control target
= control target key end

     0   :  { %s10599_s15 = smov 0   ;;  %s10601_s16 = smov 0   ;;  %s12975_s0 = inlined_call_operand.vmem [shape: bf16[4,2,8,8,128], index: 0, kind: input, shape index: {}]   ;;  %s12976_s1 = inlined_call_operand.vmem [shape: bf16[3,384,128], index: 1, kind: input, shape index: {}]   ;;  %s12977_s2 = inlined_call_operand.vmem [shape: f32[1,128], index: 2, kind: input, shape index: {}]   ;;  %s12978_s3 = inlined_call_operand.vmem [shape: f32[1,128], index: 3, kind: input, shape index: {}]   ;;  %s12979_s4 = inlined_call_operand.vmem [shape: bf16[4,128,128], index: 4, kind: output, shape index: {}]  }
   0x1   :  { %s10603_s17 = smov 0  }
   0x2 LB: > { %s7771_s18 = sadd.s32 4294967295, %s10570_s17   ;;  %s10616_s19 = sadd.s32 1, %s10570_s17   ;;  %s10570_s17 = sphi %s10603_s17, %s12987_s17   ;;  %s10566_s16 = sphi %s10601_s16, %s12986_s16   ;;  %s10562_s15 = sphi %s10599_s15, %s12985_s15  }
   0x3   : > { %s18_s20 = ssub.s32 %s10570_s17, %s10616_s19  ;;  %s21_s21 = sadd.s32 1, %s10566_s16 }
   0x4   : > { %p19_p0 = scmp.eq.s32.totalorder %s18_s20, 0  ;;  %p28_p1 = scmp.ne.s32.totalorder %s10566_s16, %s10562_s15 }
   0x5   : > { %p29_p2 = scmp.eq.s32.totalorder %s10570_s17, 0  ;;  %p121_p3 = scmp.eq.s32.totalorder %s7771_s18, 1 }
   0x6   : > { %s10627_s22 = scalar_select %p19_p0, %s10566_s16, %s21_s21  }
   0x7   : > { %p30_p4 = por %p29_p2, %p28_p1  ;;  %p10629_p5 = por %p121_p3, %p28_p1 }
   0x8   : > { %p7774_p6 = scmp.ge.s32.totalorder %s10570_s17, 2 }
   0xa   : > { %152 = sbr.rel (%p7774_p6) target bundleno = 29 (0x1d), region = 28 }
  0x11   : > { %155 = sbr.rel (!%p30_p4) target bundleno = 29 (0x1d), region = 32  ;;  %s157_s24 = sand.u32 (%p30_p4), 1, %s10566_s16  }
  0x12   : > { %s9008_s25 = sshll.u32 (%p30_p4), %s10570_s17, 5  ;;  %s7775_s26 = sshll.u32 (%p30_p4), %s157_s24, 7 }
  0x13   : > { %s10639_s29 = scalar_lea.vmem (%p30_p4), %s12975_s0, %s9008_s25  ;;  %s159_s30 = scalar_lea.vmem (%p30_p4), [#allocation5], %s7775_s26 }
  0x14   : > { %v178_v0 = vld [vmem:[%s10639_s29] sm:$0xff] (%p30_p4)   ;;  %v182_v1 = vld [vmem:[%s10639_s29 + $0x8] sm:$0xff] (%p30_p4)   ;;  %v186_v2 = vld [vmem:[%s10639_s29 + $0x10] sm:$0xff] (%p30_p4)  }
  0x15   : > { %179 = vst [vmem:[%s159_s30] sm:$0xff] (%p30_p4), %v178_v0   ;;  %183 = vst [vmem:[%s159_s30 + $0x8] sm:$0xff] (%p30_p4), %v182_v1   ;;  %v190_v3 = vld [vmem:[%s10639_s29 + $0x18] sm:$0xff] (%p30_p4)   ;;  %v194_v4 = vld [vmem:[%s10639_s29 + $0x40] sm:$0xff] (%p30_p4)  }
  0x16   : > { %187 = vst [vmem:[%s159_s30 + $0x10] sm:$0xff] (%p30_p4), %v186_v2   ;;  %v198_v5 = vld [vmem:[%s10639_s29 + $0x48] sm:$0xff] (%p30_p4)   ;;  %191 = vst [vmem:[%s159_s30 + $0x18] sm:$0xff] (%p30_p4), %v190_v3   ;;  %v202_v6 = vld [vmem:[%s10639_s29 + $0x50] sm:$0xff] (%p30_p4)  }
  0x17   : > { %195 = vst [vmem:[%s159_s30 + $0x20] sm:$0xff] (%p30_p4), %v194_v4   ;;  %199 = vst [vmem:[%s159_s30 + $0x28] sm:$0xff] (%p30_p4), %v198_v5   ;;  %v206_v7 = vld [vmem:[%s10639_s29 + $0x58] sm:$0xff] (%p30_p4)   ;;  %v210_v8 = vld [vmem:[%s10639_s29 + $0x80] sm:$0xff] (%p30_p4)  }
  0x18   : > { %203 = vst [vmem:[%s159_s30 + $0x30] sm:$0xff] %v202_v6   ;;  %207 = vst [vmem:[%s159_s30 + $0x38] sm:$0xff] %v206_v7   ;;  %v214_v9 = vld [vmem:[%s10639_s29 + $0x88] sm:$0xff]   ;;  %v218_v10 = vld [vmem:[%s10639_s29 + $0x90] sm:$0xff]  }
  0x19   : > { %211 = vst [vmem:[%s159_s30 + $0x40] sm:$0xff] %v210_v8   ;;  %v222_v11 = vld [vmem:[%s10639_s29 + $0x98] sm:$0xff]   ;;  %215 = vst [vmem:[%s159_s30 + $0x48] sm:$0xff] %v214_v9   ;;  %v226_v12 = vld [vmem:[%s10639_s29 + $0xc0] sm:$0xff]  }
  0x1a   : > { %219 = vst [vmem:[%s159_s30 + $0x50] sm:$0xff] %v218_v10   ;;  %223 = vst [vmem:[%s159_s30 + $0x58] sm:$0xff] %v222_v11   ;;  %v230_v13 = vld [vmem:[%s10639_s29 + $0xc8] sm:$0xff]   ;;  %v234_v14 = vld [vmem:[%s10639_s29 + $0xd0] sm:$0xff]  }
  0x1b   : > { %227 = vst [vmem:[%s159_s30 + $0x60] sm:$0xff] %v226_v12   ;;  %231 = vst [vmem:[%s159_s30 + $0x68] sm:$0xff] %v230_v13   ;;  %v238_v15 = vld [vmem:[%s10639_s29 + $0xd8] sm:$0xff]  }
  0x1c   : > { %235 = vst [vmem:[%s159_s30 + $0x70] sm:$0xff] %v234_v14   ;;  %239 = vst [vmem:[%s159_s30 + $0x78] sm:$0xff] %v238_v15  }
  0x1d PF: > { %p7778_p7 = scmp.ge.s32.totalorder %s10570_s17, 1  ;;  %p327_p8 = scmp.lt.s32.totalorder %s10570_s17, 3 }
  0x1f   : > { %p328_p9 = pnand %p7778_p7, %p327_p8 }
  0x20   : > { %v10203_v16 = vld [vmem:[%s12976_s1 + $0x40] sm:$0xff] (!%p328_p9)   ;;  %v10206_v19 = vld [vmem:[%s12976_s1 + $0x48] sm:$0xff] (!%p328_p9)   ;;  %v10572_v21 = vmov (!%p328_p9), 0   ;;  %v10209_v23 = vld [vmem:[%s12976_s1 + $0x50] sm:$0xff] (!%p328_p9)   ;;  %s334_s21 = sand.u32 (!%p328_p9), 1, %s10562_s15   ;;  %vm364_vm0 = vcmask (!%p328_p9), 1040384  }
  0x21   : > { %331 = sbr.rel (%p328_p9) target bundleno = 720 (0x2d0), region = 73  ;;  %v10204_v17 = vld [vmem:[%s12976_s1 + $0x80] sm:$0xff] (!%p328_p9)   ;;  %9105 = vmatprep.subr.bf16.mxu0 (!%p328_p9), %v10203_v16  ;;  %v10207_v20 = vld [vmem:[%s12976_s1 + $0x88] sm:$0xff] (!%p328_p9)   ;;  %362 = vst [vmem:[#allocation2] sm:$0xf] (!%p328_p9), %v10572_v21  ;;  %v10210_v24 = vld [vmem:[%s12976_s1 + $0x90] sm:$0xff] (!%p328_p9)  }
  0x22   : > { %v10205_v18 = vld [vmem:[%s12976_s1] sm:$0xff] (!%p328_p9)   ;;  %9729 = vmatprep.subr.bf16.mxu1 (!%p328_p9), %v10204_v17  ;;  %363 = vst [vmem:[#allocation2 + $0x4] sm:$0xf] (!%p328_p9), %v10572_v21  ;;  %370 = vst [vmem:[#allocation2 + $0xc] sm:$0xf] (!%p328_p9), %v10572_v21  ;;  %v10208_v22 = vld [vmem:[%s12976_s1 + $0x8] sm:$0xff] (!%p328_p9)  }
  0x23   : > { %9106 = vmatpush3.bf16.msra.mxu0 (!%p328_p9), %v10205_v18  ;;  %9730 = vmatpush3.bf16.msra.mxu1 (!%p328_p9), %v10204_v17  ;;  %371 = vst [vmem:[#allocation2 + $0x10] sm:$0xf] (!%p328_p9), %v10572_v21  ;;  %375 = vst [vmem:[#allocation2 + $0x18] sm:$0xf] (!%p328_p9), %v10572_v21  ;;  %v10211_v25 = vld [vmem:[%s12976_s1 + $0x10] sm:$0xff] (!%p328_p9)   ;;  %v10212_v26 = vld [vmem:[%s12976_s1 + $0x58] sm:$0xff] (!%p328_p9)  }
  0x24   : > { %376 = vst [vmem:[#allocation2 + $0x1c] sm:$0xf] (!%p328_p9), %v10572_v21  ;;  %380 = vst [vmem:[#allocation2 + $0x24] sm:$0xf] (!%p328_p9), %v10572_v21  ;;  %9107 = vmatprep.subr.bf16.mxu0 (!%p328_p9), %v10206_v19  ;;  %9731 = vmatprep.subr.bf16.mxu1 (!%p328_p9), %v10207_v20  ;;  %v10213_v27 = vld [vmem:[%s12976_s1 + $0x98] sm:$0xff] (!%p328_p9)   ;;  %v10215_v29 = vld [vmem:[%s12976_s1 + $0x60] sm:$0xff] (!%p328_p9)  }
  0x25   : > { %381 = vst [vmem:[#allocation2 + $0x28] sm:$0xf] (!%p328_p9), %v10572_v21  ;;  %385 = vst [vmem:[#allocation2 + $0x30] sm:$0xf] (!%p328_p9), %v10572_v21  ;;  %v10214_v28 = vld [vmem:[%s12976_s1 + $0x18] sm:$0xff] (!%p328_p9)   ;;  %v10216_v30 = vld [vmem:[%s12976_s1 + $0xa0] sm:$0xff] (!%p328_p9)  }
  0x26   : > { %386 = vst [vmem:[#allocation2 + $0x34] sm:$0xf] (!%p328_p9), %v10572_v21  ;;  %390 = vst [vmem:[#allocation2 + $0x3c] sm:$0xf] (!%p328_p9), %v10572_v21  ;;  %v10217_v31 = vld [vmem:[%s12976_s1 + $0x20] sm:$0xff] (!%p328_p9)   ;;  %v10218_v32 = vld [vmem:[%s12976_s1 + $0x68] sm:$0xff] (!%p328_p9)  }
  0x27   : > { %391 = vst [vmem:[#allocation2 + $0x40] sm:$0xf] (!%p328_p9), %v10572_v21  ;;  %395 = vst [vmem:[#allocation2 + $0x48] sm:$0xf] (!%p328_p9), %v10572_v21  ;;  %9108 = vmatpush3.bf16.msra.mxu0 (!%p328_p9), %v10208_v22  ;;  %9732 = vmatpush3.bf16.msra.mxu1 (!%p328_p9), %v10207_v20  ;;  %v10219_v33 = vld [vmem:[%s12976_s1 + $0xa8] sm:$0xff] (!%p328_p9)   ;;  %s10711_s28 = sshll.u32 (!%p328_p9), %s334_s21, 7 }
  0x28   : > { %396 = vst [vmem:[#allocation2 + $0x4c] sm:$0xf] %v10572_v21  ;;  %400 = vst [vmem:[#allocation2 + $0x54] sm:$0xf] %v10572_v21  ;;  %9109 = vmatprep.subr.bf16.mxu0 %v10209_v23  ;;  %9733 = vmatprep.subr.bf16.mxu1 %v10210_v24  ;;  %v10220_v34 = vld [vmem:[%s12976_s1 + $0x28] sm:$0xff]   ;;  %v10221_v35 = vld [vmem:[%s12976_s1 + $0x70] sm:$0xff]  }
  0x29   : > { %401 = vst [vmem:[#allocation2 + $0x58] sm:$0xf] %v10572_v21  ;;  %405 = vst [vmem:[#allocation2 + $0x60] sm:$0xf] %v10572_v21  ;;  %v10222_v36 = vld [vmem:[%s12976_s1 + $0xb0] sm:$0xff]   ;;  %s10726_s10 = scalar_lea.vmem [#allocation5], %s10711_s28 }
  0x2a   : > { %406 = vst [vmem:[#allocation2 + $0x64] sm:$0xf] %v10572_v21  ;;  %410 = vst [vmem:[#allocation2 + $0x6c] sm:$0xf] %v10572_v21  ;;  %v10223_v37 = vld [vmem:[%s12976_s1 + $0x30] sm:$0xff]   ;;  %v10224_v40 = vld [vmem:[%s12976_s1 + $0x78] sm:$0xff]  }
  0x2b   : > { %411 = vst [vmem:[#allocation2 + $0x70] sm:$0xf] %v10572_v21  ;;  %9110 = vmatpush3.bf16.msra.mxu0 %v10211_v25  ;;  %9734 = vmatpush3.bf16.msra.mxu1 %v10210_v24  ;;  %vm365_vm1 = vsmask.f32 256  ;;  %v423_v38 = vld [vmem:[%s10726_s10] sm:$0xf] }
  0x2c   : > { %9111 = vmatprep.subr.bf16.mxu0 %v10212_v26  ;;  %9735 = vmatprep.subr.bf16.mxu1 %v10213_v27  ;;  %v424_v39 = vld [vmem:[%s10726_s10 + $0x4] sm:$0xf]  ;;  %432 = vst [vmem:[#allocation2 + $0x10] sm:$0xf] %v423_v38  ;;  %v10736_v42 = vld [vmem:[#allocation2 + $0x4] sm:$0xf]  ;;  %vm10742_vm2 = vmand %vm364_vm0, %vm365_vm1 }
  0x2d   : > { %v10225_v41 = vld [vmem:[%s12976_s1 + $0xb8] sm:$0xff]   ;;  %433 = vst [vmem:[#allocation2 + $0x1c] sm:$0xf] %v424_v39  ;;  %v7781_v43 = vcombine.low %v10736_v42, %v10736_v42  ;;  %v367_v46 = vld [vmem:[#allocation2 + $0x8] sm:$0x1]  ;;  %v10230_v56 = vld [vmem:[%s12976_s1 + $0x100] sm:$0xff]  }
  0x2e   : > { %v10226_v45 = vld [vmem:[%s12976_s1 + $0x38] sm:$0xff]   ;;  %v372_v47 = vld [vmem:[#allocation2 + $0x14] sm:$0x1]  ;;  %v368_v51 = vsel %vm10742_vm2, 0, %v367_v46  ;;  %v377_v53 = vld [vmem:[#allocation2 + $0x20] sm:$0x1] }
  0x2f   : > { %9112 = vmatpush3.bf16.msra.mxu0 %v10214_v28  ;;  %9736 = vmatpush3.bf16.msra.mxu1 %v10213_v27  ;;  %v521_v48 = vshrl.u32 %v7781_v43, 16  ;;  %v524_v49 = vshll.u32 %v7781_v43, 16  ;;  %v8076_v50 = vld [vmem:[%s10726_s10 + $0x20] sm:$0xf]  ;;  %v373_v52 = vsel %vm10742_vm2, 0, %v372_v47  ;;  %v378_v55 = vsel %vm10742_vm2, 0, %v377_v53 }
  0x30   : > { %9113 = vmatprep.subr.bf16.mxu0 %v10215_v29  ;;  %9737 = vmatprep.subr.bf16.mxu1 %v10216_v30  ;;  %v440_v54 = vld [vmem:[#allocation2] sm:$0x8]  ;;  %369 = vst [vmem:[#allocation2 + $0x8] sm:$0x1] %v368_v51  ;;  %374 = vst [vmem:[#allocation2 + $0x14] sm:$0x1] %v373_v52 }
  0x31   : > { %v523_v57 = vrot.slane %v521_v48, 4  ;;  %v526_v58 = vrot.slane %v524_v49, 5  ;;  %379 = vst [vmem:[#allocation2 + $0x20] sm:$0x1] %v378_v55  ;;  %vm7803_vm3 = vcmask 1043456  ;;  %v10762_v59 = vld [vmem:[%s12976_s1 + $0x140] sm:$0xff]  }
  0x32   : > { %v382_v60 = vld [vmem:[#allocation2 + $0x2c] sm:$0x1]  ;;  %v425_v61 = vld [vmem:[%s10726_s10 + $0x8] sm:$0xf]  ;;  %v442_v10 = vld [vmem:[#allocation2 + $0xc] sm:$0x8] }
  0x33   : > { %9114 = vmatpush3.bf16.msra.mxu0 %v10217_v31  ;;  %9738 = vmatpush3.bf16.msra.mxu1 %v10216_v30  ;;  %v443_v62 = vld [vmem:[#allocation2 + $0x10] sm:$0xf]  ;;  %v527_v0 = vor.u32 %v526_v58, %v523_v57  ;;  %v383_v1 = vsel %vm10742_vm2, 0, %v382_v60  ;;  %434 = vst [vmem:[#allocation2 + $0x28] sm:$0xf] %v425_v61  ;;  %v10233_v61 = vld [vmem:[%s12976_s1 + $0xc0] sm:$0xff]  }
  0x34   : > { %9115 = vmatprep.subr.bf16.mxu0 %v10218_v32  ;;  %9739 = vmatprep.subr.bf16.mxu1 %v10219_v33  ;;  %v445_v63 = vld [vmem:[#allocation2 + $0x1c] sm:$0xf]  ;;  %v7782_v2 = vcombine.low %v443_v62, %v443_v62  ;;  %2223 = vst [vmem:[#allocation2 + $0x10] sm:$0xf] %v8076_v50  ;;  %384 = vst [vmem:[#allocation2 + $0x2c] sm:$0x1] %v383_v1 }
  0x35   : > { %v7783_v3 = vcombine.low %v445_v63, %v445_v63  ;;  %v7801_v4 = vcombine.low %v440_v54, %v527_v0  ;;  %v7804_v5 = vsel %vm7803_vm3, %v10736_v42, %v527_v0  ;;  %v8078_v14 = vld [vmem:[%s10726_s10 + $0x28] sm:$0xf]  ;;  %v444_v29 = vld [vmem:[#allocation2 + $0x18] sm:$0x8]  ;;  %vm704_vm4 = vsmask.f32 4368 }
  0x36   : > { %v529_v6 = vshrl.u32 %v7782_v2, 16  ;;  %v532_v7 = vshll.u32 %v7782_v2, 16  ;;  %v712_v12 = vshrl.u32 %v7804_v5, 16  ;;  %v715_v21 = vshll.u32 %v7804_v5, 16  ;;  %vm10779_vm5 = vmor %vm365_vm1, %vm704_vm4  ;;  %v10276_v44 = vld [vmem:[%s12976_s1 + $0x1a8] sm:$0xff]   ;;  %s12618_s9 = scalar_lea.vmem [#allocation6], %s10711_s28 }
  0x37   : > { %9116 = vmatpush3.bf16.msra.mxu0 %v10220_v34  ;;  %9740 = vmatpush3.bf16.msra.mxu1 %v10219_v33  ;;  %v537_v8 = vshrl.u32 %v7783_v3, 16  ;;  %v540_v9 = vshll.u32 %v7783_v3, 16  ;;  %v707_v11 = vshrl.u32 %v7801_v4, 16  ;;  %v460_v13 = vld [vmem:[#allocation2 + $0x8] sm:$0x1]  ;;  %s9041_s29 = sshll.u32 (%p10629_p5), %s7771_s18, 5 }
  0x38   : > { %9117 = vmatprep.subr.bf16.mxu0 %v10221_v35  ;;  %9741 = vmatprep.subr.bf16.mxu1 %v10222_v36  ;;  %v531_v15 = vrot.slane %v529_v6, 4  ;;  %v534_v16 = vrot.slane %v532_v7, 5  ;;  %v461_v19 = vld [vmem:[#allocation2 + $0x14] sm:$0x1]  ;;  %v714_v20 = vrot.slane %v712_v12, 7  ;;  %v7791_v23 = vcombine.low %v10736_v42, %v460_v13  ;;  %v10234_v12 = vld [vmem:[%s12976_s1 + $0x108] sm:$0xff]   ;;  %s7551_s23 = scalar_lea.vmem (%p10629_p5), %s12979_s4, %s9041_s29 }
  0x39   : > { %v539_v17 = vrot.slane %v537_v8, 4  ;;  %v542_v18 = vrot.slane %v540_v9, 5  ;;  %v462_v22 = vld [vmem:[#allocation2 + $0x20] sm:$0x1]  ;;  %v7792_v24 = vcombine.low %v443_v62, %v461_v19  ;;  %v7841_v33 = vrot.slane %v707_v11, 11 }
  0x3a   : > { %v535_v25 = vor.u32 %v534_v16, %v531_v15  ;;  %v7793_v27 = vcombine.low %v445_v63, %v462_v22  ;;  %v10772_v28 = vld [vmem:[#allocation2 + $0x28] sm:$0xf]  ;;  %v630_v30 = vrot.slane %v7791_v23, 5  ;;  %v426_v6 = vld [vmem:[%s10726_s10 + $0xc] sm:$0xf]  ;;  %v10237_v22 = vld [vmem:[%s12976_s1 + $0x110] sm:$0xff]  }
  0x3b   : > { %9118 = vmatpush3.bf16.msra.mxu0 %v10223_v37  ;;  %9742 = vmatpush3.bf16.msra.mxu1 %v10222_v36  ;;  %v543_v26 = vor.u32 %v542_v18, %v539_v17  ;;  %2225 = vst [vmem:[#allocation2 + $0x28] sm:$0xf] %v8078_v14  ;;  %v631_v34 = vrot.slane %v7792_v24, 5  ;;  %v717_v36 = vor.u32 %v715_v21, %v714_v20  ;;  %v463_v60 = vld [vmem:[#allocation2 + $0x2c] sm:$0x1] }
  0x3c   : > { %9119 = vmatprep.subr.bf16.mxu0 %v10224_v40  ;;  %9743 = vmatprep.subr.bf16.mxu1 %v10225_v41  ;;  %v7806_v31 = vcombine.low %v442_v10, %v535_v25  ;;  %v7809_v32 = vsel %vm7803_vm3, %v443_v62, %v535_v25  ;;  %v7805_v46 = vcombine.high %v630_v30, %v630_v30  ;;  %v427_v7 = vld [vmem:[%s10726_s10 + $0x10] sm:$0xf] }
  0x3d   : > { %v10776_v35 = vsel %vm7803_vm3, %v445_v63, %v543_v26  ;;  %v738_v37 = vshrl.u32 %v7809_v32, 16  ;;  %v741_v38 = vshll.u32 %v7809_v32, 16  ;;  %v7811_v42 = vcombine.low %v444_v29, %v543_v26  ;;  %435 = vst [vmem:[#allocation2 + $0x34] sm:$0xf] %v426_v6  ;;  %436 = vst [vmem:[#allocation2 + $0x40] sm:$0xf] %v427_v7 }
  0x3e   : > { %v733_v40 = vshrl.u32 %v7806_v31, 16  ;;  %v764_v48 = vshrl.u32 %v10776_v35, 16  ;;  %v7807_v49 = vcombine.low %v631_v34, %v631_v34  ;;  %v7810_v50 = vcombine.high %v631_v34, %v631_v34  ;;  %v10236_v16 = vld [vmem:[%s12976_s1 + $0xc8] sm:$0xff]   ;;  %v446_v26 = vld [vmem:[#allocation2 + $0x24] sm:$0x8] }
  0x3f   : > { %9120 = vmatpush3.bf16.msra.mxu0 %v10226_v45  ;;  %9744 = vmatpush3.bf16.msra.mxu1 %v10225_v41  ;;  %v632_v41 = vrot.slane %v7793_v27, 5  ;;  %v740_v43 = vrot.slane %v738_v37, 7  ;;  %v7802_v45 = vcombine.low %v630_v30, %v630_v30  ;;  %v718_v51 = vsel %vm10779_vm5, %v7841_v33, %v717_v36  ;;  %v10235_v6 = vld [vmem:[%s12976_s1 + $0x148] sm:$0xff]  }
  0x40   : > { %9157 = vmatprep.subr.bf16.mxu0 %v10230_v56  ;;  %9753 = vmatprep.subr.bf16.mxu1 %v10762_v59  ;;  %v7843_v47 = vrot.slane %v733_v40, 11  ;;  %v7784_v54 = vcombine.low %v10772_v28, %v10772_v28  ;;  %v725_v56 = vshrl.u32 %v7805_v46, 16  ;;  %v728_v57 = vshll.u32 %v7805_v46, 16  ;;  %v10239_v40 = vld [vmem:[%s12976_s1 + $0xd0] sm:$0xff]   ;;  %v10240_v46 = vld [vmem:[%s12976_s1 + $0x118] sm:$0xff]  }
  0x41   : > { %v743_v52 = vor.u32 %v741_v38, %v740_v43  ;;  %v7815_v53 = vcombine.high %v632_v41, %v632_v41  ;;  %v720_v55 = vshrl.u32 %v7802_v45, 16  ;;  %v746_v58 = vshrl.u32 %v7807_v49, 16 }
  0x42   : > { %v7812_v63 = vcombine.low %v632_v41, %v632_v41  ;;  %v751_v0 = vshrl.u32 %v7810_v50, 16  ;;  %v754_v1 = vshll.u32 %v7810_v50, 16  ;;  %v10795_v2 = vshrl.u32 %v7811_v42, 16 }
  0x43   : > { %v10793_v62 = vsel %vm10779_vm5, %v7843_v47, %v743_v52  ;;  %v767_v3 = vshll.u32 %v10776_v35, 16  ;;  %v7842_v8 = vrot.slane %v720_v55, 11  ;;  %v727_v9 = vrot.slane %v725_v56, 7  ;;  %v428_v56 = vld [vmem:[%s10726_s10 + $0x14] sm:$0xf] }
  0x44   : > { %v7857_v4 = vcombine.low %v718_v51, %v10793_v62  ;;  %v7858_v5 = vcombine.high %v718_v51, %v10793_v62  ;;  %v7844_v10 = vrot.slane %v746_v58, 11  ;;  %v753_v11 = vrot.slane %v751_v0, 7  ;;  %v10826_v47 = vld [vmem:[#allocation2 + $0x34] sm:$0xf]  ;;  %v10830_v50 = vld [vmem:[#allocation2 + $0x40] sm:$0xf] }
  0x45   : > { %v766_v13 = vrot.slane %v764_v48, 7  ;;  %v777_v14 = vshrl.u32 %v7815_v53, 16  ;;  %v7794_v15 = vcombine.low %v10772_v28, %v463_v60  ;;  %v545_v17 = vshrl.u32 %v7784_v54, 16  ;;  %437 = vst [vmem:[#allocation2 + $0x4c] sm:$0xf] %v428_v56 }
  0x46   : > { %1186 = vmatprep.mubr.bf16.mxu0 %v7858_v5  ;;  %v730_v18 = vor.u32 %v728_v57, %v727_v9  ;;  %v756_v19 = vor.u32 %v754_v1, %v753_v11  ;;  %v772_v20 = vshrl.u32 %v7812_v63, 16  ;;  %v548_v21 = vshll.u32 %v7784_v54, 16  ;;  %v429_v63 = vld [vmem:[%s10726_s10 + $0x18] sm:$0xf]  ;;  %v10245_v5 = vld [vmem:[%s12976_s1 + $0x120] sm:$0xff]  }
  0x47   : > { %1187 = vmatmul.mubr.bf16.vlgmr.msra.gmra.mrb[0].mxu0 %v7857_v4  ;;  %v779_v23 = vrot.slane %v777_v14, 7  ;;  %v780_v24 = vshll.u32 %v7815_v53, 16  ;;  %v633_v25 = vrot.slane %v7794_v15, 5  ;;  %v547_v27 = vrot.slane %v545_v17, 4  ;;  %v448_v4 = vld [vmem:[#allocation2 + $0x30] sm:$0x8] }
  0x48   : > { %9158 = vmatpush3.bf16.msra.mxu0 %v10233_v61  ;;  %v7845_v29 = vrot.slane %v10795_v2, 11  ;;  %v731_v30 = vsel %vm10779_vm5, %v7842_v8, %v730_v18  ;;  %v10817_v31 = vsel %vm10779_vm5, %v7844_v10, %v756_v19  ;;  %v550_v32 = vrot.slane %v548_v21, 5  ;;  %438 = vst [vmem:[#allocation2 + $0x58] sm:$0xf] %v429_v63  ;;  %v387_v11 = vld [vmem:[#allocation2 + $0x38] sm:$0x1] }
  0x49   : > { %9159 = vmatprep.subr.bf16.mxu0 %v10234_v12  ;;  %v7859_v33 = vcombine.low %v731_v30, %v10817_v31  ;;  %v7817_v34 = vcombine.low %v633_v25, %v633_v25  ;;  %v7820_v35 = vcombine.high %v633_v25, %v633_v25  ;;  %v769_v36 = vor.u32 %v767_v3, %v766_v13  ;;  %v10242_v3 = vld [vmem:[%s12976_s1 + $0xd8] sm:$0xff]   ;;  %v397_v25 = vld [vmem:[#allocation2 + $0x50] sm:$0x1] }
  0x4a   : > { %v7846_v37 = vrot.slane %v772_v20, 11  ;;  %v551_v38 = vor.u32 %v550_v32, %v547_v27  ;;  %v782_v41 = vor.u32 %v780_v24, %v779_v23  ;;  %v7785_v51 = vcombine.low %v10826_v47, %v10826_v47  ;;  %v450_v18 = vld [vmem:[#allocation2 + $0x3c] sm:$0x8]  ;;  %v10247_v24 = vld [vmem:[%s12976_s1 + $0xe0] sm:$0xff]   ;;  %v10253_v63 = vld [vmem:[%s12976_s1 + $0x130] sm:$0xff]  }
  0x4b   : > { %9745 = vmatprep.mubr.bf16.mxu1 %v7859_v33  ;;  %v798_v42 = vshrl.u32 %v7817_v34, 16  ;;  %v803_v43 = vshrl.u32 %v7820_v35, 16  ;;  %v806_v45 = vshll.u32 %v7820_v35, 16  ;;  %v7786_v58 = vcombine.low %v10830_v50, %v10830_v50  ;;  %v402_v33 = vld [vmem:[#allocation2 + $0x5c] sm:$0x1] }
  0x4c   : > { %9160 = vmatpush3.bf16.msra.mxu0 %v10236_v16  ;;  %v7816_v48 = vcombine.low %v446_v26, %v551_v38  ;;  %v7819_v49 = vsel %vm7803_vm3, %v10772_v28, %v551_v38  ;;  %v553_v60 = vshrl.u32 %v7785_v51, 16  ;;  %v556_v61 = vshll.u32 %v7785_v51, 16  ;;  %v392_v16 = vld [vmem:[#allocation2 + $0x44] sm:$0x1]  ;;  %v10892_v38 = vld [vmem:[#allocation2 + $0x4c] sm:$0xf] }
  0x4d   : > { %9161 = vmatprep.subr.bf16.mxu0 %v10237_v22  ;;  %v7848_v52 = vrot.slane %v798_v42, 11  ;;  %v805_v53 = vrot.slane %v803_v43, 7  ;;  %v790_v54 = vshrl.u32 %v7819_v49, 16  ;;  %v793_v55 = vshll.u32 %v7819_v49, 16  ;;  %v10250_v49 = vld [vmem:[%s12976_s1 + $0xe8] sm:$0xff]  }
  0x4e   : > { %v785_v57 = vshrl.u32 %v7816_v48, 16  ;;  %v10840_v28 = vsel %vm10779_vm5, %v7845_v29, %v769_v36  ;;  %v10844_v0 = vsel %vm10779_vm5, %v7846_v37, %v782_v41  ;;  %v555_v8 = vrot.slane %v553_v60, 4  ;;  %v10238_v29 = vld [vmem:[%s12976_s1 + $0x150] sm:$0xff]   ;;  %v10248_v37 = vld [vmem:[%s12976_s1 + $0x128] sm:$0xff]  }
  0x4f   : > { %v808_v1 = vor.u32 %v806_v45, %v805_v53  ;;  %v792_v2 = vrot.slane %v790_v54, 7  ;;  %v558_v9 = vrot.slane %v556_v61, 5  ;;  %v561_v10 = vshrl.u32 %v7786_v58, 16  ;;  %v10897_v42 = vld [vmem:[#allocation2 + $0x58] sm:$0xf] }
  0x50   : > { %9162 = vmatpush3.bf16.msra.mxu0 %v10239_v40  ;;  %v7847_v7 = vrot.slane %v785_v57, 11  ;;  %v564_v14 = vshll.u32 %v7786_v58, 16  ;;  %v388_v15 = vsel %vm10742_vm2, 0, %v387_v11  ;;  %v393_v21 = vsel %vm10742_vm2, 0, %v392_v16 }
  0x51   : > { %9163 = vmatprep.subr.bf16.mxu0 %v10240_v46  ;;  %v10857_v12 = vsel %vm10779_vm5, %v7848_v52, %v808_v1  ;;  %v795_v13 = vor.u32 %v793_v55, %v792_v2  ;;  %v559_v19 = vor.u32 %v558_v9, %v555_v8  ;;  %v563_v20 = vrot.slane %v561_v10, 4  ;;  %389 = vst [vmem:[#allocation2 + $0x38] sm:$0x1] %v388_v15  ;;  %v10241_v1 = vld [vmem:[%s12976_s1 + $0x158] sm:$0xff]  }
  0x52   : > { %v10863_v17 = vcombine.low %v10844_v0, %v10857_v12  ;;  %v566_v23 = vrot.slane %v564_v14, 5  ;;  %394 = vst [vmem:[#allocation2 + $0x44] sm:$0x1] %v393_v21  ;;  %v398_v40 = vsel %vm10742_vm2, 0, %v397_v25  ;;  %v403_v43 = vsel %vm10742_vm2, 0, %v402_v33  ;;  %v10246_v21 = vld [vmem:[%s12976_s1 + $0x160] sm:$0xff]  }
  0x53   : > { %v10869_v22 = vsel %vm10779_vm5, %v7847_v7, %v795_v13  ;;  %v7821_v30 = vcombine.low %v448_v4, %v559_v19  ;;  %v7824_v32 = vsel %vm7803_vm3, %v10826_v47, %v559_v19  ;;  %399 = vst [vmem:[#allocation2 + $0x50] sm:$0x1] %v398_v40  ;;  %v7788_v51 = vcombine.low %v10897_v42, %v10897_v42  ;;  %v10255_v13 = vld [vmem:[%s12976_s1 + $0xf0] sm:$0xff]  }
  0x54   : > { %9164 = vmatpush3.bf16.msra.mxu0 %v10242_v3  ;;  %9746 = vmatmul.mubr.bf16.vlgmr.msra.gmra.mrb[0].mxu1 %v10863_v17  ;;  %v10877_v26 = vcombine.high %v10840_v28, %v10869_v22  ;;  %v10881_v27 = vcombine.low %v10840_v28, %v10869_v22  ;;  %v567_v34 = vor.u32 %v566_v23, %v563_v20  ;;  %v816_v35 = vshrl.u32 %v7824_v32, 16  ;;  %v452_v3 = vld [vmem:[#allocation2 + $0x48] sm:$0x8]  ;;  %v454_v19 = vld [vmem:[#allocation2 + $0x54] sm:$0x8] }
  0x55   : > { %9754 = vmatpush3.bf16.msra.mxu1 %v10762_v59  ;;  %v819_v36 = vshll.u32 %v7824_v32, 16  ;;  %9165 = vmatprep.subr.bf16.mxu0 %v10245_v5  ;;  %v811_v41 = vshrl.u32 %v7821_v30, 16  ;;  %v7787_v59 = vcombine.low %v10892_v38, %v10892_v38  ;;  %404 = vst [vmem:[#allocation2 + $0x5c] sm:$0x1] %v403_v43  ;;  %v577_v60 = vshrl.u32 %v7788_v51, 16 }
  0x56   : > { %9755 = vmatprep.subr.bf16.mxu1 %v10235_v6  ;;  %1194 = vmatprep.mubr.bf16.mxu0 %v10877_v26  ;;  %v7826_v45 = vcombine.low %v450_v18, %v567_v34  ;;  %v7829_v46 = vsel %vm7803_vm3, %v10830_v50, %v567_v34  ;;  %v818_v48 = vrot.slane %v816_v35, 7  ;;  %v580_v5 = vshll.u32 %v7788_v51, 16  ;;  %v10249_v34 = vld [vmem:[%s12976_s1 + $0x168] sm:$0xff]  }
  0x57   : > { %1195 = vmatmul.mubr.bf16.gmra.mrb[4].mxu0 %v10881_v27  ;;  %v7849_v52 = vrot.slane %v811_v41, 11  ;;  %v842_v53 = vshrl.u32 %v7829_v46, 16  ;;  %v845_v54 = vshll.u32 %v7829_v46, 16  ;;  %v569_v55 = vshrl.u32 %v7787_v59, 16  ;;  %v10258_v41 = vld [vmem:[%s12976_s1 + $0xf8] sm:$0xff]  }
  0x58   : > { %9166 = vmatpush3.bf16.msra.mxu0 %v10247_v24  ;;  %v821_v56 = vor.u32 %v819_v36, %v818_v48  ;;  %v837_v57 = vshrl.u32 %v7826_v45, 16  ;;  %v572_v58 = vshll.u32 %v7787_v59, 16  ;;  %v464_v61 = vld [vmem:[#allocation2 + $0x38] sm:$0x1]  ;;  %v579_v11 = vrot.slane %v577_v60, 4 }
  0x59   : > { %9756 = vmatpush3.bf16.msra.mxu1 %v10235_v6  ;;  %9167 = vmatprep.subr.bf16.mxu0 %v10248_v37  ;;  %v844_v2 = vrot.slane %v842_v53, 7  ;;  %v571_v4 = vrot.slane %v569_v55, 4  ;;  %v465_v6 = vld [vmem:[#allocation2 + $0x44] sm:$0x1]  ;;  %v7795_v7 = vcombine.low %v10826_v47, %v464_v61  ;;  %v582_v15 = vrot.slane %v580_v5, 5 }
  0x5a   : > { %9757 = vmatprep.subr.bf16.mxu1 %v10238_v29  ;;  %v10920_v8 = vsel %vm10779_vm5, %v7849_v52, %v821_v56  ;;  %v7851_v9 = vrot.slane %v837_v57, 11  ;;  %v574_v10 = vrot.slane %v572_v58, 5  ;;  %v7796_v16 = vcombine.low %v10830_v50, %v465_v6  ;;  %v10256_v50 = vld [vmem:[%s12976_s1 + $0x138] sm:$0xff]   ;;  %v466_v48 = vld [vmem:[#allocation2 + $0x50] sm:$0x1] }
  0x5b   : > { %v847_v14 = vor.u32 %v845_v54, %v844_v2  ;;  %v634_v18 = vrot.slane %v7795_v7, 5  ;;  %v583_v23 = vor.u32 %v582_v15, %v579_v11  ;;  %v10254_v7 = vld [vmem:[%s12976_s1 + $0x170] sm:$0xff]  }
  0x5c   : > { %9168 = vmatpush3.bf16.msra.mxu0 %v10250_v49  ;;  %v575_v47 = vor.u32 %v574_v10, %v571_v4  ;;  %v635_v24 = vrot.slane %v7796_v16, 5  ;;  %v10259_v49 = vld [vmem:[%s12976_s1 + $0x1c0] sm:$0xff]   ;;  %v467_v55 = vld [vmem:[#allocation2 + $0x5c] sm:$0x1] }
  0x5d   : > { %9758 = vmatpush3.bf16.msra.mxu1 %v10238_v29  ;;  %9169 = vmatprep.subr.bf16.mxu0 %v10253_v63  ;;  %v10928_v20 = vsel %vm10779_vm5, %v7851_v9, %v847_v14  ;;  %v7822_v25 = vcombine.low %v634_v18, %v634_v18  ;;  %v7836_v35 = vcombine.low %v454_v19, %v583_v23 }
  0x5e   : > { %9759 = vmatprep.subr.bf16.mxu1 %v10241_v1  ;;  %v10938_v29 = vcombine.high %v10920_v8, %v10928_v20  ;;  %v10942_v30 = vcombine.low %v10920_v8, %v10928_v20  ;;  %v7831_v32 = vcombine.low %v452_v3, %v575_v47  ;;  %v7834_v33 = vsel %vm7803_vm3, %v10892_v38, %v575_v47 }
  0x5f   : > { %v7839_v36 = vsel %vm7803_vm3, %v10897_v42, %v583_v23  ;;  %v868_v37 = vshrl.u32 %v7834_v33, 16  ;;  %v871_v40 = vshll.u32 %v7834_v33, 16  ;;  %v7825_v46 = vcombine.high %v634_v18, %v634_v18 }
  0x60   : > { %9170 = vmatpush3.bf16.msra.mxu0 %v10255_v13  ;;  %1202 = vmatprep.mubr.bf16.mxu0 %v10938_v29  ;;  %v863_v59 = vshrl.u32 %v7831_v32, 16  ;;  %v894_v43 = vshrl.u32 %v7839_v36, 16  ;;  %v897_v45 = vshll.u32 %v7839_v36, 16  ;;  %v889_v52 = vshrl.u32 %v7836_v35, 16  ;;  %v10257_v32 = vld [vmem:[%s12976_s1 + $0x178] sm:$0xff]  }
  0x61   : > { %9760 = vmatpush3.bf16.msra.mxu1 %v10241_v1  ;;  %1203 = vmatmul.mubr.bf16.gmra.mrb[8].mxu0 %v10942_v30  ;;  %v870_v51 = vrot.slane %v868_v37, 7  ;;  %v7827_v53 = vcombine.low %v635_v24, %v635_v24  ;;  %v7830_v54 = vcombine.high %v635_v24, %v635_v24  ;;  %v824_v58 = vshrl.u32 %v7822_v25, 16 }
  0x62   : > { %9761 = vmatprep.subr.bf16.mxu1 %v10246_v21  ;;  %v7853_v56 = vrot.slane %v863_v59, 11  ;;  %v896_v57 = vrot.slane %v894_v43, 7  ;;  %v829_v60 = vshrl.u32 %v7825_v46, 16  ;;  %9171 = vmatprep.subr.bf16.mxu0 %v10256_v50  ;;  %v7855_v63 = vrot.slane %v889_v52, 11 }
  0x63   : > { %v873_v61 = vor.u32 %v871_v40, %v870_v51  ;;  %v832_v1 = vshll.u32 %v7825_v46, 16  ;;  %v850_v2 = vshrl.u32 %v7827_v53, 16  ;;  %v7850_v4 = vrot.slane %v824_v58, 11  ;;  %v10260_v46 = vld [vmem:[%s12976_s1 + $0x200] sm:$0xff]   ;;  %v10262_v58 = vld [vmem:[%s12976_s1 + $0x1c8] sm:$0xff]  }
  0x64   : > { %9172 = vmatpush3.bf16.msra.mxu0 %v10258_v41  ;;  %v899_v3 = vor.u32 %v897_v45, %v896_v57  ;;  %v831_v5 = vrot.slane %v829_v60, 7  ;;  %v855_v6 = vshrl.u32 %v7830_v54, 16  ;;  %v858_v11 = vshll.u32 %v7830_v54, 16 }
  0x65   : > { %9762 = vmatpush3.bf16.msra.mxu1 %v10246_v21  ;;  %9209 = vmatprep.subr.bf16.mxu0 %v10259_v49  ;;  %v10964_v9 = vsel %vm10779_vm5, %v7853_v56, %v873_v61  ;;  %v7852_v10 = vrot.slane %v850_v2, 11  ;;  %v7797_v13 = vcombine.low %v10892_v38, %v466_v48  ;;  %v7798_v18 = vcombine.low %v10897_v42, %v467_v55  ;;  %v10261_v55 = vld [vmem:[%s12976_s1 + $0x180] sm:$0xff]   ;;  %v10264_v2 = vld [vmem:[%s12976_s1 + $0x188] sm:$0xff]  }
  0x66   : > { %9763 = vmatprep.subr.bf16.mxu1 %v10249_v34  ;;  %v10969_v14 = vsel %vm10779_vm5, %v7855_v63, %v899_v3  ;;  %v834_v15 = vor.u32 %v832_v1, %v831_v5  ;;  %v857_v16 = vrot.slane %v855_v6, 7  ;;  %v7949_v38 = vcombine.high %v10793_v62, %v10840_v28  ;;  %v407_v63 = vld [vmem:[#allocation2 + $0x68] sm:$0x1]  ;;  %v10268_v6 = vld [vmem:[%s12976_s1 + $0x1d8] sm:$0xff]  }
  0x67   : > { %v10974_v19 = vcombine.high %v10964_v9, %v10969_v14  ;;  %v10978_v47 = vcombine.low %v10964_v9, %v10969_v14  ;;  %v636_v21 = vrot.slane %v7797_v13, 5  ;;  %v637_v25 = vrot.slane %v7798_v18, 5 }
  0x68   : > { %v10984_v23 = vsel %vm10779_vm5, %v7850_v4, %v834_v15  ;;  %v860_v24 = vor.u32 %v858_v11, %v857_v16  ;;  %v7948_v51 = vcombine.low %v10793_v62, %v10840_v28  ;;  %v7952_v56 = vcombine.high %v10869_v22, %v10920_v8  ;;  %v430_v62 = vld [vmem:[%s10726_s10 + $0x1c] sm:$0xf]  ;;  %v10271_v15 = vld [vmem:[%s12976_s1 + $0x1e0] sm:$0xff]  }
  0x69   : > { %9764 = vmatpush3.bf16.msra.mxu1 %v10249_v34  ;;  %1210 = vmatprep.mubr.bf16.mxu0 %v10974_v19  ;;  %v7832_v42 = vcombine.low %v636_v21, %v636_v21  ;;  %v7835_v50 = vcombine.high %v636_v21, %v636_v21  ;;  %v7837_v34 = vcombine.low %v637_v25, %v637_v25  ;;  %v408_v3 = vsel %vm10742_vm2, 0, %v407_v63  ;;  %v10267_v4 = vld [vmem:[%s12976_s1 + $0x190] sm:$0xff]  }
  0x6a   : > { %9765 = vmatprep.subr.bf16.mxu1 %v10254_v7  ;;  %1211 = vmatmul.mubr.bf16.gmra.mrb[12].mxu0 %v10978_v47  ;;  %v10993_v33 = vsel %vm10779_vm5, %v7852_v10, %v860_v24  ;;  %v7840_v35 = vcombine.high %v637_v25, %v637_v25  ;;  %v7950_v28 = vcombine.low %v10817_v31, %v10844_v0  ;;  %v10265_v31 = vld [vmem:[%s12976_s1 + $0x1d0] sm:$0xff]   ;;  %v10270_v10 = vld [vmem:[%s12976_s1 + $0x198] sm:$0xff]   ;;  %v10273_v24 = vld [vmem:[%s12976_s1 + $0x1a0] sm:$0xff]  }
  0x6b   : > { %v10997_v36 = vcombine.low %v10984_v23, %v10993_v33  ;;  %v876_v37 = vshrl.u32 %v7832_v42, 16  ;;  %v881_v40 = vshrl.u32 %v7835_v50, 16  ;;  %v884_v41 = vshll.u32 %v7835_v50, 16  ;;  %1586 = vmatprep.mubr.bf16.mxu0 %v7949_v38  ;;  %439 = vst [vmem:[#allocation2 + $0x64] sm:$0xf] %v430_v62  ;;  %v10266_v38 = vld [vmem:[%s12976_s1 + $0x210] sm:$0xff]  }
  0x6c   : > { %v902_v59 = vshrl.u32 %v7837_v34, 16  ;;  %v907_v43 = vshrl.u32 %v7840_v35, 16  ;;  %v910_v45 = vshll.u32 %v7840_v35, 16  ;;  %409 = vst [vmem:[#allocation2 + $0x68] sm:$0x1] %v408_v3  ;;  %v7951_v0 = vcombine.low %v10869_v22, %v10920_v8  ;;  %v10263_v22 = vld [vmem:[%s12976_s1 + $0x208] sm:$0xff]  }
  0x6d   : > { %9766 = vmatpush3.bf16.msra.mxu1 %v10254_v7  ;;  %9749 = vmatprep.mubr.bf16.mxu1 %v10997_v36  ;;  %v7854_v48 = vrot.slane %v876_v37, 11  ;;  %v883_v49 = vrot.slane %v881_v40, 7  ;;  %v7955_v5 = vcombine.high %v10928_v20, %v10964_v9  ;;  %v7953_v7 = vcombine.low %v10857_v12, %v10984_v23  ;;  %v10274_v34 = vld [vmem:[%s12976_s1 + $0x1e8] sm:$0xff]   ;;  %v10269_v40 = vld [vmem:[%s12976_s1 + $0x218] sm:$0xff]  }
  0x6e   : > { %9767 = vmatprep.subr.bf16.mxu1 %v10257_v32  ;;  %v7856_v52 = vrot.slane %v902_v59, 11  ;;  %v909_v53 = vrot.slane %v907_v43, 7  ;;  %v7954_v23 = vcombine.low %v10928_v20, %v10964_v9 }
  0x6f   : > { %v886_v54 = vor.u32 %v884_v41, %v883_v49 }
  0x70   : > { %v912_v57 = vor.u32 %v910_v45, %v909_v53 }
  0x71   : > { %9768 = vmatpush3.bf16.msra.mxu1 %v10257_v32  ;;  %v887_v60 = vsel %vm10779_vm5, %v7854_v48, %v886_v54  ;;  %v456_v32 = vld [vmem:[#allocation2 + $0x60] sm:$0x8] }
  0x72   : > { %9777 = vmatprep.subr.bf16.mxu1 %v10260_v46  ;;  %v11020_v61 = vsel %vm10779_vm5, %v7856_v52, %v912_v57  ;;  %1587 = vmatmul.mubr.bf16.vlgmr.msra.gmra.mrb[16].mxu0 %v7948_v51  ;;  %v457_v8 = vld [vmem:[#allocation2 + $0x64] sm:$0xf]  ;;  %v7956_v13 = vcombine.low %v10993_v33, %v887_v60  ;;  %v412_v33 = vld [vmem:[#allocation2 + $0x74] sm:$0x1] }
  0x73   : > { %v11023_v1 = vcombine.low %v887_v60, %v11020_v61  ;;  %9210 = vmatpush3.bf16.msra.mxu0 %v10261_v55  ;;  %1594 = vmatprep.mubr.bf16.mxu0 %v7952_v56  ;;  %v7789_v11 = vcombine.low %v457_v8, %v457_v8  ;;  %v468_v12 = vld [vmem:[#allocation2 + $0x68] sm:$0x1]  ;;  %v413_v9 = vsel %vm10742_vm2, 0, %v412_v33  ;;  %v10278_v55 = vld [vmem:[%s12976_s1 + $0x1f0] sm:$0xff]   ;;  %v10272_v56 = vld [vmem:[%s12976_s1 + $0x220] sm:$0xff]  }
  0x74   : > { %9211 = vmatprep.subr.bf16.mxu0 %v10262_v58  ;;  %v7799_v21 = vcombine.low %v457_v8, %v468_v12  ;;  %414 = vst [vmem:[#allocation2 + $0x74] sm:$0x1] %v413_v9 }
  0x75   : > { %9750 = vmatmul.mubr.bf16.gmra.mrb[4].mxu1 %v11023_v1  ;;  %v585_v16 = vshrl.u32 %v7789_v11, 16  ;;  %v588_v18 = vshll.u32 %v7789_v11, 16  ;;  %v10283_v11 = vld [vmem:[%s12976_s1 + $0x1b8] sm:$0xff]  }
  0x76   : > { %9769 = vmatprep.mubr.bf16.mxu1 %v7950_v28  ;;  %v638_v50 = vrot.slane %v7799_v21, 5  ;;  %v10280_v28 = vld [vmem:[%s12976_s1 + $0x1b0] sm:$0xff]  }
  0x77   : > { %9212 = vmatpush3.bf16.msra.mxu0 %v10264_v2  ;;  %v587_v25 = vrot.slane %v585_v16, 4  ;;  %v590_v42 = vrot.slane %v588_v18, 5  ;;  %v458_v18 = vld [vmem:[#allocation2 + $0x6c] sm:$0x8]  ;;  %v10279_v21 = vld [vmem:[%s12976_s1 + $0x230] sm:$0xff]  }
  0x78   : > { %9213 = vmatprep.subr.bf16.mxu0 %v10265_v31  ;;  %v7894_v37 = vcombine.low %v638_v50, %v638_v50  ;;  %v7897_v20 = vcombine.high %v638_v50, %v638_v50 }
  0x79   : > { %v591_v35 = vor.u32 %v590_v42, %v587_v25  ;;  %v10282_v42 = vld [vmem:[%s12976_s1 + $0x238] sm:$0xff]  }
  0x7a   : > { %1595 = vmatmul.mubr.bf16.gmra.mrb[20].mxu0 %v7951_v0  ;;  %v1322_v43 = vshrl.u32 %v7894_v37, 16  ;;  %v1327_v45 = vshrl.u32 %v7897_v20, 16  ;;  %v1330_v51 = vshll.u32 %v7897_v20, 16  ;;  %v10287_v37 = vld [vmem:[%s12976_s1 + $0x48] sm:$0xff]  }
  0x7b   : > { %9214 = vmatpush3.bf16.msra.mxu0 %v10267_v4  ;;  %1602 = vmatprep.mubr.bf16.mxu0 %v7955_v5  ;;  %v7893_v41 = vcombine.low %v456_v32, %v591_v35  ;;  %v7896_v59 = vsel %vm7803_vm3, %v457_v8, %v591_v35  ;;  %v469_v3 = vld [vmem:[#allocation2 + $0x74] sm:$0x1]  ;;  %v10281_v4 = vld [vmem:[%s12976_s1 + $0x1f8] sm:$0xff]  }
  0x7c   : > { %9215 = vmatprep.subr.bf16.mxu0 %v10268_v6  ;;  %v1314_v48 = vshrl.u32 %v7896_v59, 16  ;;  %v1317_v49 = vshll.u32 %v7896_v59, 16  ;;  %v7899_v53 = vrot.slane %v1322_v43, 11  ;;  %v1329_v54 = vrot.slane %v1327_v45, 7  ;;  %v10289_v59 = vld [vmem:[%s12976_s1 + $0x8] sm:$0xff]   ;;  %v10291_v43 = vld [vmem:[%s12976_s1 + $0x50] sm:$0xff]  }
  0x7d   : > { %9770 = vmatmul.mubr.bf16.vlgmr.msra.gmra.mrb[0].mxu1 %v7953_v7  ;;  %v1309_v52 = vshrl.u32 %v7893_v41, 16  ;;  %v10285_v41 = vld [vmem:[%s12976_s1 + $0x80] sm:$0xff]  }
  0x7e   : > { %9778 = vmatpush3.bf16.msra.mxu1 %v10260_v46  ;;  %9773 = vmatprep.mubr.bf16.mxu1 %v7956_v13  ;;  %v11073_v46 = vld [vmem:[#allocation2 + $0x70] sm:$0xf]  ;;  %v1316_v57 = vrot.slane %v1314_v48, 7  ;;  %v1332_v62 = vor.u32 %v1330_v51, %v1329_v54  ;;  %v8385_v51 = vld [vmem:[%s10726_s10 + $0x40] sm:$0xf] }
  0x7f   : > { %9779 = vmatprep.subr.bf16.mxu1 %v10263_v22  ;;  %9216 = vmatpush3.bf16.msra.mxu0 %v10270_v10  ;;  %v7790_v58 = vcombine.low %v11073_v46, %v11073_v46  ;;  %v7898_v60 = vrot.slane %v1309_v52, 11  ;;  %v7800_v5 = vcombine.low %v11073_v46, %v469_v3  ;;  %v11146_v48 = vld [vmem:[#allocation2 + $0x10] sm:$0xf]  ;;  %v2251_v52 = vld [vmem:[#allocation2 + $0x8] sm:$0x1] }
  0x80   : > { %9217 = vmatprep.subr.bf16.mxu0 %v10271_v15  ;;  %v1319_v63 = vor.u32 %v1317_v49, %v1316_v57  ;;  %v11091_v2 = vsel %vm10779_vm5, %v7899_v53, %v1332_v62  ;;  %v8085_v53 = vcombine.low %v11146_v48, %v11146_v48  ;;  %3999 = vst [vmem:[#allocation2 + $0x10] sm:$0xf] %v8385_v51  ;;  %v2252_v54 = vld [vmem:[#allocation2 + $0x14] sm:$0x1]  ;;  %v10288_v62 = vld [vmem:[%s12976_s1 + $0x88] sm:$0xff]  }
  0x81   : > { %v7959_v0 = vcombine.low %v11020_v61, %v11091_v2  ;;  %v593_v6 = vshrl.u32 %v7790_v58, 16  ;;  %v596_v8 = vshll.u32 %v7790_v58, 16  ;;  %v10275_v61 = vld [vmem:[%s12976_s1 + $0x228] sm:$0xff]   ;;  %v639_v10 = vrot.slane %v7800_v5, 5  ;;  %v10294_v5 = vld [vmem:[%s12976_s1 + $0x58] sm:$0xff]  }
  0x82   : > { %9780 = vmatpush3.bf16.msra.mxu1 %v10263_v22  ;;  %1603 = vmatmul.mubr.bf16.gmra.mrb[24].mxu0 %v7954_v23  ;;  %v11095_v31 = vsel %vm10779_vm5, %v7898_v60, %v1319_v63  ;;  %v8095_v60 = vcombine.low %v11146_v48, %v2252_v54  ;;  %v10293_v63 = vld [vmem:[%s12976_s1 + $0x10] sm:$0xff]   ;;  %v2320_v3 = vshrl.u32 %v8085_v53, 16 }
  0x83   : > { %9781 = vmatprep.subr.bf16.mxu1 %v10266_v38  ;;  %9218 = vmatpush3.bf16.msra.mxu0 %v10273_v24  ;;  %v7958_v7 = vcombine.high %v10969_v14, %v11095_v31  ;;  %v7957_v22 = vcombine.low %v10969_v14, %v11095_v31  ;;  %v595_v13 = vrot.slane %v593_v6, 4  ;;  %v10284_v14 = vld [vmem:[%s12976_s1 + $0x40] sm:$0xff]   ;;  %v7985_v15 = vcombine.low %v639_v10, %v639_v10 }
  0x84   : > { %9219 = vmatprep.subr.bf16.mxu0 %v10274_v34  ;;  %v7988_v12 = vcombine.high %v639_v10, %v639_v10  ;;  %v598_v16 = vrot.slane %v596_v8, 5  ;;  %v2422_v8 = vrot.slane %v8095_v60, 5 }
  0x85   : > { %9774 = vmatmul.mubr.bf16.gmra.mrb[4].mxu1 %v7959_v0  ;;  %1610 = vmatprep.mubr.bf16.mxu0 %v7958_v7  ;;  %v2323_v0 = vshll.u32 %v8085_v53, 16 }
  0x86   : > { %9782 = vmatpush3.bf16.msra.mxu1 %v10266_v38  ;;  %9793 = vmatprep.mubr.bf16.mxu1 %v10863_v17  ;;  %v1730_v38 = vshrl.u32 %v7985_v15, 16  ;;  %v1735_v23 = vshrl.u32 %v7988_v12, 16  ;;  %v1738_v24 = vshll.u32 %v7988_v12, 16  ;;  %v599_v25 = vor.u32 %v598_v16, %v595_v13  ;;  %v10286_v17 = vld [vmem:[%s12976_s1] sm:$0xff]   ;;  %v11173_v15 = vld [vmem:[#allocation2 + $0x2c] sm:$0x1] }
  0x87   : > { %9783 = vmatprep.subr.bf16.mxu1 %v10269_v40  ;;  %9220 = vmatpush3.bf16.msra.mxu0 %v10276_v44  ;;  %v2322_v13 = vrot.slane %v2320_v3, 4 }
  0x88   : > { %9221 = vmatprep.subr.bf16.mxu0 %v10278_v55  ;;  %v1737_v50 = vrot.slane %v1735_v23, 7  ;;  %v7987_v32 = vsel %vm7803_vm3, %v11073_v46, %v599_v25  ;;  %v7990_v33 = vrot.slane %v1730_v38, 11  ;;  %v2232_v46 = vld [vmem:[#allocation2 + $0x4] sm:$0xf]  ;;  %v8110_v38 = vcombine.low %v2422_v8, %v2422_v8  ;;  %v8387_v23 = vld [vmem:[%s10726_s10 + $0x48] sm:$0xf] }
  0x89   : > { %v1722_v34 = vshrl.u32 %v7987_v32, 16  ;;  %v1725_v35 = vshll.u32 %v7987_v32, 16  ;;  %v8084_v49 = vcombine.low %v2232_v46, %v2232_v46  ;;  %v8094_v55 = vcombine.low %v2232_v46, %v2251_v52 }
  0x8a   : > { %9784 = vmatpush3.bf16.msra.mxu1 %v10269_v40  ;;  %1611 = vmatmul.mubr.bf16.gmra.mrb[28].mxu0 %v7957_v22  ;;  %v1740_v20 = vor.u32 %v1738_v24, %v1737_v50  ;;  %v10292_v24 = vld [vmem:[%s12976_s1 + $0x90] sm:$0xff]   ;;  %v8113_v50 = vcombine.high %v2422_v8, %v2422_v8 }
  0x8b   : > { %9785 = vmatprep.subr.bf16.mxu1 %v10272_v56  ;;  %9222 = vmatpush3.bf16.msra.mxu0 %v10280_v28  ;;  %v1724_v40 = vrot.slane %v1722_v34, 7  ;;  %v2312_v57 = vshrl.u32 %v8084_v49, 16  ;;  %v2315_v58 = vshll.u32 %v8084_v49, 16  ;;  %v2421_v22 = vrot.slane %v8094_v55, 5  ;;  %v8386_v34 = vld [vmem:[%s10726_s10 + $0x44] sm:$0xf] }
  0x8c   : > { %9223 = vmatprep.subr.bf16.mxu0 %v10281_v4  ;;  %1976 = vmatprep.mubr.bf16.mxu0 %v10877_v26  ;;  %v7984_v26 = vcombine.low %v458_v18, %v599_v25  ;;  %v11144_v44 = vsel %vm10779_vm5, %v7990_v33, %v1740_v20  ;;  %v8077_v4 = vld [vmem:[%s10726_s10 + $0x24] sm:$0xf]  ;;  %v2540_v54 = vshrl.u32 %v8113_v50, 16  ;;  %v10299_v55 = vld [vmem:[%s12976_s1 + $0x20] sm:$0xff]  }
  0x8d   : > { %v8041_v28 = vcombine.low %v11091_v2, %v11144_v44  ;;  %v2314_v6 = vrot.slane %v2312_v57, 4  ;;  %v2317_v7 = vrot.slane %v2315_v58, 5  ;;  %2224 = vst [vmem:[#allocation2 + $0x1c] sm:$0xf] %v8077_v4  ;;  %v8105_v18 = vcombine.low %v2421_v22, %v2421_v22  ;;  %v10296_v25 = vld [vmem:[%s12976_s1 + $0x18] sm:$0xff]   ;;  %v10300_v57 = vld [vmem:[%s12976_s1 + $0x68] sm:$0xff]  }
  0x8e   : > { %9786 = vmatpush3.bf16.msra.mxu1 %v10272_v56  ;;  %v1717_v9 = vshrl.u32 %v7984_v26, 16  ;;  %v10302_v2 = vld [vmem:[%s12976_s1 + $0x28] sm:$0xff]  }
  0x8f   : > { %9787 = vmatprep.subr.bf16.mxu1 %v10275_v61  ;;  %9224 = vmatpush3.bf16.msra.mxu0 %v10283_v11  ;;  %v2233_v11 = vld [vmem:[#allocation2 + $0xc] sm:$0x8]  ;;  %v2318_v16 = vor.u32 %v2317_v7, %v2314_v6 }
  0x90   : > { %9261 = vmatprep.subr.bf16.mxu0 %v10284_v14  ;;  %v7989_v45 = vrot.slane %v1717_v9, 11  ;;  %v2325_v14 = vrot.slane %v2323_v0, 5  ;;  %v2542_v0 = vrot.slane %v2540_v54, 7 }
  0x91   : > { %v8107_v32 = vsel %vm7803_vm3, %v2232_v46, %v2318_v16 }
  0x92   : > { %9788 = vmatpush3.bf16.msra.mxu1 %v10275_v61  ;;  %1977 = vmatmul.mubr.bf16.vlgmr.msra.gmra.mrb[32].mxu0 %v10881_v27  ;;  %v1727_v27 = vor.u32 %v1725_v35, %v1724_v40  ;;  %v11169_v61 = vld [vmem:[#allocation2 + $0x28] sm:$0xf]  ;;  %v2501_v20 = vshrl.u32 %v8107_v32, 16  ;;  %v2504_v9 = vshll.u32 %v8107_v32, 16  ;;  %v2253_v40 = vld [vmem:[#allocation2 + $0x20] sm:$0x1] }
  0x93   : > { %9789 = vmatprep.subr.bf16.mxu1 %v10279_v21  ;;  %9262 = vmatpush3.bf16.msra.mxu0 %v10286_v17  ;;  %v11177_v12 = vcombine.low %v11169_v61, %v11169_v61  ;;  %v8097_v26 = vcombine.low %v11169_v61, %v11173_v15  ;;  %4001 = vst [vmem:[#allocation2 + $0x28] sm:$0xf] %v8387_v23  ;;  %v2509_v17 = vshrl.u32 %v8105_v18, 16  ;;  %v10307_v32 = vld [vmem:[%s12976_s1 + $0x78] sm:$0xff]  }
  0x94   : > { %9263 = vmatprep.subr.bf16.mxu0 %v10287_v37  ;;  %1984 = vmatprep.mubr.bf16.mxu0 %v10938_v29  ;;  %v11154_v56 = vsel %vm10779_vm5, %v7989_v45, %v1727_v27  ;;  %v2231_v29 = vld [vmem:[#allocation2] sm:$0x8]  ;;  %v2503_v45 = vrot.slane %v2501_v20, 7  ;;  %v11199_v51 = vld [vmem:[#allocation2 + $0x1c] sm:$0xf] }
  0x95   : > { %v8040_v10 = vcombine.high %v11095_v31, %v11154_v56  ;;  %4000 = vst [vmem:[#allocation2 + $0x1c] sm:$0xf] %v8386_v34  ;;  %v8096_v4 = vcombine.low %v11199_v51, %v2253_v40  ;;  %v2424_v7 = vrot.slane %v8097_v26, 5  ;;  %v2336_v15 = vshrl.u32 %v11177_v12, 16  ;;  %v2235_v20 = vld [vmem:[#allocation2 + $0x18] sm:$0x8] }
  0x96   : > { %9790 = vmatpush3.bf16.msra.mxu1 %v10279_v21  ;;  %v8108_v21 = vcombine.high %v2421_v22, %v2421_v22  ;;  %v2506_v58 = vor.u32 %v2504_v9, %v2503_v45  ;;  %v8086_v22 = vcombine.low %v11199_v51, %v11199_v51  ;;  %v2339_v34 = vshll.u32 %v11177_v12, 16  ;;  %v8079_v9 = vld [vmem:[%s10726_s10 + $0x2c] sm:$0xf]  ;;  %v10305_v40 = vld [vmem:[%s12976_s1 + $0xb0] sm:$0xff]   ;;  %v8080_v45 = vld [vmem:[%s10726_s10 + $0x30] sm:$0xf] }
  0x97   : > { %9791 = vmatprep.subr.bf16.mxu1 %v10282_v42  ;;  %9264 = vmatpush3.bf16.msra.mxu0 %v10289_v59  ;;  %v2423_v8 = vrot.slane %v8096_v4, 5  ;;  %2226 = vst [vmem:[#allocation2 + $0x34] sm:$0xf] %v8079_v9  ;;  %v10309_v12 = vld [vmem:[%s12976_s1 + $0x38] sm:$0xff]   ;;  %2227 = vst [vmem:[#allocation2 + $0x40] sm:$0xf] %v8080_v45 }
  0x98   : > { %9265 = vmatprep.subr.bf16.mxu0 %v10291_v43  ;;  %v2514_v33 = vshrl.u32 %v8108_v21, 16  ;;  %v8145_v43 = vrot.slane %v2509_v17, 11  ;;  %v2517_v49 = vshll.u32 %v8108_v21, 16  ;;  %v10317_v4 = vld [vmem:[%s12976_s1 + $0xc0] sm:$0xff]  }
  0x99   : > { %v8115_v18 = vcombine.low %v2423_v8, %v2423_v8  ;;  %v8118_v21 = vcombine.high %v2423_v8, %v2423_v8 }
  0x9a   : > { %9792 = vmatpush3.bf16.msra.mxu1 %v10282_v42  ;;  %1985 = vmatmul.mubr.bf16.gmra.mrb[36].mxu0 %v10942_v30  ;;  %v2326_v42 = vor.u32 %v2325_v14, %v2322_v13  ;;  %v10297_v30 = vld [vmem:[%s12976_s1 + $0x60] sm:$0xff]   ;;  %v2516_v27 = vrot.slane %v2514_v33, 7  ;;  %v8120_v13 = vcombine.low %v2424_v7, %v2424_v7  ;;  %v2328_v14 = vshrl.u32 %v8086_v22, 16 }
  0x9b   : > { %9801 = vmatprep.subr.bf16.mxu1 %v10285_v41  ;;  %9266 = vmatpush3.bf16.msra.mxu0 %v10293_v63  ;;  %v2543_v63 = vshll.u32 %v8113_v50, 16  ;;  %v2338_v33 = vrot.slane %v2336_v15, 4 }
  0x9c   : > { %v8109_v35 = vcombine.low %v2233_v11, %v2326_v42  ;;  %v8112_v37 = vsel %vm7803_vm3, %v11146_v48, %v2326_v42  ;;  %9267 = vmatprep.subr.bf16.mxu0 %v10294_v5  ;;  %1992 = vmatprep.mubr.bf16.mxu0 %v10974_v19  ;;  %v2535_v48 = vshrl.u32 %v8110_v38, 16  ;;  %v10295_v19 = vld [vmem:[%s12976_s1 + $0x98] sm:$0xff]   ;;  %v10298_v5 = vld [vmem:[%s12976_s1 + $0xa0] sm:$0xff]   ;;  %v8039_v11 = vcombine.low %v11095_v31, %v11154_v56 }
  0x9d   : > { %9794 = vmatmul.mubr.bf16.vlgmr.msra.gmra.mrb[0].mxu1 %v10997_v36  ;;  %v8104_v36 = vcombine.low %v2231_v29, %v2318_v16  ;;  %v2530_v59 = vshll.u32 %v8112_v37, 16  ;;  %v8123_v38 = vcombine.high %v2424_v7, %v2424_v7  ;;  %v2330_v56 = vrot.slane %v2328_v14, 4 }
  0x9e   : > { %9802 = vmatpush3.bf16.msra.mxu1 %v10285_v41  ;;  %9797 = vmatprep.mubr.bf16.mxu1 %v11023_v1  ;;  %v2527_v41 = vshrl.u32 %v8112_v37, 16  ;;  %v2522_v46 = vshrl.u32 %v8109_v35, 16  ;;  %v8147_v3 = vrot.slane %v2535_v48, 11  ;;  %v2566_v42 = vshrl.u32 %v8118_v21, 16  ;;  %v2240_v8 = vld [vmem:[#allocation2 + $0x34] sm:$0xf] }
  0x9f   : > { %9803 = vmatprep.subr.bf16.mxu1 %v10288_v62  ;;  %v2496_v1 = vshrl.u32 %v8104_v36, 16  ;;  %9268 = vmatpush3.bf16.msra.mxu0 %v10296_v25  ;;  %v11249_v25 = vshrl.u32 %v8115_v18, 16  ;;  %v11251_v50 = vshrl.u32 %v8120_v13, 16  ;;  %v2592_v26 = vshrl.u32 %v8123_v38, 16  ;;  %v10306_v36 = vld [vmem:[%s12976_s1 + $0x30] sm:$0xff]  }
  0xa0   : > { %v2529_v53 = vrot.slane %v2527_v41, 7  ;;  %v8146_v60 = vrot.slane %v2522_v46, 11  ;;  %9269 = vmatprep.subr.bf16.mxu0 %v10297_v30  ;;  %v10301_v30 = vld [vmem:[%s12976_s1 + $0xa8] sm:$0xff]   ;;  %v2568_v35 = vrot.slane %v2566_v42, 7  ;;  %v2569_v37 = vshll.u32 %v8118_v21, 16  ;;  %v10313_v46 = vld [vmem:[%s12976_s1 + $0x100] sm:$0xff]  }
  0xa1   : > { %v8144_v52 = vrot.slane %v2496_v1, 11  ;;  %v2594_v1 = vrot.slane %v2592_v26, 7  ;;  %v2595_v41 = vshll.u32 %v8123_v38, 16  ;;  %v2242_v15 = vld [vmem:[#allocation2 + $0x40] sm:$0xf] }
  0xa2   : > { %9804 = vmatpush3.bf16.msra.mxu1 %v10288_v62  ;;  %v2519_v62 = vor.u32 %v2517_v49, %v2516_v27  ;;  %v2532_v29 = vor.u32 %v2530_v59, %v2529_v53  ;;  %1993 = vmatmul.mubr.bf16.gmra.mrb[40].mxu0 %v10978_v47  ;;  %v8149_v27 = vrot.slane %v11249_v25, 11  ;;  %v8151_v49 = vrot.slane %v11251_v50, 11  ;;  %v10321_v25 = vld [vmem:[%s12976_s1 + $0x110] sm:$0xff]  }
  0xa3   : > { %9805 = vmatprep.subr.bf16.mxu1 %v10292_v24  ;;  %v11220_v6 = vsel %vm10779_vm5, %v8144_v52, %v2506_v58  ;;  %2000 = vmatprep.mubr.bf16.mxu0 %v8040_v10  ;;  %v10304_v10 = vld [vmem:[%s12976_s1 + $0x70] sm:$0xff]   ;;  %v2237_v52 = vld [vmem:[#allocation2 + $0x24] sm:$0x8]  ;;  %v8089_v38 = vcombine.low %v2242_v15, %v2242_v15 }
  0xa4   : > { %v11232_v47 = vsel %vm10779_vm5, %v8146_v60, %v2532_v29  ;;  %v2520_v44 = vsel %vm10779_vm5, %v8145_v43, %v2519_v62  ;;  %9270 = vmatpush3.bf16.msra.mxu0 %v10299_v55  ;;  %v2341_v43 = vrot.slane %v2339_v34, 5  ;;  %v8388_v58 = vld [vmem:[%s10726_s10 + $0x4c] sm:$0xf]  ;;  %v10308_v60 = vld [vmem:[%s12976_s1 + $0xb8] sm:$0xff]   ;;  %v2597_v62 = vor.u32 %v2595_v41, %v2594_v1  ;;  %v10319_v34 = vld [vmem:[%s12976_s1 + $0x148] sm:$0xff]  }
  0xa5   : > { %9798 = vmatmul.mubr.bf16.gmra.mrb[4].mxu1 %v8041_v28  ;;  %v2545_v28 = vor.u32 %v2543_v63, %v2542_v0  ;;  %9271 = vmatprep.subr.bf16.mxu0 %v10300_v57  ;;  %v8161_v23 = vcombine.high %v11220_v6, %v11232_v47  ;;  %v8389_v0 = vld [vmem:[%s10726_s10 + $0x50] sm:$0xf]  ;;  %4002 = vst [vmem:[#allocation2 + $0x34] sm:$0xf] %v8388_v58  ;;  %v2256_v1 = vld [vmem:[#allocation2 + $0x44] sm:$0x1] }
  0xa6   : > { %9806 = vmatpush3.bf16.msra.mxu1 %v10292_v24  ;;  %v2331_v24 = vshll.u32 %v8086_v22, 16  ;;  %v2342_v53 = vor.u32 %v2341_v43, %v2338_v33  ;;  %v11299_v13 = vsel %vm10779_vm5, %v8151_v49, %v2597_v62  ;;  %4003 = vst [vmem:[#allocation2 + $0x40] sm:$0xf] %v8389_v0  ;;  %v2255_v33 = vld [vmem:[#allocation2 + $0x38] sm:$0x1]  ;;  %v8099_v45 = vcombine.low %v2242_v15, %v2256_v1 }
  0xa7   : > { %9807 = vmatprep.subr.bf16.mxu1 %v10295_v19  ;;  %v11244_v16 = vsel %vm10779_vm5, %v8147_v3, %v2545_v28  ;;  %v8098_v43 = vcombine.low %v2240_v8, %v2255_v33 }
  0xa8   : > { %v8162_v31 = vcombine.low %v2520_v44, %v11244_v16  ;;  %9272 = vmatpush3.bf16.msra.mxu0 %v10302_v2  ;;  %v2333_v17 = vrot.slane %v2331_v24, 5  ;;  %v8119_v63 = vcombine.low %v2237_v52, %v2342_v53  ;;  %v8122_v29 = vsel %vm7803_vm3, %v11169_v61, %v2342_v53  ;;  %v10318_v61 = vld [vmem:[%s12976_s1 + $0x108] sm:$0xff]   ;;  %v8391_v53 = vld [vmem:[%s10726_s10 + $0x58] sm:$0xf] }
  0xa9   : > { %9273 = vmatprep.subr.bf16.mxu0 %v10304_v10  ;;  %v2579_v7 = vshrl.u32 %v8122_v29, 16  ;;  %v2582_v22 = vshll.u32 %v8122_v29, 16  ;;  %v8088_v10 = vcombine.low %v2240_v8, %v2240_v8  ;;  %v10320_v24 = vld [vmem:[%s12976_s1 + $0xc8] sm:$0xff]   ;;  %v11352_v58 = vrot.slane %v8099_v45, 5 }
  0xaa   : > { %9808 = vmatpush3.bf16.msra.mxu1 %v10295_v19  ;;  %9817 = vmatprep.mubr.bf16.mxu1 %v8162_v31  ;;  %v2334_v59 = vor.u32 %v2333_v17, %v2330_v56  ;;  %v2571_v19 = vor.u32 %v2569_v37, %v2568_v35  ;;  %v2574_v44 = vshrl.u32 %v8119_v63, 16  ;;  %v8082_v31 = vld [vmem:[%s10726_s10 + $0x38] sm:$0xf]  ;;  %v10314_v56 = vld [vmem:[%s12976_s1 + $0x140] sm:$0xff]   ;;  %v2355_v17 = vshll.u32 %v8089_v38, 16 }
  0xab   : > { %9809 = vmatprep.subr.bf16.mxu1 %v10298_v5  ;;  %2001 = vmatmul.mubr.bf16.gmra.mrb[44].mxu0 %v8039_v11  ;;  %v2344_v42 = vshrl.u32 %v8088_v10, 16  ;;  %v2347_v50 = vshll.u32 %v8088_v10, 16  ;;  %2229 = vst [vmem:[#allocation2 + $0x58] sm:$0xf] %v8082_v31  ;;  %v8390_v52 = vld [vmem:[%s10726_s10 + $0x54] sm:$0xf] }
  0xac   : > { %2975 = vmatprep.mubr.bf16.mxu0 %v8161_v23  ;;  %9274 = vmatpush3.bf16.msra.mxu0 %v10306_v36  ;;  %v8114_v48 = vcombine.low %v2235_v20, %v2334_v59  ;;  %v8117_v54 = vsel %vm7803_vm3, %v11199_v51, %v2334_v59  ;;  %v8160_v51 = vcombine.low %v11220_v6, %v11232_v47  ;;  %v2581_v6 = vrot.slane %v2579_v7, 7  ;;  %v8081_v23 = vld [vmem:[%s10726_s10 + $0x34] sm:$0xf]  ;;  %v2239_v36 = vld [vmem:[#allocation2 + $0x30] sm:$0x8]  ;;  %v10329_v7 = vld [vmem:[%s12976_s1 + $0x120] sm:$0xff]  }
  0xad   : > { %9275 = vmatprep.subr.bf16.mxu0 %v10307_v32  ;;  %v2553_v55 = vshrl.u32 %v8117_v54, 16  ;;  %v2556_v57 = vshll.u32 %v8117_v54, 16  ;;  %v11295_v11 = vsel %vm10779_vm5, %v8149_v27, %v2571_v19  ;;  %v8150_v14 = vrot.slane %v2574_v44, 11  ;;  %2228 = vst [vmem:[#allocation2 + $0x4c] sm:$0xf] %v8081_v23  ;;  %v10323_v20 = vld [vmem:[%s12976_s1 + $0xd0] sm:$0xff]  }
  0xae   : > { %9810 = vmatpush3.bf16.msra.mxu1 %v10298_v5  ;;  %v2548_v3 = vshrl.u32 %v8114_v48, 16  ;;  %v2584_v21 = vor.u32 %v2582_v22, %v2581_v6  ;;  %v11318_v26 = vcombine.low %v11295_v11, %v11299_v13  ;;  %v2352_v32 = vshrl.u32 %v8089_v38, 16  ;;  %v10322_v48 = vld [vmem:[%s12976_s1 + $0x150] sm:$0xff]   ;;  %v10326_v54 = vld [vmem:[%s12976_s1 + $0xd8] sm:$0xff]   ;;  %v10332_v31 = vld [vmem:[%s12976_s1 + $0x128] sm:$0xff]  }
  0xaf   : > { %9811 = vmatprep.subr.bf16.mxu1 %v10301_v30  ;;  %v2555_v5 = vrot.slane %v2553_v55, 7  ;;  %v2346_v9 = vrot.slane %v2344_v42, 4  ;;  %v2357_v59 = vrot.slane %v2355_v17, 5  ;;  %v10325_v6 = vld [vmem:[%s12976_s1 + $0x158] sm:$0xff]  }
  0xb0   : > { %9276 = vmatpush3.bf16.msra.mxu0 %v10309_v12  ;;  %v8148_v2 = vrot.slane %v2548_v3, 11  ;;  %v2354_v41 = vrot.slane %v2352_v32, 4  ;;  %v10324_v12 = vld [vmem:[%s12976_s1 + $0x118] sm:$0xff]  }
  0xb1   : > { %9313 = vmatprep.subr.bf16.mxu0 %v10313_v46  ;;  %v2558_v28 = vor.u32 %v2556_v57, %v2555_v5  ;;  %v2241_v46 = vld [vmem:[#allocation2 + $0x3c] sm:$0x8]  ;;  %v2425_v57 = vrot.slane %v8098_v43, 5 }
  0xb2   : > { %9812 = vmatpush3.bf16.msra.mxu1 %v10301_v30  ;;  %v11322_v30 = vsel %vm10779_vm5, %v8150_v14, %v2584_v21  ;;  %v2358_v49 = vor.u32 %v2357_v59, %v2354_v41  ;;  %v11358_v0 = vld [vmem:[#allocation2 + $0x58] sm:$0xf]  ;;  %v8133_v41 = vcombine.high %v11352_v58, %v11352_v58 }
  0xb3   : > { %9813 = vmatprep.subr.bf16.mxu1 %v10305_v40  ;;  %2976 = vmatmul.mubr.bf16.vlgmr.msra.gmra.mrb[48].mxu0 %v8160_v51  ;;  %v11303_v18 = vsel %vm10779_vm5, %v8148_v2, %v2558_v28  ;;  %4005 = vst [vmem:[#allocation2 + $0x58] sm:$0xf] %v8391_v53  ;;  %v8125_v28 = vcombine.low %v2425_v57, %v2425_v57 }
  0xb4   : > { %9314 = vmatpush3.bf16.msra.mxu0 %v10317_v4  ;;  %v11329_v35 = vcombine.high %v11303_v18, %v11322_v30  ;;  %v11333_v37 = vcombine.low %v11303_v18, %v11322_v30  ;;  %v8132_v62 = vsel %vm7803_vm3, %v2242_v15, %v2358_v49  ;;  %v11356_v3 = vld [vmem:[#allocation2 + $0x4c] sm:$0xf]  ;;  %v10331_v15 = vld [vmem:[%s12976_s1 + $0xe0] sm:$0xff]   ;;  %v8128_v17 = vcombine.high %v2425_v57, %v2425_v57 }
  0xb5   : > { %9315 = vmatprep.subr.bf16.mxu0 %v10318_v61  ;;  %v2631_v4 = vshrl.u32 %v8132_v62, 16  ;;  %v2634_v5 = vshll.u32 %v8132_v62, 16  ;;  %v8090_v22 = vcombine.low %v11356_v3, %v11356_v3  ;;  %4004 = vst [vmem:[#allocation2 + $0x4c] sm:$0xf] %v8390_v52  ;;  %v8091_v61 = vcombine.low %v11358_v0, %v11358_v0  ;;  %v2257_v62 = vld [vmem:[#allocation2 + $0x50] sm:$0x1] }
  0xb6   : > { %9814 = vmatpush3.bf16.msra.mxu1 %v10305_v40  ;;  %v2349_v40 = vrot.slane %v2347_v50, 5  ;;  %2983 = vmatprep.mubr.bf16.mxu0 %v11329_v35  ;;  %v2245_v50 = vld [vmem:[#allocation2 + $0x54] sm:$0x8]  ;;  %v2613_v59 = vshrl.u32 %v8125_v28, 16 }
  0xb7   : > { %9815 = vmatprep.subr.bf16.mxu1 %v10308_v60  ;;  %v2633_v14 = vrot.slane %v2631_v4, 7  ;;  %v2360_v10 = vshrl.u32 %v8090_v22, 16  ;;  %v2363_v21 = vshll.u32 %v8090_v22, 16 }
  0xb8   : > { %9316 = vmatpush3.bf16.msra.mxu0 %v10320_v24  ;;  %v2350_v27 = vor.u32 %v2349_v40, %v2346_v9  ;;  %v2368_v24 = vshrl.u32 %v8091_v61, 16  ;;  %v8130_v9 = vcombine.low %v11352_v58, %v11352_v58 }
  0xb9   : > { %9317 = vmatprep.subr.bf16.mxu0 %v10321_v25  ;;  %v2371_v25 = vshll.u32 %v8091_v61, 16  ;;  %v2636_v42 = vor.u32 %v2634_v5, %v2633_v14  ;;  %v2365_v32 = vrot.slane %v2363_v21, 5  ;;  %v2644_v61 = vshrl.u32 %v8133_v41, 16 }
  0xba   : > { %9816 = vmatpush3.bf16.msra.mxu1 %v10308_v60  ;;  %v8124_v19 = vcombine.low %v2239_v36, %v2350_v27  ;;  %v8127_v55 = vsel %vm7803_vm3, %v2240_v8, %v2350_v27  ;;  %v8129_v60 = vcombine.low %v2241_v46, %v2358_v49  ;;  %v2362_v36 = vrot.slane %v2360_v10, 4  ;;  %v10334_v49 = vld [vmem:[%s12976_s1 + $0xe8] sm:$0xff]   ;;  %v10339_v10 = vld [vmem:[%s12976_s1 + $0xf0] sm:$0xff]  }
  0xbb   : > { %9825 = vmatprep.subr.bf16.mxu1 %v10314_v56  ;;  %2984 = vmatmul.mubr.bf16.gmra.mrb[52].mxu0 %v11333_v37  ;;  %v2605_v63 = vshrl.u32 %v8127_v55, 16  ;;  %v2608_v29 = vshll.u32 %v8127_v55, 16  ;;  %v2618_v27 = vshrl.u32 %v8128_v17, 16 }
  0xbc   : > { %9318 = vmatpush3.bf16.msra.mxu0 %v10323_v20  ;;  %v2600_v51 = vshrl.u32 %v8124_v19, 16  ;;  %v2626_v44 = vshrl.u32 %v8129_v60, 16  ;;  %v2373_v20 = vrot.slane %v2371_v25, 5  ;;  %v2366_v1 = vor.u32 %v2365_v32, %v2362_v36  ;;  %v10337_v19 = vld [vmem:[%s12976_s1 + $0x130] sm:$0xff]  }
  0xbd   : > { %9818 = vmatmul.mubr.bf16.vlgmr.msra.gmra.mrb[8].mxu1 %v11318_v26  ;;  %9319 = vmatprep.subr.bf16.mxu0 %v10324_v12  ;;  %v2607_v2 = vrot.slane %v2605_v63, 7  ;;  %v10330_v12 = vld [vmem:[%s12976_s1 + $0x160] sm:$0xff]   ;;  %v2258_v63 = vld [vmem:[#allocation2 + $0x5c] sm:$0x1]  ;;  %v10338_v32 = vld [vmem:[%s12976_s1 + $0x170] sm:$0xff]  }
  0xbe   : > { %9826 = vmatpush3.bf16.msra.mxu1 %v10314_v56  ;;  %v8152_v8 = vrot.slane %v2600_v51, 11  ;;  %v8154_v23 = vrot.slane %v2626_v44, 11  ;;  %v2243_v56 = vld [vmem:[#allocation2 + $0x48] sm:$0x8]  ;;  %v8137_v53 = vsel %vm7803_vm3, %v11356_v3, %v2366_v1  ;;  %v2639_v44 = vshrl.u32 %v8130_v9, 16 }
  0xbf   : > { %9827 = vmatprep.subr.bf16.mxu1 %v10319_v34  ;;  %v2610_v38 = vor.u32 %v2608_v29, %v2607_v2  ;;  %v8134_v52 = vcombine.low %v2243_v56, %v2366_v1  ;;  %v2657_v58 = vshrl.u32 %v8137_v53, 16  ;;  %v2660_v60 = vshll.u32 %v8137_v53, 16  ;;  %v10333_v29 = vld [vmem:[%s12976_s1 + $0x168] sm:$0xff]   ;;  %v10342_v1 = vld [vmem:[%s12976_s1 + $0xf8] sm:$0xff]  }
  0xc0   : > { %9320 = vmatpush3.bf16.msra.mxu0 %v10326_v54  ;;  %v11384_v40 = vsel %vm10779_vm5, %v8154_v23, %v2636_v42  ;;  %v2621_v54 = vshll.u32 %v8128_v17, 16  ;;  %v8155_v23 = vrot.slane %v2639_v44, 11  ;;  %v8101_v25 = vcombine.low %v11358_v0, %v2258_v63  ;;  %v10344_v63 = vld [vmem:[%s12976_s1 + $0x200] sm:$0xff]  }
  0xc1   : > { %v11378_v33 = vsel %vm10779_vm5, %v8152_v8, %v2610_v38  ;;  %9321 = vmatprep.subr.bf16.mxu0 %v10329_v7  ;;  %v2652_v51 = vshrl.u32 %v8134_v52, 16  ;;  %v2620_v7 = vrot.slane %v2618_v27, 7  ;;  %v2659_v22 = vrot.slane %v2657_v58, 7 }
  0xc2   : > { %9828 = vmatpush3.bf16.msra.mxu1 %v10319_v34  ;;  %v2370_v34 = vrot.slane %v2368_v24, 4  ;;  %v11390_v43 = vcombine.high %v11378_v33, %v11384_v40  ;;  %v11394_v45 = vcombine.low %v11378_v33, %v11384_v40  ;;  %v8100_v24 = vcombine.low %v11356_v3, %v2257_v62 }
  0xc3   : > { %9829 = vmatprep.subr.bf16.mxu1 %v10322_v48  ;;  %v8156_v28 = vrot.slane %v2652_v51, 11  ;;  %v2623_v14 = vor.u32 %v2621_v54, %v2620_v7  ;;  %v2662_v21 = vor.u32 %v2660_v60, %v2659_v22  ;;  %v2428_v17 = vrot.slane %v8101_v25, 5  ;;  %v10345_v22 = vld [vmem:[%s12976_s1 + $0x180] sm:$0xff]  }
  0xc4   : > { %v2374_v46 = vor.u32 %v2373_v20, %v2370_v34  ;;  %9322 = vmatpush3.bf16.msra.mxu0 %v10331_v15  ;;  %2991 = vmatprep.mubr.bf16.mxu0 %v11390_v43  ;;  %v2647_v15 = vshll.u32 %v8133_v41, 16  ;;  %v8252_v41 = vcombine.high %v11232_v47, %v11303_v18  ;;  %v10355_v25 = vld [vmem:[%s12976_s1 + $0x1e0] sm:$0xff]  }
  0xc5   : > { %9323 = vmatprep.subr.bf16.mxu0 %v10332_v31  ;;  %2992 = vmatmul.mubr.bf16.gmra.mrb[56].mxu0 %v11394_v45  ;;  %v2646_v31 = vrot.slane %v2644_v61, 7  ;;  %v11424_v42 = vsel %vm10779_vm5, %v8156_v28, %v2662_v21  ;;  %v8140_v27 = vcombine.low %v2428_v17, %v2428_v17  ;;  %v8143_v52 = vcombine.high %v2428_v17, %v2428_v17  ;;  %v10346_v61 = vld [vmem:[%s12976_s1 + $0x1c8] sm:$0xff]   ;;  %v8083_v28 = vld [vmem:[%s10726_s10 + $0x3c] sm:$0xf]  ;;  %v10357_v17 = vld [vmem:[%s12976_s1 + $0x1a0] sm:$0xff]  }
  0xc6   : > { %9830 = vmatpush3.bf16.msra.mxu1 %v10322_v48  ;;  %v8153_v48 = vrot.slane %v2613_v59, 11  ;;  %v8139_v55 = vcombine.low %v2245_v50, %v2374_v46  ;;  %v8142_v57 = vsel %vm7803_vm3, %v11358_v0, %v2374_v46  ;;  %v2427_v0 = vrot.slane %v8100_v24, 5  ;;  %2230 = vst [vmem:[#allocation2 + $0x64] sm:$0xf] %v8083_v28  ;;  %v10351_v21 = vld [vmem:[%s12976_s1 + $0x190] sm:$0xff]  }
  0xc7   : > { %9831 = vmatprep.subr.bf16.mxu1 %v10325_v6  ;;  %v2683_v4 = vshrl.u32 %v8142_v57, 16  ;;  %v2686_v5 = vshll.u32 %v8142_v57, 16  ;;  %v2649_v36 = vor.u32 %v2647_v15, %v2646_v31  ;;  %v2696_v57 = vshrl.u32 %v8143_v52, 16  ;;  %v10349_v15 = vld [vmem:[%s12976_s1 + $0x1d0] sm:$0xff]   ;;  %v10352_v31 = vld [vmem:[%s12976_s1 + $0x1d8] sm:$0xff]  }
  0xc8   : > { %v2678_v2 = vshrl.u32 %v8139_v55, 16  ;;  %9324 = vmatpush3.bf16.msra.mxu0 %v10334_v49  ;;  %v11428_v50 = vsel %vm10779_vm5, %v8153_v48, %v2623_v14  ;;  %v8138_v46 = vcombine.high %v2427_v0, %v2427_v0  ;;  %v10343_v49 = vld [vmem:[%s12976_s1 + $0x1c0] sm:$0xff]   ;;  %v10341_v55 = vld [vmem:[%s12976_s1 + $0x178] sm:$0xff]   ;;  %v2699_v58 = vshll.u32 %v8143_v52, 16  ;;  %v10348_v14 = vld [vmem:[%s12976_s1 + $0x188] sm:$0xff]  }
  0xc9   : > { %v2685_v8 = vrot.slane %v2683_v4, 7  ;;  %9325 = vmatprep.subr.bf16.mxu0 %v10337_v19  ;;  %v11447_v9 = vsel %vm10779_vm5, %v8155_v23, %v2649_v36  ;;  %v2691_v19 = vshrl.u32 %v8140_v27, 16  ;;  %v2698_v51 = vrot.slane %v2696_v57, 7  ;;  %v2260_v52 = vld [vmem:[#allocation2 + $0x74] sm:$0x1] }
  0xca   : > { %9832 = vmatpush3.bf16.msra.mxu1 %v10325_v6  ;;  %v8158_v38 = vrot.slane %v2678_v2, 11  ;;  %v10340_v6 = vld [vmem:[%s12976_s1 + $0x138] sm:$0xff]   ;;  %v11456_v59 = vcombine.low %v11428_v50, %v11447_v9  ;;  %v2670_v48 = vshrl.u32 %v8138_v46, 16  ;;  %v2673_v54 = vshll.u32 %v8138_v46, 16 }
  0xcb   : > { %9833 = vmatprep.subr.bf16.mxu1 %v10330_v12  ;;  %v2688_v56 = vor.u32 %v2686_v5, %v2685_v8  ;;  %v8251_v5 = vcombine.low %v11232_v47, %v11303_v18  ;;  %v2701_v7 = vor.u32 %v2699_v58, %v2698_v51  ;;  %v8255_v2 = vcombine.high %v11322_v30, %v11378_v33 }
  0xcc   : > { %9326 = vmatpush3.bf16.msra.mxu0 %v10339_v10  ;;  %9821 = vmatprep.mubr.bf16.mxu1 %v11456_v59  ;;  %v2672_v62 = vrot.slane %v2670_v48, 7  ;;  %v8253_v18 = vcombine.low %v11244_v16, %v11295_v11  ;;  %v8392_v16 = vld [vmem:[%s10726_s10 + $0x5c] sm:$0xf]  ;;  %v8254_v11 = vcombine.low %v11322_v30, %v11378_v33  ;;  %v2259_v10 = vld [vmem:[#allocation2 + $0x68] sm:$0x1]  ;;  %v8256_v23 = vcombine.low %v11299_v13, %v11428_v50  ;;  %v10354_v13 = vld [vmem:[%s12976_s1 + $0x198] sm:$0xff]  }
  0xcd   : > { %v11435_v3 = vsel %vm10779_vm5, %v8158_v38, %v2688_v56  ;;  %9327 = vmatprep.subr.bf16.mxu0 %v10340_v6  ;;  %v8258_v38 = vcombine.high %v11384_v40, %v11424_v42  ;;  %v2248_v6 = vld [vmem:[#allocation2 + $0x64] sm:$0xf]  ;;  %v10347_v30 = vld [vmem:[%s12976_s1 + $0x208] sm:$0xff]   ;;  %v8257_v27 = vcombine.low %v11384_v40, %v11424_v42 }
  0xce   : > { %9834 = vmatpush3.bf16.msra.mxu1 %v10330_v12  ;;  %v11439_v34 = vcombine.high %v11424_v42, %v11435_v3  ;;  %v11443_v20 = vcombine.low %v11424_v42, %v11435_v3  ;;  %v8135_v12 = vcombine.low %v2427_v0, %v2427_v0  ;;  %v2675_v4 = vor.u32 %v2673_v54, %v2672_v62  ;;  %v10350_v0 = vld [vmem:[%s12976_s1 + $0x210] sm:$0xff]   ;;  %v10353_v62 = vld [vmem:[%s12976_s1 + $0x218] sm:$0xff]  }
  0xcf   : > { %9835 = vmatprep.subr.bf16.mxu1 %v10333_v29  ;;  %v8092_v33 = vcombine.low %v2248_v6, %v2248_v6  ;;  %4006 = vst [vmem:[#allocation2 + $0x64] sm:$0xf] %v8392_v16  ;;  %v8102_v24 = vcombine.low %v2248_v6, %v2259_v10 }
  0xd0   : > { %2999 = vmatprep.mubr.bf16.mxu0 %v11439_v34  ;;  %v2665_v53 = vshrl.u32 %v8135_v12, 16  ;;  %9328 = vmatpush3.bf16.msra.mxu0 %v10342_v1 }
  0xd1   : > { %3000 = vmatmul.mubr.bf16.gmra.mrb[60].mxu0 %v11443_v20  ;;  %9365 = vmatprep.subr.bf16.mxu0 %v10343_v49  ;;  %v2376_v50 = vshrl.u32 %v8092_v33, 16  ;;  %v2379_v36 = vshll.u32 %v8092_v33, 16  ;;  %v11530_v49 = vld [vmem:[#allocation2 + $0x70] sm:$0xf]  ;;  %v10367_v33 = vld [vmem:[%s12976_s1 + $0x1b8] sm:$0xff]  }
  0xd2   : > { %9836 = vmatpush3.bf16.msra.mxu1 %v10333_v29  ;;  %v8157_v60 = vrot.slane %v2665_v53, 11  ;;  %3374 = vmatprep.mubr.bf16.mxu0 %v8252_v41  ;;  %v8159_v29 = vrot.slane %v2691_v19, 11  ;;  %v10358_v53 = vld [vmem:[%s12976_s1 + $0x1e8] sm:$0xff]   ;;  %v8103_v57 = vcombine.low %v11530_v49, %v2260_v52 }
  0xd3   : > { %9837 = vmatprep.subr.bf16.mxu1 %v10338_v32  ;;  %v2378_v1 = vrot.slane %v2376_v50, 4  ;;  %v2381_v41 = vrot.slane %v2379_v36, 5  ;;  %v2249_v36 = vld [vmem:[#allocation2 + $0x6c] sm:$0x8] }
  0xd4   : > { %v2676_v44 = vsel %vm10779_vm5, %v8157_v60, %v2675_v4  ;;  %v11485_v47 = vsel %vm10779_vm5, %v8159_v29, %v2701_v7  ;;  %v2430_v51 = vrot.slane %v8103_v57, 5  ;;  %v10360_v4 = vld [vmem:[%s12976_s1 + $0x1a8] sm:$0xff]  }
  0xd5   : > { %v11490_v8 = vcombine.low %v2676_v44, %v11485_v47  ;;  %v8259_v56 = vcombine.low %v11447_v9, %v2676_v44  ;;  %v2247_v9 = vld [vmem:[#allocation2 + $0x60] sm:$0x8]  ;;  %v2382_v48 = vor.u32 %v2381_v41, %v2378_v1  ;;  %v10371_v52 = vld [vmem:[%s12976_s1 + $0x48] sm:$0xff]  }
  0xd6   : > { %9838 = vmatpush3.bf16.msra.mxu1 %v10338_v32  ;;  %v2429_v32 = vrot.slane %v8102_v24, 5  ;;  %v8291_v44 = vcombine.high %v2430_v51, %v2430_v51  ;;  %v10368_v24 = vld [vmem:[%s12976_s1 + $0x40] sm:$0xff]  }
  0xd7   : > { %9839 = vmatprep.subr.bf16.mxu1 %v10341_v55  ;;  %9822 = vmatmul.mubr.bf16.gmra.mrb[12].mxu1 %v11490_v8  ;;  %v8196_v58 = vcombine.low %v2247_v9, %v2382_v48  ;;  %v8199_v60 = vsel %vm7803_vm3, %v2248_v6, %v2382_v48 }
  0xd8   : > { %9841 = vmatprep.mubr.bf16.mxu1 %v8253_v18  ;;  %v8197_v12 = vcombine.low %v2429_v32, %v2429_v32  ;;  %v8200_v46 = vcombine.high %v2429_v32, %v2429_v32  ;;  %v3106_v29 = vshll.u32 %v8199_v60, 16  ;;  %v8093_v18 = vcombine.low %v11530_v49, %v11530_v49  ;;  %v10363_v32 = vld [vmem:[%s12976_s1 + $0x230] sm:$0xff]  }
  0xd9   : > { %3375 = vmatmul.mubr.bf16.vlgmr.msra.gmra.mrb[64].mxu0 %v8251_v5  ;;  %v3098_v5 = vshrl.u32 %v8196_v58, 16  ;;  %v3526_v50 = vshll.u32 %v8291_v44, 16  ;;  %v11608_v58 = vld [vmem:[#allocation2 + $0x10] sm:$0xf] }
  0xda   : > { %9840 = vmatpush3.bf16.msra.mxu1 %v10341_v55  ;;  %9366 = vmatpush3.bf16.msra.mxu0 %v10345_v22  ;;  %v3111_v54 = vshrl.u32 %v8197_v12, 16  ;;  %v3116_v19 = vshrl.u32 %v8200_v46, 16  ;;  %v3119_v55 = vshll.u32 %v8200_v46, 16 }
  0xdb   : > { %9849 = vmatprep.subr.bf16.mxu1 %v10344_v63  ;;  %3382 = vmatprep.mubr.bf16.mxu0 %v8255_v2  ;;  %v10362_v2 = vld [vmem:[%s12976_s1 + $0x1f0] sm:$0xff]  }
  0xdc   : > { %9367 = vmatprep.subr.bf16.mxu0 %v10346_v61  ;;  %v8202_v40 = vrot.slane %v3111_v54, 11  ;;  %v3118_v42 = vrot.slane %v3116_v19, 7  ;;  %v8201_v61 = vrot.slane %v3098_v5, 11  ;;  %v11596_v54 = vld [vmem:[#allocation2 + $0x4] sm:$0xf]  ;;  %v10373_v19 = vld [vmem:[%s12976_s1 + $0x8] sm:$0xff]  }
  0xde   : > { %9368 = vmatpush3.bf16.msra.mxu0 %v10348_v14  ;;  %v3121_v7 = vor.u32 %v3119_v55, %v3118_v42  ;;  %v10356_v14 = vld [vmem:[%s12976_s1 + $0x220] sm:$0xff]   ;;  %v10375_v55 = vld [vmem:[%s12976_s1 + $0x50] sm:$0xff]   ;;  %v8394_v42 = vcombine.low %v11608_v58, %v11608_v58 }
  0xdf   : > { %9369 = vmatprep.subr.bf16.mxu0 %v10349_v15  ;;  %9842 = vmatmul.mubr.bf16.vlgmr.msra.gmra.mrb[8].mxu1 %v8256_v23  ;;  %v3523_v23 = vshrl.u32 %v8291_v44, 16 }
  0xe0   : > { %9850 = vmatpush3.bf16.msra.mxu1 %v10344_v63  ;;  %9845 = vmatprep.mubr.bf16.mxu1 %v8259_v56  ;;  %v3103_v63 = vshrl.u32 %v8199_v60, 16  ;;  %v11548_v28 = vsel %vm10779_vm5, %v8202_v40, %v3121_v7  ;;  %v2387_v56 = vshll.u32 %v8093_v18, 16  ;;  %v8393_v60 = vcombine.low %v11596_v54, %v11596_v54 }
  0xe1   : > { %3383 = vmatmul.mubr.bf16.gmra.mrb[68].mxu0 %v8254_v11  ;;  %9851 = vmatprep.subr.bf16.mxu1 %v10347_v30  ;;  %v8262_v16 = vcombine.low %v11485_v47, %v11548_v28  ;;  %v10364_v11 = vld [vmem:[%s12976_s1 + $0x1b0] sm:$0xff]   ;;  %v10359_v47 = vld [vmem:[%s12976_s1 + $0x228] sm:$0xff]   ;;  %v4096_v44 = vshrl.u32 %v8394_v42, 16 }
  0xe2   : > { %9370 = vmatpush3.bf16.msra.mxu0 %v10351_v21  ;;  %3390 = vmatprep.mubr.bf16.mxu0 %v8258_v38  ;;  %v3105_v22 = vrot.slane %v3103_v63, 7  ;;  %v10365_v21 = vld [vmem:[%s12976_s1 + $0x1f8] sm:$0xff]   ;;  %v8288_v38 = vcombine.low %v2430_v51, %v2430_v51  ;;  %v4027_v63 = vld [vmem:[#allocation2 + $0x8] sm:$0x1]  ;;  %v4088_v51 = vshrl.u32 %v8393_v60, 16 }
  0xe3   : > { %9371 = vmatprep.subr.bf16.mxu0 %v10352_v31  ;;  %v8403_v5 = vcombine.low %v11596_v54, %v4027_v63  ;;  %v10383_v63 = vld [vmem:[%s12976_s1 + $0x20] sm:$0xff]  }
  0xe4   : > { %9852 = vmatpush3.bf16.msra.mxu1 %v10347_v30  ;;  %v3108_v15 = vor.u32 %v3106_v29, %v3105_v22  ;;  %v2384_v30 = vshrl.u32 %v8093_v18, 16  ;;  %v4028_v29 = vld [vmem:[#allocation2 + $0x14] sm:$0x1]  ;;  %v10372_v18 = vld [vmem:[%s12976_s1 + $0x88] sm:$0xff]  }
  0xe5   : > { %9853 = vmatprep.subr.bf16.mxu1 %v10350_v0  ;;  %v8404_v7 = vcombine.low %v11608_v58, %v4028_v29 }
  0xe6   : > { %9372 = vmatpush3.bf16.msra.mxu0 %v10354_v13  ;;  %v11562_v10 = vsel %vm10779_vm5, %v8201_v61, %v3108_v15  ;;  %v2386_v13 = vrot.slane %v2384_v30, 4  ;;  %v4099_v61 = vshll.u32 %v8394_v42, 16  ;;  %v10377_v15 = vld [vmem:[%s12976_s1 + $0x10] sm:$0xff]   ;;  %v4029_v30 = vld [vmem:[#allocation2 + $0x20] sm:$0x1] }
  0xe7   : > { %9373 = vmatprep.subr.bf16.mxu0 %v10355_v25  ;;  %9846 = vmatmul.mubr.bf16.gmra.mrb[12].mxu1 %v8262_v16  ;;  %v8261_v31 = vcombine.high %v11435_v3, %v11562_v10  ;;  %v8260_v6 = vcombine.low %v11435_v3, %v11562_v10  ;;  %v3518_v25 = vshrl.u32 %v8288_v38, 16  ;;  %v3525_v3 = vrot.slane %v3523_v23, 7  ;;  %v4009_v16 = vld [vmem:[#allocation2 + $0xc] sm:$0x8]  ;;  %v10378_v38 = vld [vmem:[%s12976_s1 + $0x58] sm:$0xff]  }
  0xe8   : > { %9854 = vmatpush3.bf16.msra.mxu1 %v10350_v0  ;;  %9865 = vmatprep.mubr.bf16.mxu1 %v11318_v26  ;;  %v2389_v26 = vrot.slane %v2387_v56, 5  ;;  %v4098_v23 = vrot.slane %v4096_v44, 4 }
  0xe9   : > { %3391 = vmatmul.mubr.bf16.gmra.mrb[72].mxu0 %v8257_v27  ;;  %9855 = vmatprep.subr.bf16.mxu1 %v10353_v62  ;;  %v8293_v41 = vrot.slane %v3518_v25, 11  ;;  %v3528_v12 = vor.u32 %v3526_v50, %v3525_v3  ;;  %v8695_v25 = vld [vmem:[%s10726_s10 + $0x64] sm:$0xf]  ;;  %v8696_v3 = vld [vmem:[%s10726_s10 + $0x68] sm:$0xf] }
  0xea   : > { %9374 = vmatpush3.bf16.msra.mxu0 %v10357_v17  ;;  %3398 = vmatprep.mubr.bf16.mxu0 %v8261_v31  ;;  %v2390_v0 = vor.u32 %v2389_v26, %v2386_v13  ;;  %v10366_v17 = vld [vmem:[%s12976_s1 + $0x238] sm:$0xff]   ;;  %v4197_v31 = vrot.slane %v8403_v5, 5  ;;  %v10384_v5 = vld [vmem:[%s12976_s1 + $0x68] sm:$0xff]  }
  0xeb   : > { %9375 = vmatprep.subr.bf16.mxu0 %v10358_v53 }
  0xec   : > { %9856 = vmatpush3.bf16.msra.mxu1 %v10353_v62  ;;  %v8287_v9 = vcombine.low %v2249_v36, %v2390_v0  ;;  %v8290_v1 = vsel %vm7803_vm3, %v11530_v49, %v2390_v0  ;;  %v10369_v49 = vld [vmem:[%s12976_s1 + $0x80] sm:$0xff]   ;;  %v8694_v62 = vld [vmem:[%s10726_s10 + $0x60] sm:$0xf]  ;;  %v8414_v26 = vcombine.low %v4197_v31, %v4197_v31  ;;  %v8417_v36 = vcombine.high %v4197_v31, %v4197_v31  ;;  %v10376_v0 = vld [vmem:[%s12976_s1 + $0x90] sm:$0xff]  }
  0xed   : > { %9857 = vmatprep.subr.bf16.mxu1 %v10356_v14  ;;  %v3510_v46 = vshrl.u32 %v8290_v1, 16  ;;  %v3513_v27 = vshll.u32 %v8290_v1, 16  ;;  %5775 = vst [vmem:[#allocation2 + $0x10] sm:$0xf] %v8694_v62  ;;  %v10379_v62 = vld [vmem:[%s12976_s1 + $0x98] sm:$0xff]   ;;  %v10382_v31 = vld [vmem:[%s12976_s1 + $0xa0] sm:$0xff]  }
  0xee   : > { %9376 = vmatpush3.bf16.msra.mxu0 %v10360_v4  ;;  %v3505_v53 = vshrl.u32 %v8287_v9, 16  ;;  %v4091_v4 = vshll.u32 %v8393_v60, 16 }
  0xef   : > { %9377 = vmatprep.subr.bf16.mxu0 %v10362_v2  ;;  %v3512_v48 = vrot.slane %v3510_v46, 7  ;;  %v4007_v2 = vld [vmem:[#allocation2] sm:$0x8] }
  0xf0   : > { %9858 = vmatpush3.bf16.msra.mxu1 %v10356_v14  ;;  %v8292_v57 = vrot.slane %v3505_v53, 11 }
  0xf1   : > { %3399 = vmatmul.mubr.bf16.gmra.mrb[76].mxu0 %v8260_v6  ;;  %9859 = vmatprep.subr.bf16.mxu1 %v10359_v47  ;;  %v3515_v40 = vor.u32 %v3513_v27, %v3512_v48  ;;  %v4198_v6 = vrot.slane %v8404_v7, 5 }
  0xf2   : > { %9378 = vmatpush3.bf16.msra.mxu0 %v10364_v11  ;;  %3763 = vmatprep.mubr.bf16.mxu0 %v11329_v35  ;;  %v10370_v35 = vld [vmem:[%s12976_s1] sm:$0xff]   ;;  %v4093_v11 = vrot.slane %v4091_v4, 5 }
  0xf3   : > { %9379 = vmatprep.subr.bf16.mxu0 %v10365_v21  ;;  %v11624_v22 = vsel %vm10779_vm5, %v8292_v57, %v3515_v40  ;;  %v11634_v21 = vld [vmem:[#allocation2 + $0x1c] sm:$0xf]  ;;  %v4293_v57 = vshll.u32 %v8417_v36, 16 }
  0xf4   : > { %9860 = vmatpush3.bf16.msra.mxu1 %v10359_v47  ;;  %v4101_v47 = vrot.slane %v4099_v61, 5  ;;  %v8405_v13 = vcombine.low %v11634_v21, %v4029_v30  ;;  %5776 = vst [vmem:[#allocation2 + $0x1c] sm:$0xf] %v8695_v25  ;;  %v8395_v61 = vcombine.low %v11634_v21, %v11634_v21 }
  0xf5   : > { %9861 = vmatprep.subr.bf16.mxu1 %v10363_v32 }
  0xf6   : > { %9380 = vmatpush3.bf16.msra.mxu0 %v10367_v33  ;;  %v8343_v33 = vcombine.high %v11562_v10, %v11624_v22  ;;  %v4102_v50 = vor.u32 %v4101_v47, %v4098_v23 }
  0xf7   : > { %9417 = vmatprep.subr.bf16.mxu0 %v10368_v24  ;;  %v11641_v24 = vld [vmem:[#allocation2 + $0x28] sm:$0xf] }
  0xf8   : > { %9862 = vmatpush3.bf16.msra.mxu1 %v10363_v32  ;;  %v8419_v32 = vcombine.low %v4198_v6, %v4198_v6  ;;  %5777 = vst [vmem:[#allocation2 + $0x28] sm:$0xf] %v8696_v3  ;;  %v4104_v3 = vshrl.u32 %v8395_v61, 16 }
  0xf9   : > { %3764 = vmatmul.mubr.bf16.vlgmr.msra.gmra.mrb[80].mxu0 %v11333_v37  ;;  %v11614_v37 = vsel %vm10779_vm5, %v8293_v41, %v3528_v12  ;;  %9863 = vmatprep.subr.bf16.mxu1 %v10366_v17  ;;  %v4199_v41 = vrot.slane %v8405_v13, 5  ;;  %v8421_v12 = vsel %vm7803_vm3, %v11608_v58, %v4102_v50 }
  0xfa   : > { %9418 = vmatpush3.bf16.msra.mxu0 %v10370_v35  ;;  %3771 = vmatprep.mubr.bf16.mxu0 %v11390_v43  ;;  %v8344_v14 = vcombine.low %v11548_v28, %v11614_v37  ;;  %v4090_v43 = vrot.slane %v4088_v51, 4  ;;  %v8422_v35 = vcombine.high %v4198_v6, %v4198_v6  ;;  %v4303_v48 = vshrl.u32 %v8421_v12, 16  ;;  %v10386_v6 = vld [vmem:[%s12976_s1 + $0x28] sm:$0xff]  }
  0xfb   : > { %9419 = vmatprep.subr.bf16.mxu0 %v10371_v52  ;;  %v4030_v52 = vld [vmem:[#allocation2 + $0x2c] sm:$0x1]  ;;  %v4311_v58 = vshrl.u32 %v8419_v32, 16  ;;  %v8427_v47 = vcombine.high %v4199_v41, %v4199_v41 }
  0xfc   : > { %9864 = vmatpush3.bf16.msra.mxu1 %v10366_v17  ;;  %v4094_v56 = vor.u32 %v4093_v11, %v4090_v43  ;;  %v10380_v17 = vld [vmem:[%s12976_s1 + $0x18] sm:$0xff]   ;;  %v4305_v40 = vrot.slane %v4303_v48, 7  ;;  %v4316_v4 = vshrl.u32 %v8422_v35, 16  ;;  %v8406_v44 = vcombine.low %v11641_v24, %v4030_v52  ;;  %v11723_v52 = vld [vmem:[#allocation2 + $0x34] sm:$0xf] }
  0xfd   : > { %9873 = vmatprep.subr.bf16.mxu1 %v10369_v49  ;;  %v8424_v43 = vcombine.low %v4199_v41, %v4199_v41  ;;  %v4342_v13 = vshrl.u32 %v8427_v47, 16  ;;  %v4345_v25 = vshll.u32 %v8427_v47, 16  ;;  %v4106_v41 = vrot.slane %v4104_v3, 4  ;;  %v10401_v47 = vld [vmem:[%s12976_s1 + $0xc0] sm:$0xff]   ;;  %v4017_v3 = vld [vmem:[#allocation2 + $0x3c] sm:$0x8] }
  0xfe   : > { %9420 = vmatpush3.bf16.msra.mxu0 %v10373_v19  ;;  %v8413_v9 = vcombine.low %v4007_v2, %v4094_v56  ;;  %v8416_v1 = vsel %vm7803_vm3, %v11596_v54, %v4094_v56  ;;  %v4306_v54 = vshll.u32 %v8421_v12, 16  ;;  %v4285_v19 = vshrl.u32 %v8414_v26, 16 }
  0xff   : > { %9421 = vmatprep.subr.bf16.mxu0 %v10375_v55  ;;  %9866 = vmatmul.mubr.bf16.vlgmr.msra.gmra.mrb[8].mxu1 %v11456_v59  ;;  %v8418_v59 = vcombine.low %v4009_v16, %v4102_v50  ;;  %v4277_v46 = vshrl.u32 %v8416_v1, 16  ;;  %v4280_v27 = vshll.u32 %v8416_v1, 16  ;;  %v4290_v55 = vshrl.u32 %v8417_v36, 16 }
 0x100   : > { %9874 = vmatpush3.bf16.msra.mxu1 %v10369_v49  ;;  %9869 = vmatprep.mubr.bf16.mxu1 %v11490_v8  ;;  %v4272_v53 = vshrl.u32 %v8413_v9, 16  ;;  %v8454_v42 = vrot.slane %v4285_v19, 11  ;;  %v4308_v7 = vor.u32 %v4306_v54, %v4305_v40  ;;  %v4319_v2 = vshll.u32 %v8422_v35, 16  ;;  %v4011_v35 = vld [vmem:[#allocation2 + $0x18] sm:$0x8] }
 0x101   : > { %3772 = vmatmul.mubr.bf16.gmra.mrb[84].mxu0 %v11394_v45  ;;  %v10381_v45 = vld [vmem:[%s12976_s1 + $0x60] sm:$0xff]   ;;  %9875 = vmatprep.subr.bf16.mxu1 %v10372_v18  ;;  %v4279_v8 = vrot.slane %v4277_v46, 7  ;;  %v4298_v49 = vshrl.u32 %v8418_v59, 16  ;;  %v4318_v16 = vrot.slane %v4316_v4, 7  ;;  %v4200_v23 = vrot.slane %v8406_v44, 5  ;;  %v10390_v59 = vld [vmem:[%s12976_s1 + $0x30] sm:$0xff]  }
 0x102   : > { %9422 = vmatpush3.bf16.msra.mxu0 %v10377_v15  ;;  %3779 = vmatprep.mubr.bf16.mxu0 %v11439_v34  ;;  %v8453_v60 = vrot.slane %v4272_v53, 11  ;;  %v4292_v34 = vrot.slane %v4290_v55, 7  ;;  %v8456_v15 = vrot.slane %v4311_v58, 11  ;;  %v11697_v37 = vshrl.u32 %v8424_v43, 16  ;;  %v10391_v53 = vld [vmem:[%s12976_s1 + $0x78] sm:$0xff]   ;;  %v10389_v55 = vld [vmem:[%s12976_s1 + $0xb0] sm:$0xff]  }
 0x103   : > { %9423 = vmatprep.subr.bf16.mxu0 %v10378_v38  ;;  %v4282_v29 = vor.u32 %v4280_v27, %v4279_v8  ;;  %v8455_v51 = vrot.slane %v4298_v49, 11  ;;  %v4321_v30 = vor.u32 %v4319_v2, %v4318_v16  ;;  %v8429_v56 = vcombine.low %v4200_v23, %v4200_v23  ;;  %v11728_v8 = vld [vmem:[#allocation2 + $0x40] sm:$0xf]  ;;  %v4015_v43 = vld [vmem:[#allocation2 + $0x30] sm:$0x8] }
 0x104   : > { %9876 = vmatpush3.bf16.msra.mxu1 %v10372_v18  ;;  %v4295_v18 = vor.u32 %v4293_v57, %v4292_v34  ;;  %v4107_v50 = vshll.u32 %v8395_v61, 16  ;;  %v4344_v36 = vrot.slane %v4342_v13, 7  ;;  %v8458_v12 = vrot.slane %v11697_v37, 11  ;;  %v10393_v57 = vld [vmem:[%s12976_s1 + $0x38] sm:$0xff]   ;;  %v10397_v2 = vld [vmem:[%s12976_s1 + $0x100] sm:$0xff]   ;;  %v10402_v13 = vld [vmem:[%s12976_s1 + $0x108] sm:$0xff]  }
 0x105   : > { %9877 = vmatprep.subr.bf16.mxu1 %v10376_v0  ;;  %v11681_v11 = vsel %vm10779_vm5, %v8453_v60, %v4282_v29  ;;  %v11685_v38 = vsel %vm10779_vm5, %v8455_v51, %v4308_v7  ;;  %v11711_v26 = vsel %vm10779_vm5, %v8456_v15, %v4321_v30  ;;  %v11713_v32 = vshrl.u32 %v8429_v56, 16  ;;  %v8698_v29 = vld [vmem:[%s10726_s10 + $0x70] sm:$0xf] }
 0x106   : > { %9424 = vmatpush3.bf16.msra.mxu0 %v10380_v17  ;;  %v4296_v28 = vsel %vm10779_vm5, %v8454_v42, %v4295_v18  ;;  %v10385_v17 = vld [vmem:[%s12976_s1 + $0xa8] sm:$0xff]   ;;  %v4347_v48 = vor.u32 %v4345_v25, %v4344_v36  ;;  %v8397_v49 = vcombine.low %v11723_v52, %v11723_v52  ;;  %v4013_v42 = vld [vmem:[#allocation2 + $0x24] sm:$0x8]  ;;  %5779 = vst [vmem:[#allocation2 + $0x40] sm:$0xf] %v8698_v29 }
 0x107   : > { %9425 = vmatprep.subr.bf16.mxu0 %v10381_v45  ;;  %9870 = vmatmul.mubr.bf16.gmra.mrb[12].mxu1 %v8344_v14  ;;  %v8396_v14 = vcombine.low %v11641_v24, %v11641_v24  ;;  %v8471_v9 = vcombine.low %v4296_v28, %v11711_v26  ;;  %v4109_v45 = vrot.slane %v4107_v50, 5  ;;  %v8460_v60 = vrot.slane %v11713_v32, 11 }
 0x108   : > { %9878 = vmatpush3.bf16.msra.mxu1 %v10376_v0  ;;  %v8469_v7 = vcombine.low %v11681_v11, %v11685_v38  ;;  %v4123_v18 = vshll.u32 %v8397_v49, 16  ;;  %v11752_v15 = vsel %vm10779_vm5, %v8458_v12, %v4347_v48  ;;  %v10398_v48 = vld [vmem:[%s12976_s1 + $0x140] sm:$0xff]  }
 0x109   : > { %3780 = vmatmul.mubr.bf16.gmra.mrb[88].mxu0 %v11443_v20  ;;  %v8342_v20 = vcombine.low %v11562_v10, %v11624_v22  ;;  %9879 = vmatprep.subr.bf16.mxu1 %v10379_v62  ;;  %v10388_v10 = vld [vmem:[%s12976_s1 + $0x70] sm:$0xff]   ;;  %v8470_v22 = vcombine.high %v11681_v11, %v11685_v38  ;;  %v4112_v27 = vshrl.u32 %v8396_v14, 16  ;;  %v4110_v54 = vor.u32 %v4109_v45, %v4106_v41  ;;  %v10392_v11 = vld [vmem:[%s12976_s1 + $0xb8] sm:$0xff]  }
 0x10a   : > { %3787 = vmatprep.mubr.bf16.mxu0 %v8343_v33  ;;  %9426 = vmatpush3.bf16.msra.mxu0 %v10383_v63  ;;  %v8432_v33 = vcombine.high %v4200_v23, %v4200_v23  ;;  %v4115_v19 = vshll.u32 %v8396_v14, 16  ;;  %v8697_v63 = vld [vmem:[%s10726_s10 + $0x6c] sm:$0xf] }
 0x10b   : > { %9427 = vmatprep.subr.bf16.mxu0 %v10384_v5  ;;  %9889 = vmatprep.mubr.bf16.mxu1 %v8471_v9  ;;  %v4114_v58 = vrot.slane %v4112_v27, 4  ;;  %v8423_v34 = vcombine.low %v4011_v35, %v4110_v54  ;;  %v8426_v4 = vsel %vm7803_vm3, %v11634_v21, %v4110_v54  ;;  %v4120_v5 = vshrl.u32 %v8397_v49, 16  ;;  %5778 = vst [vmem:[#allocation2 + $0x34] sm:$0xf] %v8697_v63  ;;  %v10404_v54 = vld [vmem:[%s12976_s1 + $0xc8] sm:$0xff]  }
 0x10c   : > { %v4368_v0 = vshrl.u32 %v8432_v33, 16  ;;  %9880 = vmatpush3.bf16.msra.mxu1 %v10379_v62  ;;  %v4371_v1 = vshll.u32 %v8432_v33, 16  ;;  %v8398_v62 = vcombine.low %v11728_v8, %v11728_v8  ;;  %v4117_v51 = vrot.slane %v4115_v19, 5  ;;  %v11796_v63 = vld [vmem:[#allocation2 + $0x58] sm:$0xf] }
 0x10d   : > { %9881 = vmatprep.subr.bf16.mxu1 %v10382_v31  ;;  %v4329_v44 = vshrl.u32 %v8426_v4, 16  ;;  %v4332_v61 = vshll.u32 %v8426_v4, 16  ;;  %v4324_v16 = vshrl.u32 %v8423_v34, 16  ;;  %v4122_v23 = vrot.slane %v4120_v5, 4 }
 0x10e   : > { %9428 = vmatpush3.bf16.msra.mxu0 %v10386_v6  ;;  %v4370_v46 = vrot.slane %v4368_v0, 7  ;;  %v4118_v21 = vor.u32 %v4117_v51, %v4114_v58  ;;  %v4128_v28 = vshrl.u32 %v8398_v62, 16  ;;  %v4131_v37 = vshll.u32 %v8398_v62, 16  ;;  %v8699_v51 = vld [vmem:[%s10726_s10 + $0x74] sm:$0xf] }
 0x10f   : > { %9429 = vmatprep.subr.bf16.mxu0 %v10388_v10  ;;  %v8457_v56 = vrot.slane %v4324_v16, 11 }
 0x110   : > { %v4373_v40 = vor.u32 %v4371_v1, %v4370_v46  ;;  %9882 = vmatpush3.bf16.msra.mxu1 %v10382_v31  ;;  %v4331_v31 = vrot.slane %v4329_v44, 7  ;;  %v8428_v6 = vcombine.low %v4013_v42, %v4118_v21  ;;  %v8431_v30 = vsel %vm7803_vm3, %v11641_v24, %v4118_v21  ;;  %v10403_v44 = vld [vmem:[%s12976_s1 + $0x148] sm:$0xff]  }
 0x111   : > { %3788 = vmatmul.mubr.bf16.gmra.mrb[92].mxu0 %v8342_v20  ;;  %9883 = vmatprep.subr.bf16.mxu1 %v10385_v17  ;;  %v4125_v20 = vrot.slane %v4123_v18, 5  ;;  %v4358_v25 = vshll.u32 %v8431_v30, 16  ;;  %v4130_v0 = vrot.slane %v4128_v28, 4 }
 0x112   : > { %4751 = vmatprep.mubr.bf16.mxu0 %v8470_v22  ;;  %9430 = vmatpush3.bf16.msra.mxu0 %v10390_v59  ;;  %v11762_v14 = vsel %vm10779_vm5, %v8460_v60, %v4373_v40  ;;  %v4334_v10 = vor.u32 %v4332_v61, %v4331_v31  ;;  %v4355_v22 = vshrl.u32 %v8431_v30, 16  ;;  %v4350_v32 = vshrl.u32 %v8428_v6, 16  ;;  %v11789_v60 = vld [vmem:[#allocation2 + $0x4c] sm:$0xf]  ;;  %v10405_v40 = vld [vmem:[%s12976_s1 + $0x110] sm:$0xff]  }
 0x113   : > { %9431 = vmatprep.subr.bf16.mxu0 %v10391_v53  ;;  %v4126_v50 = vor.u32 %v4125_v20, %v4122_v23  ;;  %v11773_v1 = vcombine.low %v11752_v15, %v11762_v14  ;;  %v8399_v29 = vcombine.low %v11789_v60, %v11789_v60  ;;  %5780 = vst [vmem:[#allocation2 + $0x4c] sm:$0xf] %v8699_v51  ;;  %v4032_v23 = vld [vmem:[#allocation2 + $0x44] sm:$0x1] }
 0x114   : > { %9884 = vmatpush3.bf16.msra.mxu1 %v10385_v17  ;;  %v4133_v17 = vrot.slane %v4131_v37, 5  ;;  %v4357_v35 = vrot.slane %v4355_v22, 7  ;;  %v8459_v12 = vrot.slane %v4350_v32, 11  ;;  %v11785_v19 = vsel %vm10779_vm5, %v8457_v56, %v4334_v10  ;;  %v10408_v37 = vld [vmem:[%s12976_s1 + $0x118] sm:$0xff]   ;;  %v4019_v56 = vld [vmem:[#allocation2 + $0x48] sm:$0x8] }
 0x115   : > { %9885 = vmatprep.subr.bf16.mxu1 %v10389_v55  ;;  %v8433_v41 = vcombine.low %v4015_v43, %v4126_v50  ;;  %v8436_v45 = vsel %vm7803_vm3, %v11723_v52, %v4126_v50  ;;  %v4031_v43 = vld [vmem:[#allocation2 + $0x38] sm:$0x1]  ;;  %v8400_v31 = vcombine.low %v11796_v63, %v11796_v63  ;;  %v4136_v20 = vshrl.u32 %v8399_v29, 16  ;;  %v10406_v50 = vld [vmem:[%s12976_s1 + $0x150] sm:$0xff]  }
 0x116   : > { %9432 = vmatpush3.bf16.msra.mxu0 %v10393_v57  ;;  %v4134_v46 = vor.u32 %v4133_v17, %v4130_v0  ;;  %v4381_v27 = vshrl.u32 %v8436_v45, 16  ;;  %v4384_v53 = vshll.u32 %v8436_v45, 16  ;;  %v4360_v49 = vor.u32 %v4358_v25, %v4357_v35  ;;  %v11837_v17 = vld [vmem:[#allocation2 + $0x50] sm:$0x1] }
 0x117   : > { %9469 = vmatprep.subr.bf16.mxu0 %v10397_v2  ;;  %v8700_v2 = vld [vmem:[%s10726_s10 + $0x78] sm:$0xf]  ;;  %v4139_v28 = vshll.u32 %v8399_v29, 16  ;;  %v4138_v22 = vrot.slane %v4136_v20, 4  ;;  %v8409_v45 = vcombine.low %v11789_v60, %v11837_v17  ;;  %v10414_v20 = vld [vmem:[%s12976_s1 + $0x160] sm:$0xff]  }
 0x118   : > { %9886 = vmatpush3.bf16.msra.mxu1 %v10389_v55  ;;  %v4376_v55 = vshrl.u32 %v8433_v41, 16  ;;  %v8438_v42 = vcombine.low %v4017_v3, %v4134_v46  ;;  %v8441_v58 = vsel %vm7803_vm3, %v11728_v8, %v4134_v46  ;;  %v4383_v62 = vrot.slane %v4381_v27, 7  ;;  %5781 = vst [vmem:[#allocation2 + $0x58] sm:$0xf] %v8700_v2  ;;  %v10413_v46 = vld [vmem:[%s12976_s1 + $0x120] sm:$0xff]   ;;  %v10421_v17 = vld [vmem:[%s12976_s1 + $0x130] sm:$0xff]  }
 0x119   : > { %4752 = vmatmul.mubr.bf16.vlgmr.msra.gmra.mrb[96].mxu0 %v8469_v7  ;;  %9887 = vmatprep.subr.bf16.mxu1 %v10392_v11  ;;  %v11803_v34 = vsel %vm10779_vm5, %v8459_v12, %v4360_v49  ;;  %v4407_v5 = vshrl.u32 %v8441_v58, 16  ;;  %v4410_v7 = vshll.u32 %v8441_v58, 16  ;;  %v4141_v25 = vrot.slane %v4139_v28, 5  ;;  %v10415_v58 = vld [vmem:[%s12976_s1 + $0xe0] sm:$0xff]  }
 0x11a   : > { %v9121_v33 = vpop.f32.mrb[0].mxu0  ;;  %9470 = vmatpush3.bf16.msra.mxu0 %v10401_v47  ;;  %v8461_v4 = vrot.slane %v4376_v55, 11  ;;  %v11811_v61 = vcombine.high %v11785_v19, %v11803_v34  ;;  %v11815_v18 = vcombine.low %v11785_v19, %v11803_v34  ;;  %v4386_v21 = vor.u32 %v4384_v53, %v4383_v62 }
 0x11b   : > { %v9122_v36 = vpop.f32.mrb[1].mxu0  ;;  %9471 = vmatprep.subr.bf16.mxu0 %v10402_v13  ;;  %v4402_v16 = vshrl.u32 %v8438_v42, 16  ;;  %v4409_v47 = vrot.slane %v4407_v5, 7  ;;  %v8408_v13 = vcombine.low %v11728_v8, %v4032_v23  ;;  %v4144_v3 = vshrl.u32 %v8400_v31, 16  ;;  %v4034_v5 = vld [vmem:[#allocation2 + $0x5c] sm:$0x1] }
 0x11c   : > { %v11769_v9 = vadd.f32 %v9122_v36, %v9121_v33  ;;  %v9124_v24 = vpop.f32.mrb[2].mxu0  ;;  %9888 = vmatpush3.bf16.msra.mxu1 %v10392_v11  ;;  %v10407_v11 = vld [vmem:[%s12976_s1 + $0xd0] sm:$0xff]   ;;  %4759 = vmatprep.mubr.bf16.mxu0 %v11811_v61  ;;  %v11828_v6 = vsel %vm10779_vm5, %v8461_v4, %v4386_v21  ;;  %v8407_v33 = vcombine.low %v11723_v52, %v4031_v43  ;;  %v4147_v36 = vshll.u32 %v8400_v31, 16  ;;  %v10410_v52 = vld [vmem:[%s12976_s1 + $0xd8] sm:$0xff]  }
 0x11d   : > { %v9125_v59 = vpop.f32.mrb[3].mxu0  ;;  %9897 = vmatprep.subr.bf16.mxu1 %v10398_v48  ;;  %v8463_v30 = vrot.slane %v4402_v16, 11  ;;  %v4412_v10 = vor.u32 %v4410_v7, %v4409_v47  ;;  %v4202_v0 = vrot.slane %v8408_v13, 5  ;;  %v4142_v35 = vor.u32 %v4141_v25, %v4138_v22  ;;  %v10418_v13 = vld [vmem:[%s12976_s1 + $0xe8] sm:$0xff]  }
 0x11e   : > { %v11787_v57 = vadd.f32 %v9125_v59, %v9124_v24  ;;  %9472 = vmatpush3.bf16.msra.mxu0 %v10404_v54  ;;  %v4201_v32 = vrot.slane %v8407_v33, 5  ;;  %v4021_v24 = vld [vmem:[#allocation2 + $0x54] sm:$0x8]  ;;  %v4146_v41 = vrot.slane %v4144_v3, 4  ;;  %v4149_v27 = vrot.slane %v4147_v36, 5 }
 0x11f   : > { %9473 = vmatprep.subr.bf16.mxu0 %v10405_v40  ;;  %9890 = vmatmul.mubr.bf16.vlgmr.msra.gmra.mrb[16].mxu1 %v11773_v1  ;;  %v11844_v8 = vsel %vm10779_vm5, %v8463_v30, %v4412_v10  ;;  %v8443_v54 = vcombine.low %v4019_v56, %v4142_v35  ;;  %v8446_v49 = vsel %vm7803_vm3, %v11789_v60, %v4142_v35  ;;  %v10416_v60 = vld [vmem:[%s12976_s1 + $0x128] sm:$0xff]  }
 0x120   : > { %9898 = vmatpush3.bf16.msra.mxu1 %v10398_v48  ;;  %v11850_v59 = vcombine.high %v11828_v6, %v11844_v8  ;;  %v11854_v12 = vcombine.low %v11828_v6, %v11844_v8  ;;  %v8434_v53 = vcombine.low %v4201_v32, %v4201_v32  ;;  %v10409_v48 = vld [vmem:[%s12976_s1 + $0x158] sm:$0xff]   ;;  %v8437_v55 = vcombine.high %v4201_v32, %v4201_v32 }
 0x121   : > { %4760 = vmatmul.mubr.bf16.gmra.mrb[100].mxu0 %v11815_v18  ;;  %9899 = vmatprep.subr.bf16.mxu1 %v10403_v44  ;;  %v8439_v40 = vcombine.low %v4202_v0, %v4202_v0  ;;  %v4150_v62 = vor.u32 %v4149_v27, %v4146_v41  ;;  %v4433_v29 = vshrl.u32 %v8446_v49, 16  ;;  %v4436_v51 = vshll.u32 %v8446_v49, 16 }
 0x122   : > { %9474 = vmatpush3.bf16.msra.mxu0 %v10407_v11  ;;  %4767 = vmatprep.mubr.bf16.mxu0 %v11850_v59  ;;  %v8442_v4 = vcombine.high %v4202_v0, %v4202_v0  ;;  %v4428_v2 = vshrl.u32 %v8443_v54, 16  ;;  %v4394_v21 = vshrl.u32 %v8437_v55, 16  ;;  %v4397_v16 = vshll.u32 %v8437_v55, 16 }
 0x123   : > { %9475 = vmatprep.subr.bf16.mxu0 %v10408_v37  ;;  %v8448_v23 = vcombine.low %v4021_v24, %v4150_v62  ;;  %v8451_v11 = vsel %vm7803_vm3, %v11796_v63, %v4150_v62  ;;  %v4435_v47 = vrot.slane %v4433_v29, 7  ;;  %v4415_v31 = vshrl.u32 %v8439_v40, 16  ;;  %v10423_v40 = vld [vmem:[%s12976_s1 + $0xf0] sm:$0xff]  }
 0x124   : > { %9900 = vmatpush3.bf16.msra.mxu1 %v10403_v44  ;;  %v4389_v44 = vshrl.u32 %v8434_v53, 16  ;;  %v8465_v28 = vrot.slane %v4428_v2, 11  ;;  %v4459_v37 = vshrl.u32 %v8451_v11, 16  ;;  %v4462_v30 = vshll.u32 %v8451_v11, 16 }
 0x125   : > { %9901 = vmatprep.subr.bf16.mxu1 %v10406_v50  ;;  %v4438_v10 = vor.u32 %v4436_v51, %v4435_v47  ;;  %v4454_v22 = vshrl.u32 %v8448_v23, 16  ;;  %v4396_v25 = vrot.slane %v4394_v21, 7  ;;  %v8464_v3 = vrot.slane %v4415_v31, 11 }
 0x126   : > { %9476 = vmatpush3.bf16.msra.mxu0 %v10410_v52  ;;  %v8462_v56 = vrot.slane %v4389_v44, 11  ;;  %v4461_v36 = vrot.slane %v4459_v37, 7  ;;  %v4420_v32 = vshrl.u32 %v8442_v4, 16  ;;  %v4423_v0 = vshll.u32 %v8442_v4, 16  ;;  %v10422_v44 = vld [vmem:[%s12976_s1 + $0x170] sm:$0xff]   ;;  %v10426_v37 = vld [vmem:[%s12976_s1 + $0xf8] sm:$0xff]  }
 0x127   : > { %9477 = vmatprep.subr.bf16.mxu0 %v10413_v46  ;;  %v11886_v52 = vsel %vm10779_vm5, %v8465_v28, %v4438_v10  ;;  %v8467_v24 = vrot.slane %v4454_v22, 11  ;;  %v4399_v35 = vor.u32 %v4397_v16, %v4396_v25  ;;  %v4203_v41 = vrot.slane %v8409_v45, 5  ;;  %v10417_v46 = vld [vmem:[%s12976_s1 + $0x168] sm:$0xff]  }
 0x128   : > { %9902 = vmatpush3.bf16.msra.mxu1 %v10406_v50  ;;  %v8410_v50 = vcombine.low %v11796_v63, %v4034_v5  ;;  %v4464_v27 = vor.u32 %v4462_v30, %v4461_v36  ;;  %v4422_v53 = vrot.slane %v4420_v32, 7  ;;  %v8561_v45 = vcombine.high %v11685_v38, %v11785_v19  ;;  %v10425_v32 = vld [vmem:[%s12976_s1 + $0x178] sm:$0xff]  }
 0x129   : > { %4768 = vmatmul.mubr.bf16.gmra.mrb[104].mxu0 %v11854_v12  ;;  %9903 = vmatprep.subr.bf16.mxu1 %v10409_v48  ;;  %v8444_v55 = vcombine.low %v4203_v41, %v4203_v41  ;;  %v8447_v63 = vcombine.high %v4203_v41, %v4203_v41 }
 0x12a   : > { %v9127_v42 = vpop.f32.mrb[4].mxu0  ;;  %9478 = vmatpush3.bf16.msra.mxu0 %v10415_v58  ;;  %v4204_v54 = vrot.slane %v8410_v50, 5  ;;  %v11902_v62 = vsel %vm10779_vm5, %v8467_v24, %v4464_v27  ;;  %v8560_v24 = vcombine.low %v11685_v38, %v11785_v19  ;;  %v8564_v27 = vcombine.high %v11803_v34, %v11828_v6  ;;  %v10430_v38 = vld [vmem:[%s12976_s1 + $0x1c8] sm:$0xff]  }
 0x12b   : > { %v9128_v7 = vpop.f32.mrb[5].mxu0  ;;  %9479 = vmatprep.subr.bf16.mxu0 %v10416_v60  ;;  %v11910_v29 = vcombine.high %v11886_v52, %v11902_v62  ;;  %v11914_v51 = vcombine.low %v11886_v52, %v11902_v62  ;;  %v4441_v21 = vshrl.u32 %v8444_v55, 16  ;;  %v4446_v16 = vshrl.u32 %v8447_v63, 16  ;;  %v10432_v55 = vld [vmem:[%s12976_s1 + $0x188] sm:$0xff]  }
 0x12c   : > { %v9130_v43 = vpop.f32.mrb[6].mxu0  ;;  %v11891_v49 = vadd.f32 %v9128_v7, %v9127_v42  ;;  %9904 = vmatpush3.bf16.msra.mxu1 %v10409_v48  ;;  %v11906_v48 = vsel %vm10779_vm5, %v8462_v56, %v4399_v35  ;;  %v4425_v42 = vor.u32 %v4423_v0, %v4422_v53  ;;  %v8449_v4 = vcombine.low %v4204_v54, %v4204_v54  ;;  %v10424_v7 = vld [vmem:[%s12976_s1 + $0x138] sm:$0xff]  }
 0x12d   : > { %v9131_v33 = vpop.f32.mrb[7].mxu0  ;;  %9905 = vmatprep.subr.bf16.mxu1 %v10414_v20  ;;  %v8452_v5 = vcombine.high %v4204_v54, %v4204_v54  ;;  %4775 = vmatprep.mubr.bf16.mxu0 %v11910_v29  ;;  %v8466_v56 = vrot.slane %v4441_v21, 11  ;;  %v8562_v35 = vcombine.low %v11711_v26, %v11752_v15  ;;  %v10428_v15 = vld [vmem:[%s12976_s1 + $0x200] sm:$0xff]  }
 0x12e   : > { %v11896_v58 = vadd.f32 %v9131_v33, %v9130_v43  ;;  %9480 = vmatpush3.bf16.msra.mxu0 %v10418_v13  ;;  %v11921_v2 = vsel %vm10779_vm5, %v8464_v3, %v4425_v42  ;;  %v4449_v43 = vshll.u32 %v8447_v63, 16  ;;  %v4467_v47 = vshrl.u32 %v8449_v4, 16  ;;  %v8701_v4 = vld [vmem:[%s10726_s10 + $0x7c] sm:$0xf] }
 0x12f   : > { %9481 = vmatprep.subr.bf16.mxu0 %v10421_v17  ;;  %v11929_v11 = vcombine.low %v11906_v48, %v11921_v2  ;;  %v4472_v31 = vshrl.u32 %v8452_v5, 16  ;;  %v4475_v28 = vshll.u32 %v8452_v5, 16  ;;  %v4448_v33 = vrot.slane %v4446_v16, 7  ;;  %v4035_v5 = vld [vmem:[#allocation2 + $0x68] sm:$0x1] }
 0x130   : > { %9906 = vmatpush3.bf16.msra.mxu1 %v10414_v20  ;;  %v10427_v20 = vld [vmem:[%s12976_s1 + $0x1c0] sm:$0xff]   ;;  %v8468_v22 = vrot.slane %v4467_v47, 11 }
 0x131   : > { %9907 = vmatprep.subr.bf16.mxu1 %v10417_v46  ;;  %4776 = vmatmul.mubr.bf16.gmra.mrb[108].mxu0 %v11914_v51  ;;  %v4474_v25 = vrot.slane %v4472_v31, 7  ;;  %v4451_v36 = vor.u32 %v4449_v43, %v4448_v33  ;;  %v10431_v43 = vld [vmem:[%s12976_s1 + $0x208] sm:$0xff]   ;;  %v4023_v47 = vld [vmem:[#allocation2 + $0x60] sm:$0x8] }
 0x132   : > { %9893 = vmatprep.mubr.bf16.mxu1 %v11929_v11  ;;  %9482 = vmatpush3.bf16.msra.mxu0 %v10423_v40  ;;  %v4024_v40 = vld [vmem:[#allocation2 + $0x64] sm:$0xf] }
 0x133   : > { %9483 = vmatprep.subr.bf16.mxu0 %v10424_v7  ;;  %5150 = vmatprep.mubr.bf16.mxu0 %v8561_v45  ;;  %v4477_v0 = vor.u32 %v4475_v28, %v4474_v25  ;;  %v11948_v17 = vsel %vm10779_vm5, %v8466_v56, %v4451_v36  ;;  %v8401_v42 = vcombine.low %v4024_v40, %v4024_v40  ;;  %v10433_v7 = vld [vmem:[%s12976_s1 + $0x1d0] sm:$0xff]  }
 0x134   : > { %v9133_v60 = vpop.f32.mrb[8].mxu0  ;;  %9908 = vmatpush3.bf16.msra.mxu1 %v10417_v46  ;;  %v10429_v46 = vld [vmem:[%s12976_s1 + $0x180] sm:$0xff]   ;;  %5782 = vst [vmem:[#allocation2 + $0x64] sm:$0xf] %v8701_v4  ;;  %v10435_v28 = vld [vmem:[%s12976_s1 + $0x190] sm:$0xff]   ;;  %v8567_v56 = vcombine.high %v11844_v8, %v11886_v52  ;;  %v8566_v4 = vcombine.low %v11844_v8, %v11886_v52 }
 0x135   : > { %v9134_v23 = vpop.f32.mrb[9].mxu0  ;;  %9909 = vmatprep.subr.bf16.mxu1 %v10422_v44  ;;  %v11952_v50 = vsel %vm10779_vm5, %v8468_v22, %v4477_v0  ;;  %v4152_v21 = vshrl.u32 %v8401_v42, 16  ;;  %v4155_v16 = vshll.u32 %v8401_v42, 16  ;;  %v10440_v52 = vld [vmem:[%s12976_s1 + $0x220] sm:$0xff]  }
 0x136   : > { %v9136_v30 = vpop.f32.mrb[10].mxu0  ;;  %v11938_v13 = vadd.f32 %v9134_v23, %v9133_v60  ;;  %9484 = vmatpush3.bf16.msra.mxu0 %v10426_v37  ;;  %v11960_v41 = vcombine.low %v11948_v17, %v11952_v50  ;;  %v8411_v60 = vcombine.low %v4024_v40, %v4035_v5  ;;  %v8563_v23 = vcombine.low %v11803_v34, %v11828_v6 }
 0x137   : > { %v9137_v10 = vpop.f32.mrb[11].mxu0  ;;  %9521 = vmatprep.subr.bf16.mxu0 %v10427_v20  ;;  %v10434_v20 = vld [vmem:[%s12976_s1 + $0x210] sm:$0xff]  }
 0x138   : > { %v11941_v3 = vadd.f32 %v9137_v10, %v9136_v30  ;;  %9910 = vmatpush3.bf16.msra.mxu1 %v10422_v44  ;;  %v8565_v44 = vcombine.low %v11762_v14, %v11906_v48  ;;  %v4205_v31 = vrot.slane %v8411_v60, 5  ;;  %v4154_v30 = vrot.slane %v4152_v21, 4  ;;  %v10436_v48 = vld [vmem:[%s12976_s1 + $0x1d8] sm:$0xff]  }
 0x139   : > { %9894 = vmatmul.mubr.bf16.gmra.mrb[20].mxu1 %v11960_v41  ;;  %9911 = vmatprep.subr.bf16.mxu1 %v10425_v32  ;;  %v4157_v14 = vrot.slane %v4155_v16, 5  ;;  %v10438_v10 = vld [vmem:[%s12976_s1 + $0x198] sm:$0xff]  }
 0x13a   : > { %5151 = vmatmul.mubr.bf16.vlgmr.msra.gmra.mrb[112].mxu0 %v8560_v24  ;;  %9913 = vmatprep.mubr.bf16.mxu1 %v8562_v35  ;;  %v8506_v34 = vcombine.low %v4205_v31, %v4205_v31  ;;  %v8509_v6 = vcombine.high %v4205_v31, %v4205_v31  ;;  %v12038_v31 = vld [vmem:[#allocation2 + $0x70] sm:$0xf] }
 0x13b   : > { %9522 = vmatpush3.bf16.msra.mxu0 %v10429_v46  ;;  %5158 = vmatprep.mubr.bf16.mxu0 %v8564_v27  ;;  %v4158_v36 = vor.u32 %v4157_v14, %v4154_v30  ;;  %v4036_v30 = vld [vmem:[#allocation2 + $0x74] sm:$0x1]  ;;  %v8402_v14 = vcombine.low %v12038_v31, %v12038_v31 }
 0x13c   : > { %9912 = vmatpush3.bf16.msra.mxu1 %v10425_v32  ;;  %9523 = vmatprep.subr.bf16.mxu0 %v10430_v38  ;;  %v8568_v32 = vcombine.low %v11921_v2, %v11948_v17  ;;  %v4887_v24 = vshrl.u32 %v8506_v34, 16  ;;  %v4892_v35 = vshrl.u32 %v8509_v6, 16  ;;  %v4895_v46 = vshll.u32 %v8509_v6, 16  ;;  %v10446_v34 = vld [vmem:[%s12976_s1 + $0x1f0] sm:$0xff]  }
 0x13d   : > { %v9139_v53 = vpop.f32.mrb[12].mxu0  ;;  %9921 = vmatprep.subr.bf16.mxu1 %v10428_v15  ;;  %v8505_v38 = vcombine.low %v4023_v47, %v4158_v36  ;;  %v8508_v2 = vsel %vm7803_vm3, %v4024_v40, %v4158_v36  ;;  %v10441_v40 = vld [vmem:[%s12976_s1 + $0x1a0] sm:$0xff]   ;;  %v8412_v6 = vcombine.low %v12038_v31, %v4036_v30 }
 0x13e   : > { %v9140_v26 = vpop.f32.mrb[13].mxu0  ;;  %v8511_v17 = vrot.slane %v4887_v24, 11  ;;  %v4882_v42 = vshll.u32 %v8508_v2, 16 }
 0x13f   : > { %v11974_v19 = vadd.f32 %v9140_v26, %v9139_v53  ;;  %v9142_v54 = vpop.f32.mrb[14].mxu0  ;;  %9524 = vmatpush3.bf16.msra.mxu0 %v10432_v55  ;;  %v10439_v26 = vld [vmem:[%s12976_s1 + $0x1e0] sm:$0xff]  }
 0x140   : > { %v9143_v63 = vpop.f32.mrb[15].mxu0  ;;  %9525 = vmatprep.subr.bf16.mxu0 %v10433_v7 }
 0x141   : > { %v11979_v45 = vadd.f32 %v9143_v63, %v9142_v54  ;;  %9914 = vmatmul.mubr.bf16.vlgmr.msra.gmra.mrb[16].mxu1 %v8565_v44  ;;  %v10437_v54 = vld [vmem:[%s12976_s1 + $0x218] sm:$0xff]   ;;  %v4879_v63 = vshrl.u32 %v8508_v2, 16 }
 0x142   : > { %9922 = vmatpush3.bf16.msra.mxu1 %v10428_v15  ;;  %5159 = vmatmul.mubr.bf16.gmra.mrb[116].mxu0 %v8563_v23  ;;  %v4894_v15 = vrot.slane %v4892_v35, 7 }
 0x143   : > { %9923 = vmatprep.subr.bf16.mxu1 %v10431_v43  ;;  %9526 = vmatpush3.bf16.msra.mxu0 %v10435_v28  ;;  %v4881_v60 = vrot.slane %v4879_v63, 7  ;;  %v10444_v28 = vld [vmem:[%s12976_s1 + $0x1a8] sm:$0xff]   ;;  %v10450_v63 = vld [vmem:[%s12976_s1 + $0x238] sm:$0xff]  }
 0x144   : > { %9527 = vmatprep.subr.bf16.mxu0 %v10436_v48  ;;  %5166 = vmatprep.mubr.bf16.mxu0 %v8567_v56  ;;  %v4897_v5 = vor.u32 %v4895_v46, %v4894_v15  ;;  %v4163_v46 = vshll.u32 %v8402_v14, 16 }
 0x145   : > { %v9173_v37 = vpop.f32.mrb[16].mxu0  ;;  %9917 = vmatprep.mubr.bf16.mxu1 %v8568_v32  ;;  %v4884_v16 = vor.u32 %v4882_v42, %v4881_v60  ;;  %v4160_v32 = vshrl.u32 %v8402_v14, 16  ;;  %v10459_v14 = vld [vmem:[%s12976_s1 + $0x50] sm:$0xff]  }
 0x146   : > { %v9174_v33 = vpop.f32.mrb[17].mxu0  ;;  %9924 = vmatpush3.bf16.msra.mxu1 %v10431_v43  ;;  %v12031_v21 = vsel %vm10779_vm5, %v8511_v17, %v4897_v5 }
 0x147   : > { %v9175_v22 = vadd.f32 %v9174_v33, %v9173_v37  ;;  %v9176_v25 = vpop.f32.mrb[18].mxu0  ;;  %9925 = vmatprep.subr.bf16.mxu1 %v10434_v20  ;;  %9528 = vmatpush3.bf16.msra.mxu0 %v10438_v10  ;;  %v8571_v43 = vcombine.low %v11952_v50, %v12031_v21 }
 0x148   : > { %v9177_v0 = vpop.f32.mrb[19].mxu0  ;;  %9529 = vmatprep.subr.bf16.mxu0 %v10439_v26  ;;  %v10451_v26 = vld [vmem:[%s12976_s1 + $0x1b8] sm:$0xff]  }
 0x149   : > { %v12009_v27 = vadd.f32 %v9175_v22, %v11769_v9  ;;  %v9178_v53 = vadd.f32 %v9177_v0, %v9176_v25  ;;  %v4874_v9 = vshrl.u32 %v8505_v38, 16  ;;  %9918 = vmatmul.mubr.bf16.gmra.mrb[20].mxu1 %v8571_v43  ;;  %v10448_v22 = vld [vmem:[%s12976_s1 + $0x1b0] sm:$0xff]   ;;  %v4206_v25 = vrot.slane %v8412_v6, 5 }
 0x14a   : > { %9926 = vmatpush3.bf16.msra.mxu1 %v10434_v20  ;;  %5167 = vmatmul.mubr.bf16.gmra.mrb[120].mxu0 %v8566_v4  ;;  %v10443_v20 = vld [vmem:[%s12976_s1 + $0x228] sm:$0xff]   ;;  %v10447_v38 = vld [vmem:[%s12976_s1 + $0x230] sm:$0xff]   ;;  %v4165_v4 = vrot.slane %v4163_v46, 5 }
 0x14b   : > { %v12019_v55 = vadd.f32 %v9178_v53, %v11787_v57  ;;  %v8510_v7 = vrot.slane %v4874_v9, 11  ;;  %v10442_v57 = vld [vmem:[%s12976_s1 + $0x1e8] sm:$0xff]   ;;  %9927 = vmatprep.subr.bf16.mxu1 %v10437_v54  ;;  %9530 = vmatpush3.bf16.msra.mxu0 %v10441_v40  ;;  %v8600_v0 = vcombine.high %v4206_v25, %v4206_v25  ;;  %v8597_v53 = vcombine.low %v4206_v25, %v4206_v25  ;;  %v10452_v9 = vld [vmem:[%s12976_s1 + $0x40] sm:$0xff]  }
 0x14c   : > { %9531 = vmatprep.subr.bf16.mxu0 %v10442_v57  ;;  %9937 = vmatprep.mubr.bf16.mxu1 %v11773_v1  ;;  %v10457_v57 = vld [vmem:[%s12976_s1 + $0x8] sm:$0xff]  }
 0x14d   : > { %v9179_v44 = vpop.f32.mrb[20].mxu0  ;;  %v12047_v50 = vsel %vm10779_vm5, %v8510_v7, %v4884_v16  ;;  %v5299_v15 = vshrl.u32 %v8600_v0, 16  ;;  %v5294_v5 = vshrl.u32 %v8597_v53, 16  ;;  %v5302_v40 = vshll.u32 %v8600_v0, 16  ;;  %v4025_v7 = vld [vmem:[#allocation2 + $0x6c] sm:$0x8] }
 0x14e   : > { %v9180_v8 = vpop.f32.mrb[21].mxu0  ;;  %v8570_v33 = vcombine.high %v11902_v62, %v12047_v50  ;;  %9928 = vmatpush3.bf16.msra.mxu1 %v10437_v54  ;;  %v4162_v54 = vrot.slane %v4160_v32, 4  ;;  %v12127_v32 = vld [vmem:[#allocation2 + $0x10] sm:$0xf]  ;;  %v5804_v0 = vld [vmem:[#allocation2 + $0x14] sm:$0x1] }
 0x14f   : > { %v9181_v23 = vadd.f32 %v9180_v8, %v9179_v44  ;;  %v9182_v47 = vpop.f32.mrb[22].mxu0  ;;  %9929 = vmatprep.subr.bf16.mxu1 %v10440_v52  ;;  %9532 = vmatpush3.bf16.msra.mxu0 %v10444_v28  ;;  %v10455_v44 = vld [vmem:[%s12976_s1 + $0x48] sm:$0xff]   ;;  %v8602_v16 = vrot.slane %v5294_v5, 11 }
 0x150   : > { %v9183_v37 = vpop.f32.mrb[23].mxu0  ;;  %5174 = vmatprep.mubr.bf16.mxu0 %v8570_v33  ;;  %9533 = vmatprep.subr.bf16.mxu0 %v10446_v34  ;;  %v4166_v60 = vor.u32 %v4165_v4, %v4162_v54 }
 0x151   : > { %v12050_v48 = vadd.f32 %v9181_v23, %v11891_v49  ;;  %v9184_v56 = vadd.f32 %v9183_v37, %v9182_v47  ;;  %v8569_v49 = vcombine.low %v11902_v62, %v12047_v50 }
 0x152   : > { %9930 = vmatpush3.bf16.msra.mxu1 %v10440_v52  ;;  %v8596_v8 = vcombine.low %v4025_v7, %v4166_v60  ;;  %v8599_v52 = vsel %vm7803_vm3, %v12038_v31, %v4166_v60  ;;  %v5783_v7 = vld [vmem:[#allocation2] sm:$0x8] }
 0x153   : > { %v12062_v10 = vadd.f32 %v9184_v56, %v11896_v58  ;;  %v10449_v58 = vld [vmem:[%s12976_s1 + $0x1f8] sm:$0xff]   ;;  %5175 = vmatmul.mubr.bf16.gmra.mrb[124].mxu0 %v8569_v49  ;;  %9931 = vmatprep.subr.bf16.mxu1 %v10443_v20  ;;  %v5286_v23 = vshrl.u32 %v8599_v52, 16  ;;  %v5289_v47 = vshll.u32 %v8599_v52, 16  ;;  %v10461_v49 = vld [vmem:[%s12976_s1 + $0x10] sm:$0xff]  }
 0x154   : > { %9534 = vmatpush3.bf16.msra.mxu0 %v10448_v22  ;;  %5539 = vmatprep.mubr.bf16.mxu0 %v11811_v61  ;;  %v5301_v61 = vrot.slane %v5299_v15, 7  ;;  %v5281_v30 = vshrl.u32 %v8596_v8, 16 }
 0x155   : > { %v9185_v36 = vpop.f32.mrb[24].mxu0  ;;  %9535 = vmatprep.subr.bf16.mxu0 %v10449_v58  ;;  %v5288_v33 = vrot.slane %v5286_v23, 7  ;;  %v10463_v23 = vld [vmem:[%s12976_s1 + $0x98] sm:$0xff]  }
 0x156   : > { %v9186_v1 = vpop.f32.mrb[25].mxu0  ;;  %9932 = vmatpush3.bf16.msra.mxu1 %v10443_v20  ;;  %v5304_v28 = vor.u32 %v5302_v40, %v5301_v61  ;;  %v10456_v20 = vld [vmem:[%s12976_s1 + $0x88] sm:$0xff]   ;;  %v8601_v22 = vrot.slane %v5281_v30, 11  ;;  %v10465_v61 = vld [vmem:[%s12976_s1 + $0x60] sm:$0xff]  }
 0x157   : > { %v9187_v24 = vadd.f32 %v9186_v1, %v9185_v36  ;;  %v9188_v35 = vpop.f32.mrb[26].mxu0  ;;  %9933 = vmatprep.subr.bf16.mxu1 %v10447_v38  ;;  %v5291_v25 = vor.u32 %v5289_v47, %v5288_v33  ;;  %v5784_v36 = vld [vmem:[#allocation2 + $0x4] sm:$0xf]  ;;  %v5803_v1 = vld [vmem:[#allocation2 + $0x8] sm:$0x1] }
 0x158   : > { %v9189_v62 = vpop.f32.mrb[27].mxu0  ;;  %9536 = vmatpush3.bf16.msra.mxu0 %v10451_v26  ;;  %v8702_v58 = vcombine.low %v5784_v36, %v5784_v36  ;;  %v8712_v46 = vcombine.low %v5784_v36, %v5803_v1  ;;  %v8713_v26 = vcombine.low %v12127_v32, %v5804_v0 }
 0x159   : > { %v12080_v2 = vadd.f32 %v9187_v24, %v11938_v13  ;;  %v9190_v17 = vadd.f32 %v9189_v62, %v9188_v35  ;;  %v10454_v13 = vld [vmem:[%s12976_s1] sm:$0xff]   ;;  %9573 = vmatprep.subr.bf16.mxu0 %v10452_v9  ;;  %v10462_v24 = vld [vmem:[%s12976_s1 + $0x58] sm:$0xff]   ;;  %v8703_v35 = vcombine.low %v12127_v32, %v12127_v32  ;;  %v10460_v62 = vld [vmem:[%s12976_s1 + $0x90] sm:$0xff]   ;;  %v12145_v15 = vsel %vm10779_vm5, %v8601_v22, %v5291_v25 }
 0x15a   : > { %9934 = vmatpush3.bf16.msra.mxu1 %v10447_v38  ;;  %v5867_v38 = vshll.u32 %v8702_v58, 16  ;;  %v10464_v9 = vld [vmem:[%s12976_s1 + $0x18] sm:$0xff]   ;;  %v8652_v52 = vcombine.high %v12047_v50, %v12145_v15  ;;  %v10470_v25 = vld [vmem:[%s12976_s1 + $0x28] sm:$0xff]  }
 0x15b   : > { %v12090_v42 = vadd.f32 %v9190_v17, %v11941_v3  ;;  %v10453_v3 = vld [vmem:[%s12976_s1 + $0x80] sm:$0xff]   ;;  %5540 = vmatmul.mubr.bf16.vlgmr.msra.gmra.mrb[128].mxu0 %v11815_v18  ;;  %9935 = vmatprep.subr.bf16.mxu1 %v10450_v63  ;;  %v5875_v54 = vshll.u32 %v8703_v35, 16 }
 0x15c   : > { %9574 = vmatpush3.bf16.msra.mxu0 %v10454_v13  ;;  %5547 = vmatprep.mubr.bf16.mxu0 %v11850_v59  ;;  %v12119_v59 = vsel %vm10779_vm5, %v8602_v16, %v5304_v28  ;;  %v5869_v5 = vrot.slane %v5867_v38, 5  ;;  %v5785_v16 = vld [vmem:[#allocation2 + $0xc] sm:$0x8] }
 0x15d   : > { %v9191_v43 = vpop.f32.mrb[28].mxu0  ;;  %9575 = vmatprep.subr.bf16.mxu0 %v10455_v44  ;;  %v5877_v44 = vrot.slane %v5875_v54, 5 }
 0x15e   : > { %v9192_v37 = vpop.f32.mrb[29].mxu0  ;;  %9936 = vmatpush3.bf16.msra.mxu1 %v10450_v63 }
 0x15f   : > { %v9193_v31 = vadd.f32 %v9192_v37, %v9191_v43  ;;  %v9194_v56 = vpop.f32.mrb[30].mxu0  ;;  %9945 = vmatprep.subr.bf16.mxu1 %v10453_v3 }
 0x160   : > { %v9195_v18 = vpop.f32.mrb[31].mxu0  ;;  %9576 = vmatpush3.bf16.msra.mxu0 %v10457_v57 }
 0x161   : > { %v12112_v34 = vadd.f32 %v9193_v31, %v11974_v19  ;;  %v9196_v6 = vadd.f32 %v9195_v18, %v9194_v56  ;;  %9577 = vmatprep.subr.bf16.mxu0 %v10459_v14  ;;  %9938 = vmatmul.mubr.bf16.vlgmr.msra.gmra.mrb[16].mxu1 %v11929_v11  ;;  %v5864_v11 = vshrl.u32 %v8702_v58, 16  ;;  %v12175_v18 = vld [vmem:[%s12976_s1 + $0xa0] sm:$0xff]  }
 0x162   : > { %9946 = vmatpush3.bf16.msra.mxu1 %v10453_v3  ;;  %9941 = vmatprep.mubr.bf16.mxu1 %v11960_v41  ;;  %v5872_v41 = vshrl.u32 %v8703_v35, 16 }
 0x163   : > { %v12125_v19 = vadd.f32 %v9196_v6, %v11979_v45  ;;  %v8653_v45 = vcombine.low %v12031_v21, %v12119_v59  ;;  %9947 = vmatprep.subr.bf16.mxu1 %v10456_v20  ;;  %5548 = vmatmul.mubr.bf16.gmra.mrb[132].mxu0 %v11854_v12  ;;  %v5973_v21 = vrot.slane %v8712_v46, 5  ;;  %v5866_v13 = vrot.slane %v5864_v11, 4  ;;  %v10468_v6 = vld [vmem:[%s12976_s1 + $0x68] sm:$0xff]  }
 0x164   : > { %9578 = vmatpush3.bf16.msra.mxu0 %v10461_v49  ;;  %5555 = vmatprep.mubr.bf16.mxu0 %v11910_v29  ;;  %v5974_v12 = vrot.slane %v8713_v26, 5  ;;  %v5874_v60 = vrot.slane %v5872_v41, 4 }
 0x165   : > { %v9225_v53 = vpop.f32.mrb[32].mxu0  ;;  %9579 = vmatprep.subr.bf16.mxu0 %v10462_v24  ;;  %v8723_v3 = vcombine.low %v5973_v21, %v5973_v21  ;;  %v12154_v57 = vcombine.high %v5973_v21, %v5973_v21  ;;  %v5870_v43 = vor.u32 %v5869_v5, %v5866_v13  ;;  %v12194_v21 = vld [vmem:[#allocation2 + $0x1c] sm:$0xf] }
 0x166   : > { %v9226_v17 = vpop.f32.mrb[33].mxu0  ;;  %9948 = vmatpush3.bf16.msra.mxu1 %v10456_v20  ;;  %v5878_v47 = vor.u32 %v5877_v44, %v5874_v60  ;;  %v8728_v28 = vcombine.low %v5974_v12, %v5974_v12  ;;  %v12162_v37 = vcombine.high %v5974_v12, %v5974_v12  ;;  %v12200_v60 = vld [vmem:[#allocation2 + $0x28] sm:$0xf]  ;;  %v5805_v44 = vld [vmem:[#allocation2 + $0x20] sm:$0x1] }
 0x167   : > { %v9227_v63 = vadd.f32 %v9226_v17, %v9225_v53  ;;  %v9228_v4 = vpop.f32.mrb[34].mxu0  ;;  %9949 = vmatprep.subr.bf16.mxu1 %v10460_v62  ;;  %v6066_v30 = vshrl.u32 %v12154_v57, 16  ;;  %v8722_v31 = vcombine.low %v5783_v7, %v5870_v43  ;;  %v8725_v56 = vsel %vm7803_vm3, %v5784_v36, %v5870_v43 }
 0x168   : > { %v9229_v40 = vpop.f32.mrb[35].mxu0  ;;  %9580 = vmatpush3.bf16.msra.mxu0 %v10464_v9  ;;  %v12170_v33 = vshrl.u32 %v8723_v3, 16  ;;  %v8727_v20 = vcombine.low %v5785_v16, %v5878_v47  ;;  %v6053_v59 = vshrl.u32 %v8725_v56, 16  ;;  %v6056_v49 = vshll.u32 %v8725_v56, 16  ;;  %v5806_v3 = vld [vmem:[#allocation2 + $0x2c] sm:$0x1] }
 0x169   : > { %v10021_v29 = vadd.f32 %v12009_v27, %v9227_v63  ;;  %v9230_v8 = vadd.f32 %v9229_v40, %v9228_v4  ;;  %v10467_v27 = vld [vmem:[%s12976_s1 + $0x20] sm:$0xff]   ;;  %9942 = vmatmul.mubr.bf16.gmra.mrb[20].mxu1 %v8653_v45  ;;  %9581 = vmatprep.subr.bf16.mxu0 %v10465_v61  ;;  %v6048_v58 = vshrl.u32 %v8722_v31, 16  ;;  %v6069_v24 = vshll.u32 %v12154_v57, 16  ;;  %v10469_v57 = vld [vmem:[%s12976_s1 + $0xa8] sm:$0xff]  }
 0x16a   : > { %9950 = vmatpush3.bf16.msra.mxu1 %v10460_v62  ;;  %v6055_v45 = vrot.slane %v6053_v59, 7  ;;  %v6074_v62 = vshrl.u32 %v8727_v20, 16  ;;  %v6068_v53 = vrot.slane %v6066_v30, 7  ;;  %v12190_v11 = vshrl.u32 %v8728_v28, 16  ;;  %v10477_v20 = vld [vmem:[%s12976_s1 + $0x38] sm:$0xff]  }
 0x16b   : > { %v10027_v14 = vadd.f32 %v12019_v55, %v9230_v8  ;;  %v8730_v55 = vsel %vm7803_vm3, %v12127_v32, %v5878_v47  ;;  %9951 = vmatprep.subr.bf16.mxu1 %v10463_v23  ;;  %5556 = vmatmul.mubr.bf16.gmra.mrb[136].mxu0 %v11914_v51  ;;  %v10472_v32 = vld [vmem:[%s12976_s1 + $0x70] sm:$0xff]   ;;  %v8762_v54 = vrot.slane %v6048_v58, 11  ;;  %v8763_v5 = vrot.slane %v12170_v33, 11 }
 0x16c   : > { %v6079_v1 = vshrl.u32 %v8730_v55, 16  ;;  %v6082_v0 = vshll.u32 %v8730_v55, 16  ;;  %9582 = vmatpush3.bf16.msra.mxu0 %v10467_v27  ;;  %5563 = vmatprep.mubr.bf16.mxu0 %v8652_v52  ;;  %v6058_v4 = vor.u32 %v6056_v49, %v6055_v45  ;;  %v8764_v13 = vrot.slane %v6074_v62, 11 }
 0x16d   : > { %v9231_v36 = vpop.f32.mrb[36].mxu0  ;;  %9583 = vmatprep.subr.bf16.mxu0 %v10468_v6  ;;  %v6071_v7 = vor.u32 %v6069_v24, %v6068_v53  ;;  %v6092_v52 = vshrl.u32 %v12162_v37, 16  ;;  %v8765_v47 = vrot.slane %v12190_v11, 11  ;;  %v6095_v30 = vshll.u32 %v12162_v37, 16  ;;  %v10482_v24 = vld [vmem:[%s12976_s1 + $0x100] sm:$0xff]  }
 0x16e   : > { %v9232_v46 = vpop.f32.mrb[37].mxu0  ;;  %v6081_v51 = vrot.slane %v6079_v1, 7  ;;  %9952 = vmatpush3.bf16.msra.mxu1 %v10463_v23  ;;  %v12217_v23 = vsel %vm10779_vm5, %v8762_v54, %v6058_v4  ;;  %v8714_v27 = vcombine.low %v12194_v21, %v5805_v44 }
 0x16f   : > { %v9233_v17 = vadd.f32 %v9232_v46, %v9231_v36  ;;  %v9234_v41 = vpop.f32.mrb[38].mxu0  ;;  %9953 = vmatprep.subr.bf16.mxu1 %v12175_v18  ;;  %v6072_v56 = vsel %vm10779_vm5, %v8763_v5, %v6071_v7 }
 0x170   : > { %v9795_v22 = vpop.f32.mrb[0].mxu1  ;;  %v9235_v63 = vpop.f32.mrb[39].mxu0  ;;  %v6084_v8 = vor.u32 %v6082_v0, %v6081_v51  ;;  %9584 = vmatpush3.bf16.msra.mxu0 %v10470_v25  ;;  %v5975_v59 = vrot.slane %v8714_v27, 5  ;;  %v5787_v27 = vld [vmem:[#allocation2 + $0x18] sm:$0x8] }
 0x171   : > { %v2043_v35 = vpop.f32.mrb[1].mxu1  ;;  %v10018_v61 = vadd.f32 %v12050_v48, %v9233_v17  ;;  %v9236_v40 = vadd.f32 %v9235_v63, %v9234_v41  ;;  %v10474_v48 = vld [vmem:[%s12976_s1 + $0x30] sm:$0xff]   ;;  %9585 = vmatprep.subr.bf16.mxu0 %v10472_v32  ;;  %v10476_v17 = vld [vmem:[%s12976_s1 + $0xb8] sm:$0xff]   ;;  %v10486_v63 = vld [vmem:[%s12976_s1 + $0xc0] sm:$0xff]  }
 0x172   : > { %v12192_v38 = vadd.f32 %v10021_v29, %v2043_v35  ;;  %v9796_v26 = vpop.f32.mrb[2].mxu1  ;;  %v8651_v29 = vcombine.low %v12047_v50, %v12145_v15  ;;  %v10473_v50 = vld [vmem:[%s12976_s1 + $0xb0] sm:$0xff]   ;;  %v10475_v15 = vld [vmem:[%s12976_s1 + $0x78] sm:$0xff]   ;;  %v12228_v28 = vsel %vm10779_vm5, %v8764_v13, %v6084_v8  ;;  %9954 = vmatpush3.bf16.msra.mxu1 %v12175_v18  ;;  %v8715_v18 = vcombine.low %v12200_v60, %v5806_v3  ;;  %v10487_v13 = vld [vmem:[%s12976_s1 + $0x108] sm:$0xff]  }
 0x173   : > { %v2046_v9 = vpop.f32.mrb[3].mxu1  ;;  %v12212_v16 = vadd.f32 %v10018_v61, %v9795_v22  ;;  %v10024_v43 = vadd.f32 %v12062_v10, %v9236_v40  ;;  %v6094_v10 = vrot.slane %v6092_v52, 7  ;;  %9955 = vmatprep.subr.bf16.mxu1 %v10469_v57  ;;  %v8779_v37 = vcombine.high %v12217_v23, %v12228_v28 }
 0x174   : > { %v12197_v12 = vadd.f32 %v10027_v14, %v2046_v9  ;;  %5564 = vmatmul.mubr.bf16.gmra.mrb[140].mxu0 %v8651_v29  ;;  %v8778_v25 = vcombine.low %v12217_v23, %v12228_v28  ;;  %v5976_v35 = vrot.slane %v8715_v18, 5  ;;  %v8733_v32 = vcombine.low %v5975_v59, %v5975_v59 }
 0x175   : > { %v12235_v31 = vadd.f32 %v10024_v43, %v9796_v26  ;;  %v9237_v33 = vpop.f32.mrb[40].mxu0  ;;  %v6097_v55 = vor.u32 %v6095_v30, %v6094_v10  ;;  %9586 = vmatpush3.bf16.msra.mxu0 %v10474_v48  ;;  %6527 = vmatprep.mubr.bf16.mxu0 %v8779_v37  ;;  %v8736_v46 = vcombine.high %v5975_v59, %v5975_v59  ;;  %v12279_v43 = vld [vmem:[#allocation2 + $0x34] sm:$0xf]  ;;  %v12281_v30 = vld [vmem:[#allocation2 + $0x40] sm:$0xf] }
 0x176   : > { %v9238_v49 = vpop.f32.mrb[41].mxu0  ;;  %9587 = vmatprep.subr.bf16.mxu0 %v10475_v15  ;;  %9956 = vmatpush3.bf16.msra.mxu1 %v10469_v57  ;;  %v8704_v26 = vcombine.low %v12194_v21, %v12194_v21  ;;  %v8738_v41 = vcombine.low %v5976_v35, %v5976_v35  ;;  %v8741_v54 = vcombine.high %v5976_v35, %v5976_v35  ;;  %v6113_v51 = vshrl.u32 %v8733_v32, 16  ;;  %v10483_v57 = vld [vmem:[%s12976_s1 + $0x140] sm:$0xff]   ;;  %v10492_v59 = vld [vmem:[%s12976_s1 + $0x110] sm:$0xff]  }
 0x177   : > { %v9239_v36 = vadd.f32 %v9238_v49, %v9237_v33  ;;  %v9240_v58 = vpop.f32.mrb[42].mxu0  ;;  %v12251_v0 = vsel %vm10779_vm5, %v8765_v47, %v6097_v55  ;;  %9957 = vmatprep.subr.bf16.mxu1 %v10473_v50  ;;  %v6118_v9 = vshrl.u32 %v8736_v46, 16  ;;  %v8705_v61 = vcombine.low %v12200_v60, %v12200_v60 }
 0x178   : > { %v12233_v14 = vpop.f32.mrb[4].mxu1  ;;  %v9241_v45 = vpop.f32.mrb[43].mxu0  ;;  %v8780_v62 = vcombine.low %v6072_v56, %v12251_v0  ;;  %v8767_v40 = vrot.slane %v6113_v51, 11  ;;  %v6139_v44 = vshrl.u32 %v8738_v41, 16  ;;  %v6144_v3 = vshrl.u32 %v8741_v54, 16 }
 0x179   : > { %v2059_v6 = vpop.f32.mrb[5].mxu1  ;;  %v10033_v53 = vadd.f32 %v12080_v2, %v9239_v36  ;;  %v9242_v11 = vadd.f32 %v9241_v45, %v9240_v58  ;;  %9588 = vmatpush3.bf16.msra.mxu0 %v10477_v20  ;;  %v6121_v2 = vshll.u32 %v8736_v46, 16  ;;  %v6120_v7 = vrot.slane %v6118_v9, 7  ;;  %v10488_v45 = vld [vmem:[%s12976_s1 + $0x148] sm:$0xff]   ;;  %v10495_v9 = vld [vmem:[%s12976_s1 + $0x118] sm:$0xff]  }
 0x17a   : > { %v12245_v22 = vpop.f32.mrb[6].mxu1  ;;  %9961 = vmatprep.mubr.bf16.mxu1 %v8780_v62  ;;  %9625 = vmatprep.subr.bf16.mxu0 %v10482_v24  ;;  %v6147_v29 = vshll.u32 %v8741_v54, 16  ;;  %v5880_v52 = vshrl.u32 %v8704_v26, 16  ;;  %v8769_v23 = vrot.slane %v6139_v44, 11  ;;  %v6146_v47 = vrot.slane %v6144_v3, 7  ;;  %v10500_v3 = vld [vmem:[%s12976_s1 + $0x120] sm:$0xff]  }
 0x17b   : > { %v2062_v1 = vpop.f32.mrb[7].mxu1  ;;  %v12266_v4 = vadd.f32 %v10033_v53, %v2059_v6  ;;  %v10039_v5 = vadd.f32 %v12090_v42, %v9242_v11  ;;  %9958 = vmatpush3.bf16.msra.mxu1 %v10473_v50  ;;  %v6123_v42 = vor.u32 %v6121_v2, %v6120_v7  ;;  %v5883_v15 = vshll.u32 %v8704_v26, 16  ;;  %v10489_v50 = vld [vmem:[%s12976_s1 + $0xc8] sm:$0xff]   ;;  %v5789_v62 = vld [vmem:[#allocation2 + $0x24] sm:$0x8]  ;;  %v10494_v53 = vld [vmem:[%s12976_s1 + $0xd0] sm:$0xff]  }
 0x17c   : > { %9959 = vmatprep.subr.bf16.mxu1 %v10476_v17  ;;  %6528 = vmatmul.mubr.bf16.vlgmr.msra.gmra.mrb[144].mxu0 %v8778_v25  ;;  %v5882_v56 = vrot.slane %v5880_v52, 4  ;;  %v5888_v33 = vshrl.u32 %v8705_v61, 16  ;;  %v6149_v37 = vor.u32 %v6147_v29, %v6146_v47  ;;  %v5891_v18 = vshll.u32 %v8705_v61, 16 }
 0x17d   : > { %v12277_v8 = vadd.f32 %v10039_v5, %v2062_v1  ;;  %9626 = vmatpush3.bf16.msra.mxu0 %v10486_v63  ;;  %v12288_v20 = vsel %vm10779_vm5, %v8767_v40, %v6123_v42  ;;  %v5885_v55 = vrot.slane %v5883_v15, 5  ;;  %v8706_v32 = vcombine.low %v12279_v43, %v12279_v43  ;;  %v12338_v15 = vld [vmem:[#allocation2 + $0x58] sm:$0xf] }
 0x17e   : > { %v9243_v48 = vpop.f32.mrb[44].mxu0  ;;  %9627 = vmatprep.subr.bf16.mxu0 %v10487_v13  ;;  %v5890_v25 = vrot.slane %v5888_v33, 4  ;;  %v12295_v1 = vsel %vm10779_vm5, %v8769_v23, %v6149_v37  ;;  %v5893_v35 = vrot.slane %v5891_v18, 5 }
 0x17f   : > { %v9244_v10 = vpop.f32.mrb[45].mxu0  ;;  %9960 = vmatpush3.bf16.msra.mxu1 %v10476_v17  ;;  %v5886_v24 = vor.u32 %v5885_v55, %v5882_v56  ;;  %v12301_v46 = vcombine.low %v12288_v20, %v12295_v1  ;;  %v8707_v17 = vcombine.low %v12281_v30, %v12281_v30  ;;  %v5896_v63 = vshrl.u32 %v8706_v32, 16  ;;  %v10496_v55 = vld [vmem:[%s12976_s1 + $0x158] sm:$0xff]  }
 0x180   : > { %v9246_v6 = vpop.f32.mrb[46].mxu0  ;;  %v9245_v36 = vadd.f32 %v9244_v10, %v9243_v48  ;;  %9969 = vmatprep.subr.bf16.mxu1 %v10483_v57  ;;  %v5894_v41 = vor.u32 %v5893_v35, %v5890_v25  ;;  %v5899_v47 = vshll.u32 %v8706_v32, 16  ;;  %v10502_v35 = vld [vmem:[%s12976_s1 + $0xe0] sm:$0xff]  }
 0x181   : > { %v9247_v49 = vpop.f32.mrb[47].mxu0  ;;  %9628 = vmatpush3.bf16.msra.mxu0 %v10489_v50  ;;  %v8732_v54 = vcombine.low %v5787_v27, %v5886_v24  ;;  %v8735_v51 = vsel %vm7803_vm3, %v12194_v21, %v5886_v24  ;;  %v10497_v21 = vld [vmem:[%s12976_s1 + $0xd8] sm:$0xff]   ;;  %v5898_v44 = vrot.slane %v5896_v63, 4  ;;  %v5791_v27 = vld [vmem:[#allocation2 + $0x30] sm:$0x8]  ;;  %v5904_v56 = vshrl.u32 %v8707_v17, 16 }
 0x182   : > { %v9248_v58 = vadd.f32 %v9247_v49, %v9246_v6  ;;  %v10030_v11 = vadd.f32 %v12112_v34, %v9245_v36  ;;  %9629 = vmatprep.subr.bf16.mxu0 %v10492_v59  ;;  %9962 = vmatmul.mubr.bf16.vlgmr.msra.gmra.mrb[24].mxu1 %v12301_v46  ;;  %v6105_v2 = vshrl.u32 %v8735_v51, 16  ;;  %v6108_v34 = vshll.u32 %v8735_v51, 16  ;;  %v12340_v6 = vld [vmem:[#allocation2 + $0x38] sm:$0x1]  ;;  %v12345_v49 = vld [vmem:[#allocation2 + $0x44] sm:$0x1] }
 0x183   : > { %9970 = vmatpush3.bf16.msra.mxu1 %v10483_v57  ;;  %v8737_v61 = vcombine.low %v5789_v62, %v5894_v41  ;;  %v8740_v40 = vsel %vm7803_vm3, %v12200_v60, %v5894_v41  ;;  %v6100_v7 = vshrl.u32 %v8732_v54, 16  ;;  %v5901_v18 = vrot.slane %v5899_v47, 5  ;;  %v10501_v41 = vld [vmem:[%s12976_s1 + $0x160] sm:$0xff]  }
 0x184   : > { %v10036_v26 = vadd.f32 %v12125_v19, %v9248_v58  ;;  %v10493_v19 = vld [vmem:[%s12976_s1 + $0x150] sm:$0xff]   ;;  %v12323_v13 = vadd.f32 %v10030_v11, %v12233_v14  ;;  %9971 = vmatprep.subr.bf16.mxu1 %v10488_v45  ;;  %v6107_v29 = vrot.slane %v6105_v2, 7  ;;  %v6131_v52 = vshrl.u32 %v8740_v40, 16  ;;  %v5793_v58 = vld [vmem:[#allocation2 + $0x3c] sm:$0x8] }
 0x185   : > { %v6134_v48 = vshll.u32 %v8740_v40, 16  ;;  %9630 = vmatpush3.bf16.msra.mxu0 %v10494_v53  ;;  %v8766_v57 = vrot.slane %v6100_v7, 11  ;;  %v6126_v23 = vshrl.u32 %v8737_v61, 16  ;;  %v5907_v59 = vshll.u32 %v8707_v17, 16  ;;  %v10503_v53 = vld [vmem:[%s12976_s1 + $0x128] sm:$0xff]  }
 0x186   : > { %v12329_v5 = vadd.f32 %v10036_v26, %v12245_v22  ;;  %v9277_v14 = vpop.f32.mrb[48].mxu0  ;;  %v12336_v22 = vld [vmem:[#allocation2 + $0x4c] sm:$0xf]  ;;  %9631 = vmatprep.subr.bf16.mxu0 %v10495_v9  ;;  %v6110_v10 = vor.u32 %v6108_v34, %v6107_v29  ;;  %v6133_v50 = vrot.slane %v6131_v52, 7  ;;  %v5906_v24 = vrot.slane %v5904_v56, 4 }
 0x187   : > { %v9278_v42 = vpop.f32.mrb[49].mxu0  ;;  %9972 = vmatpush3.bf16.msra.mxu1 %v10488_v45  ;;  %v8768_v37 = vrot.slane %v6126_v23, 11  ;;  %v5902_v45 = vor.u32 %v5901_v18, %v5898_v44  ;;  %v5909_v62 = vrot.slane %v5907_v59, 5  ;;  %v8708_v26 = vcombine.low %v12336_v22, %v12336_v22  ;;  %v10505_v61 = vld [vmem:[%s12976_s1 + $0xe8] sm:$0xff]   ;;  %v10515_v59 = vld [vmem:[%s12976_s1 + $0x138] sm:$0xff]  }
 0x188   : > { %v9280_v60 = vpop.f32.mrb[50].mxu0  ;;  %v12349_v25 = vsel %vm10779_vm5, %v8766_v57, %v6110_v10  ;;  %v6136_v36 = vor.u32 %v6134_v48, %v6133_v50  ;;  %9973 = vmatprep.subr.bf16.mxu1 %v10493_v19  ;;  %v12354_v32 = vadd.f32 %v9278_v42, %v9277_v14  ;;  %v8709_v54 = vcombine.low %v12338_v15, %v12338_v15  ;;  %v10510_v57 = vld [vmem:[%s12976_s1 + $0x130] sm:$0xff]   ;;  %v10504_v10 = vld [vmem:[%s12976_s1 + $0x168] sm:$0xff]  }
 0x189   : > { %v9281_v33 = vpop.f32.mrb[51].mxu0  ;;  %9632 = vmatpush3.bf16.msra.mxu0 %v10497_v21  ;;  %v8716_v51 = vcombine.low %v12279_v43, %v12340_v6  ;;  %v8717_v9 = vcombine.low %v12281_v30, %v12345_v49  ;;  %v5910_v34 = vor.u32 %v5909_v62, %v5906_v24  ;;  %v8742_v21 = vcombine.low %v5791_v27, %v5902_v45  ;;  %v5795_v50 = vld [vmem:[#allocation2 + $0x48] sm:$0x8]  ;;  %v10514_v27 = vld [vmem:[%s12976_s1 + $0xf0] sm:$0xff]  }
 0x18a   : > { %9633 = vmatprep.subr.bf16.mxu0 %v10500_v3  ;;  %v12359_v11 = vadd.f32 %v9281_v33, %v9280_v60  ;;  %v12365_v17 = vsel %vm10779_vm5, %v8768_v37, %v6136_v36  ;;  %v8745_v7 = vsel %vm7803_vm3, %v12279_v43, %v5902_v45  ;;  %v5912_v44 = vshrl.u32 %v8708_v26, 16 }
 0x18b   : > { %v12378_v63 = vcombine.high %v12349_v25, %v12365_v17  ;;  %v12382_v2 = vcombine.low %v12349_v25, %v12365_v17  ;;  %9974 = vmatpush3.bf16.msra.mxu1 %v10493_v19  ;;  %v5915_v3 = vshll.u32 %v8708_v26, 16  ;;  %v5920_v14 = vshrl.u32 %v8709_v54, 16 }
 0x18c   : > { %9975 = vmatprep.subr.bf16.mxu1 %v10496_v55  ;;  %v8747_v19 = vcombine.low %v5793_v58, %v5910_v34  ;;  %v8750_v52 = vsel %vm7803_vm3, %v12281_v30, %v5910_v34  ;;  %v6152_v48 = vshrl.u32 %v8742_v21, 16  ;;  %v6157_v42 = vshrl.u32 %v8745_v7, 16 }
 0x18d   : > { %9634 = vmatpush3.bf16.msra.mxu0 %v10502_v35  ;;  %6535 = vmatprep.mubr.bf16.mxu0 %v12378_v63  ;;  %v6160_v23 = vshll.u32 %v8745_v7, 16  ;;  %v6183_v47 = vshrl.u32 %v8750_v52, 16  ;;  %v6186_v60 = vshll.u32 %v8750_v52, 16  ;;  %v5914_v30 = vrot.slane %v5912_v44, 4  ;;  %v5797_v44 = vld [vmem:[#allocation2 + $0x54] sm:$0x8] }
 0x18e   : > { %v12387_v40 = vpop.f32.mrb[52].mxu0  ;;  %9635 = vmatprep.subr.bf16.mxu0 %v10503_v53  ;;  %6536 = vmatmul.mubr.bf16.gmra.mrb[148].mxu0 %v12382_v2  ;;  %v8770_v33 = vrot.slane %v6152_v48, 11  ;;  %v6159_v6 = vrot.slane %v6157_v42, 7  ;;  %v6178_v37 = vshrl.u32 %v8747_v19, 16  ;;  %v5917_v18 = vrot.slane %v5915_v3, 5  ;;  %v10511_v52 = vld [vmem:[%s12976_s1 + $0x170] sm:$0xff]  }
 0x18f   : > { %v12391_v29 = vpop.f32.mrb[53].mxu0  ;;  %9976 = vmatpush3.bf16.msra.mxu1 %v10496_v55  ;;  %v6185_v49 = vrot.slane %v6183_v47, 7  ;;  %v5922_v36 = vrot.slane %v5920_v14, 4  ;;  %v5923_v58 = vshll.u32 %v8709_v54, 16  ;;  %v5977_v24 = vrot.slane %v8716_v51, 5  ;;  %v10517_v47 = vld [vmem:[%s12976_s1 + $0xf8] sm:$0xff]  }
 0x190   : > { %v12399_v43 = vpop.f32.mrb[54].mxu0  ;;  %9977 = vmatprep.subr.bf16.mxu1 %v10501_v41  ;;  %v6162_v35 = vor.u32 %v6160_v23, %v6159_v6  ;;  %v8772_v45 = vrot.slane %v6178_v37, 11  ;;  %v5918_v62 = vor.u32 %v5917_v18, %v5914_v30  ;;  %v5978_v53 = vrot.slane %v8717_v9, 5  ;;  %v5809_v23 = vld [vmem:[#allocation2 + $0x50] sm:$0x1] }
 0x191   : > { %v12408_v56 = vpop.f32.mrb[55].mxu0  ;;  %9636 = vmatpush3.bf16.msra.mxu0 %v10505_v61  ;;  %v6188_v55 = vor.u32 %v6186_v60, %v6185_v49  ;;  %v5925_v26 = vrot.slane %v5923_v58, 5  ;;  %v8743_v34 = vcombine.low %v5977_v24, %v5977_v24  ;;  %v8746_v21 = vcombine.high %v5977_v24, %v5977_v24  ;;  %v10516_v58 = vld [vmem:[%s12976_s1 + $0x178] sm:$0xff]  }
 0x192   : > { %9637 = vmatprep.subr.bf16.mxu0 %v10510_v57  ;;  %v12415_v7 = vsel %vm10779_vm5, %v8770_v33, %v6162_v35  ;;  %v8752_v3 = vcombine.low %v5795_v50, %v5918_v62  ;;  %v8755_v54 = vsel %vm7803_vm3, %v12336_v22, %v5918_v62  ;;  %v8748_v51 = vcombine.low %v5978_v53, %v5978_v53  ;;  %v10518_v33 = vld [vmem:[%s12976_s1 + $0x1c0] sm:$0xff]  }
 0x193   : > { %9978 = vmatpush3.bf16.msra.mxu1 %v10501_v41  ;;  %v12421_v61 = vsel %vm10779_vm5, %v8772_v45, %v6188_v55  ;;  %v5926_v9 = vor.u32 %v5925_v26, %v5922_v36  ;;  %v6209_v14 = vshrl.u32 %v8755_v54, 16  ;;  %v6212_v19 = vshll.u32 %v8755_v54, 16  ;;  %v5810_v36 = vld [vmem:[#allocation2 + $0x5c] sm:$0x1] }
 0x194   : > { %9979 = vmatprep.subr.bf16.mxu1 %v10504_v10  ;;  %v12428_v41 = vcombine.high %v12415_v7, %v12421_v61  ;;  %v12432_v48 = vcombine.low %v12415_v7, %v12421_v61  ;;  %v6204_v42 = vshrl.u32 %v8752_v3, 16  ;;  %v8751_v57 = vcombine.high %v5978_v53, %v5978_v53 }
 0x195   : > { %9638 = vmatpush3.bf16.msra.mxu0 %v10514_v27  ;;  %v8757_v60 = vcombine.low %v5797_v44, %v5926_v9  ;;  %v8760_v50 = vsel %vm7803_vm3, %v12338_v15, %v5926_v9  ;;  %v6211_v30 = vrot.slane %v6209_v14, 7  ;;  %v6165_v27 = vshrl.u32 %v8743_v34, 16 }
 0x196   : > { %9639 = vmatprep.subr.bf16.mxu0 %v10515_v59  ;;  %6543 = vmatprep.mubr.bf16.mxu0 %v12428_v41  ;;  %v8774_v37 = vrot.slane %v6204_v42, 11  ;;  %v6235_v18 = vshrl.u32 %v8760_v50, 16  ;;  %v6238_v59 = vshll.u32 %v8760_v50, 16  ;;  %v6170_v49 = vshrl.u32 %v8746_v21, 16 }
 0x197   : > { %9980 = vmatpush3.bf16.msra.mxu1 %v10504_v10  ;;  %6544 = vmatmul.mubr.bf16.gmra.mrb[152].mxu0 %v12432_v48  ;;  %v6214_v35 = vor.u32 %v6212_v19, %v6211_v30  ;;  %v6230_v45 = vshrl.u32 %v8757_v60, 16  ;;  %v8771_v62 = vrot.slane %v6165_v27, 11  ;;  %v6173_v53 = vshll.u32 %v8746_v21, 16 }
 0x198   : > { %v9289_v6 = vpop.f32.mrb[56].mxu0  ;;  %9981 = vmatprep.subr.bf16.mxu1 %v10511_v52  ;;  %v6237_v26 = vrot.slane %v6235_v18, 7  ;;  %v6172_v10 = vrot.slane %v6170_v49, 7  ;;  %v6191_v34 = vshrl.u32 %v8748_v51, 16  ;;  %v6196_v44 = vshrl.u32 %v8751_v57, 16 }
 0x199   : > { %v9290_v24 = vpop.f32.mrb[57].mxu0  ;;  %9640 = vmatpush3.bf16.msra.mxu0 %v10517_v47  ;;  %v12449_v54 = vsel %vm10779_vm5, %v8774_v37, %v6214_v35  ;;  %v8776_v9 = vrot.slane %v6230_v45, 11  ;;  %v6199_v14 = vshll.u32 %v8751_v57, 16  ;;  %v8718_v42 = vcombine.low %v12336_v22, %v5809_v23  ;;  %v12464_v22 = vld [vmem:[%s12976_s1 + $0x200] sm:$0xff]  }
 0x19a   : > { %v9292_v55 = vpop.f32.mrb[58].mxu0  ;;  %9677 = vmatprep.subr.bf16.mxu0 %v10518_v33  ;;  %v6240_v19 = vor.u32 %v6238_v59, %v6237_v26  ;;  %v6175_v60 = vor.u32 %v6173_v53, %v6172_v10  ;;  %v8773_v21 = vrot.slane %v6191_v34, 11  ;;  %v6198_v50 = vrot.slane %v6196_v44, 7 }
 0x19b   : > { %v9293_v3 = vpop.f32.mrb[59].mxu0  ;;  %9982 = vmatpush3.bf16.msra.mxu1 %v10511_v52  ;;  %v8719_v30 = vcombine.low %v12338_v15, %v5810_v36  ;;  %v5979_v51 = vrot.slane %v8718_v42, 5  ;;  %v12455_v47 = vadd.f32 %v12391_v29, %v12387_v40  ;;  %v12459_v27 = vadd.f32 %v12408_v56, %v12399_v43 }
 0x19c   : > { %9983 = vmatprep.subr.bf16.mxu1 %v10516_v58  ;;  %v12468_v52 = vsel %vm10779_vm5, %v8776_v9, %v6240_v19  ;;  %v12472_v15 = vsel %vm10779_vm5, %v8771_v62, %v6175_v60  ;;  %v6201_v40 = vor.u32 %v6199_v14, %v6198_v50  ;;  %v8870_v57 = vcombine.high %v12228_v28, %v12349_v25 }
 0x19d   : > { %v12476_v29 = vcombine.high %v12449_v54, %v12468_v52  ;;  %v12480_v43 = vcombine.low %v12449_v54, %v12468_v52  ;;  %v5980_v56 = vrot.slane %v8719_v30, 5  ;;  %v8753_v33 = vcombine.low %v5979_v51, %v5979_v51 }
 0x19e   : > { %v12486_v23 = vsel %vm10779_vm5, %v8773_v21, %v6201_v40  ;;  %v8756_v37 = vcombine.high %v5979_v51, %v5979_v51  ;;  %v12495_v53 = vadd.f32 %v9290_v24, %v9289_v6  ;;  %v12503_v9 = vadd.f32 %v9293_v3, %v9292_v55  ;;  %v12508_v6 = vld [vmem:[%s12978_s3] ss:$0 sm:$0xff] }
 0x19f   : > { %9984 = vmatpush3.bf16.msra.mxu1 %v10516_v58  ;;  %6551 = vmatprep.mubr.bf16.mxu0 %v12476_v29  ;;  %v12491_v18 = vcombine.low %v12472_v15, %v12486_v23  ;;  %v8758_v59 = vcombine.low %v5980_v56, %v5980_v56  ;;  %v8761_v49 = vcombine.high %v5980_v56, %v5980_v56  ;;  %v6217_v35 = vshrl.u32 %v8753_v33, 16  ;;  %v12500_v58 = vld [vmem:[%s12977_s2] ss:$0 sm:$0xff] }
 0x1a0   : > { %6552 = vmatmul.mubr.bf16.gmra.mrb[156].mxu0 %v12480_v43  ;;  %v6222_v45 = vshrl.u32 %v8756_v37, 16  ;;  %v6225_v62 = vshll.u32 %v8756_v37, 16  ;;  %9993 = vmatprep.subr.bf16.mxu1 %v12464_v22  ;;  %v2112_v51 = vmul.f32 %v12192_v38, %v12500_v58  ;;  %v2113_v55 = vmul.f32 %v12197_v12, %v12500_v58  ;;  %v10520_v56 = vld [vmem:[%s12976_s1 + $0x180] sm:$0xff]  }
 0x1a1   : > { %9965 = vmatprep.mubr.bf16.mxu1 %v12491_v18  ;;  %v6243_v10 = vshrl.u32 %v8758_v59, 16  ;;  %v6248_v34 = vshrl.u32 %v8761_v49, 16  ;;  %v6251_v44 = vshll.u32 %v8761_v49, 16  ;;  %6926 = vmatprep.mubr.bf16.mxu0 %v8870_v57  ;;  %v8775_v42 = vrot.slane %v6217_v35, 11  ;;  %v5800_v57 = vld [vmem:[#allocation2 + $0x64] sm:$0xf] }
 0x1a2   : > { %v6224_v19 = vrot.slane %v6222_v45, 7  ;;  %v8869_v40 = vcombine.low %v12228_v28, %v12349_v25  ;;  %v2114_v33 = vmul.f32 %v12212_v16, %v12500_v58  ;;  %v8873_v59 = vcombine.high %v12365_v17, %v12415_v7  ;;  %v5811_v49 = vld [vmem:[#allocation2 + $0x68] sm:$0x1] }
 0x1a3   : > { %v8777_v24 = vrot.slane %v6243_v10, 11  ;;  %v6250_v21 = vrot.slane %v6248_v34, 7  ;;  %v8710_v38 = vcombine.low %v5800_v57, %v5800_v57  ;;  %v10521_v28 = vld [vmem:[%s12976_s1 + $0x1c8] sm:$0xff]   ;;  %v8720_v25 = vcombine.low %v5800_v57, %v5811_v49 }
 0x1a4   : > { %v9295_v36 = vpop.f32.mrb[60].mxu0  ;;  %v6227_v3 = vor.u32 %v6225_v62, %v6224_v19  ;;  %v8871_v16 = vcombine.low %v12251_v0, %v12288_v20  ;;  %v12544_v10 = vadd.f32 %v12508_v6, %v2113_v55  ;;  %v12551_v19 = vadd.f32 %v12508_v6, %v2114_v33  ;;  %v10523_v0 = vld [vmem:[%s12976_s1 + $0x188] sm:$0xff]   ;;  %v10524_v55 = vld [vmem:[%s12976_s1 + $0x1d0] sm:$0xff]  }
 0x1a5   : > { %v9296_v26 = vpop.f32.mrb[61].mxu0  ;;  %v6253_v37 = vor.u32 %v6251_v44, %v6250_v21  ;;  %v5928_v45 = vshrl.u32 %v8710_v38, 16  ;;  %v5931_v62 = vshll.u32 %v8710_v38, 16  ;;  %v8872_v33 = vcombine.low %v12365_v17, %v12415_v7 }
 0x1a6   : > { %v9298_v14 = vpop.f32.mrb[62].mxu0  ;;  %v12510_v50 = vadd.f32 %v9296_v26, %v9295_v36  ;;  %v12529_v12 = vsel %vm10779_vm5, %v8775_v42, %v6227_v3  ;;  %v12541_v26 = vadd.f32 %v12508_v6, %v2112_v51  ;;  %v5981_v42 = vrot.slane %v8720_v25, 5 }
 0x1a7   : > { %v9299_v60 = vpop.f32.mrb[63].mxu0  ;;  %v12536_v36 = vsel %vm10779_vm5, %v8777_v24, %v6253_v37  ;;  %v5930_v24 = vrot.slane %v5928_v45, 4  ;;  %v5933_v21 = vrot.slane %v5931_v62, 5  ;;  %v2115_v51 = vmul.f32 %v12235_v31, %v12500_v58  ;;  %v10527_v45 = vld [vmem:[%s12976_s1 + $0x1d8] sm:$0xff]  }
 0x1a8   : > { %v12512_v30 = vadd.f32 %v9299_v60, %v9298_v14  ;;  %v12548_v34 = vcombine.low %v12529_v12, %v12536_v36  ;;  %6927 = vmatmul.mubr.bf16.vlgmr.msra.gmra.mrb[160].mxu0 %v8869_v40  ;;  %v5799_v14 = vld [vmem:[#allocation2 + $0x60] sm:$0x8]  ;;  %v8815_v40 = vcombine.low %v5981_v42, %v5981_v42  ;;  %v8876_v31 = vcombine.high %v12421_v61, %v12449_v54 }
 0x1a9   : > { %9678 = vmatpush3.bf16.msra.mxu0 %v10520_v56  ;;  %6934 = vmatprep.mubr.bf16.mxu0 %v8873_v59  ;;  %v8818_v56 = vcombine.high %v5981_v42, %v5981_v42  ;;  %v5934_v38 = vor.u32 %v5933_v21, %v5930_v24  ;;  %vm2142_vm6 = vcmp.ge.f32.partialorder %v12541_v26, 1.0  ;;  %v8874_v7 = vcombine.low %v12295_v1, %v12472_v15  ;;  %v10522_v1 = vld [vmem:[%s12976_s1 + $0x208] sm:$0xff]  }
 0x1aa   : > { %9966 = vmatmul.mubr.bf16.gmra.mrb[28].mxu1 %v12548_v34  ;;  %9679 = vmatprep.subr.bf16.mxu0 %v10521_v28  ;;  %v6663_v49 = vshrl.u32 %v8815_v40, 16  ;;  %vm2143_vm7 = vcmp.ge.f32.partialorder %v12544_v10, 1.0  ;;  %v10573_v24 = vmov 0.0   ;;  %vm2144_vm8 = vcmp.ge.f32.partialorder %v12551_v19, 1.0 }
 0x1ab   : > { %9985 = vmatprep.mubr.bf16.mxu1 %v8871_v16  ;;  %v6668_v28 = vshrl.u32 %v8818_v56, 16  ;;  %v6671_v25 = vshll.u32 %v8818_v56, 16  ;;  %v8814_v17 = vcombine.low %v5799_v14, %v5934_v38  ;;  %v2166_v21 = vsel %vm2142_vm6, 1.0, %v10573_v24 }
 0x1ac   : > { %v9329_v35 = vpop.f32.mrb[64].mxu0  ;;  %v8820_v14 = vrot.slane %v6663_v49, 11  ;;  %v2150_v39 = vsel %vm2142_vm6, 0.0, %v12541_v26 }
 0x1ad   : > { %v9330_v44 = vpop.f32.mrb[65].mxu0  ;;  %9680 = vmatpush3.bf16.msra.mxu0 %v10523_v0  ;;  %v6670_v42 = vrot.slane %v6668_v28, 7  ;;  %v6650_v0 = vshrl.u32 %v8814_v17, 16  ;;  %v2117_v17 = vmul.f32 %v12277_v8, %v12500_v58  ;;  %v10532_v8 = vld [vmem:[%s12976_s1 + $0x1a0] sm:$0xff]  }
 0x1ae   : > { %v9331_v20 = vadd.f32 %v9330_v44, %v9329_v35  ;;  %v9332_v60 = vpop.f32.mrb[66].mxu0  ;;  %v10526_v35 = vld [vmem:[%s12976_s1 + $0x190] sm:$0xff]   ;;  %9681 = vmatprep.subr.bf16.mxu0 %v10524_v55  ;;  %v10529_v55 = vld [vmem:[%s12976_s1 + $0x198] sm:$0xff]  }
 0x1af   : > { %v9333_v3 = vpop.f32.mrb[67].mxu0 }
 0x1b0   : > { %v12565_v37 = vadd.f32 %v9331_v20, %v12354_v32  ;;  %v9334_v59 = vadd.f32 %v9333_v3, %v9332_v60  ;;  %v8817_v32 = vsel %vm7803_vm3, %v5800_v57, %v5934_v38  ;;  %6935 = vmatmul.mubr.bf16.gmra.mrb[164].mxu0 %v8872_v33  ;;  %v6673_v57 = vor.u32 %v6671_v25, %v6670_v42  ;;  %v12600_v33 = vld [vmem:[#allocation2 + $0x70] sm:$0xf] }
 0x1b1   : > { %v6655_v62 = vshrl.u32 %v8817_v32, 16  ;;  %v6658_v44 = vshll.u32 %v8817_v32, 16  ;;  %9682 = vmatpush3.bf16.msra.mxu0 %v10526_v35  ;;  %6942 = vmatprep.mubr.bf16.mxu0 %v8876_v31  ;;  %v8819_v3 = vrot.slane %v6650_v0, 11  ;;  %v2116_v38 = vmul.f32 %v12266_v4, %v12500_v58 }
 0x1b2   : > { %v12573_v16 = vadd.f32 %v9334_v59, %v12359_v11  ;;  %v8877_v11 = vcombine.low %v12486_v23, %v12529_v12  ;;  %v2167_v23 = vsel %vm2143_vm7, 1.0, %v10573_v24  ;;  %v12595_v12 = vadd.f32 %v12508_v6, %v2115_v51  ;;  %9986 = vmatmul.mubr.bf16.vlgmr.msra.gmra.mrb[24].mxu1 %v8874_v7  ;;  %9683 = vmatprep.subr.bf16.mxu0 %v10527_v45  ;;  %v10530_v51 = vld [vmem:[%s12976_s1 + $0x1e0] sm:$0xff]  }
 0x1b3   : > { %v6657_v15 = vrot.slane %v6655_v62, 7  ;;  %v9043_v59 = vpack.c.bf16 %v2167_v23, %v2166_v21  ;;  %v8711_v31 = vcombine.low %v12600_v33, %v12600_v33  ;;  %9994 = vmatpush3.bf16.msra.mxu1 %v12464_v22  ;;  %v12612_v25 = vsel %vm10779_vm5, %v8820_v14, %v6673_v57  ;;  %v10525_v22 = vld [vmem:[%s12976_s1 + $0x210] sm:$0xff]  }
 0x1b4   : > { %v9335_v20 = vpop.f32.mrb[68].mxu0  ;;  %9989 = vmatprep.mubr.bf16.mxu1 %v8877_v11  ;;  %9995 = vmatprep.subr.bf16.mxu1 %v10522_v1  ;;  %v8875_v32 = vcombine.low %v12421_v61, %v12449_v54  ;;  %v2118_v7 = vmul.f32 %v12323_v13, %v12500_v58  ;;  %v2119_v45 = vmul.f32 %v12329_v5, %v12500_v58  ;;  %v10533_v54 = vld [vmem:[%s12976_s1 + $0x1e8] sm:$0xff]   ;;  %vm2145_vm9 = vcmp.ge.f32.partialorder %v12595_v12, 1.0  ;;  %v10528_v11 = vld [vmem:[%s12976_s1 + $0x218] sm:$0xff]   ;;  %v5812_v14 = vld [vmem:[#allocation2 + $0x74] sm:$0x1] }
 0x1b5   : > { %v9336_v60 = vpop.f32.mrb[69].mxu0  ;;  %v6660_v49 = vor.u32 %v6658_v44, %v6657_v15  ;;  %9044 = vst [vmem:[%s12618_s9] sm:$0xff] %v9043_v59   ;;  %9684 = vmatpush3.bf16.msra.mxu0 %v10529_v55  ;;  %v8880_v13 = vcombine.low %v12536_v36, %v12612_v25  ;;  %v5936_v5 = vshrl.u32 %v8711_v31, 16  ;;  %v5939_v44 = vshll.u32 %v8711_v31, 16  ;;  %v10535_v15 = vld [vmem:[%s12976_s1 + $0x1a8] sm:$0xff]   ;;  %v10538_v55 = vld [vmem:[%s12976_s1 + $0x1f0] sm:$0xff]  }
 0x1b6   : > { %v9337_v40 = vadd.f32 %v9336_v60, %v9335_v20  ;;  %v9338_v56 = vpop.f32.mrb[70].mxu0  ;;  %9685 = vmatprep.subr.bf16.mxu0 %v10530_v51  ;;  %v12651_v42 = vadd.f32 %v12508_v6, %v2116_v38  ;;  %v2169_v20 = vsel %vm2145_vm9, 1.0, %v10573_v24  ;;  %v2168_v21 = vsel %vm2144_vm8, 1.0, %v10573_v24 }
 0x1b7   : > { %v9339_v28 = vpop.f32.mrb[71].mxu0  ;;  %9996 = vmatpush3.bf16.msra.mxu1 %v10522_v1  ;;  %v12664_v1 = vadd.f32 %v12508_v6, %v2118_v7  ;;  %v12673_v23 = vadd.f32 %v12508_v6, %v2119_v45  ;;  %v9046_v59 = vpack.c.bf16 %v2169_v20, %v2168_v21  ;;  %v10534_v7 = vld [vmem:[%s12976_s1 + $0x228] sm:$0xff]   ;;  %v10539_v20 = vld [vmem:[%s12976_s1 + $0x230] sm:$0xff]  }
 0x1b8   : > { %v12615_v4 = vadd.f32 %v9337_v40, %v12455_v47  ;;  %v9340_v35 = vadd.f32 %v9339_v28, %v9338_v56  ;;  %v12630_v47 = vsel %vm10779_vm5, %v8819_v3, %v6660_v49  ;;  %9997 = vmatprep.subr.bf16.mxu1 %v10525_v22  ;;  %6943 = vmatmul.mubr.bf16.gmra.mrb[168].mxu0 %v8875_v32  ;;  %v5938_v40 = vrot.slane %v5936_v5, 4  ;;  %v10531_v28 = vld [vmem:[%s12976_s1 + $0x220] sm:$0xff]  }
 0x1b9   : > { %v8879_v62 = vcombine.high %v12468_v52, %v12630_v47  ;;  %9686 = vmatpush3.bf16.msra.mxu0 %v10532_v8  ;;  %v5941_v56 = vrot.slane %v5939_v44, 5  ;;  %v8721_v49 = vcombine.low %v12600_v33, %v5812_v14  ;;  %vm2146_vm10 = vcmp.ge.f32.partialorder %v12651_v42, 1.0  ;;  %9090 = vst [vmem:[%s12618_s9 + $0x8] sm:$0xff] %v9046_v59   ;;  %v5801_v44 = vld [vmem:[#allocation2 + $0x6c] sm:$0x8] }
 0x1ba   : > { %v12642_v61 = vadd.f32 %v9340_v35, %v12459_v27  ;;  %v12655_v27 = vadd.f32 %v12508_v6, %v2117_v17  ;;  %9687 = vmatprep.subr.bf16.mxu0 %v10533_v54  ;;  %9990 = vmatmul.mubr.bf16.gmra.mrb[28].mxu1 %v8880_v13  ;;  %v8878_v31 = vcombine.low %v12468_v52, %v12630_v47  ;;  %vm2148_vm12 = vcmp.ge.f32.partialorder %v12664_v1, 1.0  ;;  %v10541_v35 = vld [vmem:[%s12976_s1 + $0x1f8] sm:$0xff]  }
 0x1bb   : > { %6950 = vmatprep.mubr.bf16.mxu0 %v8879_v62  ;;  %9998 = vmatpush3.bf16.msra.mxu1 %v10525_v22  ;;  %v5942_v17 = vor.u32 %v5941_v56, %v5938_v40  ;;  %v2170_v52 = vsel %vm2146_vm10, 1.0, %v10573_v24  ;;  %vm2149_vm13 = vcmp.ge.f32.partialorder %v12673_v23, 1.0  ;;  %v2172_v45 = vsel %vm2148_vm12, 1.0, %v10573_v24  ;;  %v10543_v62 = vld [vmem:[%s12976_s1 + $0x1b8] sm:$0xff]  }
 0x1bc   : > { %v9341_v0 = vpop.f32.mrb[72].mxu0  ;;  %10009 = vmatprep.mubr.bf16.mxu1 %v12301_v46  ;;  %9999 = vmatprep.subr.bf16.mxu1 %v10528_v11  ;;  %vm2147_vm11 = vcmp.ge.f32.partialorder %v12655_v27, 1.0  ;;  %v10540_v46 = vld [vmem:[%s12976_s1 + $0x1b0] sm:$0xff]   ;;  %v2173_v8 = vsel %vm2149_vm13, 1.0, %v10573_v24  ;;  %v10542_v40 = vld [vmem:[%s12976_s1 + $0x238] sm:$0xff]  }
 0x1bd   : > { %v9342_v36 = vpop.f32.mrb[73].mxu0  ;;  %9688 = vmatpush3.bf16.msra.mxu0 %v10535_v15  ;;  %v2171_v22 = vsel %vm2147_vm11, 1.0, %v10573_v24  ;;  %v9052_v13 = vpack.c.bf16 %v2173_v8, %v2172_v45 }
 0x1be   : > { %v9343_v57 = vadd.f32 %v9342_v36, %v9341_v0  ;;  %v9344_v60 = vpop.f32.mrb[74].mxu0  ;;  %9689 = vmatprep.subr.bf16.mxu0 %v10538_v55  ;;  %v9049_v32 = vpack.c.bf16 %v2171_v22, %v2170_v52  ;;  %v8908_v0 = vsel %vm7803_vm3, %v12600_v33, %v5942_v17 }
 0x1bf   : > { %v9345_v3 = vpop.f32.mrb[75].mxu0  ;;  %10000 = vmatpush3.bf16.msra.mxu1 %v10528_v11  ;;  %9092 = vst [vmem:[%s12618_s9 + $0x18] sm:$0xff] %v9052_v13   ;;  %v7062_v21 = vshrl.u32 %v8908_v0, 16 }
 0x1c0   : > { %v12680_v38 = vadd.f32 %v9343_v57, %v12495_v53  ;;  %v9346_v51 = vadd.f32 %v9345_v3, %v9344_v60  ;;  %10001 = vmatprep.subr.bf16.mxu1 %v10531_v28  ;;  %6951 = vmatmul.mubr.bf16.gmra.mrb[172].mxu0 %v8878_v31  ;;  %9091 = vst [vmem:[%s12618_s9 + $0x10] sm:$0xff] %v9049_v32  }
 0x1c1   : > { %9690 = vmatpush3.bf16.msra.mxu0 %v10540_v46  ;;  %7315 = vmatprep.mubr.bf16.mxu0 %v12378_v63  ;;  %v8905_v60 = vcombine.low %v5801_v44, %v5942_v17  ;;  %v7064_v59 = vrot.slane %v7062_v21, 7 }
 0x1c2   : > { %v12695_v53 = vadd.f32 %v9346_v51, %v12503_v9  ;;  %v5982_v9 = vrot.slane %v8721_v49, 5  ;;  %9691 = vmatprep.subr.bf16.mxu0 %v10541_v35  ;;  %v7065_v51 = vshll.u32 %v8908_v0, 16 }
 0x1c3   : > { %10002 = vmatpush3.bf16.msra.mxu1 %v10531_v28  ;;  %v7057_v56 = vshrl.u32 %v8905_v60, 16 }
 0x1c4   : > { %v9347_v54 = vpop.f32.mrb[76].mxu0  ;;  %v8909_v11 = vcombine.high %v5982_v9, %v5982_v9  ;;  %10003 = vmatprep.subr.bf16.mxu1 %v10534_v7  ;;  %v8906_v33 = vcombine.low %v5982_v9, %v5982_v9 }
 0x1c5   : > { %v9348_v5 = vpop.f32.mrb[77].mxu0  ;;  %9692 = vmatpush3.bf16.msra.mxu0 %v10543_v62  ;;  %v8910_v9 = vrot.slane %v7057_v56, 11 }
 0x1c6   : > { %v9349_v36 = vadd.f32 %v9348_v5, %v9347_v54  ;;  %v9350_v14 = vpop.f32.mrb[78].mxu0  ;;  %v7075_v55 = vshrl.u32 %v8909_v11, 16  ;;  %v7070_v28 = vshrl.u32 %v8906_v33, 16  ;;  %v7078_v46 = vshll.u32 %v8909_v11, 16 }
 0x1c7   : > { %v9351_v63 = vpop.f32.mrb[79].mxu0  ;;  %10004 = vmatpush3.bf16.msra.mxu1 %v10534_v7  ;;  %v2151_v33 = vsel %vm2143_vm7, 0.0, %v12544_v10 }
 0x1c8   : > { %v12729_v15 = vadd.f32 %v9349_v36, %v12510_v50  ;;  %v9352_v57 = vadd.f32 %v9351_v63, %v9350_v14  ;;  %10005 = vmatprep.subr.bf16.mxu1 %v10539_v20  ;;  %7316 = vmatmul.mubr.bf16.vlgmr.msra.gmra.mrb[176].mxu0 %v12382_v2  ;;  %v7077_v31 = vrot.slane %v7075_v55, 7  ;;  %v7067_v2 = vor.u32 %v7065_v51, %v7064_v59 }
 0x1c9   : > { %7323 = vmatprep.mubr.bf16.mxu0 %v12428_v41  ;;  %v8911_v41 = vrot.slane %v7070_v28, 11 }
 0x1ca   : > { %v12732_v3 = vadd.f32 %v9352_v57, %v12512_v30  ;;  %v7080_v32 = vor.u32 %v7078_v46, %v7077_v31  ;;  %v7068_v8 = vsel %vm10779_vm5, %v8910_v9, %v7067_v2 }
 0x1cb   : > { %10006 = vmatpush3.bf16.msra.mxu1 %v10539_v20  ;;  %v8960_v46 = vcombine.low %v12630_v47, %v7068_v8 }
 0x1cc   : > { %v9381_v50 = vpop.f32.mrb[80].mxu0  ;;  %10007 = vmatprep.subr.bf16.mxu1 %v10542_v40  ;;  %v7081_v13 = vsel %vm10779_vm5, %v8911_v41, %v7080_v32 }
 0x1cd   : > { %v9382_v49 = vpop.f32.mrb[81].mxu0  ;;  %v8962_v63 = vcombine.low %v12612_v25, %v7081_v13 }
 0x1ce   : > { %v9383_v30 = vadd.f32 %v9382_v49, %v9381_v50  ;;  %v9384_v35 = vpop.f32.mrb[82].mxu0 }
 0x1cf   : > { %v9385_v17 = vpop.f32.mrb[83].mxu0  ;;  %10008 = vmatpush3.bf16.msra.mxu1 %v10542_v40 }
 0x1d0   : > { %v10045_v52 = vadd.f32 %v12565_v37, %v9383_v30  ;;  %v9386_v22 = vadd.f32 %v9385_v17, %v9384_v35  ;;  %7324 = vmatmul.mubr.bf16.gmra.mrb[180].mxu0 %v12432_v48  ;;  %v2153_v30 = vsel %vm2145_vm9, 0.0, %v12595_v12 }
 0x1d1   : > { %7331 = vmatprep.mubr.bf16.mxu0 %v12476_v29  ;;  %v8961_v29 = vcombine.high %v12630_v47, %v7068_v8 }
 0x1d2   : > { %v10051_v7 = vadd.f32 %v12573_v16, %v9386_v22  ;;  %v9867_v45 = vpop.f32.mrb[8].mxu1  ;;  %10010 = vmatmul.mubr.bf16.vlgmr.msra.gmra.mrb[24].mxu1 %v12491_v18 }
 0x1d3   : > { %v3830_v37 = vpop.f32.mrb[9].mxu1  ;;  %10013 = vmatprep.mubr.bf16.mxu1 %v12548_v34 }
 0x1d4   : > { %v9387_v62 = vpop.f32.mrb[84].mxu0  ;;  %v10046_v5 = vadd.f32 %v10045_v52, %v3830_v37  ;;  %v9868_v16 = vpop.f32.mrb[10].mxu1 }
 0x1d5   : > { %v9388_v54 = vpop.f32.mrb[85].mxu0  ;;  %v3833_v0 = vpop.f32.mrb[11].mxu1 }
 0x1d6   : > { %v9389_v44 = vadd.f32 %v9388_v54, %v9387_v62  ;;  %v9390_v48 = vpop.f32.mrb[86].mxu0  ;;  %v3893_v36 = vmul.f32 %v10046_v5, %v12500_v58  ;;  %v10052_v14 = vadd.f32 %v10051_v7, %v3833_v0 }
 0x1d7   : > { %v9391_v11 = vpop.f32.mrb[87].mxu0 }
 0x1d8   : > { %v10042_v18 = vadd.f32 %v12615_v4, %v9389_v44  ;;  %v9392_v20 = vadd.f32 %v9391_v11, %v9390_v48  ;;  %v3901_v34 = vadd.f32 %v3893_v36, %v2150_v39  ;;  %v3894_v57 = vmul.f32 %v10052_v14, %v12500_v58  ;;  %7332 = vmatmul.mubr.bf16.gmra.mrb[184].mxu0 %v12480_v43 }
 0x1d9   : > { %7339 = vmatprep.mubr.bf16.mxu0 %v8961_v29  ;;  %v2155_v29 = vsel %vm2147_vm11, 0.0, %v12655_v27 }
 0x1da   : > { %v10043_v60 = vadd.f32 %v10042_v18, %v9867_v45  ;;  %v10048_v21 = vadd.f32 %v12642_v61, %v9392_v20  ;;  %v3909_v4 = vadd.f32 %v12508_v6, %v3901_v34  ;;  %v3902_v55 = vadd.f32 %v3894_v57, %v2151_v33  ;;  %v9871_v25 = vpop.f32.mrb[12].mxu1  ;;  %10014 = vmatmul.mubr.bf16.gmra.mrb[28].mxu1 %v8962_v63 }
 0x1db   : > { %v2152_v61 = vsel %vm2144_vm8, 0.0, %v12551_v19  ;;  %v3846_v56 = vpop.f32.mrb[13].mxu1 }
 0x1dc   : > { %v3895_v40 = vmul.f32 %v10043_v60, %v12500_v58  ;;  %v10049_v26 = vadd.f32 %v10048_v21, %v9868_v16  ;;  %v9393_v50 = vpop.f32.mrb[88].mxu0  ;;  %v3910_v59 = vadd.f32 %v12508_v6, %v3902_v55  ;;  %v9872_v10 = vpop.f32.mrb[14].mxu1  ;;  %vm3917_vm14 = vcmp.ge.f32.partialorder %v3909_v4, 1.0 }
 0x1dd   : > { %v9394_v43 = vpop.f32.mrb[89].mxu0  ;;  %v3849_v35 = vpop.f32.mrb[15].mxu1  ;;  %v12775_v2 = vsel %vm3917_vm14, 0.0, %v3909_v4  ;;  %v3941_v12 = vsel %vm3917_vm14, 1.0, %v10573_v24 }
 0x1de   : > { %v3903_v51 = vadd.f32 %v3895_v40, %v2152_v61  ;;  %v3896_v49 = vmul.f32 %v10049_v26, %v12500_v58  ;;  %v9395_v28 = vadd.f32 %v9394_v43, %v9393_v50  ;;  %v9396_v31 = vpop.f32.mrb[90].mxu0  ;;  %vm3918_vm15 = vcmp.ge.f32.partialorder %v3910_v59, 1.0 }
 0x1df   : > { %v9397_v17 = vpop.f32.mrb[91].mxu0  ;;  %v12779_v7 = vsel %vm3918_vm15, 0.0, %v3910_v59  ;;  %v3942_v45 = vsel %vm3918_vm15, 1.0, %v10573_v24 }
 0x1e0   : > { %v3911_v19 = vadd.f32 %v12508_v6, %v3903_v51  ;;  %v3904_v52 = vadd.f32 %v3896_v49, %v2153_v30  ;;  %v10057_v22 = vadd.f32 %v12680_v38, %v9395_v28  ;;  %v9398_v9 = vadd.f32 %v9397_v17, %v9396_v31  ;;  %7340 = vmatmul.mubr.bf16.gmra.mrb[188].mxu0 %v8960_v46 }
 0x1e1   : > { %v9055_v37 = vpack.c.bf16 %v3942_v45, %v3941_v12 }
 0x1e2   : > { %v3912_v41 = vadd.f32 %v12508_v6, %v3904_v52  ;;  %v10058_v32 = vadd.f32 %v10057_v22, %v3846_v56  ;;  %v10063_v47 = vadd.f32 %v12695_v53, %v9398_v9  ;;  %vm3919_vm0 = vcmp.ge.f32.partialorder %v3911_v19, 1.0 }
 0x1e3   : > { %v12785_v54 = vsel %vm3919_vm0, 0.0, %v3911_v19  ;;  %v2154_v53 = vsel %vm2146_vm10, 0.0, %v12651_v42  ;;  %9093 = vst [vmem:[%s12618_s9 + $0x20] sm:$0xff] %v9055_v37   ;;  %v3943_v36 = vsel %vm3919_vm0, 1.0, %v10573_v24  ;;  %v2157_v56 = vsel %vm2149_vm13, 0.0, %v12673_v23 }
 0x1e4   : > { %v3897_v38 = vmul.f32 %v10058_v32, %v12500_v58  ;;  %v10064_v8 = vadd.f32 %v10063_v47, %v3849_v35  ;;  %v9399_v62 = vpop.f32.mrb[92].mxu0  ;;  %vm3920_vm1 = vcmp.ge.f32.partialorder %v3912_v41, 1.0 }
 0x1e5   : > { %v9400_v13 = vpop.f32.mrb[93].mxu0  ;;  %v12792_v0 = vsel %vm3920_vm1, 0.0, %v3912_v41  ;;  %v3944_v42 = vsel %vm3920_vm1, 1.0, %v10573_v24 }
 0x1e6   : > { %v3905_v5 = vadd.f32 %v3897_v38, %v2154_v53  ;;  %v3898_v16 = vmul.f32 %v10064_v8, %v12500_v58  ;;  %v9401_v44 = vadd.f32 %v9400_v13, %v9399_v62  ;;  %v9402_v48 = vpop.f32.mrb[94].mxu0  ;;  %v9058_v39 = vpack.c.bf16 %v3944_v42, %v3943_v36 }
 0x1e7   : > { %v9403_v11 = vpop.f32.mrb[95].mxu0 }
 0x1e8   : > { %v3913_v14 = vadd.f32 %v12508_v6, %v3905_v5  ;;  %v3906_v18 = vadd.f32 %v3898_v16, %v2155_v29  ;;  %v10054_v20 = vadd.f32 %v12729_v15, %v9401_v44  ;;  %v9404_v63 = vadd.f32 %v9403_v11, %v9402_v48  ;;  %9094 = vst [vmem:[%s12618_s9 + $0x28] sm:$0xff] %v9058_v39  }
 0x1e9   : > { %v2156_v15 = vsel %vm2148_vm12, 0.0, %v12664_v1 }
 0x1ea   : > { %v3914_v34 = vadd.f32 %v12508_v6, %v3906_v18  ;;  %v10055_v57 = vadd.f32 %v10054_v20, %v9871_v25  ;;  %v10060_v60 = vadd.f32 %v12732_v3, %v9404_v63  ;;  %vm3921_vm2 = vcmp.ge.f32.partialorder %v3913_v14, 1.0 }
 0x1eb   : > { %v12805_v27 = vsel %vm3921_vm2, 0.0, %v3913_v14  ;;  %v3945_v55 = vsel %vm3921_vm2, 1.0, %v10573_v24 }
 0x1ec   : > { %v3899_v21 = vmul.f32 %v10055_v57, %v12500_v58  ;;  %v10061_v33 = vadd.f32 %v10060_v60, %v9872_v10  ;;  %vm3922_vm3 = vcmp.ge.f32.partialorder %v3914_v34, 1.0  ;;  %v9433_v4 = vpop.f32.mrb[96].mxu0 }
 0x1ed   : > { %v12812_v40 = vsel %vm3922_vm3, 0.0, %v3914_v34  ;;  %v3946_v3 = vsel %vm3922_vm3, 1.0, %v10573_v24  ;;  %v9434_v50 = vpop.f32.mrb[97].mxu0 }
 0x1ee   : > { %v3907_v25 = vadd.f32 %v3899_v21, %v2156_v15  ;;  %v3900_v26 = vmul.f32 %v10061_v33, %v12500_v58  ;;  %v9061_v61 = vpack.c.bf16 %v3946_v3, %v3945_v55  ;;  %v9435_v43 = vadd.f32 %v9434_v50, %v9433_v4  ;;  %v9436_v59 = vpop.f32.mrb[98].mxu0 }
 0x1ef   : > { %v9437_v10 = vpop.f32.mrb[99].mxu0 }
 0x1f0   : > { %v3915_v1 = vadd.f32 %v12508_v6, %v3907_v25  ;;  %v3908_v51 = vadd.f32 %v3900_v26, %v2157_v56  ;;  %9095 = vst [vmem:[%s12618_s9 + $0x30] sm:$0xff] %v9061_v61   ;;  %v9438_v49 = vadd.f32 %v9437_v10, %v9436_v59 }
 0x1f2   : > { %v3916_v28 = vadd.f32 %v12508_v6, %v3908_v51  ;;  %vm3923_vm4 = vcmp.ge.f32.partialorder %v3915_v1, 1.0 }
 0x1f3   : > { %v12822_v31 = vsel %vm3923_vm4, 0.0, %v3915_v1  ;;  %v3947_v30 = vsel %vm3923_vm4, 1.0, %v10573_v24 }
 0x1f4   : > { %vm3924_vm5 = vcmp.ge.f32.partialorder %v3916_v28, 1.0  ;;  %v9439_v46 = vpop.f32.mrb[100].mxu0 }
 0x1f5   : > { %v12825_v35 = vsel %vm3924_vm5, 0.0, %v3916_v28  ;;  %v3948_v23 = vsel %vm3924_vm5, 1.0, %v10573_v24  ;;  %v9440_v17 = vpop.f32.mrb[101].mxu0 }
 0x1f6   : > { %v9064_v19 = vpack.c.bf16 %v3948_v23, %v3947_v30  ;;  %v9441_v52 = vadd.f32 %v9440_v17, %v9439_v46  ;;  %v9442_v22 = vpop.f32.mrb[102].mxu0 }
 0x1f7   : > { %v9443_v9 = vpop.f32.mrb[103].mxu0 }
 0x1f8   : > { %9096 = vst [vmem:[%s12618_s9 + $0x38] sm:$0xff] %v9064_v19   ;;  %v9444_v41 = vadd.f32 %v9443_v9, %v9442_v22 }
 0x1fc   : > { %v9445_v32 = vpop.f32.mrb[104].mxu0 }
 0x1fd   : > { %v9446_v47 = vpop.f32.mrb[105].mxu0 }
 0x1fe   : > { %v9447_v12 = vadd.f32 %v9446_v47, %v9445_v32  ;;  %v9448_v45 = vpop.f32.mrb[106].mxu0 }
 0x1ff   : > { %v9449_v38 = vpop.f32.mrb[107].mxu0 }
 0x200   : > { %v9450_v8 = vadd.f32 %v9449_v38, %v9448_v45 }
 0x204   : > { %v9451_v62 = vpop.f32.mrb[108].mxu0 }
 0x205   : > { %v9452_v37 = vpop.f32.mrb[109].mxu0 }
 0x206   : > { %v9453_v53 = vadd.f32 %v9452_v37, %v9451_v62  ;;  %v9454_v13 = vpop.f32.mrb[110].mxu0 }
 0x207   : > { %v9455_v5 = vpop.f32.mrb[111].mxu0 }
 0x208   : > { %v9456_v16 = vadd.f32 %v9455_v5, %v9454_v13 }
 0x20d   : > { %v9485_v44 = vpop.f32.mrb[112].mxu0 }
 0x20e   : > { %v9486_v48 = vpop.f32.mrb[113].mxu0 }
 0x20f   : > { %v9487_v29 = vadd.f32 %v9486_v48, %v9485_v44  ;;  %v9488_v11 = vpop.f32.mrb[114].mxu0 }
 0x210   : > { %v9489_v36 = vpop.f32.mrb[115].mxu0 }
 0x211   : > { %v10068_v42 = vadd.f32 %v9487_v29, %v9435_v43  ;;  %v9490_v14 = vadd.f32 %v9489_v36, %v9488_v11 }
 0x213   : > { %v10074_v18 = vadd.f32 %v9490_v14, %v9438_v49 }
 0x215   : > { %v9491_v20 = vpop.f32.mrb[116].mxu0 }
 0x216   : > { %v9492_v63 = vpop.f32.mrb[117].mxu0 }
 0x217   : > { %v9493_v39 = vadd.f32 %v9492_v63, %v9491_v20  ;;  %v9494_v34 = vpop.f32.mrb[118].mxu0 }
 0x218   : > { %v9495_v57 = vpop.f32.mrb[119].mxu0 }
 0x219   : > { %v10065_v60 = vadd.f32 %v9493_v39, %v9441_v52  ;;  %v9496_v21 = vadd.f32 %v9495_v57, %v9494_v34 }
 0x21b   : > { %v10071_v33 = vadd.f32 %v9496_v21, %v9444_v41 }
 0x21d   : > { %v9497_v15 = vpop.f32.mrb[120].mxu0 }
 0x21e   : > { %v9498_v4 = vpop.f32.mrb[121].mxu0 }
 0x21f   : > { %v9499_v55 = vadd.f32 %v9498_v4, %v9497_v15  ;;  %v9500_v3 = vpop.f32.mrb[122].mxu0 }
 0x220   : > { %v9501_v25 = vpop.f32.mrb[123].mxu0 }
 0x221   : > { %v10080_v26 = vadd.f32 %v9499_v55, %v9447_v12  ;;  %v9502_v50 = vadd.f32 %v9501_v25, %v9500_v3 }
 0x223   : > { %v12829_v61 = vadd.f32 %v9502_v50, %v9450_v8 }
 0x226   : > { %v9503_v56 = vpop.f32.mrb[124].mxu0 }
 0x227   : > { %v9504_v43 = vpop.f32.mrb[125].mxu0 }
 0x228   : > { %v9505_v59 = vadd.f32 %v9504_v43, %v9503_v56  ;;  %v9506_v1 = vpop.f32.mrb[126].mxu0 }
 0x229   : > { %v9507_v51 = vpop.f32.mrb[127].mxu0 }
 0x22a   : > { %v12831_v10 = vadd.f32 %v9505_v59, %v9453_v53  ;;  %v9508_v49 = vadd.f32 %v9507_v51, %v9506_v1 }
 0x22c   : > { %v12833_v28 = vadd.f32 %v9508_v49, %v9456_v16 }
 0x22e   : > { %v9537_v46 = vpop.f32.mrb[128].mxu0 }
 0x22f   : > { %v9538_v30 = vpop.f32.mrb[129].mxu0 }
 0x230   : > { %v9539_v23 = vadd.f32 %v9538_v30, %v9537_v46  ;;  %v9540_v17 = vpop.f32.mrb[130].mxu0 }
 0x231   : > { %v9541_v19 = vpop.f32.mrb[131].mxu0 }
 0x232   : > { %v10069_v52 = vadd.f32 %v10068_v42, %v9539_v23  ;;  %v9542_v22 = vadd.f32 %v9541_v19, %v9540_v17 }
 0x234   : > { %v10075_v9 = vadd.f32 %v10074_v18, %v9542_v22  ;;  %v9939_v41 = vpop.f32.mrb[16].mxu1 }
 0x235   : > { %v5606_v32 = vpop.f32.mrb[17].mxu1 }
 0x236   : > { %v10070_v47 = vadd.f32 %v10069_v52, %v5606_v32  ;;  %v9940_v12 = vpop.f32.mrb[18].mxu1  ;;  %v9543_v45 = vpop.f32.mrb[132].mxu0 }
 0x237   : > { %v5609_v38 = vpop.f32.mrb[19].mxu1  ;;  %v9544_v8 = vpop.f32.mrb[133].mxu0 }
 0x238   : > { %v5669_v62 = vmul.f32 %v10070_v47, %v12500_v58  ;;  %v10076_v37 = vadd.f32 %v10075_v9, %v5609_v38  ;;  %v9545_v53 = vadd.f32 %v9544_v8, %v9543_v45  ;;  %v9546_v13 = vpop.f32.mrb[134].mxu0 }
 0x239   : > { %v9547_v5 = vpop.f32.mrb[135].mxu0 }
 0x23a   : > { %v5677_v16 = vadd.f32 %v5669_v62, %v12775_v2  ;;  %v5670_v44 = vmul.f32 %v10076_v37, %v12500_v58  ;;  %v10066_v48 = vadd.f32 %v10065_v60, %v9545_v53  ;;  %v9548_v29 = vadd.f32 %v9547_v5, %v9546_v13 }
 0x23c   : > { %v5685_v11 = vadd.f32 %v12508_v6, %v5677_v16  ;;  %v5678_v36 = vadd.f32 %v5670_v44, %v12779_v7  ;;  %v9943_v42 = vpop.f32.mrb[20].mxu1  ;;  %v10067_v14 = vadd.f32 %v10066_v48, %v9939_v41  ;;  %v10072_v18 = vadd.f32 %v10071_v33, %v9548_v29 }
 0x23d   : > { %v5622_v20 = vpop.f32.mrb[21].mxu1 }
 0x23e   : > { %v5686_v63 = vadd.f32 %v12508_v6, %v5678_v36  ;;  %v5671_v39 = vmul.f32 %v10067_v14, %v12500_v58  ;;  %v9944_v34 = vpop.f32.mrb[22].mxu1  ;;  %v10073_v57 = vadd.f32 %v10072_v18, %v9940_v12  ;;  %v9549_v21 = vpop.f32.mrb[136].mxu0  ;;  %vm5693_vm6 = vcmp.ge.f32.partialorder %v5685_v11, 1.0 }
 0x23f   : > { %v5625_v2 = vpop.f32.mrb[23].mxu1  ;;  %v9550_v15 = vpop.f32.mrb[137].mxu0  ;;  %v12842_v60 = vsel %vm5693_vm6, 0.0, %v5685_v11  ;;  %v5717_v25 = vsel %vm5693_vm6, 1.0, %v10573_v24 }
 0x240   : > { %v5679_v4 = vadd.f32 %v5671_v39, %v12785_v54  ;;  %v5672_v7 = vmul.f32 %v10073_v57, %v12500_v58  ;;  %v9551_v55 = vadd.f32 %v9550_v15, %v9549_v21  ;;  %v9552_v33 = vpop.f32.mrb[138].mxu0  ;;  %vm5694_vm7 = vcmp.ge.f32.partialorder %v5686_v63, 1.0 }
 0x241   : > { %v9553_v3 = vpop.f32.mrb[139].mxu0  ;;  %v12847_v50 = vsel %vm5694_vm7, 0.0, %v5686_v63  ;;  %v5718_v56 = vsel %vm5694_vm7, 1.0, %v10573_v24 }
 0x242   : > { %v5687_v43 = vadd.f32 %v12508_v6, %v5679_v4  ;;  %v5680_v59 = vadd.f32 %v5672_v7, %v12792_v0  ;;  %v10081_v1 = vadd.f32 %v10080_v26, %v9551_v55  ;;  %v9554_v51 = vadd.f32 %v9553_v3, %v9552_v33 }
 0x243   : > { %v9067_v54 = vpack.c.bf16 %v5718_v56, %v5717_v25 }
 0x244   : > { %v5688_v49 = vadd.f32 %v12508_v6, %v5680_v59  ;;  %v10082_v46 = vadd.f32 %v10081_v1, %v5622_v20  ;;  %v10087_v30 = vadd.f32 %v12829_v61, %v9554_v51  ;;  %vm5695_vm8 = vcmp.ge.f32.partialorder %v5687_v43, 1.0  ;;  %v12887_v20 = vld [vmem:[%s12978_s3] ss:$0 sm:$0xff] }
 0x245   : > { %9097 = vst [vmem:[%s12618_s9 + $0x40] sm:$0xff] %v9067_v54   ;;  %v12855_v23 = vsel %vm5695_vm8, 0.0, %v5687_v43  ;;  %v5719_v0 = vsel %vm5695_vm8, 1.0, %v10573_v24 }
 0x246   : > { %v5673_v17 = vmul.f32 %v10082_v46, %v12500_v58  ;;  %v10088_v19 = vadd.f32 %v10087_v30, %v5625_v2  ;;  %vm5696_vm9 = vcmp.ge.f32.partialorder %v5688_v49, 1.0 }
 0x247   : > { %v9555_v52 = vpop.f32.mrb[140].mxu0  ;;  %v12859_v26 = vsel %vm5696_vm9, 0.0, %v5688_v49  ;;  %v5720_v9 = vsel %vm5696_vm9, 1.0, %v10573_v24 }
 0x248   : > { %v9556_v22 = vpop.f32.mrb[141].mxu0  ;;  %v5681_v41 = vadd.f32 %v5673_v17, %v12805_v27  ;;  %v5674_v61 = vmul.f32 %v10088_v19, %v12500_v58  ;;  %v9070_v12 = vpack.c.bf16 %v5720_v9, %v5719_v0 }
 0x249   : > { %v9557_v32 = vadd.f32 %v9556_v22, %v9555_v52  ;;  %v9558_v47 = vpop.f32.mrb[142].mxu0 }
 0x24a   : > { %v9559_v45 = vpop.f32.mrb[143].mxu0  ;;  %v5689_v38 = vadd.f32 %v12508_v6, %v5681_v41  ;;  %v5682_v8 = vadd.f32 %v5674_v61, %v12812_v40  ;;  %9098 = vst [vmem:[%s12618_s9 + $0x48] sm:$0xff] %v9070_v12  }
 0x24b   : > { %v10078_v62 = vadd.f32 %v12831_v10, %v9557_v32  ;;  %v9560_v37 = vadd.f32 %v9559_v45, %v9558_v47 }
 0x24c   : > { %v5690_v53 = vadd.f32 %v12508_v6, %v5682_v8  ;;  %vm5697_vm10 = vcmp.ge.f32.partialorder %v5689_v38, 1.0 }
 0x24d   : > { %v10079_v13 = vadd.f32 %v10078_v62, %v9943_v42  ;;  %v10084_v5 = vadd.f32 %v12833_v28, %v9560_v37  ;;  %v12870_v27 = vsel %vm5697_vm10, 0.0, %v5689_v38  ;;  %v5721_v40 = vsel %vm5697_vm10, 1.0, %v10573_v24  ;;  %v12881_v28 = vld [vmem:[%s12977_s2] ss:$0 sm:$0xff] }
 0x24e   : > { %vm5698_vm11 = vcmp.ge.f32.partialorder %v5690_v53, 1.0 }
 0x24f   : > { %v5675_v16 = vmul.f32 %v10079_v13, %v12500_v58  ;;  %v10085_v44 = vadd.f32 %v10084_v5, %v9944_v34  ;;  %v9589_v48 = vpop.f32.mrb[144].mxu0  ;;  %v12874_v10 = vsel %vm5698_vm11, 0.0, %v5690_v53  ;;  %v5722_v11 = vsel %vm5698_vm11, 1.0, %v10573_v24 }
 0x250   : > { %v9590_v29 = vpop.f32.mrb[145].mxu0  ;;  %v9073_v14 = vpack.c.bf16 %v5722_v11, %v5721_v40 }
 0x251   : > { %v5683_v6 = vadd.f32 %v5675_v16, %v12822_v31  ;;  %v5676_v58 = vmul.f32 %v12881_v28, %v10085_v44  ;;  %v9591_v36 = vadd.f32 %v9590_v29, %v9589_v48  ;;  %v9592_v42 = vpop.f32.mrb[146].mxu0 }
 0x252   : > { %v9593_v18 = vpop.f32.mrb[147].mxu0  ;;  %9099 = vst [vmem:[%s12618_s9 + $0x50] sm:$0xff] %v9073_v14  }
 0x253   : > { %v5691_v63 = vadd.f32 %v12887_v20, %v5683_v6  ;;  %v5684_v31 = vadd.f32 %v5676_v58, %v12825_v35  ;;  %v9594_v39 = vadd.f32 %v9593_v18, %v9592_v42 }
 0x255   : > { %v5692_v34 = vadd.f32 %v12887_v20, %v5684_v31  ;;  %vm5699_vm12 = vcmp.ge.f32.partialorder %v5691_v63, 1.0 }
 0x256   : > { %v12893_v57 = vsel %vm5699_vm12, 0.0, %v5691_v63  ;;  %v5723_v21 = vsel %vm5699_vm12, 1.0, %v10573_v24 }
 0x257   : > { %vm5700_vm13 = vcmp.ge.f32.partialorder %v5692_v34, 1.0 }
 0x258   : > { %v12896_v2 = vsel %vm5700_vm13, 0.0, %v5692_v34  ;;  %v5724_v15 = vsel %vm5700_vm13, 1.0, %v10573_v24 }
 0x259   : > { %v9076_v4 = vpack.c.bf16 %v5724_v15, %v5723_v21 }
 0x25b   : > { %9100 = vst [vmem:[%s12618_s9 + $0x58] sm:$0xff] %v9076_v4  }
 0x261   : > { %v9595_v7 = vpop.f32.mrb[148].mxu0 }
 0x262   : > { %v9596_v55 = vpop.f32.mrb[149].mxu0 }
 0x263   : > { %v9597_v33 = vadd.f32 %v9596_v55, %v9595_v7  ;;  %v9598_v35 = vpop.f32.mrb[150].mxu0 }
 0x264   : > { %v9599_v3 = vpop.f32.mrb[151].mxu0 }
 0x265   : > { %v9600_v25 = vadd.f32 %v9599_v3, %v9598_v35 }
 0x26a   : > { %v9601_v56 = vpop.f32.mrb[152].mxu0 }
 0x26b   : > { %v9602_v43 = vpop.f32.mrb[153].mxu0 }
 0x26c   : > { %v9603_v59 = vadd.f32 %v9602_v43, %v9601_v56  ;;  %v9604_v1 = vpop.f32.mrb[154].mxu0 }
 0x26d   : > { %v9605_v51 = vpop.f32.mrb[155].mxu0 }
 0x26e   : > { %v9606_v54 = vadd.f32 %v9605_v51, %v9604_v1 }
 0x273   : > { %v9607_v49 = vpop.f32.mrb[156].mxu0 }
 0x274   : > { %v9608_v46 = vpop.f32.mrb[157].mxu0 }
 0x275   : > { %v9609_v30 = vadd.f32 %v9608_v46, %v9607_v49  ;;  %v9610_v17 = vpop.f32.mrb[158].mxu0 }
 0x276   : > { %v9611_v19 = vpop.f32.mrb[159].mxu0 }
 0x277   : > { %v9612_v52 = vadd.f32 %v9611_v19, %v9610_v17 }
 0x27b   : > { %v9641_v22 = vpop.f32.mrb[160].mxu0 }
 0x27c   : > { %v9642_v0 = vpop.f32.mrb[161].mxu0 }
 0x27d   : > { %v9643_v9 = vadd.f32 %v9642_v0, %v9641_v22  ;;  %v9644_v41 = vpop.f32.mrb[162].mxu0 }
 0x27e   : > { %v9645_v61 = vpop.f32.mrb[163].mxu0 }
 0x27f   : > { %v10092_v32 = vadd.f32 %v9643_v9, %v9591_v36  ;;  %v9646_v47 = vadd.f32 %v9645_v61, %v9644_v41 }
 0x281   : > { %v10098_v12 = vadd.f32 %v9646_v47, %v9594_v39 }
 0x283   : > { %v9647_v45 = vpop.f32.mrb[164].mxu0 }
 0x284   : > { %v9648_v38 = vpop.f32.mrb[165].mxu0 }
 0x285   : > { %v9649_v8 = vadd.f32 %v9648_v38, %v9647_v45  ;;  %v9650_v62 = vpop.f32.mrb[166].mxu0 }
 0x286   : > { %v9651_v37 = vpop.f32.mrb[167].mxu0 }
 0x287   : > { %v10089_v53 = vadd.f32 %v9649_v8, %v9597_v33  ;;  %v9652_v13 = vadd.f32 %v9651_v37, %v9650_v62 }
 0x289   : > { %v10095_v5 = vadd.f32 %v9652_v13, %v9600_v25 }
 0x28b   : > { %v9653_v16 = vpop.f32.mrb[168].mxu0 }
 0x28c   : > { %v9654_v44 = vpop.f32.mrb[169].mxu0 }
 0x28d   : > { %v9655_v48 = vadd.f32 %v9654_v44, %v9653_v16  ;;  %v9656_v29 = vpop.f32.mrb[170].mxu0 }
 0x28e   : > { %v9657_v40 = vpop.f32.mrb[171].mxu0 }
 0x28f   : > { %v10104_v11 = vadd.f32 %v9655_v48, %v9603_v59  ;;  %v9658_v6 = vadd.f32 %v9657_v40, %v9656_v29 }
 0x291   : > { %v10110_v58 = vadd.f32 %v9658_v6, %v9606_v54 }
 0x293   : > { %v9659_v42 = vpop.f32.mrb[172].mxu0 }
 0x294   : > { %v9660_v36 = vpop.f32.mrb[173].mxu0 }
 0x295   : > { %v9661_v14 = vadd.f32 %v9660_v36, %v9659_v42  ;;  %v9662_v18 = vpop.f32.mrb[174].mxu0 }
 0x296   : > { %v9663_v63 = vpop.f32.mrb[175].mxu0 }
 0x297   : > { %v12900_v31 = vadd.f32 %v9661_v14, %v9609_v30  ;;  %v9664_v39 = vadd.f32 %v9663_v63, %v9662_v18 }
 0x299   : > { %v12902_v34 = vadd.f32 %v9664_v39, %v9612_v52 }
 0x29b   : > { %v9693_v21 = vpop.f32.mrb[176].mxu0 }
 0x29c   : > { %v9694_v15 = vpop.f32.mrb[177].mxu0 }
 0x29d   : > { %v9695_v4 = vadd.f32 %v9694_v15, %v9693_v21  ;;  %v9696_v7 = vpop.f32.mrb[178].mxu0 }
 0x29e   : > { %v9697_v55 = vpop.f32.mrb[179].mxu0 }
 0x29f   : > { %v10093_v33 = vadd.f32 %v10092_v32, %v9695_v4  ;;  %v9698_v35 = vadd.f32 %v9697_v55, %v9696_v7 }
 0x2a1   : > { %v10099_v3 = vadd.f32 %v10098_v12, %v9698_v35 }
 0x2a3   : > { %v9699_v25 = vpop.f32.mrb[180].mxu0 }
 0x2a4   : > { %v9700_v56 = vpop.f32.mrb[181].mxu0 }
 0x2a5   : > { %v10011_v43 = vpop.f32.mrb[24].mxu1  ;;  %v9701_v59 = vadd.f32 %v9700_v56, %v9699_v25  ;;  %v9702_v1 = vpop.f32.mrb[182].mxu0 }
 0x2a6   : > { %v7382_v51 = vpop.f32.mrb[25].mxu1  ;;  %v9703_v54 = vpop.f32.mrb[183].mxu0 }
 0x2a7   : > { %v10094_v49 = vadd.f32 %v10093_v33, %v7382_v51  ;;  %v10012_v46 = vpop.f32.mrb[26].mxu1  ;;  %v10090_v30 = vadd.f32 %v10089_v53, %v9701_v59  ;;  %v9704_v17 = vadd.f32 %v9703_v54, %v9702_v1 }
 0x2a8   : > { %v7385_v19 = vpop.f32.mrb[27].mxu1 }
 0x2a9   : > { %v7445_v52 = vmul.f32 %v12881_v28, %v10094_v49  ;;  %v10100_v22 = vadd.f32 %v10099_v3, %v7385_v19  ;;  %v10091_v0 = vadd.f32 %v10090_v30, %v10011_v43  ;;  %v10096_v9 = vadd.f32 %v10095_v5, %v9704_v17 }
 0x2ab   : > { %v7453_v41 = vadd.f32 %v7445_v52, %v12842_v60  ;;  %v7446_v61 = vmul.f32 %v12881_v28, %v10100_v22  ;;  %v7447_v32 = vmul.f32 %v12881_v28, %v10091_v0  ;;  %v10097_v47 = vadd.f32 %v10096_v9, %v10012_v46  ;;  %v9705_v12 = vpop.f32.mrb[184].mxu0 }
 0x2ac   : > { %v9706_v45 = vpop.f32.mrb[185].mxu0 }
 0x2ad   : > { %v7461_v38 = vadd.f32 %v12887_v20, %v7453_v41  ;;  %v7454_v8 = vadd.f32 %v7446_v61, %v12847_v50  ;;  %v10015_v62 = vpop.f32.mrb[28].mxu1  ;;  %v7455_v37 = vadd.f32 %v7447_v32, %v12855_v23  ;;  %v7448_v53 = vmul.f32 %v12881_v28, %v10097_v47  ;;  %v9708_v13 = vpop.f32.mrb[186].mxu0  ;;  %v7587_v61 = vld [vmem:[%s12618_s9 + $0x28] sm:$0xff] (%p10629_p5)   ;;  %v7591_v32 = vld [vmem:[%s12618_s9 + $0x30] sm:$0xff] (%p10629_p5)   ;;  %v7595_v47 = vld [vmem:[%s12618_s9 + $0x38] sm:$0xff] (%p10629_p5)  }
 0x2ae   : > { %v7398_v5 = vpop.f32.mrb[29].mxu1  ;;  %v9707_v16 = vadd.f32 %v9706_v45, %v9705_v12  ;;  %v9709_v60 = vpop.f32.mrb[187].mxu0  ;;  %7588 = vst [vmem:[%s7551_s23 + $0x48] sm:$0xff] (%p10629_p5), %v7587_v61   ;;  %v7599_v12 = vld [vmem:[%s12618_s9 + $0x40] sm:$0xff] (%p10629_p5)   ;;  %7592 = vst [vmem:[%s7551_s23 + $0x50] sm:$0xff] (%p10629_p5), %v7591_v32   ;;  %v7603_v45 = vld [vmem:[%s12618_s9 + $0x48] sm:$0xff] (%p10629_p5)  }
 0x2af   : > { %vm7469_vm14 = vcmp.ge.f32.partialorder %v7461_v38, 1.0  ;;  %v7462_v44 = vadd.f32 %v12887_v20, %v7454_v8  ;;  %v7463_v48 = vadd.f32 %v12887_v20, %v7455_v37  ;;  %v10016_v29 = vpop.f32.mrb[30].mxu1  ;;  %v7456_v40 = vadd.f32 %v7448_v53, %v12859_v26  ;;  %7596 = vst [vmem:[%s7551_s23 + $0x58] sm:$0xff] (%p10629_p5), %v7595_v47   ;;  %7600 = vst [vmem:[%s7551_s23 + $0x80] sm:$0xff] (%p10629_p5), %v7599_v12   ;;  %v7607_v38 = vld [vmem:[%s12618_s9 + $0x50] sm:$0xff] (%p10629_p5)   ;;  %v7611_v8 = vld [vmem:[%s12618_s9 + $0x58] sm:$0xff] (%p10629_p5)  }
 0x2b0   : > { %v7401_v6 = vpop.f32.mrb[31].mxu1  ;;  %v10105_v42 = vadd.f32 %v10104_v11, %v9707_v16  ;;  %v9710_v50 = vadd.f32 %v9709_v60, %v9708_v13  ;;  %v7493_v36 = vsel %vm7469_vm14, 1.0, %v10573_v24  ;;  %7604 = vst [vmem:[%s7551_s23 + $0x88] sm:$0xff] (%p10629_p5), %v7603_v45   ;;  %7608 = vst [vmem:[%s7551_s23 + $0x90] sm:$0xff] (%p10629_p5), %v7607_v38  }
 0x2b1   : > { %vm7470_vm15 = vcmp.ge.f32.partialorder %v7462_v44, 1.0  ;;  %vm7471_vm0 = vcmp.ge.f32.partialorder %v7463_v48, 1.0  ;;  %v7464_v23 = vadd.f32 %v12887_v20, %v7456_v40  ;;  %7612 = vst [vmem:[%s7551_s23 + $0x98] sm:$0xff] (%p10629_p5), %v7611_v8  }
 0x2b2   : > { %v7494_v14 = vsel %vm7470_vm15, 1.0, %v10573_v24  ;;  %v10106_v18 = vadd.f32 %v10105_v42, %v7398_v5  ;;  %v10111_v63 = vadd.f32 %v10110_v58, %v9710_v50  ;;  %v7495_v26 = vsel %vm7471_vm0, 1.0, %v10573_v24 }
 0x2b3   : > { %v9079_v39 = vpack.c.bf16 %v7494_v14, %v7493_v36  ;;  %vm7472_vm1 = vcmp.ge.f32.partialorder %v7464_v23, 1.0  ;;  %v9711_v21 = vpop.f32.mrb[188].mxu0 }
 0x2b4   : > { %v7496_v11 = vsel %vm7472_vm1, 1.0, %v10573_v24  ;;  %v7449_v15 = vmul.f32 %v12881_v28, %v10106_v18  ;;  %v10112_v4 = vadd.f32 %v10111_v63, %v7401_v6  ;;  %v9712_v7 = vpop.f32.mrb[189].mxu0 }
 0x2b5   : > { %9101 = vst [vmem:[%s12618_s9 + $0x60] sm:$0xff] %v9079_v39   ;;  %v9082_v55 = vpack.c.bf16 %v7496_v11, %v7495_v26  ;;  %v9713_v33 = vadd.f32 %v9712_v7, %v9711_v21  ;;  %v9714_v35 = vpop.f32.mrb[190].mxu0 }
 0x2b6   : > { %v7457_v3 = vadd.f32 %v7449_v15, %v12870_v27  ;;  %v7450_v58 = vmul.f32 %v12881_v28, %v10112_v4  ;;  %v9715_v25 = vpop.f32.mrb[191].mxu0 }
 0x2b7   : > { %9102 = vst [vmem:[%s12618_s9 + $0x68] sm:$0xff] %v9082_v55   ;;  %v10102_v56 = vadd.f32 %v12900_v31, %v9713_v33  ;;  %v9716_v43 = vadd.f32 %v9715_v25, %v9714_v35 }
 0x2b8   : > { %v7465_v59 = vadd.f32 %v12887_v20, %v7457_v3  ;;  %v7458_v1 = vadd.f32 %v7450_v58, %v12874_v10 }
 0x2b9   : > { %v10103_v51 = vadd.f32 %v10102_v56, %v10015_v62  ;;  %v10108_v54 = vadd.f32 %v12902_v34, %v9716_v43 }
 0x2ba   : > { %vm7473_vm2 = vcmp.ge.f32.partialorder %v7465_v59, 1.0  ;;  %v7466_v49 = vadd.f32 %v12887_v20, %v7458_v1 }
 0x2bb   : > { %v7451_v27 = vmul.f32 %v12881_v28, %v10103_v51  ;;  %v10109_v46 = vadd.f32 %v10108_v54, %v10016_v29  ;;  %v7497_v30 = vsel %vm7473_vm2, 1.0, %v10573_v24 }
 0x2bc   : > { %vm7474_vm3 = vcmp.ge.f32.partialorder %v7466_v49, 1.0  ;;  %v7615_v62 = vld [vmem:[%s12618_s9 + $0x60] sm:$0xff] (%p10629_p5)  }
 0x2bd   : > { %v7498_v31 = vsel %vm7474_vm3, 1.0, %v10573_v24  ;;  %v7459_v17 = vadd.f32 %v7451_v27, %v12893_v57  ;;  %v7452_v19 = vmul.f32 %v12881_v28, %v10109_v46  ;;  %v7567_v28 = vld [vmem:[%s12618_s9] sm:$0xff] (%p10629_p5)   ;;  %v7579_v57 = vld [vmem:[%s12618_s9 + $0x18] sm:$0xff] (%p10629_p5)   ;;  %7616 = vst [vmem:[%s7551_s23 + $0xc0] sm:$0xff] (%p10629_p5), %v7615_v62  }
 0x2be   : > { %v9085_v10 = vpack.c.bf16 %v7498_v31, %v7497_v30  ;;  %7568 = vst [vmem:[%s7551_s23] sm:$0xff] (%p10629_p5), %v7567_v28   ;;  %7580 = vst [vmem:[%s7551_s23 + $0x18] sm:$0xff] (%p10629_p5), %v7579_v57   ;;  %v7619_v37 = vld [vmem:[%s12618_s9 + $0x68] sm:$0xff] (%p10629_p5)  }
 0x2bf   : > { %v7467_v52 = vadd.f32 %v12887_v20, %v7459_v17  ;;  %v7460_v34 = vadd.f32 %v7452_v19, %v12896_v2  ;;  %v7583_v2 = vld [vmem:[%s12618_s9 + $0x20] sm:$0xff] (%p10629_p5)   ;;  %7620 = vst [vmem:[%s7551_s23 + $0xc8] sm:$0xff] (%p10629_p5), %v7619_v37  }
 0x2c0   : > { %9103 = vst [vmem:[%s12618_s9 + $0x70] sm:$0xff] %v9085_v10   ;;  %7584 = vst [vmem:[%s7551_s23 + $0x40] sm:$0xff] (%p10629_p5), %v7583_v2  }
 0x2c1   : > { %vm7475_vm4 = vcmp.ge.f32.partialorder %v7467_v52, 1.0  ;;  %v7468_v22 = vadd.f32 %v12887_v20, %v7460_v34  ;;  %7548 = sbr.rel (!%p10629_p5) target bundleno = 720 (0x2d0), region = 81  ;;  %v7571_v20 = vld [vmem:[%s12618_s9 + $0x8] sm:$0xff] (%p10629_p5)  }
 0x2c2   : > { %v7499_v0 = vsel %vm7475_vm4, 1.0, %v10573_v24  ;;  %7572 = vst [vmem:[%s7551_s23 + $0x8] sm:$0xff] (%p10629_p5), %v7571_v20  }
 0x2c3   : > { %vm7476_vm5 = vcmp.ge.f32.partialorder %v7468_v22, 1.0 }
 0x2c4   : > { %v7500_v9 = vsel %vm7476_vm5, 1.0, %v10573_v24  ;;  %v7575_v24 = vld [vmem:[%s12618_s9 + $0x10] sm:$0xff] (%p10629_p5)  }
 0x2c5   : > { %v9088_v41 = vpack.c.bf16 %v7500_v9, %v7499_v0  ;;  %7576 = vst [vmem:[%s7551_s23 + $0x10] sm:$0xff] (%p10629_p5), %v7575_v24  }
 0x2c7   : > { %9104 = vst [vmem:[%s12618_s9 + $0x78] sm:$0xff] %v9088_v41   ;;  %v7623_v53 = vld [vmem:[%s12618_s9 + $0x70] sm:$0xff] (%p10629_p5)  }
 0x2c8   : > { %7624 = vst [vmem:[%s7551_s23 + $0xd0] sm:$0xff] %v7623_v53  }
 0x2ce   : > { %v7627_v13 = vld [vmem:[%s12618_s9 + $0x78] sm:$0xff]  }
 0x2cf   : > { %7628 = vst [vmem:[%s7551_s23 + $0xd8] sm:$0xff] %v7627_v13  }
 0x2d0 PF: > { %p11_p10 = scmp.ge.s32.totalorder %s10616_s19, 4   ;;  %s12985_s15 = smov %s10566_s16 }
 0x2d1   : > { %s12986_s16 = smov %s10627_s22  ;;  %s12987_s17 = smov %s10616_s19 }
 0x2d2   :  { %13 = sbr.rel (!%p11_p10) target bundleno = 2 (0x2), region = 162 }

</bundles_post_ra>
